<compile_context>
chip_gen: v7x
topology: tpu7x:2x2x1
jax: 0.10.0
libtpu: 0.0.40
codegen_flags: <defaults>
</compile_context>

<pallas_src>
import math

import jax
import jax.numpy as jnp
import numpy as np
from jax.experimental import pallas as pl
from jax.experimental.pallas import tpu as pltpu


# ------------------------------ host-side helpers ------------------------------

def _upsample_matrix(H, W):
    """(H*W, 4*H*W) 0/1 matrix: x_flat @ U == nearest-2x-upsample(x).flatten()."""
    m = np.zeros((H * W, 4 * H * W), np.float32)
    for h in range(H):
        for w in range(W):
            src = h * W + w
            for r in range(2):
                for c in range(2):
                    m[src, (2 * h + r) * (2 * W) + (2 * w + c)] = 1.0
    return jnp.asarray(m, jnp.bfloat16)


# ------------------------------- fused kernel ----------------------------------

def _build_kernel(names, block_cfgs, blend, style_dim):
    n_in = len(names)
    idx = {n: i for i, n in enumerate(names)}

    def kernel(*refs):
        g = {n: refs[idx[n]] for n in names}
        o_ref = refs[n_in]

        def leaky(x):
            return jnp.maximum(x, 0.2 * x)

        def adain(y, gamma, beta):
            # InstanceNorm2d (biased var, eps=1e-5) + styled affine, per image.
            mean = jnp.mean(y, axis=1, keepdims=True)
            var = jnp.maximum(
                jnp.mean(y * y, axis=1, keepdims=True) - mean * mean, 0.0)
            return gamma * ((y - mean) * jax.lax.rsqrt(var + 1e-5)) + beta

        def make_shift(H, W):
            HW = H * W
            lane = jax.lax.broadcasted_iota(jnp.int32, (1, HW), 1)
            if (W & (W - 1)) == 0:               # W is a power of two here
                col = jnp.bitwise_and(lane, W - 1)
                row = jnp.right_shift(lane, W.bit_length() - 1)
            else:
                col = lane % W
                row = lane // W

            def shift(x, dh, dw):
                """out[:, h*W+w] = x[:, (h+dh)*W+(w+dw)], zero outside the image."""
                if dh == 0 and dw == 0:
                    return x
                s = dh * W + dw
                rolled = jnp.concatenate([x[:, s:], x[:, :s]], axis=1)
                m = ((row + dh >= 0) & (row + dh < H)
                     & (col + dw >= 0) & (col + dw < W))
                return jnp.where(m, rolled, jnp.zeros_like(rolled))

            return shift

        def conv3x3(x_bf, w_ref, b_ref, shift):
            # im2col: taps stacked on sublanes -> one (Cout,9Cin)@(9Cin,HW) matmul.
            patches = jnp.concatenate(
                [shift(x_bf, dh, dw) for dh in (-1, 0, 1) for dw in (-1, 0, 1)],
                axis=0)
            y = jnp.dot(w_ref[...], patches, preferred_element_type=jnp.float32)
            return y + b_ref[...]

        x = None
        prev = None
        for i, cfg in enumerate(block_cfgs):
            H, W, C = cfg["H"], cfg["W"], cfg["cout"]
            HW = H * W
            shift = make_shift(H, W)
            noise_i = g[f"noise{i}"][...].reshape(1, HW)          # (1, HW)
            style_i = g[f"style{i}"][...].reshape(1, style_dim)   # (1, S)

            # Merged adain1+adain2 style projection: (4C, S) . style -> (4C, 1).
            s_all = (jnp.sum(g[f"aw{i}"][...] * style_i, axis=1, keepdims=True)
                     + g[f"ab{i}"][...])
            gma1, bta1 = s_all[0:C], s_all[C:2 * C]
            gma2, bta2 = s_all[2 * C:3 * C], s_all[3 * C:4 * C]

            prev = x
            if cfg["initial"]:
                y = g[f"const{i}"][...]                            # (C, HW) f32
            else:
                xb = x.astype(jnp.bfloat16)
                if cfg["upsample"]:
                    # TODO(synk): FusedUpsample (conv_transpose) variant of the
                    # full 1024px model's later blocks is not exercised here.
                    xb = jnp.dot(xb, g[f"up{i}"][...],
                                 preferred_element_type=jnp.float32
                                 ).astype(jnp.bfloat16)            # (Cin, HW)
                y = conv3x3(xb, g[f"c1w{i}"], g[f"c1b{i}"], shift)
                if cfg["upsample"]:
                    # Blur [[1,2,1],[2,4,2],[1,2,1]]/16 (separable, zero pad).
                    v = shift(y, -1, 0) + 2.0 * y + shift(y, 1, 0)
                    y = (shift(v, 0, -1) + 2.0 * v
                         + shift(v, 0, 1)) * (1.0 / 16.0)

            y = leaky(y + g[f"nw1_{i}"][...] * noise_i)
            y = adain(y, gma1, bta1)
            y = conv3x3(y.astype(jnp.bfloat16), g[f"c2w{i}"], g[f"c2b{i}"], shift)
            y = leaky(y + g[f"nw2_{i}"][...] * noise_i)
            x = adain(y, gma2, bta2)

        # to_rgb (1x1 conv) + progressive-growing alpha blend (runtime alpha).
        rgb = (jnp.dot(g["rgb_w"][...], x, preferred_element_type=jnp.float32)
               + g["rgb_b"][...])                                  # (3, HWf)
        if blend:
            skip = (jnp.dot(g["rgbp_w"][...], prev,
                            preferred_element_type=jnp.float32)
                    + g["rgbp_b"][...])                            # (3, HWp)
            skip = jnp.dot(skip, g["up_skip"][...].astype(jnp.float32),
                           preferred_element_type=jnp.float32)     # (3, HWf)
            a = g["alpha"][...]                                    # (1, 1)
            a = jnp.where((a >= 0.0) & (a < 1.0), a, jnp.ones_like(a))
            rgb = a * rgb + (1.0 - a) * skip
        o_ref[...] = rgb[jnp.newaxis]                              # (1, 3, HWf)

    return kernel


# --------------------------------- JAX wrapper ----------------------------------

def generator_forward(params, style, noise, step=0, alpha=-1.0,
                      mixing_range=(-1, -1)):
    """style: list of (B, style_dim); noise: list of (B, 1, H_i, W_i).
    Returns (B, 3, H, W), matching the PyTorch Generator."""
    blocks = params["progression"]
    n_blocks = min(step + 1, len(blocks))
    B, S = style[0].shape

    # TODO(synk): torch picks inject_index via random.sample (host RNG); a
    # deterministic stand-in is used for the style-mixing path.
    if len(style) < 2:
        inject_index = [len(blocks) + 1]
    else:
        inject_index = list(range(len(style) - 1))

    styles_per_block = []
    crossover = 0
    for i in range(n_blocks):
        if mixing_range == (-1, -1):
            if crossover < len(inject_index) and i > inject_index[crossover]:
                crossover = min(crossover + 1, len(style) - 1)
            styles_per_block.append(style[crossover])
        elif mixing_range[0] <= i <= mixing_range[1]:
            styles_per_block.append(style[1])
        else:
            styles_per_block.append(style[0])

    # ---- fused-kernel input plan (names <-> arrays <-> specs kept in lockstep) --
    plan = []

    def add(name, arr, batched=False):
        plan.append((name, jnp.asarray(arr), batched))

    hw0 = blocks[0]["const"].shape[-1]
    H = W = int(round(math.sqrt(hw0)))
    sizes, block_cfgs = [], []
    for i in range(n_blocks):
        blk = blocks[i]
        if (not blk["initial"]) and blk["upsample"]:
            H, W = 2 * H, 2 * W
        sizes.append((H, W))
        block_cfgs.append(dict(initial=blk["initial"], upsample=blk["upsample"],
                               cout=blk["cout"], H=H, W=W))
        add(f"style{i}", styles_per_block[i][:, None, :], batched=True)
        add(f"noise{i}", noise[i].reshape(B, 1, H * W), batched=True)
        if blk["initial"]:
            add(f"const{i}", blk["const"])
        else:
            add(f"c1w{i}", blk["conv1_w"])
            add(f"c1b{i}", blk["conv1_b"])
            if blk["upsample"]:
                add(f"up{i}", _upsample_matrix(H // 2, W // 2))
        add(f"c2w{i}", blk["conv2_w"])
        add(f"c2b{i}", blk["conv2_b"])
        add(f"aw{i}", blk["adain_w"])
        add(f"ab{i}", blk["adain_b"])
        add(f"nw1_{i}", blk["noise1_w"])
        add(f"nw2_{i}", blk["noise2_w"])

    rgb = params["to_rgb"][n_blocks - 1]
    add("rgb_w", rgb["w"])
    add("rgb_b", rgb["b"])
    blend = n_blocks > 1   # blend path compiled when step>0; alpha gates at runtime
    if blend:
        rgbp = params["to_rgb"][n_blocks - 2]
        add("rgbp_w", rgbp["w"])
        add("rgbp_b", rgbp["b"])
        Hp, Wp = sizes[-2]
        add("up_skip", _upsample_matrix(Hp, Wp))
        add("alpha", jnp.asarray(alpha, jnp.float32).reshape(1, 1))

    names = [p[0] for p in plan]
    arrays = [p[1] for p in plan]
    in_specs = []
    for (_, arr, batched) in plan:
        r = arr.ndim
        if batched:
            in_specs.append(pl.BlockSpec(
                (1,) + arr.shape[1:],
                lambda b, _r=r: (b,) + (0,) * (_r - 1)))
        else:
            in_specs.append(pl.BlockSpec(
                arr.shape, lambda b, _r=r: (0,) * _r))

    Hf, Wf = sizes[-1]
    kernel = _build_kernel(names, block_cfgs, blend, S)

    out = pl.pallas_call(
        kernel,
        out_shape=jax.ShapeDtypeStruct((B, 3, Hf * Wf), jnp.float32),
        grid=(B,),
        in_specs=in_specs,
        out_specs=pl.BlockSpec((1, 3, Hf * Wf), lambda b: (b, 0, 0)),
        compiler_params=pltpu.CompilerParams(
            dimension_semantics=("parallel",)),
    )(*arrays)
    return out.reshape(B, 3, Hf, Wf)   # free reshape to NCHW (lane-dense store)


# --------------------------- deterministic parameters ---------------------------

class _KeyGen:
    def __init__(self, seed):
        self._key = jax.random.PRNGKey(seed)

    def __call__(self):
        self._key, sub = jax.random.split(self._key)
        return sub


def init_generator_params(seed, block_cfg, style_dim, const_size=4):
    """EqualLR scales folded into weights once; conv/upsample weights stored bf16."""
    kg = _KeyGen(seed)
    progression, to_rgb = [], []
    for (cin, cout, initial, upsample) in block_cfg:
        p = {"initial": initial, "upsample": upsample, "cin": cin, "cout": cout}
        if initial:
            assert cin == cout
            # ConstantInput: randn(1, C, 4, 4) stored channel-major (C, H*W).
            p["const"] = jax.random.normal(
                kg(), (cin, const_size * const_size), jnp.float32)
        else:
            w = jax.random.normal(kg(), (cout, cin, 3, 3), jnp.float32)
            w = w * math.sqrt(2.0 / (cin * 9))
            p["conv1_w"] = (jnp.transpose(w, (0, 2, 3, 1))
                            .reshape(cout, 9 * cin).astype(jnp.bfloat16))
            p["conv1_b"] = jnp.zeros((cout, 1), jnp.float32)
        w = jax.random.normal(kg(), (cout, cout, 3, 3), jnp.float32)
        w = w * math.sqrt(2.0 / (cout * 9))
        p["conv2_w"] = (jnp.transpose(w, (0, 2, 3, 1))
                        .reshape(cout, 9 * cout).astype(jnp.bfloat16))
        p["conv2_b"] = jnp.zeros((cout, 1), jnp.float32)
        # adain1 + adain2 merged: rows [gamma1 | beta1 | gamma2 | beta2].
        aw = jnp.concatenate(
            [jax.random.normal(kg(), (2 * cout, style_dim), jnp.float32),
             jax.random.normal(kg(), (2 * cout, style_dim), jnp.float32)], axis=0)
        p["adain_w"] = aw * math.sqrt(2.0 / style_dim)
        p["adain_b"] = jnp.concatenate(
            [jnp.ones((cout,)), jnp.zeros((cout,)),
             jnp.ones((cout,)), jnp.zeros((cout,))]
        ).astype(jnp.float32).reshape(4 * cout, 1)
        # NoiseInjection weights are zero-initialised in the reference model.
        p["noise1_w"] = jnp.zeros((cout, 1), jnp.float32)
        p["noise2_w"] = jnp.zeros((cout, 1), jnp.float32)
        progression.append(p)
        rw = jax.random.normal(kg(), (3, cout), jnp.float32) * math.sqrt(2.0 / cout)
        to_rgb.append({"w": rw, "b": jnp.zeros((3, 1), jnp.float32)})
    return {"progression": progression, "to_rgb": to_rgb}


# ------------------------------------- main -------------------------------------

if __name__ == "__main__":
    style_dim = 32
    batch = 2
    # (in_channel, out_channel, initial, upsample) -- mirrors progression[0:3]
    block_cfg = [
        (32, 32, True, False),
        (32, 32, False, True),
        (32, 16, False, True),
    ]
    params = init_generator_params(0, block_cfg, style_dim)

    root = jax.random.PRNGKey(0)
    k_style, k_n0, k_n1, k_n2 = jax.random.split(root, 4)
    style_vec = jax.random.normal(k_style, (batch, style_dim), jnp.float32)
    noise = [
        jax.random.normal(k_n0, (batch, 1, 4, 4), jnp.float32),
        jax.random.normal(k_n1, (batch, 1, 8, 8), jnp.float32),
        jax.random.normal(k_n2, (batch, 1, 16, 16), jnp.float32),
    ]

    @jax.jit
    def fwd(s, n0, n1, n2, alpha):
        return generator_forward(params, [s], [n0, n1, n2], step=2, alpha=alpha)

    out = jax.block_until_ready(
        fwd(style_vec, noise[0], noise[1], noise[2], jnp.float32(0.5)))
    assert out.shape == (batch, 3, 16, 16), out.shape
    assert bool(jnp.all(jnp.isfinite(out)))
    print("KERNEL_OK")
</pallas_src>

<mosaic_0001>
module attributes {stable_mosaic.version = 11 : i64} {
  func.func @kernel(%arg0: i32, %arg1: memref<1x1x32xf32, #tpu.memory_space<vmem>>, %arg2: memref<1x1x16xf32, #tpu.memory_space<vmem>>, %arg3: memref<32x16xf32, #tpu.memory_space<vmem>>, %arg4: memref<32x288xbf16, #tpu.memory_space<vmem>>, %arg5: memref<32x1xf32, #tpu.memory_space<vmem>>, %arg6: memref<128x32xf32, #tpu.memory_space<vmem>>, %arg7: memref<128x1xf32, #tpu.memory_space<vmem>>, %arg8: memref<32x1xf32, #tpu.memory_space<vmem>>, %arg9: memref<32x1xf32, #tpu.memory_space<vmem>>, %arg10: memref<1x1x32xf32, #tpu.memory_space<vmem>>, %arg11: memref<1x1x64xf32, #tpu.memory_space<vmem>>, %arg12: memref<32x288xbf16, #tpu.memory_space<vmem>>, %arg13: memref<32x1xf32, #tpu.memory_space<vmem>>, %arg14: memref<16x64xbf16, #tpu.memory_space<vmem>>, %arg15: memref<32x288xbf16, #tpu.memory_space<vmem>>, %arg16: memref<32x1xf32, #tpu.memory_space<vmem>>, %arg17: memref<128x32xf32, #tpu.memory_space<vmem>>, %arg18: memref<128x1xf32, #tpu.memory_space<vmem>>, %arg19: memref<32x1xf32, #tpu.memory_space<vmem>>, %arg20: memref<32x1xf32, #tpu.memory_space<vmem>>, %arg21: memref<1x1x32xf32, #tpu.memory_space<vmem>>, %arg22: memref<1x1x256xf32, #tpu.memory_space<vmem>>, %arg23: memref<16x288xbf16, #tpu.memory_space<vmem>>, %arg24: memref<16x1xf32, #tpu.memory_space<vmem>>, %arg25: memref<64x256xbf16, #tpu.memory_space<vmem>>, %arg26: memref<16x144xbf16, #tpu.memory_space<vmem>>, %arg27: memref<16x1xf32, #tpu.memory_space<vmem>>, %arg28: memref<64x32xf32, #tpu.memory_space<vmem>>, %arg29: memref<64x1xf32, #tpu.memory_space<vmem>>, %arg30: memref<16x1xf32, #tpu.memory_space<vmem>>, %arg31: memref<16x1xf32, #tpu.memory_space<vmem>>, %arg32: memref<3x16xf32, #tpu.memory_space<vmem>>, %arg33: memref<3x1xf32, #tpu.memory_space<vmem>>, %arg34: memref<3x32xf32, #tpu.memory_space<vmem>>, %arg35: memref<3x1xf32, #tpu.memory_space<vmem>>, %arg36: memref<64x256xbf16, #tpu.memory_space<vmem>>, %arg37: memref<1x1xf32, #tpu.memory_space<vmem>>, %arg38: memref<1x3x256xf32, #tpu.memory_space<vmem>>) attributes {dimension_semantics = [#tpu.dimension_semantics<parallel>], iteration_bounds = array<i64: 2>, scalar_prefetch = 0 : i64, scratch_operands = 0 : i64, tpu.core_type = #tpu.core_type<tc>, window_params = [{transform_indices = @transform_0, window_bounds = array<i64: 1, 1, 32>}, {transform_indices = @transform_1, window_bounds = array<i64: 1, 1, 16>}, {pipeline_mode = #tpu.pipeline_mode<synchronous>, transform_indices = @transform_2, window_bounds = array<i64: 32, 16>}, {pipeline_mode = #tpu.pipeline_mode<synchronous>, transform_indices = @transform_3, window_bounds = array<i64: 32, 288>}, {pipeline_mode = #tpu.pipeline_mode<synchronous>, transform_indices = @transform_4, window_bounds = array<i64: 32, 1>}, {pipeline_mode = #tpu.pipeline_mode<synchronous>, transform_indices = @transform_5, window_bounds = array<i64: 128, 32>}, {pipeline_mode = #tpu.pipeline_mode<synchronous>, transform_indices = @transform_6, window_bounds = array<i64: 128, 1>}, {pipeline_mode = #tpu.pipeline_mode<synchronous>, transform_indices = @transform_7, window_bounds = array<i64: 32, 1>}, {pipeline_mode = #tpu.pipeline_mode<synchronous>, transform_indices = @transform_8, window_bounds = array<i64: 32, 1>}, {transform_indices = @transform_9, window_bounds = array<i64: 1, 1, 32>}, {transform_indices = @transform_10, window_bounds = array<i64: 1, 1, 64>}, {pipeline_mode = #tpu.pipeline_mode<synchronous>, transform_indices = @transform_11, window_bounds = array<i64: 32, 288>}, {pipeline_mode = #tpu.pipeline_mode<synchronous>, transform_indices = @transform_12, window_bounds = array<i64: 32, 1>}, {pipeline_mode = #tpu.pipeline_mode<synchronous>, transform_indices = @transform_13, window_bounds = array<i64: 16, 64>}, {pipeline_mode = #tpu.pipeline_mode<synchronous>, transform_indices = @transform_14, window_bounds = array<i64: 32, 288>}, {pipeline_mode = #tpu.pipeline_mode<synchronous>, transform_indices = @transform_15, window_bounds = array<i64: 32, 1>}, {pipeline_mode = #tpu.pipeline_mode<synchronous>, transform_indices = @transform_16, window_bounds = array<i64: 128, 32>}, {pipeline_mode = #tpu.pipeline_mode<synchronous>, transform_indices = @transform_17, window_bounds = array<i64: 128, 1>}, {pipeline_mode = #tpu.pipeline_mode<synchronous>, transform_indices = @transform_18, window_bounds = array<i64: 32, 1>}, {pipeline_mode = #tpu.pipeline_mode<synchronous>, transform_indices = @transform_19, window_bounds = array<i64: 32, 1>}, {transform_indices = @transform_20, window_bounds = array<i64: 1, 1, 32>}, {transform_indices = @transform_21, window_bounds = array<i64: 1, 1, 256>}, {pipeline_mode = #tpu.pipeline_mode<synchronous>, transform_indices = @transform_22, window_bounds = array<i64: 16, 288>}, {pipeline_mode = #tpu.pipeline_mode<synchronous>, transform_indices = @transform_23, window_bounds = array<i64: 16, 1>}, {pipeline_mode = #tpu.pipeline_mode<synchronous>, transform_indices = @transform_24, window_bounds = array<i64: 64, 256>}, {pipeline_mode = #tpu.pipeline_mode<synchronous>, transform_indices = @transform_25, window_bounds = array<i64: 16, 144>}, {pipeline_mode = #tpu.pipeline_mode<synchronous>, transform_indices = @transform_26, window_bounds = array<i64: 16, 1>}, {pipeline_mode = #tpu.pipeline_mode<synchronous>, transform_indices = @transform_27, window_bounds = array<i64: 64, 32>}, {pipeline_mode = #tpu.pipeline_mode<synchronous>, transform_indices = @transform_28, window_bounds = array<i64: 64, 1>}, {pipeline_mode = #tpu.pipeline_mode<synchronous>, transform_indices = @transform_29, window_bounds = array<i64: 16, 1>}, {pipeline_mode = #tpu.pipeline_mode<synchronous>, transform_indices = @transform_30, window_bounds = array<i64: 16, 1>}, {pipeline_mode = #tpu.pipeline_mode<synchronous>, transform_indices = @transform_31, window_bounds = array<i64: 3, 16>}, {pipeline_mode = #tpu.pipeline_mode<synchronous>, transform_indices = @transform_32, window_bounds = array<i64: 3, 1>}, {pipeline_mode = #tpu.pipeline_mode<synchronous>, transform_indices = @transform_33, window_bounds = array<i64: 3, 32>}, {pipeline_mode = #tpu.pipeline_mode<synchronous>, transform_indices = @transform_34, window_bounds = array<i64: 3, 1>}, {pipeline_mode = #tpu.pipeline_mode<synchronous>, transform_indices = @transform_35, window_bounds = array<i64: 64, 256>}, {pipeline_mode = #tpu.pipeline_mode<synchronous>, transform_indices = @transform_36, window_bounds = array<i64: 1, 1>}, {transform_indices = @transform_37, window_bounds = array<i64: 1, 3, 256>}]} {
    %0 = tpu.iota {dimensions = array<i32: 1>} : vector<1x16xi32>
    %c3_i32 = arith.constant 3 : i32
    %1 = vector.broadcast %c3_i32 : i32 to vector<1x16xi32>
    %2 = arith.andi %0, %1 : vector<1x16xi32>
    %c2_i32 = arith.constant 2 : i32
    %3 = vector.broadcast %c2_i32 : i32 to vector<1x16xi32>
    %4 = arith.shrsi %0, %3 : vector<1x16xi32>
    %c0 = arith.constant 0 : index
    %c0_0 = arith.constant 0 : index
    %c0_1 = arith.constant 0 : index
    %5 = vector.load %arg2[%c0, %c0_0, %c0_1] : memref<1x1x16xf32, #tpu.memory_space<vmem>>, vector<1x1x16xf32>
    %6 = vector.shape_cast %5 : vector<1x1x16xf32> to vector<1x16xf32>
    %c0_2 = arith.constant 0 : index
    %c0_3 = arith.constant 0 : index
    %c0_4 = arith.constant 0 : index
    %7 = vector.load %arg1[%c0_2, %c0_3, %c0_4] : memref<1x1x32xf32, #tpu.memory_space<vmem>>, vector<1x1x32xf32>
    %8 = vector.shape_cast %7 : vector<1x1x32xf32> to vector<1x32xf32>
    %c0_5 = arith.constant 0 : index
    %c0_6 = arith.constant 0 : index
    %9 = vector.load %arg6[%c0_5, %c0_6] : memref<128x32xf32, #tpu.memory_space<vmem>>, vector<128x32xf32>
    %10 = vector.broadcast %8 : vector<1x32xf32> to vector<128x32xf32>
    %11 = arith.mulf %9, %10 : vector<128x32xf32>
    %cst = arith.constant dense<0.000000e+00> : vector<128xf32>
    %12 = vector.multi_reduction <add>, %11, %cst [1] : vector<128x32xf32> to vector<128xf32>
    %13 = vector.shape_cast %12 : vector<128xf32> to vector<128x1xf32>
    %c0_7 = arith.constant 0 : index
    %c0_8 = arith.constant 0 : index
    %14 = vector.load %arg7[%c0_7, %c0_8] : memref<128x1xf32, #tpu.memory_space<vmem>>, vector<128x1xf32>
    %15 = arith.addf %13, %14 : vector<128x1xf32>
    %16 = vector.extract_strided_slice %15 {offsets = [0, 0], sizes = [32, 1], strides = [1, 1]} : vector<128x1xf32> to vector<32x1xf32>
    %17 = vector.extract_strided_slice %15 {offsets = [32, 0], sizes = [32, 1], strides = [1, 1]} : vector<128x1xf32> to vector<32x1xf32>
    %18 = vector.extract_strided_slice %15 {offsets = [64, 0], sizes = [32, 1], strides = [1, 1]} : vector<128x1xf32> to vector<32x1xf32>
    %19 = vector.extract_strided_slice %15 {offsets = [96, 0], sizes = [32, 1], strides = [1, 1]} : vector<128x1xf32> to vector<32x1xf32>
    %c0_9 = arith.constant 0 : index
    %c0_10 = arith.constant 0 : index
    %20 = vector.load %arg3[%c0_9, %c0_10] : memref<32x16xf32, #tpu.memory_space<vmem>>, vector<32x16xf32>
    %c0_11 = arith.constant 0 : index
    %c0_12 = arith.constant 0 : index
    %21 = vector.load %arg8[%c0_11, %c0_12] : memref<32x1xf32, #tpu.memory_space<vmem>>, vector<32x1xf32>
    %22 = vector.broadcast %21 : vector<32x1xf32> to vector<32x16xf32>
    %23 = vector.broadcast %6 : vector<1x16xf32> to vector<32x16xf32>
    %24 = arith.mulf %22, %23 : vector<32x16xf32>
    %25 = arith.addf %20, %24 : vector<32x16xf32>
    %cst_13 = arith.constant 2.000000e-01 : f32
    %26 = vector.broadcast %cst_13 : f32 to vector<32x16xf32>
    %27 = arith.mulf %26, %25 : vector<32x16xf32>
    %28 = arith.maximumf %25, %27 : vector<32x16xf32>
    %cst_14 = arith.constant dense<0.000000e+00> : vector<32xf32>
    %29 = vector.multi_reduction <add>, %28, %cst_14 [1] : vector<32x16xf32> to vector<32xf32>
    %30 = vector.shape_cast %29 : vector<32xf32> to vector<32x1xf32>
    %cst_15 = arith.constant 1.600000e+01 : f32
    %31 = vector.broadcast %cst_15 : f32 to vector<32x1xf32>
    %32 = arith.divf %30, %31 : vector<32x1xf32>
    %33 = arith.mulf %28, %28 : vector<32x16xf32>
    %cst_16 = arith.constant dense<0.000000e+00> : vector<32xf32>
    %34 = vector.multi_reduction <add>, %33, %cst_16 [1] : vector<32x16xf32> to vector<32xf32>
    %35 = vector.shape_cast %34 : vector<32xf32> to vector<32x1xf32>
    %cst_17 = arith.constant 1.600000e+01 : f32
    %36 = vector.broadcast %cst_17 : f32 to vector<32x1xf32>
    %37 = arith.divf %35, %36 : vector<32x1xf32>
    %38 = arith.mulf %32, %32 : vector<32x1xf32>
    %39 = arith.subf %37, %38 : vector<32x1xf32>
    %cst_18 = arith.constant 0.000000e+00 : f32
    %40 = vector.broadcast %cst_18 : f32 to vector<32x1xf32>
    %41 = arith.maximumf %39, %40 : vector<32x1xf32>
    %42 = vector.broadcast %32 : vector<32x1xf32> to vector<32x16xf32>
    %43 = arith.subf %28, %42 : vector<32x16xf32>
    %cst_19 = arith.constant 9.99999974E-6 : f32
    %44 = vector.broadcast %cst_19 : f32 to vector<32x1xf32>
    %45 = arith.addf %41, %44 : vector<32x1xf32>
    %46 = math.rsqrt %45 : vector<32x1xf32>
    %47 = vector.broadcast %46 : vector<32x1xf32> to vector<32x16xf32>
    %48 = arith.mulf %43, %47 : vector<32x16xf32>
    %49 = vector.broadcast %16 : vector<32x1xf32> to vector<32x16xf32>
    %50 = arith.mulf %49, %48 : vector<32x16xf32>
    %51 = vector.broadcast %17 : vector<32x1xf32> to vector<32x16xf32>
    %52 = arith.addf %50, %51 : vector<32x16xf32>
    %53 = arith.truncf %52 : vector<32x16xf32> to vector<32x16xbf16>
    %54 = vector.extract_strided_slice %53 {offsets = [0, 11], sizes = [32, 5], strides = [1, 1]} : vector<32x16xbf16> to vector<32x5xbf16>
    %55 = vector.extract_strided_slice %53 {offsets = [0, 0], sizes = [32, 11], strides = [1, 1]} : vector<32x16xbf16> to vector<32x11xbf16>
    %56 = tpu.concatenate %54, %55 in 1 : vector<32x5xbf16>, vector<32x11xbf16> -> vector<32x16xbf16>
    %c-1_i32 = arith.constant -1 : i32
    %57 = vector.broadcast %c-1_i32 : i32 to vector<1x16xi32>
    %58 = arith.addi %4, %57 : vector<1x16xi32>
    %c0_i32 = arith.constant 0 : i32
    %59 = vector.broadcast %c0_i32 : i32 to vector<1x16xi32>
    %60 = arith.cmpi sge, %58, %59 : vector<1x16xi32>
    %c-1_i32_20 = arith.constant -1 : i32
    %61 = vector.broadcast %c-1_i32_20 : i32 to vector<1x16xi32>
    %62 = arith.addi %4, %61 : vector<1x16xi32>
    %c4_i32 = arith.constant 4 : i32
    %63 = vector.broadcast %c4_i32 : i32 to vector<1x16xi32>
    %64 = arith.cmpi slt, %62, %63 : vector<1x16xi32>
    %65 = arith.andi %60, %64 : vector<1x16xi1>
    %c-1_i32_21 = arith.constant -1 : i32
    %66 = vector.broadcast %c-1_i32_21 : i32 to vector<1x16xi32>
    %67 = arith.addi %2, %66 : vector<1x16xi32>
    %c0_i32_22 = arith.constant 0 : i32
    %68 = vector.broadcast %c0_i32_22 : i32 to vector<1x16xi32>
    %69 = arith.cmpi sge, %67, %68 : vector<1x16xi32>
    %70 = arith.andi %65, %69 : vector<1x16xi1>
    %c-1_i32_23 = arith.constant -1 : i32
    %71 = vector.broadcast %c-1_i32_23 : i32 to vector<1x16xi32>
    %72 = arith.addi %2, %71 : vector<1x16xi32>
    %c4_i32_24 = arith.constant 4 : i32
    %73 = vector.broadcast %c4_i32_24 : i32 to vector<1x16xi32>
    %74 = arith.cmpi slt, %72, %73 : vector<1x16xi32>
    %75 = arith.andi %70, %74 : vector<1x16xi1>
    %cst_25 = arith.constant 0.000000e+00 : bf16
    %76 = vector.broadcast %cst_25 : bf16 to vector<32x16xbf16>
    %77 = vector.shape_cast %75 : vector<1x16xi1> to vector<1x16xi1>
    %78 = vector.broadcast %77 : vector<1x16xi1> to vector<32x16xi1>
    %79 = arith.select %78, %56, %76 : vector<32x16xi1>, vector<32x16xbf16>
    %80 = vector.extract_strided_slice %53 {offsets = [0, 12], sizes = [32, 4], strides = [1, 1]} : vector<32x16xbf16> to vector<32x4xbf16>
    %81 = vector.extract_strided_slice %53 {offsets = [0, 0], sizes = [32, 12], strides = [1, 1]} : vector<32x16xbf16> to vector<32x12xbf16>
    %82 = tpu.concatenate %80, %81 in 1 : vector<32x4xbf16>, vector<32x12xbf16> -> vector<32x16xbf16>
    %c-1_i32_26 = arith.constant -1 : i32
    %83 = vector.broadcast %c-1_i32_26 : i32 to vector<1x16xi32>
    %84 = arith.addi %4, %83 : vector<1x16xi32>
    %c0_i32_27 = arith.constant 0 : i32
    %85 = vector.broadcast %c0_i32_27 : i32 to vector<1x16xi32>
    %86 = arith.cmpi sge, %84, %85 : vector<1x16xi32>
    %c-1_i32_28 = arith.constant -1 : i32
    %87 = vector.broadcast %c-1_i32_28 : i32 to vector<1x16xi32>
    %88 = arith.addi %4, %87 : vector<1x16xi32>
    %c4_i32_29 = arith.constant 4 : i32
    %89 = vector.broadcast %c4_i32_29 : i32 to vector<1x16xi32>
    %90 = arith.cmpi slt, %88, %89 : vector<1x16xi32>
    %91 = arith.andi %86, %90 : vector<1x16xi1>
    %c0_i32_30 = arith.constant 0 : i32
    %92 = vector.broadcast %c0_i32_30 : i32 to vector<1x16xi32>
    %93 = arith.addi %2, %92 : vector<1x16xi32>
    %c0_i32_31 = arith.constant 0 : i32
    %94 = vector.broadcast %c0_i32_31 : i32 to vector<1x16xi32>
    %95 = arith.cmpi sge, %93, %94 : vector<1x16xi32>
    %96 = arith.andi %91, %95 : vector<1x16xi1>
    %c0_i32_32 = arith.constant 0 : i32
    %97 = vector.broadcast %c0_i32_32 : i32 to vector<1x16xi32>
    %98 = arith.addi %2, %97 : vector<1x16xi32>
    %c4_i32_33 = arith.constant 4 : i32
    %99 = vector.broadcast %c4_i32_33 : i32 to vector<1x16xi32>
    %100 = arith.cmpi slt, %98, %99 : vector<1x16xi32>
    %101 = arith.andi %96, %100 : vector<1x16xi1>
    %cst_34 = arith.constant 0.000000e+00 : bf16
    %102 = vector.broadcast %cst_34 : bf16 to vector<32x16xbf16>
    %103 = vector.shape_cast %101 : vector<1x16xi1> to vector<1x16xi1>
    %104 = vector.broadcast %103 : vector<1x16xi1> to vector<32x16xi1>
    %105 = arith.select %104, %82, %102 : vector<32x16xi1>, vector<32x16xbf16>
    %106 = vector.extract_strided_slice %53 {offsets = [0, 13], sizes = [32, 3], strides = [1, 1]} : vector<32x16xbf16> to vector<32x3xbf16>
    %107 = vector.extract_strided_slice %53 {offsets = [0, 0], sizes = [32, 13], strides = [1, 1]} : vector<32x16xbf16> to vector<32x13xbf16>
    %108 = tpu.concatenate %106, %107 in 1 : vector<32x3xbf16>, vector<32x13xbf16> -> vector<32x16xbf16>
    %c-1_i32_35 = arith.constant -1 : i32
    %109 = vector.broadcast %c-1_i32_35 : i32 to vector<1x16xi32>
    %110 = arith.addi %4, %109 : vector<1x16xi32>
    %c0_i32_36 = arith.constant 0 : i32
    %111 = vector.broadcast %c0_i32_36 : i32 to vector<1x16xi32>
    %112 = arith.cmpi sge, %110, %111 : vector<1x16xi32>
    %c-1_i32_37 = arith.constant -1 : i32
    %113 = vector.broadcast %c-1_i32_37 : i32 to vector<1x16xi32>
    %114 = arith.addi %4, %113 : vector<1x16xi32>
    %c4_i32_38 = arith.constant 4 : i32
    %115 = vector.broadcast %c4_i32_38 : i32 to vector<1x16xi32>
    %116 = arith.cmpi slt, %114, %115 : vector<1x16xi32>
    %117 = arith.andi %112, %116 : vector<1x16xi1>
    %c1_i32 = arith.constant 1 : i32
    %118 = vector.broadcast %c1_i32 : i32 to vector<1x16xi32>
    %119 = arith.addi %2, %118 : vector<1x16xi32>
    %c0_i32_39 = arith.constant 0 : i32
    %120 = vector.broadcast %c0_i32_39 : i32 to vector<1x16xi32>
    %121 = arith.cmpi sge, %119, %120 : vector<1x16xi32>
    %122 = arith.andi %117, %121 : vector<1x16xi1>
    %c1_i32_40 = arith.constant 1 : i32
    %123 = vector.broadcast %c1_i32_40 : i32 to vector<1x16xi32>
    %124 = arith.addi %2, %123 : vector<1x16xi32>
    %c4_i32_41 = arith.constant 4 : i32
    %125 = vector.broadcast %c4_i32_41 : i32 to vector<1x16xi32>
    %126 = arith.cmpi slt, %124, %125 : vector<1x16xi32>
    %127 = arith.andi %122, %126 : vector<1x16xi1>
    %cst_42 = arith.constant 0.000000e+00 : bf16
    %128 = vector.broadcast %cst_42 : bf16 to vector<32x16xbf16>
    %129 = vector.shape_cast %127 : vector<1x16xi1> to vector<1x16xi1>
    %130 = vector.broadcast %129 : vector<1x16xi1> to vector<32x16xi1>
    %131 = arith.select %130, %108, %128 : vector<32x16xi1>, vector<32x16xbf16>
    %132 = vector.extract_strided_slice %53 {offsets = [0, 15], sizes = [32, 1], strides = [1, 1]} : vector<32x16xbf16> to vector<32x1xbf16>
    %133 = vector.extract_strided_slice %53 {offsets = [0, 0], sizes = [32, 15], strides = [1, 1]} : vector<32x16xbf16> to vector<32x15xbf16>
    %134 = tpu.concatenate %132, %133 in 1 : vector<32x1xbf16>, vector<32x15xbf16> -> vector<32x16xbf16>
    %c0_i32_43 = arith.constant 0 : i32
    %135 = vector.broadcast %c0_i32_43 : i32 to vector<1x16xi32>
    %136 = arith.addi %4, %135 : vector<1x16xi32>
    %c0_i32_44 = arith.constant 0 : i32
    %137 = vector.broadcast %c0_i32_44 : i32 to vector<1x16xi32>
    %138 = arith.cmpi sge, %136, %137 : vector<1x16xi32>
    %c0_i32_45 = arith.constant 0 : i32
    %139 = vector.broadcast %c0_i32_45 : i32 to vector<1x16xi32>
    %140 = arith.addi %4, %139 : vector<1x16xi32>
    %c4_i32_46 = arith.constant 4 : i32
    %141 = vector.broadcast %c4_i32_46 : i32 to vector<1x16xi32>
    %142 = arith.cmpi slt, %140, %141 : vector<1x16xi32>
    %143 = arith.andi %138, %142 : vector<1x16xi1>
    %c-1_i32_47 = arith.constant -1 : i32
    %144 = vector.broadcast %c-1_i32_47 : i32 to vector<1x16xi32>
    %145 = arith.addi %2, %144 : vector<1x16xi32>
    %c0_i32_48 = arith.constant 0 : i32
    %146 = vector.broadcast %c0_i32_48 : i32 to vector<1x16xi32>
    %147 = arith.cmpi sge, %145, %146 : vector<1x16xi32>
    %148 = arith.andi %143, %147 : vector<1x16xi1>
    %c-1_i32_49 = arith.constant -1 : i32
    %149 = vector.broadcast %c-1_i32_49 : i32 to vector<1x16xi32>
    %150 = arith.addi %2, %149 : vector<1x16xi32>
    %c4_i32_50 = arith.constant 4 : i32
    %151 = vector.broadcast %c4_i32_50 : i32 to vector<1x16xi32>
    %152 = arith.cmpi slt, %150, %151 : vector<1x16xi32>
    %153 = arith.andi %148, %152 : vector<1x16xi1>
    %cst_51 = arith.constant 0.000000e+00 : bf16
    %154 = vector.broadcast %cst_51 : bf16 to vector<32x16xbf16>
    %155 = vector.shape_cast %153 : vector<1x16xi1> to vector<1x16xi1>
    %156 = vector.broadcast %155 : vector<1x16xi1> to vector<32x16xi1>
    %157 = arith.select %156, %134, %154 : vector<32x16xi1>, vector<32x16xbf16>
    %158 = vector.extract_strided_slice %53 {offsets = [0, 1], sizes = [32, 15], strides = [1, 1]} : vector<32x16xbf16> to vector<32x15xbf16>
    %159 = vector.extract_strided_slice %53 {offsets = [0, 0], sizes = [32, 1], strides = [1, 1]} : vector<32x16xbf16> to vector<32x1xbf16>
    %160 = tpu.concatenate %158, %159 in 1 : vector<32x15xbf16>, vector<32x1xbf16> -> vector<32x16xbf16>
    %c0_i32_52 = arith.constant 0 : i32
    %161 = vector.broadcast %c0_i32_52 : i32 to vector<1x16xi32>
    %162 = arith.addi %4, %161 : vector<1x16xi32>
    %c0_i32_53 = arith.constant 0 : i32
    %163 = vector.broadcast %c0_i32_53 : i32 to vector<1x16xi32>
    %164 = arith.cmpi sge, %162, %163 : vector<1x16xi32>
    %c0_i32_54 = arith.constant 0 : i32
    %165 = vector.broadcast %c0_i32_54 : i32 to vector<1x16xi32>
    %166 = arith.addi %4, %165 : vector<1x16xi32>
    %c4_i32_55 = arith.constant 4 : i32
    %167 = vector.broadcast %c4_i32_55 : i32 to vector<1x16xi32>
    %168 = arith.cmpi slt, %166, %167 : vector<1x16xi32>
    %169 = arith.andi %164, %168 : vector<1x16xi1>
    %c1_i32_56 = arith.constant 1 : i32
    %170 = vector.broadcast %c1_i32_56 : i32 to vector<1x16xi32>
    %171 = arith.addi %2, %170 : vector<1x16xi32>
    %c0_i32_57 = arith.constant 0 : i32
    %172 = vector.broadcast %c0_i32_57 : i32 to vector<1x16xi32>
    %173 = arith.cmpi sge, %171, %172 : vector<1x16xi32>
    %174 = arith.andi %169, %173 : vector<1x16xi1>
    %c1_i32_58 = arith.constant 1 : i32
    %175 = vector.broadcast %c1_i32_58 : i32 to vector<1x16xi32>
    %176 = arith.addi %2, %175 : vector<1x16xi32>
    %c4_i32_59 = arith.constant 4 : i32
    %177 = vector.broadcast %c4_i32_59 : i32 to vector<1x16xi32>
    %178 = arith.cmpi slt, %176, %177 : vector<1x16xi32>
    %179 = arith.andi %174, %178 : vector<1x16xi1>
    %cst_60 = arith.constant 0.000000e+00 : bf16
    %180 = vector.broadcast %cst_60 : bf16 to vector<32x16xbf16>
    %181 = vector.shape_cast %179 : vector<1x16xi1> to vector<1x16xi1>
    %182 = vector.broadcast %181 : vector<1x16xi1> to vector<32x16xi1>
    %183 = arith.select %182, %160, %180 : vector<32x16xi1>, vector<32x16xbf16>
    %184 = vector.extract_strided_slice %53 {offsets = [0, 3], sizes = [32, 13], strides = [1, 1]} : vector<32x16xbf16> to vector<32x13xbf16>
    %185 = vector.extract_strided_slice %53 {offsets = [0, 0], sizes = [32, 3], strides = [1, 1]} : vector<32x16xbf16> to vector<32x3xbf16>
    %186 = tpu.concatenate %184, %185 in 1 : vector<32x13xbf16>, vector<32x3xbf16> -> vector<32x16xbf16>
    %c1_i32_61 = arith.constant 1 : i32
    %187 = vector.broadcast %c1_i32_61 : i32 to vector<1x16xi32>
    %188 = arith.addi %4, %187 : vector<1x16xi32>
    %c0_i32_62 = arith.constant 0 : i32
    %189 = vector.broadcast %c0_i32_62 : i32 to vector<1x16xi32>
    %190 = arith.cmpi sge, %188, %189 : vector<1x16xi32>
    %c1_i32_63 = arith.constant 1 : i32
    %191 = vector.broadcast %c1_i32_63 : i32 to vector<1x16xi32>
    %192 = arith.addi %4, %191 : vector<1x16xi32>
    %c4_i32_64 = arith.constant 4 : i32
    %193 = vector.broadcast %c4_i32_64 : i32 to vector<1x16xi32>
    %194 = arith.cmpi slt, %192, %193 : vector<1x16xi32>
    %195 = arith.andi %190, %194 : vector<1x16xi1>
    %c-1_i32_65 = arith.constant -1 : i32
    %196 = vector.broadcast %c-1_i32_65 : i32 to vector<1x16xi32>
    %197 = arith.addi %2, %196 : vector<1x16xi32>
    %c0_i32_66 = arith.constant 0 : i32
    %198 = vector.broadcast %c0_i32_66 : i32 to vector<1x16xi32>
    %199 = arith.cmpi sge, %197, %198 : vector<1x16xi32>
    %200 = arith.andi %195, %199 : vector<1x16xi1>
    %c-1_i32_67 = arith.constant -1 : i32
    %201 = vector.broadcast %c-1_i32_67 : i32 to vector<1x16xi32>
    %202 = arith.addi %2, %201 : vector<1x16xi32>
    %c4_i32_68 = arith.constant 4 : i32
    %203 = vector.broadcast %c4_i32_68 : i32 to vector<1x16xi32>
    %204 = arith.cmpi slt, %202, %203 : vector<1x16xi32>
    %205 = arith.andi %200, %204 : vector<1x16xi1>
    %cst_69 = arith.constant 0.000000e+00 : bf16
    %206 = vector.broadcast %cst_69 : bf16 to vector<32x16xbf16>
    %207 = vector.shape_cast %205 : vector<1x16xi1> to vector<1x16xi1>
    %208 = vector.broadcast %207 : vector<1x16xi1> to vector<32x16xi1>
    %209 = arith.select %208, %186, %206 : vector<32x16xi1>, vector<32x16xbf16>
    %210 = vector.extract_strided_slice %53 {offsets = [0, 4], sizes = [32, 12], strides = [1, 1]} : vector<32x16xbf16> to vector<32x12xbf16>
    %211 = vector.extract_strided_slice %53 {offsets = [0, 0], sizes = [32, 4], strides = [1, 1]} : vector<32x16xbf16> to vector<32x4xbf16>
    %212 = tpu.concatenate %210, %211 in 1 : vector<32x12xbf16>, vector<32x4xbf16> -> vector<32x16xbf16>
    %c1_i32_70 = arith.constant 1 : i32
    %213 = vector.broadcast %c1_i32_70 : i32 to vector<1x16xi32>
    %214 = arith.addi %4, %213 : vector<1x16xi32>
    %c0_i32_71 = arith.constant 0 : i32
    %215 = vector.broadcast %c0_i32_71 : i32 to vector<1x16xi32>
    %216 = arith.cmpi sge, %214, %215 : vector<1x16xi32>
    %c1_i32_72 = arith.constant 1 : i32
    %217 = vector.broadcast %c1_i32_72 : i32 to vector<1x16xi32>
    %218 = arith.addi %4, %217 : vector<1x16xi32>
    %c4_i32_73 = arith.constant 4 : i32
    %219 = vector.broadcast %c4_i32_73 : i32 to vector<1x16xi32>
    %220 = arith.cmpi slt, %218, %219 : vector<1x16xi32>
    %221 = arith.andi %216, %220 : vector<1x16xi1>
    %c0_i32_74 = arith.constant 0 : i32
    %222 = vector.broadcast %c0_i32_74 : i32 to vector<1x16xi32>
    %223 = arith.addi %2, %222 : vector<1x16xi32>
    %c0_i32_75 = arith.constant 0 : i32
    %224 = vector.broadcast %c0_i32_75 : i32 to vector<1x16xi32>
    %225 = arith.cmpi sge, %223, %224 : vector<1x16xi32>
    %226 = arith.andi %221, %225 : vector<1x16xi1>
    %c0_i32_76 = arith.constant 0 : i32
    %227 = vector.broadcast %c0_i32_76 : i32 to vector<1x16xi32>
    %228 = arith.addi %2, %227 : vector<1x16xi32>
    %c4_i32_77 = arith.constant 4 : i32
    %229 = vector.broadcast %c4_i32_77 : i32 to vector<1x16xi32>
    %230 = arith.cmpi slt, %228, %229 : vector<1x16xi32>
    %231 = arith.andi %226, %230 : vector<1x16xi1>
    %cst_78 = arith.constant 0.000000e+00 : bf16
    %232 = vector.broadcast %cst_78 : bf16 to vector<32x16xbf16>
    %233 = vector.shape_cast %231 : vector<1x16xi1> to vector<1x16xi1>
    %234 = vector.broadcast %233 : vector<1x16xi1> to vector<32x16xi1>
    %235 = arith.select %234, %212, %232 : vector<32x16xi1>, vector<32x16xbf16>
    %236 = vector.extract_strided_slice %53 {offsets = [0, 5], sizes = [32, 11], strides = [1, 1]} : vector<32x16xbf16> to vector<32x11xbf16>
    %237 = vector.extract_strided_slice %53 {offsets = [0, 0], sizes = [32, 5], strides = [1, 1]} : vector<32x16xbf16> to vector<32x5xbf16>
    %238 = tpu.concatenate %236, %237 in 1 : vector<32x11xbf16>, vector<32x5xbf16> -> vector<32x16xbf16>
    %c1_i32_79 = arith.constant 1 : i32
    %239 = vector.broadcast %c1_i32_79 : i32 to vector<1x16xi32>
    %240 = arith.addi %4, %239 : vector<1x16xi32>
    %c0_i32_80 = arith.constant 0 : i32
    %241 = vector.broadcast %c0_i32_80 : i32 to vector<1x16xi32>
    %242 = arith.cmpi sge, %240, %241 : vector<1x16xi32>
    %c1_i32_81 = arith.constant 1 : i32
    %243 = vector.broadcast %c1_i32_81 : i32 to vector<1x16xi32>
    %244 = arith.addi %4, %243 : vector<1x16xi32>
    %c4_i32_82 = arith.constant 4 : i32
    %245 = vector.broadcast %c4_i32_82 : i32 to vector<1x16xi32>
    %246 = arith.cmpi slt, %244, %245 : vector<1x16xi32>
    %247 = arith.andi %242, %246 : vector<1x16xi1>
    %c1_i32_83 = arith.constant 1 : i32
    %248 = vector.broadcast %c1_i32_83 : i32 to vector<1x16xi32>
    %249 = arith.addi %2, %248 : vector<1x16xi32>
    %c0_i32_84 = arith.constant 0 : i32
    %250 = vector.broadcast %c0_i32_84 : i32 to vector<1x16xi32>
    %251 = arith.cmpi sge, %249, %250 : vector<1x16xi32>
    %252 = arith.andi %247, %251 : vector<1x16xi1>
    %c1_i32_85 = arith.constant 1 : i32
    %253 = vector.broadcast %c1_i32_85 : i32 to vector<1x16xi32>
    %254 = arith.addi %2, %253 : vector<1x16xi32>
    %c4_i32_86 = arith.constant 4 : i32
    %255 = vector.broadcast %c4_i32_86 : i32 to vector<1x16xi32>
    %256 = arith.cmpi slt, %254, %255 : vector<1x16xi32>
    %257 = arith.andi %252, %256 : vector<1x16xi1>
    %cst_87 = arith.constant 0.000000e+00 : bf16
    %258 = vector.broadcast %cst_87 : bf16 to vector<32x16xbf16>
    %259 = vector.shape_cast %257 : vector<1x16xi1> to vector<1x16xi1>
    %260 = vector.broadcast %259 : vector<1x16xi1> to vector<32x16xi1>
    %261 = arith.select %260, %238, %258 : vector<32x16xi1>, vector<32x16xbf16>
    %262 = tpu.concatenate %79, %105, %131, %157, %53, %183, %209, %235, %261 in 0 : vector<32x16xbf16>, vector<32x16xbf16>, vector<32x16xbf16>, vector<32x16xbf16>, vector<32x16xbf16>, vector<32x16xbf16>, vector<32x16xbf16>, vector<32x16xbf16>, vector<32x16xbf16> -> vector<288x16xbf16>
    %c0_88 = arith.constant 0 : index
    %c0_89 = arith.constant 0 : index
    %263 = vector.load %arg4[%c0_88, %c0_89] : memref<32x288xbf16, #tpu.memory_space<vmem>>, vector<32x288xbf16>
    %cst_90 = arith.constant dense<0.000000e+00> : vector<32x16xf32>
    %264 = tpu.matmul %263, %262, %cst_90 {dimension_numbers = #tpu.dot_dimension_numbers<[1], [0], [0], [1], [0, 0, 1, 1], [], []>} : vector<32x288xbf16>, vector<288x16xbf16>, vector<32x16xf32> -> vector<32x16xf32>
    %c0_91 = arith.constant 0 : index
    %c0_92 = arith.constant 0 : index
    %265 = vector.load %arg5[%c0_91, %c0_92] : memref<32x1xf32, #tpu.memory_space<vmem>>, vector<32x1xf32>
    %266 = vector.broadcast %265 : vector<32x1xf32> to vector<32x16xf32>
    %267 = arith.addf %264, %266 : vector<32x16xf32>
    %c0_93 = arith.constant 0 : index
    %c0_94 = arith.constant 0 : index
    %268 = vector.load %arg9[%c0_93, %c0_94] : memref<32x1xf32, #tpu.memory_space<vmem>>, vector<32x1xf32>
    %269 = vector.broadcast %268 : vector<32x1xf32> to vector<32x16xf32>
    %270 = vector.broadcast %6 : vector<1x16xf32> to vector<32x16xf32>
    %271 = arith.mulf %269, %270 : vector<32x16xf32>
    %272 = arith.addf %267, %271 : vector<32x16xf32>
    %cst_95 = arith.constant 2.000000e-01 : f32
    %273 = vector.broadcast %cst_95 : f32 to vector<32x16xf32>
    %274 = arith.mulf %273, %272 : vector<32x16xf32>
    %275 = arith.maximumf %272, %274 : vector<32x16xf32>
    %cst_96 = arith.constant dense<0.000000e+00> : vector<32xf32>
    %276 = vector.multi_reduction <add>, %275, %cst_96 [1] : vector<32x16xf32> to vector<32xf32>
    %277 = vector.shape_cast %276 : vector<32xf32> to vector<32x1xf32>
    %cst_97 = arith.constant 1.600000e+01 : f32
    %278 = vector.broadcast %cst_97 : f32 to vector<32x1xf32>
    %279 = arith.divf %277, %278 : vector<32x1xf32>
    %280 = arith.mulf %275, %275 : vector<32x16xf32>
    %cst_98 = arith.constant dense<0.000000e+00> : vector<32xf32>
    %281 = vector.multi_reduction <add>, %280, %cst_98 [1] : vector<32x16xf32> to vector<32xf32>
    %282 = vector.shape_cast %281 : vector<32xf32> to vector<32x1xf32>
    %cst_99 = arith.constant 1.600000e+01 : f32
    %283 = vector.broadcast %cst_99 : f32 to vector<32x1xf32>
    %284 = arith.divf %282, %283 : vector<32x1xf32>
    %285 = arith.mulf %279, %279 : vector<32x1xf32>
    %286 = arith.subf %284, %285 : vector<32x1xf32>
    %cst_100 = arith.constant 0.000000e+00 : f32
    %287 = vector.broadcast %cst_100 : f32 to vector<32x1xf32>
    %288 = arith.maximumf %286, %287 : vector<32x1xf32>
    %289 = vector.broadcast %279 : vector<32x1xf32> to vector<32x16xf32>
    %290 = arith.subf %275, %289 : vector<32x16xf32>
    %cst_101 = arith.constant 9.99999974E-6 : f32
    %291 = vector.broadcast %cst_101 : f32 to vector<32x1xf32>
    %292 = arith.addf %288, %291 : vector<32x1xf32>
    %293 = math.rsqrt %292 : vector<32x1xf32>
    %294 = vector.broadcast %293 : vector<32x1xf32> to vector<32x16xf32>
    %295 = arith.mulf %290, %294 : vector<32x16xf32>
    %296 = vector.broadcast %18 : vector<32x1xf32> to vector<32x16xf32>
    %297 = arith.mulf %296, %295 : vector<32x16xf32>
    %298 = vector.broadcast %19 : vector<32x1xf32> to vector<32x16xf32>
    %299 = arith.addf %297, %298 : vector<32x16xf32>
    %300 = tpu.iota {dimensions = array<i32: 1>} : vector<1x64xi32>
    %c7_i32 = arith.constant 7 : i32
    %301 = vector.broadcast %c7_i32 : i32 to vector<1x64xi32>
    %302 = arith.andi %300, %301 : vector<1x64xi32>
    %c3_i32_102 = arith.constant 3 : i32
    %303 = vector.broadcast %c3_i32_102 : i32 to vector<1x64xi32>
    %304 = arith.shrsi %300, %303 : vector<1x64xi32>
    %c0_103 = arith.constant 0 : index
    %c0_104 = arith.constant 0 : index
    %c0_105 = arith.constant 0 : index
    %305 = vector.load %arg11[%c0_103, %c0_104, %c0_105] : memref<1x1x64xf32, #tpu.memory_space<vmem>>, vector<1x1x64xf32>
    %306 = vector.shape_cast %305 : vector<1x1x64xf32> to vector<1x64xf32>
    %c0_106 = arith.constant 0 : index
    %c0_107 = arith.constant 0 : index
    %c0_108 = arith.constant 0 : index
    %307 = vector.load %arg10[%c0_106, %c0_107, %c0_108] : memref<1x1x32xf32, #tpu.memory_space<vmem>>, vector<1x1x32xf32>
    %308 = vector.shape_cast %307 : vector<1x1x32xf32> to vector<1x32xf32>
    %c0_109 = arith.constant 0 : index
    %c0_110 = arith.constant 0 : index
    %309 = vector.load %arg17[%c0_109, %c0_110] : memref<128x32xf32, #tpu.memory_space<vmem>>, vector<128x32xf32>
    %310 = vector.broadcast %308 : vector<1x32xf32> to vector<128x32xf32>
    %311 = arith.mulf %309, %310 : vector<128x32xf32>
    %cst_111 = arith.constant dense<0.000000e+00> : vector<128xf32>
    %312 = vector.multi_reduction <add>, %311, %cst_111 [1] : vector<128x32xf32> to vector<128xf32>
    %313 = vector.shape_cast %312 : vector<128xf32> to vector<128x1xf32>
    %c0_112 = arith.constant 0 : index
    %c0_113 = arith.constant 0 : index
    %314 = vector.load %arg18[%c0_112, %c0_113] : memref<128x1xf32, #tpu.memory_space<vmem>>, vector<128x1xf32>
    %315 = arith.addf %313, %314 : vector<128x1xf32>
    %316 = vector.extract_strided_slice %315 {offsets = [0, 0], sizes = [32, 1], strides = [1, 1]} : vector<128x1xf32> to vector<32x1xf32>
    %317 = vector.extract_strided_slice %315 {offsets = [32, 0], sizes = [32, 1], strides = [1, 1]} : vector<128x1xf32> to vector<32x1xf32>
    %318 = vector.extract_strided_slice %315 {offsets = [64, 0], sizes = [32, 1], strides = [1, 1]} : vector<128x1xf32> to vector<32x1xf32>
    %319 = vector.extract_strided_slice %315 {offsets = [96, 0], sizes = [32, 1], strides = [1, 1]} : vector<128x1xf32> to vector<32x1xf32>
    %320 = arith.truncf %299 : vector<32x16xf32> to vector<32x16xbf16>
    %c0_114 = arith.constant 0 : index
    %c0_115 = arith.constant 0 : index
    %321 = vector.load %arg14[%c0_114, %c0_115] : memref<16x64xbf16, #tpu.memory_space<vmem>>, vector<16x64xbf16>
    %cst_116 = arith.constant dense<0.000000e+00> : vector<32x64xf32>
    %322 = tpu.matmul %320, %321, %cst_116 {dimension_numbers = #tpu.dot_dimension_numbers<[1], [0], [0], [1], [0, 0, 1, 1], [], []>} : vector<32x16xbf16>, vector<16x64xbf16>, vector<32x64xf32> -> vector<32x64xf32>
    %323 = arith.truncf %322 : vector<32x64xf32> to vector<32x64xbf16>
    %324 = vector.extract_strided_slice %323 {offsets = [0, 55], sizes = [32, 9], strides = [1, 1]} : vector<32x64xbf16> to vector<32x9xbf16>
    %325 = vector.extract_strided_slice %323 {offsets = [0, 0], sizes = [32, 55], strides = [1, 1]} : vector<32x64xbf16> to vector<32x55xbf16>
    %326 = tpu.concatenate %324, %325 in 1 : vector<32x9xbf16>, vector<32x55xbf16> -> vector<32x64xbf16>
    %c-1_i32_117 = arith.constant -1 : i32
    %327 = vector.broadcast %c-1_i32_117 : i32 to vector<1x64xi32>
    %328 = arith.addi %304, %327 : vector<1x64xi32>
    %c0_i32_118 = arith.constant 0 : i32
    %329 = vector.broadcast %c0_i32_118 : i32 to vector<1x64xi32>
    %330 = arith.cmpi sge, %328, %329 : vector<1x64xi32>
    %c-1_i32_119 = arith.constant -1 : i32
    %331 = vector.broadcast %c-1_i32_119 : i32 to vector<1x64xi32>
    %332 = arith.addi %304, %331 : vector<1x64xi32>
    %c8_i32 = arith.constant 8 : i32
    %333 = vector.broadcast %c8_i32 : i32 to vector<1x64xi32>
    %334 = arith.cmpi slt, %332, %333 : vector<1x64xi32>
    %335 = arith.andi %330, %334 : vector<1x64xi1>
    %c-1_i32_120 = arith.constant -1 : i32
    %336 = vector.broadcast %c-1_i32_120 : i32 to vector<1x64xi32>
    %337 = arith.addi %302, %336 : vector<1x64xi32>
    %c0_i32_121 = arith.constant 0 : i32
    %338 = vector.broadcast %c0_i32_121 : i32 to vector<1x64xi32>
    %339 = arith.cmpi sge, %337, %338 : vector<1x64xi32>
    %340 = arith.andi %335, %339 : vector<1x64xi1>
    %c-1_i32_122 = arith.constant -1 : i32
    %341 = vector.broadcast %c-1_i32_122 : i32 to vector<1x64xi32>
    %342 = arith.addi %302, %341 : vector<1x64xi32>
    %c8_i32_123 = arith.constant 8 : i32
    %343 = vector.broadcast %c8_i32_123 : i32 to vector<1x64xi32>
    %344 = arith.cmpi slt, %342, %343 : vector<1x64xi32>
    %345 = arith.andi %340, %344 : vector<1x64xi1>
    %cst_124 = arith.constant 0.000000e+00 : bf16
    %346 = vector.broadcast %cst_124 : bf16 to vector<32x64xbf16>
    %347 = vector.shape_cast %345 : vector<1x64xi1> to vector<1x64xi1>
    %348 = vector.broadcast %347 : vector<1x64xi1> to vector<32x64xi1>
    %349 = arith.select %348, %326, %346 : vector<32x64xi1>, vector<32x64xbf16>
    %350 = vector.extract_strided_slice %323 {offsets = [0, 56], sizes = [32, 8], strides = [1, 1]} : vector<32x64xbf16> to vector<32x8xbf16>
    %351 = vector.extract_strided_slice %323 {offsets = [0, 0], sizes = [32, 56], strides = [1, 1]} : vector<32x64xbf16> to vector<32x56xbf16>
    %352 = tpu.concatenate %350, %351 in 1 : vector<32x8xbf16>, vector<32x56xbf16> -> vector<32x64xbf16>
    %c-1_i32_125 = arith.constant -1 : i32
    %353 = vector.broadcast %c-1_i32_125 : i32 to vector<1x64xi32>
    %354 = arith.addi %304, %353 : vector<1x64xi32>
    %c0_i32_126 = arith.constant 0 : i32
    %355 = vector.broadcast %c0_i32_126 : i32 to vector<1x64xi32>
    %356 = arith.cmpi sge, %354, %355 : vector<1x64xi32>
    %c-1_i32_127 = arith.constant -1 : i32
    %357 = vector.broadcast %c-1_i32_127 : i32 to vector<1x64xi32>
    %358 = arith.addi %304, %357 : vector<1x64xi32>
    %c8_i32_128 = arith.constant 8 : i32
    %359 = vector.broadcast %c8_i32_128 : i32 to vector<1x64xi32>
    %360 = arith.cmpi slt, %358, %359 : vector<1x64xi32>
    %361 = arith.andi %356, %360 : vector<1x64xi1>
    %c0_i32_129 = arith.constant 0 : i32
    %362 = vector.broadcast %c0_i32_129 : i32 to vector<1x64xi32>
    %363 = arith.addi %302, %362 : vector<1x64xi32>
    %c0_i32_130 = arith.constant 0 : i32
    %364 = vector.broadcast %c0_i32_130 : i32 to vector<1x64xi32>
    %365 = arith.cmpi sge, %363, %364 : vector<1x64xi32>
    %366 = arith.andi %361, %365 : vector<1x64xi1>
    %c0_i32_131 = arith.constant 0 : i32
    %367 = vector.broadcast %c0_i32_131 : i32 to vector<1x64xi32>
    %368 = arith.addi %302, %367 : vector<1x64xi32>
    %c8_i32_132 = arith.constant 8 : i32
    %369 = vector.broadcast %c8_i32_132 : i32 to vector<1x64xi32>
    %370 = arith.cmpi slt, %368, %369 : vector<1x64xi32>
    %371 = arith.andi %366, %370 : vector<1x64xi1>
    %cst_133 = arith.constant 0.000000e+00 : bf16
    %372 = vector.broadcast %cst_133 : bf16 to vector<32x64xbf16>
    %373 = vector.shape_cast %371 : vector<1x64xi1> to vector<1x64xi1>
    %374 = vector.broadcast %373 : vector<1x64xi1> to vector<32x64xi1>
    %375 = arith.select %374, %352, %372 : vector<32x64xi1>, vector<32x64xbf16>
    %376 = vector.extract_strided_slice %323 {offsets = [0, 57], sizes = [32, 7], strides = [1, 1]} : vector<32x64xbf16> to vector<32x7xbf16>
    %377 = vector.extract_strided_slice %323 {offsets = [0, 0], sizes = [32, 57], strides = [1, 1]} : vector<32x64xbf16> to vector<32x57xbf16>
    %378 = tpu.concatenate %376, %377 in 1 : vector<32x7xbf16>, vector<32x57xbf16> -> vector<32x64xbf16>
    %c-1_i32_134 = arith.constant -1 : i32
    %379 = vector.broadcast %c-1_i32_134 : i32 to vector<1x64xi32>
    %380 = arith.addi %304, %379 : vector<1x64xi32>
    %c0_i32_135 = arith.constant 0 : i32
    %381 = vector.broadcast %c0_i32_135 : i32 to vector<1x64xi32>
    %382 = arith.cmpi sge, %380, %381 : vector<1x64xi32>
    %c-1_i32_136 = arith.constant -1 : i32
    %383 = vector.broadcast %c-1_i32_136 : i32 to vector<1x64xi32>
    %384 = arith.addi %304, %383 : vector<1x64xi32>
    %c8_i32_137 = arith.constant 8 : i32
    %385 = vector.broadcast %c8_i32_137 : i32 to vector<1x64xi32>
    %386 = arith.cmpi slt, %384, %385 : vector<1x64xi32>
    %387 = arith.andi %382, %386 : vector<1x64xi1>
    %c1_i32_138 = arith.constant 1 : i32
    %388 = vector.broadcast %c1_i32_138 : i32 to vector<1x64xi32>
    %389 = arith.addi %302, %388 : vector<1x64xi32>
    %c0_i32_139 = arith.constant 0 : i32
    %390 = vector.broadcast %c0_i32_139 : i32 to vector<1x64xi32>
    %391 = arith.cmpi sge, %389, %390 : vector<1x64xi32>
    %392 = arith.andi %387, %391 : vector<1x64xi1>
    %c1_i32_140 = arith.constant 1 : i32
    %393 = vector.broadcast %c1_i32_140 : i32 to vector<1x64xi32>
    %394 = arith.addi %302, %393 : vector<1x64xi32>
    %c8_i32_141 = arith.constant 8 : i32
    %395 = vector.broadcast %c8_i32_141 : i32 to vector<1x64xi32>
    %396 = arith.cmpi slt, %394, %395 : vector<1x64xi32>
    %397 = arith.andi %392, %396 : vector<1x64xi1>
    %cst_142 = arith.constant 0.000000e+00 : bf16
    %398 = vector.broadcast %cst_142 : bf16 to vector<32x64xbf16>
    %399 = vector.shape_cast %397 : vector<1x64xi1> to vector<1x64xi1>
    %400 = vector.broadcast %399 : vector<1x64xi1> to vector<32x64xi1>
    %401 = arith.select %400, %378, %398 : vector<32x64xi1>, vector<32x64xbf16>
    %402 = vector.extract_strided_slice %323 {offsets = [0, 63], sizes = [32, 1], strides = [1, 1]} : vector<32x64xbf16> to vector<32x1xbf16>
    %403 = vector.extract_strided_slice %323 {offsets = [0, 0], sizes = [32, 63], strides = [1, 1]} : vector<32x64xbf16> to vector<32x63xbf16>
    %404 = tpu.concatenate %402, %403 in 1 : vector<32x1xbf16>, vector<32x63xbf16> -> vector<32x64xbf16>
    %c0_i32_143 = arith.constant 0 : i32
    %405 = vector.broadcast %c0_i32_143 : i32 to vector<1x64xi32>
    %406 = arith.addi %304, %405 : vector<1x64xi32>
    %c0_i32_144 = arith.constant 0 : i32
    %407 = vector.broadcast %c0_i32_144 : i32 to vector<1x64xi32>
    %408 = arith.cmpi sge, %406, %407 : vector<1x64xi32>
    %c0_i32_145 = arith.constant 0 : i32
    %409 = vector.broadcast %c0_i32_145 : i32 to vector<1x64xi32>
    %410 = arith.addi %304, %409 : vector<1x64xi32>
    %c8_i32_146 = arith.constant 8 : i32
    %411 = vector.broadcast %c8_i32_146 : i32 to vector<1x64xi32>
    %412 = arith.cmpi slt, %410, %411 : vector<1x64xi32>
    %413 = arith.andi %408, %412 : vector<1x64xi1>
    %c-1_i32_147 = arith.constant -1 : i32
    %414 = vector.broadcast %c-1_i32_147 : i32 to vector<1x64xi32>
    %415 = arith.addi %302, %414 : vector<1x64xi32>
    %c0_i32_148 = arith.constant 0 : i32
    %416 = vector.broadcast %c0_i32_148 : i32 to vector<1x64xi32>
    %417 = arith.cmpi sge, %415, %416 : vector<1x64xi32>
    %418 = arith.andi %413, %417 : vector<1x64xi1>
    %c-1_i32_149 = arith.constant -1 : i32
    %419 = vector.broadcast %c-1_i32_149 : i32 to vector<1x64xi32>
    %420 = arith.addi %302, %419 : vector<1x64xi32>
    %c8_i32_150 = arith.constant 8 : i32
    %421 = vector.broadcast %c8_i32_150 : i32 to vector<1x64xi32>
    %422 = arith.cmpi slt, %420, %421 : vector<1x64xi32>
    %423 = arith.andi %418, %422 : vector<1x64xi1>
    %cst_151 = arith.constant 0.000000e+00 : bf16
    %424 = vector.broadcast %cst_151 : bf16 to vector<32x64xbf16>
    %425 = vector.shape_cast %423 : vector<1x64xi1> to vector<1x64xi1>
    %426 = vector.broadcast %425 : vector<1x64xi1> to vector<32x64xi1>
    %427 = arith.select %426, %404, %424 : vector<32x64xi1>, vector<32x64xbf16>
    %428 = vector.extract_strided_slice %323 {offsets = [0, 1], sizes = [32, 63], strides = [1, 1]} : vector<32x64xbf16> to vector<32x63xbf16>
    %429 = vector.extract_strided_slice %323 {offsets = [0, 0], sizes = [32, 1], strides = [1, 1]} : vector<32x64xbf16> to vector<32x1xbf16>
    %430 = tpu.concatenate %428, %429 in 1 : vector<32x63xbf16>, vector<32x1xbf16> -> vector<32x64xbf16>
    %c0_i32_152 = arith.constant 0 : i32
    %431 = vector.broadcast %c0_i32_152 : i32 to vector<1x64xi32>
    %432 = arith.addi %304, %431 : vector<1x64xi32>
    %c0_i32_153 = arith.constant 0 : i32
    %433 = vector.broadcast %c0_i32_153 : i32 to vector<1x64xi32>
    %434 = arith.cmpi sge, %432, %433 : vector<1x64xi32>
    %c0_i32_154 = arith.constant 0 : i32
    %435 = vector.broadcast %c0_i32_154 : i32 to vector<1x64xi32>
    %436 = arith.addi %304, %435 : vector<1x64xi32>
    %c8_i32_155 = arith.constant 8 : i32
    %437 = vector.broadcast %c8_i32_155 : i32 to vector<1x64xi32>
    %438 = arith.cmpi slt, %436, %437 : vector<1x64xi32>
    %439 = arith.andi %434, %438 : vector<1x64xi1>
    %c1_i32_156 = arith.constant 1 : i32
    %440 = vector.broadcast %c1_i32_156 : i32 to vector<1x64xi32>
    %441 = arith.addi %302, %440 : vector<1x64xi32>
    %c0_i32_157 = arith.constant 0 : i32
    %442 = vector.broadcast %c0_i32_157 : i32 to vector<1x64xi32>
    %443 = arith.cmpi sge, %441, %442 : vector<1x64xi32>
    %444 = arith.andi %439, %443 : vector<1x64xi1>
    %c1_i32_158 = arith.constant 1 : i32
    %445 = vector.broadcast %c1_i32_158 : i32 to vector<1x64xi32>
    %446 = arith.addi %302, %445 : vector<1x64xi32>
    %c8_i32_159 = arith.constant 8 : i32
    %447 = vector.broadcast %c8_i32_159 : i32 to vector<1x64xi32>
    %448 = arith.cmpi slt, %446, %447 : vector<1x64xi32>
    %449 = arith.andi %444, %448 : vector<1x64xi1>
    %cst_160 = arith.constant 0.000000e+00 : bf16
    %450 = vector.broadcast %cst_160 : bf16 to vector<32x64xbf16>
    %451 = vector.shape_cast %449 : vector<1x64xi1> to vector<1x64xi1>
    %452 = vector.broadcast %451 : vector<1x64xi1> to vector<32x64xi1>
    %453 = arith.select %452, %430, %450 : vector<32x64xi1>, vector<32x64xbf16>
    %454 = vector.extract_strided_slice %323 {offsets = [0, 7], sizes = [32, 57], strides = [1, 1]} : vector<32x64xbf16> to vector<32x57xbf16>
    %455 = vector.extract_strided_slice %323 {offsets = [0, 0], sizes = [32, 7], strides = [1, 1]} : vector<32x64xbf16> to vector<32x7xbf16>
    %456 = tpu.concatenate %454, %455 in 1 : vector<32x57xbf16>, vector<32x7xbf16> -> vector<32x64xbf16>
    %c1_i32_161 = arith.constant 1 : i32
    %457 = vector.broadcast %c1_i32_161 : i32 to vector<1x64xi32>
    %458 = arith.addi %304, %457 : vector<1x64xi32>
    %c0_i32_162 = arith.constant 0 : i32
    %459 = vector.broadcast %c0_i32_162 : i32 to vector<1x64xi32>
    %460 = arith.cmpi sge, %458, %459 : vector<1x64xi32>
    %c1_i32_163 = arith.constant 1 : i32
    %461 = vector.broadcast %c1_i32_163 : i32 to vector<1x64xi32>
    %462 = arith.addi %304, %461 : vector<1x64xi32>
    %c8_i32_164 = arith.constant 8 : i32
    %463 = vector.broadcast %c8_i32_164 : i32 to vector<1x64xi32>
    %464 = arith.cmpi slt, %462, %463 : vector<1x64xi32>
    %465 = arith.andi %460, %464 : vector<1x64xi1>
    %c-1_i32_165 = arith.constant -1 : i32
    %466 = vector.broadcast %c-1_i32_165 : i32 to vector<1x64xi32>
    %467 = arith.addi %302, %466 : vector<1x64xi32>
    %c0_i32_166 = arith.constant 0 : i32
    %468 = vector.broadcast %c0_i32_166 : i32 to vector<1x64xi32>
    %469 = arith.cmpi sge, %467, %468 : vector<1x64xi32>
    %470 = arith.andi %465, %469 : vector<1x64xi1>
    %c-1_i32_167 = arith.constant -1 : i32
    %471 = vector.broadcast %c-1_i32_167 : i32 to vector<1x64xi32>
    %472 = arith.addi %302, %471 : vector<1x64xi32>
    %c8_i32_168 = arith.constant 8 : i32
    %473 = vector.broadcast %c8_i32_168 : i32 to vector<1x64xi32>
    %474 = arith.cmpi slt, %472, %473 : vector<1x64xi32>
    %475 = arith.andi %470, %474 : vector<1x64xi1>
    %cst_169 = arith.constant 0.000000e+00 : bf16
    %476 = vector.broadcast %cst_169 : bf16 to vector<32x64xbf16>
    %477 = vector.shape_cast %475 : vector<1x64xi1> to vector<1x64xi1>
    %478 = vector.broadcast %477 : vector<1x64xi1> to vector<32x64xi1>
    %479 = arith.select %478, %456, %476 : vector<32x64xi1>, vector<32x64xbf16>
    %480 = vector.extract_strided_slice %323 {offsets = [0, 8], sizes = [32, 56], strides = [1, 1]} : vector<32x64xbf16> to vector<32x56xbf16>
    %481 = vector.extract_strided_slice %323 {offsets = [0, 0], sizes = [32, 8], strides = [1, 1]} : vector<32x64xbf16> to vector<32x8xbf16>
    %482 = tpu.concatenate %480, %481 in 1 : vector<32x56xbf16>, vector<32x8xbf16> -> vector<32x64xbf16>
    %c1_i32_170 = arith.constant 1 : i32
    %483 = vector.broadcast %c1_i32_170 : i32 to vector<1x64xi32>
    %484 = arith.addi %304, %483 : vector<1x64xi32>
    %c0_i32_171 = arith.constant 0 : i32
    %485 = vector.broadcast %c0_i32_171 : i32 to vector<1x64xi32>
    %486 = arith.cmpi sge, %484, %485 : vector<1x64xi32>
    %c1_i32_172 = arith.constant 1 : i32
    %487 = vector.broadcast %c1_i32_172 : i32 to vector<1x64xi32>
    %488 = arith.addi %304, %487 : vector<1x64xi32>
    %c8_i32_173 = arith.constant 8 : i32
    %489 = vector.broadcast %c8_i32_173 : i32 to vector<1x64xi32>
    %490 = arith.cmpi slt, %488, %489 : vector<1x64xi32>
    %491 = arith.andi %486, %490 : vector<1x64xi1>
    %c0_i32_174 = arith.constant 0 : i32
    %492 = vector.broadcast %c0_i32_174 : i32 to vector<1x64xi32>
    %493 = arith.addi %302, %492 : vector<1x64xi32>
    %c0_i32_175 = arith.constant 0 : i32
    %494 = vector.broadcast %c0_i32_175 : i32 to vector<1x64xi32>
    %495 = arith.cmpi sge, %493, %494 : vector<1x64xi32>
    %496 = arith.andi %491, %495 : vector<1x64xi1>
    %c0_i32_176 = arith.constant 0 : i32
    %497 = vector.broadcast %c0_i32_176 : i32 to vector<1x64xi32>
    %498 = arith.addi %302, %497 : vector<1x64xi32>
    %c8_i32_177 = arith.constant 8 : i32
    %499 = vector.broadcast %c8_i32_177 : i32 to vector<1x64xi32>
    %500 = arith.cmpi slt, %498, %499 : vector<1x64xi32>
    %501 = arith.andi %496, %500 : vector<1x64xi1>
    %cst_178 = arith.constant 0.000000e+00 : bf16
    %502 = vector.broadcast %cst_178 : bf16 to vector<32x64xbf16>
    %503 = vector.shape_cast %501 : vector<1x64xi1> to vector<1x64xi1>
    %504 = vector.broadcast %503 : vector<1x64xi1> to vector<32x64xi1>
    %505 = arith.select %504, %482, %502 : vector<32x64xi1>, vector<32x64xbf16>
    %506 = vector.extract_strided_slice %323 {offsets = [0, 9], sizes = [32, 55], strides = [1, 1]} : vector<32x64xbf16> to vector<32x55xbf16>
    %507 = vector.extract_strided_slice %323 {offsets = [0, 0], sizes = [32, 9], strides = [1, 1]} : vector<32x64xbf16> to vector<32x9xbf16>
    %508 = tpu.concatenate %506, %507 in 1 : vector<32x55xbf16>, vector<32x9xbf16> -> vector<32x64xbf16>
    %c1_i32_179 = arith.constant 1 : i32
    %509 = vector.broadcast %c1_i32_179 : i32 to vector<1x64xi32>
    %510 = arith.addi %304, %509 : vector<1x64xi32>
    %c0_i32_180 = arith.constant 0 : i32
    %511 = vector.broadcast %c0_i32_180 : i32 to vector<1x64xi32>
    %512 = arith.cmpi sge, %510, %511 : vector<1x64xi32>
    %c1_i32_181 = arith.constant 1 : i32
    %513 = vector.broadcast %c1_i32_181 : i32 to vector<1x64xi32>
    %514 = arith.addi %304, %513 : vector<1x64xi32>
    %c8_i32_182 = arith.constant 8 : i32
    %515 = vector.broadcast %c8_i32_182 : i32 to vector<1x64xi32>
    %516 = arith.cmpi slt, %514, %515 : vector<1x64xi32>
    %517 = arith.andi %512, %516 : vector<1x64xi1>
    %c1_i32_183 = arith.constant 1 : i32
    %518 = vector.broadcast %c1_i32_183 : i32 to vector<1x64xi32>
    %519 = arith.addi %302, %518 : vector<1x64xi32>
    %c0_i32_184 = arith.constant 0 : i32
    %520 = vector.broadcast %c0_i32_184 : i32 to vector<1x64xi32>
    %521 = arith.cmpi sge, %519, %520 : vector<1x64xi32>
    %522 = arith.andi %517, %521 : vector<1x64xi1>
    %c1_i32_185 = arith.constant 1 : i32
    %523 = vector.broadcast %c1_i32_185 : i32 to vector<1x64xi32>
    %524 = arith.addi %302, %523 : vector<1x64xi32>
    %c8_i32_186 = arith.constant 8 : i32
    %525 = vector.broadcast %c8_i32_186 : i32 to vector<1x64xi32>
    %526 = arith.cmpi slt, %524, %525 : vector<1x64xi32>
    %527 = arith.andi %522, %526 : vector<1x64xi1>
    %cst_187 = arith.constant 0.000000e+00 : bf16
    %528 = vector.broadcast %cst_187 : bf16 to vector<32x64xbf16>
    %529 = vector.shape_cast %527 : vector<1x64xi1> to vector<1x64xi1>
    %530 = vector.broadcast %529 : vector<1x64xi1> to vector<32x64xi1>
    %531 = arith.select %530, %508, %528 : vector<32x64xi1>, vector<32x64xbf16>
    %532 = tpu.concatenate %349, %375, %401, %427, %323, %453, %479, %505, %531 in 0 : vector<32x64xbf16>, vector<32x64xbf16>, vector<32x64xbf16>, vector<32x64xbf16>, vector<32x64xbf16>, vector<32x64xbf16>, vector<32x64xbf16>, vector<32x64xbf16>, vector<32x64xbf16> -> vector<288x64xbf16>
    %c0_188 = arith.constant 0 : index
    %c0_189 = arith.constant 0 : index
    %533 = vector.load %arg12[%c0_188, %c0_189] : memref<32x288xbf16, #tpu.memory_space<vmem>>, vector<32x288xbf16>
    %cst_190 = arith.constant dense<0.000000e+00> : vector<32x64xf32>
    %534 = tpu.matmul %533, %532, %cst_190 {dimension_numbers = #tpu.dot_dimension_numbers<[1], [0], [0], [1], [0, 0, 1, 1], [], []>} : vector<32x288xbf16>, vector<288x64xbf16>, vector<32x64xf32> -> vector<32x64xf32>
    %c0_191 = arith.constant 0 : index
    %c0_192 = arith.constant 0 : index
    %535 = vector.load %arg13[%c0_191, %c0_192] : memref<32x1xf32, #tpu.memory_space<vmem>>, vector<32x1xf32>
    %536 = vector.broadcast %535 : vector<32x1xf32> to vector<32x64xf32>
    %537 = arith.addf %534, %536 : vector<32x64xf32>
    %538 = vector.extract_strided_slice %537 {offsets = [0, 56], sizes = [32, 8], strides = [1, 1]} : vector<32x64xf32> to vector<32x8xf32>
    %539 = vector.extract_strided_slice %537 {offsets = [0, 0], sizes = [32, 56], strides = [1, 1]} : vector<32x64xf32> to vector<32x56xf32>
    %540 = tpu.concatenate %538, %539 in 1 : vector<32x8xf32>, vector<32x56xf32> -> vector<32x64xf32>
    %c-1_i32_193 = arith.constant -1 : i32
    %541 = vector.broadcast %c-1_i32_193 : i32 to vector<1x64xi32>
    %542 = arith.addi %304, %541 : vector<1x64xi32>
    %c0_i32_194 = arith.constant 0 : i32
    %543 = vector.broadcast %c0_i32_194 : i32 to vector<1x64xi32>
    %544 = arith.cmpi sge, %542, %543 : vector<1x64xi32>
    %c-1_i32_195 = arith.constant -1 : i32
    %545 = vector.broadcast %c-1_i32_195 : i32 to vector<1x64xi32>
    %546 = arith.addi %304, %545 : vector<1x64xi32>
    %c8_i32_196 = arith.constant 8 : i32
    %547 = vector.broadcast %c8_i32_196 : i32 to vector<1x64xi32>
    %548 = arith.cmpi slt, %546, %547 : vector<1x64xi32>
    %549 = arith.andi %544, %548 : vector<1x64xi1>
    %c0_i32_197 = arith.constant 0 : i32
    %550 = vector.broadcast %c0_i32_197 : i32 to vector<1x64xi32>
    %551 = arith.addi %302, %550 : vector<1x64xi32>
    %c0_i32_198 = arith.constant 0 : i32
    %552 = vector.broadcast %c0_i32_198 : i32 to vector<1x64xi32>
    %553 = arith.cmpi sge, %551, %552 : vector<1x64xi32>
    %554 = arith.andi %549, %553 : vector<1x64xi1>
    %c0_i32_199 = arith.constant 0 : i32
    %555 = vector.broadcast %c0_i32_199 : i32 to vector<1x64xi32>
    %556 = arith.addi %302, %555 : vector<1x64xi32>
    %c8_i32_200 = arith.constant 8 : i32
    %557 = vector.broadcast %c8_i32_200 : i32 to vector<1x64xi32>
    %558 = arith.cmpi slt, %556, %557 : vector<1x64xi32>
    %559 = arith.andi %554, %558 : vector<1x64xi1>
    %cst_201 = arith.constant 0.000000e+00 : f32
    %560 = vector.broadcast %cst_201 : f32 to vector<32x64xf32>
    %561 = vector.shape_cast %559 : vector<1x64xi1> to vector<1x64xi1>
    %562 = vector.broadcast %561 : vector<1x64xi1> to vector<32x64xi1>
    %563 = arith.select %562, %540, %560 : vector<32x64xi1>, vector<32x64xf32>
    %cst_202 = arith.constant 2.000000e+00 : f32
    %564 = vector.broadcast %cst_202 : f32 to vector<32x64xf32>
    %565 = arith.mulf %564, %537 : vector<32x64xf32>
    %566 = arith.addf %563, %565 : vector<32x64xf32>
    %567 = vector.extract_strided_slice %537 {offsets = [0, 8], sizes = [32, 56], strides = [1, 1]} : vector<32x64xf32> to vector<32x56xf32>
    %568 = vector.extract_strided_slice %537 {offsets = [0, 0], sizes = [32, 8], strides = [1, 1]} : vector<32x64xf32> to vector<32x8xf32>
    %569 = tpu.concatenate %567, %568 in 1 : vector<32x56xf32>, vector<32x8xf32> -> vector<32x64xf32>
    %c1_i32_203 = arith.constant 1 : i32
    %570 = vector.broadcast %c1_i32_203 : i32 to vector<1x64xi32>
    %571 = arith.addi %304, %570 : vector<1x64xi32>
    %c0_i32_204 = arith.constant 0 : i32
    %572 = vector.broadcast %c0_i32_204 : i32 to vector<1x64xi32>
    %573 = arith.cmpi sge, %571, %572 : vector<1x64xi32>
    %c1_i32_205 = arith.constant 1 : i32
    %574 = vector.broadcast %c1_i32_205 : i32 to vector<1x64xi32>
    %575 = arith.addi %304, %574 : vector<1x64xi32>
    %c8_i32_206 = arith.constant 8 : i32
    %576 = vector.broadcast %c8_i32_206 : i32 to vector<1x64xi32>
    %577 = arith.cmpi slt, %575, %576 : vector<1x64xi32>
    %578 = arith.andi %573, %577 : vector<1x64xi1>
    %c0_i32_207 = arith.constant 0 : i32
    %579 = vector.broadcast %c0_i32_207 : i32 to vector<1x64xi32>
    %580 = arith.addi %302, %579 : vector<1x64xi32>
    %c0_i32_208 = arith.constant 0 : i32
    %581 = vector.broadcast %c0_i32_208 : i32 to vector<1x64xi32>
    %582 = arith.cmpi sge, %580, %581 : vector<1x64xi32>
    %583 = arith.andi %578, %582 : vector<1x64xi1>
    %c0_i32_209 = arith.constant 0 : i32
    %584 = vector.broadcast %c0_i32_209 : i32 to vector<1x64xi32>
    %585 = arith.addi %302, %584 : vector<1x64xi32>
    %c8_i32_210 = arith.constant 8 : i32
    %586 = vector.broadcast %c8_i32_210 : i32 to vector<1x64xi32>
    %587 = arith.cmpi slt, %585, %586 : vector<1x64xi32>
    %588 = arith.andi %583, %587 : vector<1x64xi1>
    %cst_211 = arith.constant 0.000000e+00 : f32
    %589 = vector.broadcast %cst_211 : f32 to vector<32x64xf32>
    %590 = vector.shape_cast %588 : vector<1x64xi1> to vector<1x64xi1>
    %591 = vector.broadcast %590 : vector<1x64xi1> to vector<32x64xi1>
    %592 = arith.select %591, %569, %589 : vector<32x64xi1>, vector<32x64xf32>
    %593 = arith.addf %566, %592 : vector<32x64xf32>
    %594 = vector.extract_strided_slice %593 {offsets = [0, 63], sizes = [32, 1], strides = [1, 1]} : vector<32x64xf32> to vector<32x1xf32>
    %595 = vector.extract_strided_slice %593 {offsets = [0, 0], sizes = [32, 63], strides = [1, 1]} : vector<32x64xf32> to vector<32x63xf32>
    %596 = tpu.concatenate %594, %595 in 1 : vector<32x1xf32>, vector<32x63xf32> -> vector<32x64xf32>
    %c0_i32_212 = arith.constant 0 : i32
    %597 = vector.broadcast %c0_i32_212 : i32 to vector<1x64xi32>
    %598 = arith.addi %304, %597 : vector<1x64xi32>
    %c0_i32_213 = arith.constant 0 : i32
    %599 = vector.broadcast %c0_i32_213 : i32 to vector<1x64xi32>
    %600 = arith.cmpi sge, %598, %599 : vector<1x64xi32>
    %c0_i32_214 = arith.constant 0 : i32
    %601 = vector.broadcast %c0_i32_214 : i32 to vector<1x64xi32>
    %602 = arith.addi %304, %601 : vector<1x64xi32>
    %c8_i32_215 = arith.constant 8 : i32
    %603 = vector.broadcast %c8_i32_215 : i32 to vector<1x64xi32>
    %604 = arith.cmpi slt, %602, %603 : vector<1x64xi32>
    %605 = arith.andi %600, %604 : vector<1x64xi1>
    %c-1_i32_216 = arith.constant -1 : i32
    %606 = vector.broadcast %c-1_i32_216 : i32 to vector<1x64xi32>
    %607 = arith.addi %302, %606 : vector<1x64xi32>
    %c0_i32_217 = arith.constant 0 : i32
    %608 = vector.broadcast %c0_i32_217 : i32 to vector<1x64xi32>
    %609 = arith.cmpi sge, %607, %608 : vector<1x64xi32>
    %610 = arith.andi %605, %609 : vector<1x64xi1>
    %c-1_i32_218 = arith.constant -1 : i32
    %611 = vector.broadcast %c-1_i32_218 : i32 to vector<1x64xi32>
    %612 = arith.addi %302, %611 : vector<1x64xi32>
    %c8_i32_219 = arith.constant 8 : i32
    %613 = vector.broadcast %c8_i32_219 : i32 to vector<1x64xi32>
    %614 = arith.cmpi slt, %612, %613 : vector<1x64xi32>
    %615 = arith.andi %610, %614 : vector<1x64xi1>
    %cst_220 = arith.constant 0.000000e+00 : f32
    %616 = vector.broadcast %cst_220 : f32 to vector<32x64xf32>
    %617 = vector.shape_cast %615 : vector<1x64xi1> to vector<1x64xi1>
    %618 = vector.broadcast %617 : vector<1x64xi1> to vector<32x64xi1>
    %619 = arith.select %618, %596, %616 : vector<32x64xi1>, vector<32x64xf32>
    %cst_221 = arith.constant 2.000000e+00 : f32
    %620 = vector.broadcast %cst_221 : f32 to vector<32x64xf32>
    %621 = arith.mulf %620, %593 : vector<32x64xf32>
    %622 = arith.addf %619, %621 : vector<32x64xf32>
    %623 = vector.extract_strided_slice %593 {offsets = [0, 1], sizes = [32, 63], strides = [1, 1]} : vector<32x64xf32> to vector<32x63xf32>
    %624 = vector.extract_strided_slice %593 {offsets = [0, 0], sizes = [32, 1], strides = [1, 1]} : vector<32x64xf32> to vector<32x1xf32>
    %625 = tpu.concatenate %623, %624 in 1 : vector<32x63xf32>, vector<32x1xf32> -> vector<32x64xf32>
    %c0_i32_222 = arith.constant 0 : i32
    %626 = vector.broadcast %c0_i32_222 : i32 to vector<1x64xi32>
    %627 = arith.addi %304, %626 : vector<1x64xi32>
    %c0_i32_223 = arith.constant 0 : i32
    %628 = vector.broadcast %c0_i32_223 : i32 to vector<1x64xi32>
    %629 = arith.cmpi sge, %627, %628 : vector<1x64xi32>
    %c0_i32_224 = arith.constant 0 : i32
    %630 = vector.broadcast %c0_i32_224 : i32 to vector<1x64xi32>
    %631 = arith.addi %304, %630 : vector<1x64xi32>
    %c8_i32_225 = arith.constant 8 : i32
    %632 = vector.broadcast %c8_i32_225 : i32 to vector<1x64xi32>
    %633 = arith.cmpi slt, %631, %632 : vector<1x64xi32>
    %634 = arith.andi %629, %633 : vector<1x64xi1>
    %c1_i32_226 = arith.constant 1 : i32
    %635 = vector.broadcast %c1_i32_226 : i32 to vector<1x64xi32>
    %636 = arith.addi %302, %635 : vector<1x64xi32>
    %c0_i32_227 = arith.constant 0 : i32
    %637 = vector.broadcast %c0_i32_227 : i32 to vector<1x64xi32>
    %638 = arith.cmpi sge, %636, %637 : vector<1x64xi32>
    %639 = arith.andi %634, %638 : vector<1x64xi1>
    %c1_i32_228 = arith.constant 1 : i32
    %640 = vector.broadcast %c1_i32_228 : i32 to vector<1x64xi32>
    %641 = arith.addi %302, %640 : vector<1x64xi32>
    %c8_i32_229 = arith.constant 8 : i32
    %642 = vector.broadcast %c8_i32_229 : i32 to vector<1x64xi32>
    %643 = arith.cmpi slt, %641, %642 : vector<1x64xi32>
    %644 = arith.andi %639, %643 : vector<1x64xi1>
    %cst_230 = arith.constant 0.000000e+00 : f32
    %645 = vector.broadcast %cst_230 : f32 to vector<32x64xf32>
    %646 = vector.shape_cast %644 : vector<1x64xi1> to vector<1x64xi1>
    %647 = vector.broadcast %646 : vector<1x64xi1> to vector<32x64xi1>
    %648 = arith.select %647, %625, %645 : vector<32x64xi1>, vector<32x64xf32>
    %649 = arith.addf %622, %648 : vector<32x64xf32>
    %cst_231 = arith.constant 6.250000e-02 : f32
    %650 = vector.broadcast %cst_231 : f32 to vector<32x64xf32>
    %651 = arith.mulf %649, %650 : vector<32x64xf32>
    %c0_232 = arith.constant 0 : index
    %c0_233 = arith.constant 0 : index
    %652 = vector.load %arg19[%c0_232, %c0_233] : memref<32x1xf32, #tpu.memory_space<vmem>>, vector<32x1xf32>
    %653 = vector.broadcast %652 : vector<32x1xf32> to vector<32x64xf32>
    %654 = vector.broadcast %306 : vector<1x64xf32> to vector<32x64xf32>
    %655 = arith.mulf %653, %654 : vector<32x64xf32>
    %656 = arith.addf %651, %655 : vector<32x64xf32>
    %cst_234 = arith.constant 2.000000e-01 : f32
    %657 = vector.broadcast %cst_234 : f32 to vector<32x64xf32>
    %658 = arith.mulf %657, %656 : vector<32x64xf32>
    %659 = arith.maximumf %656, %658 : vector<32x64xf32>
    %cst_235 = arith.constant dense<0.000000e+00> : vector<32xf32>
    %660 = vector.multi_reduction <add>, %659, %cst_235 [1] : vector<32x64xf32> to vector<32xf32>
    %661 = vector.shape_cast %660 : vector<32xf32> to vector<32x1xf32>
    %cst_236 = arith.constant 6.400000e+01 : f32
    %662 = vector.broadcast %cst_236 : f32 to vector<32x1xf32>
    %663 = arith.divf %661, %662 : vector<32x1xf32>
    %664 = arith.mulf %659, %659 : vector<32x64xf32>
    %cst_237 = arith.constant dense<0.000000e+00> : vector<32xf32>
    %665 = vector.multi_reduction <add>, %664, %cst_237 [1] : vector<32x64xf32> to vector<32xf32>
    %666 = vector.shape_cast %665 : vector<32xf32> to vector<32x1xf32>
    %cst_238 = arith.constant 6.400000e+01 : f32
    %667 = vector.broadcast %cst_238 : f32 to vector<32x1xf32>
    %668 = arith.divf %666, %667 : vector<32x1xf32>
    %669 = arith.mulf %663, %663 : vector<32x1xf32>
    %670 = arith.subf %668, %669 : vector<32x1xf32>
    %cst_239 = arith.constant 0.000000e+00 : f32
    %671 = vector.broadcast %cst_239 : f32 to vector<32x1xf32>
    %672 = arith.maximumf %670, %671 : vector<32x1xf32>
    %673 = vector.broadcast %663 : vector<32x1xf32> to vector<32x64xf32>
    %674 = arith.subf %659, %673 : vector<32x64xf32>
    %cst_240 = arith.constant 9.99999974E-6 : f32
    %675 = vector.broadcast %cst_240 : f32 to vector<32x1xf32>
    %676 = arith.addf %672, %675 : vector<32x1xf32>
    %677 = math.rsqrt %676 : vector<32x1xf32>
    %678 = vector.broadcast %677 : vector<32x1xf32> to vector<32x64xf32>
    %679 = arith.mulf %674, %678 : vector<32x64xf32>
    %680 = vector.broadcast %316 : vector<32x1xf32> to vector<32x64xf32>
    %681 = arith.mulf %680, %679 : vector<32x64xf32>
    %682 = vector.broadcast %317 : vector<32x1xf32> to vector<32x64xf32>
    %683 = arith.addf %681, %682 : vector<32x64xf32>
    %684 = arith.truncf %683 : vector<32x64xf32> to vector<32x64xbf16>
    %685 = vector.extract_strided_slice %684 {offsets = [0, 55], sizes = [32, 9], strides = [1, 1]} : vector<32x64xbf16> to vector<32x9xbf16>
    %686 = vector.extract_strided_slice %684 {offsets = [0, 0], sizes = [32, 55], strides = [1, 1]} : vector<32x64xbf16> to vector<32x55xbf16>
    %687 = tpu.concatenate %685, %686 in 1 : vector<32x9xbf16>, vector<32x55xbf16> -> vector<32x64xbf16>
    %c-1_i32_241 = arith.constant -1 : i32
    %688 = vector.broadcast %c-1_i32_241 : i32 to vector<1x64xi32>
    %689 = arith.addi %304, %688 : vector<1x64xi32>
    %c0_i32_242 = arith.constant 0 : i32
    %690 = vector.broadcast %c0_i32_242 : i32 to vector<1x64xi32>
    %691 = arith.cmpi sge, %689, %690 : vector<1x64xi32>
    %c-1_i32_243 = arith.constant -1 : i32
    %692 = vector.broadcast %c-1_i32_243 : i32 to vector<1x64xi32>
    %693 = arith.addi %304, %692 : vector<1x64xi32>
    %c8_i32_244 = arith.constant 8 : i32
    %694 = vector.broadcast %c8_i32_244 : i32 to vector<1x64xi32>
    %695 = arith.cmpi slt, %693, %694 : vector<1x64xi32>
    %696 = arith.andi %691, %695 : vector<1x64xi1>
    %c-1_i32_245 = arith.constant -1 : i32
    %697 = vector.broadcast %c-1_i32_245 : i32 to vector<1x64xi32>
    %698 = arith.addi %302, %697 : vector<1x64xi32>
    %c0_i32_246 = arith.constant 0 : i32
    %699 = vector.broadcast %c0_i32_246 : i32 to vector<1x64xi32>
    %700 = arith.cmpi sge, %698, %699 : vector<1x64xi32>
    %701 = arith.andi %696, %700 : vector<1x64xi1>
    %c-1_i32_247 = arith.constant -1 : i32
    %702 = vector.broadcast %c-1_i32_247 : i32 to vector<1x64xi32>
    %703 = arith.addi %302, %702 : vector<1x64xi32>
    %c8_i32_248 = arith.constant 8 : i32
    %704 = vector.broadcast %c8_i32_248 : i32 to vector<1x64xi32>
    %705 = arith.cmpi slt, %703, %704 : vector<1x64xi32>
    %706 = arith.andi %701, %705 : vector<1x64xi1>
    %cst_249 = arith.constant 0.000000e+00 : bf16
    %707 = vector.broadcast %cst_249 : bf16 to vector<32x64xbf16>
    %708 = vector.shape_cast %706 : vector<1x64xi1> to vector<1x64xi1>
    %709 = vector.broadcast %708 : vector<1x64xi1> to vector<32x64xi1>
    %710 = arith.select %709, %687, %707 : vector<32x64xi1>, vector<32x64xbf16>
    %711 = vector.extract_strided_slice %684 {offsets = [0, 56], sizes = [32, 8], strides = [1, 1]} : vector<32x64xbf16> to vector<32x8xbf16>
    %712 = vector.extract_strided_slice %684 {offsets = [0, 0], sizes = [32, 56], strides = [1, 1]} : vector<32x64xbf16> to vector<32x56xbf16>
    %713 = tpu.concatenate %711, %712 in 1 : vector<32x8xbf16>, vector<32x56xbf16> -> vector<32x64xbf16>
    %c-1_i32_250 = arith.constant -1 : i32
    %714 = vector.broadcast %c-1_i32_250 : i32 to vector<1x64xi32>
    %715 = arith.addi %304, %714 : vector<1x64xi32>
    %c0_i32_251 = arith.constant 0 : i32
    %716 = vector.broadcast %c0_i32_251 : i32 to vector<1x64xi32>
    %717 = arith.cmpi sge, %715, %716 : vector<1x64xi32>
    %c-1_i32_252 = arith.constant -1 : i32
    %718 = vector.broadcast %c-1_i32_252 : i32 to vector<1x64xi32>
    %719 = arith.addi %304, %718 : vector<1x64xi32>
    %c8_i32_253 = arith.constant 8 : i32
    %720 = vector.broadcast %c8_i32_253 : i32 to vector<1x64xi32>
    %721 = arith.cmpi slt, %719, %720 : vector<1x64xi32>
    %722 = arith.andi %717, %721 : vector<1x64xi1>
    %c0_i32_254 = arith.constant 0 : i32
    %723 = vector.broadcast %c0_i32_254 : i32 to vector<1x64xi32>
    %724 = arith.addi %302, %723 : vector<1x64xi32>
    %c0_i32_255 = arith.constant 0 : i32
    %725 = vector.broadcast %c0_i32_255 : i32 to vector<1x64xi32>
    %726 = arith.cmpi sge, %724, %725 : vector<1x64xi32>
    %727 = arith.andi %722, %726 : vector<1x64xi1>
    %c0_i32_256 = arith.constant 0 : i32
    %728 = vector.broadcast %c0_i32_256 : i32 to vector<1x64xi32>
    %729 = arith.addi %302, %728 : vector<1x64xi32>
    %c8_i32_257 = arith.constant 8 : i32
    %730 = vector.broadcast %c8_i32_257 : i32 to vector<1x64xi32>
    %731 = arith.cmpi slt, %729, %730 : vector<1x64xi32>
    %732 = arith.andi %727, %731 : vector<1x64xi1>
    %cst_258 = arith.constant 0.000000e+00 : bf16
    %733 = vector.broadcast %cst_258 : bf16 to vector<32x64xbf16>
    %734 = vector.shape_cast %732 : vector<1x64xi1> to vector<1x64xi1>
    %735 = vector.broadcast %734 : vector<1x64xi1> to vector<32x64xi1>
    %736 = arith.select %735, %713, %733 : vector<32x64xi1>, vector<32x64xbf16>
    %737 = vector.extract_strided_slice %684 {offsets = [0, 57], sizes = [32, 7], strides = [1, 1]} : vector<32x64xbf16> to vector<32x7xbf16>
    %738 = vector.extract_strided_slice %684 {offsets = [0, 0], sizes = [32, 57], strides = [1, 1]} : vector<32x64xbf16> to vector<32x57xbf16>
    %739 = tpu.concatenate %737, %738 in 1 : vector<32x7xbf16>, vector<32x57xbf16> -> vector<32x64xbf16>
    %c-1_i32_259 = arith.constant -1 : i32
    %740 = vector.broadcast %c-1_i32_259 : i32 to vector<1x64xi32>
    %741 = arith.addi %304, %740 : vector<1x64xi32>
    %c0_i32_260 = arith.constant 0 : i32
    %742 = vector.broadcast %c0_i32_260 : i32 to vector<1x64xi32>
    %743 = arith.cmpi sge, %741, %742 : vector<1x64xi32>
    %c-1_i32_261 = arith.constant -1 : i32
    %744 = vector.broadcast %c-1_i32_261 : i32 to vector<1x64xi32>
    %745 = arith.addi %304, %744 : vector<1x64xi32>
    %c8_i32_262 = arith.constant 8 : i32
    %746 = vector.broadcast %c8_i32_262 : i32 to vector<1x64xi32>
    %747 = arith.cmpi slt, %745, %746 : vector<1x64xi32>
    %748 = arith.andi %743, %747 : vector<1x64xi1>
    %c1_i32_263 = arith.constant 1 : i32
    %749 = vector.broadcast %c1_i32_263 : i32 to vector<1x64xi32>
    %750 = arith.addi %302, %749 : vector<1x64xi32>
    %c0_i32_264 = arith.constant 0 : i32
    %751 = vector.broadcast %c0_i32_264 : i32 to vector<1x64xi32>
    %752 = arith.cmpi sge, %750, %751 : vector<1x64xi32>
    %753 = arith.andi %748, %752 : vector<1x64xi1>
    %c1_i32_265 = arith.constant 1 : i32
    %754 = vector.broadcast %c1_i32_265 : i32 to vector<1x64xi32>
    %755 = arith.addi %302, %754 : vector<1x64xi32>
    %c8_i32_266 = arith.constant 8 : i32
    %756 = vector.broadcast %c8_i32_266 : i32 to vector<1x64xi32>
    %757 = arith.cmpi slt, %755, %756 : vector<1x64xi32>
    %758 = arith.andi %753, %757 : vector<1x64xi1>
    %cst_267 = arith.constant 0.000000e+00 : bf16
    %759 = vector.broadcast %cst_267 : bf16 to vector<32x64xbf16>
    %760 = vector.shape_cast %758 : vector<1x64xi1> to vector<1x64xi1>
    %761 = vector.broadcast %760 : vector<1x64xi1> to vector<32x64xi1>
    %762 = arith.select %761, %739, %759 : vector<32x64xi1>, vector<32x64xbf16>
    %763 = vector.extract_strided_slice %684 {offsets = [0, 63], sizes = [32, 1], strides = [1, 1]} : vector<32x64xbf16> to vector<32x1xbf16>
    %764 = vector.extract_strided_slice %684 {offsets = [0, 0], sizes = [32, 63], strides = [1, 1]} : vector<32x64xbf16> to vector<32x63xbf16>
    %765 = tpu.concatenate %763, %764 in 1 : vector<32x1xbf16>, vector<32x63xbf16> -> vector<32x64xbf16>
    %c0_i32_268 = arith.constant 0 : i32
    %766 = vector.broadcast %c0_i32_268 : i32 to vector<1x64xi32>
    %767 = arith.addi %304, %766 : vector<1x64xi32>
    %c0_i32_269 = arith.constant 0 : i32
    %768 = vector.broadcast %c0_i32_269 : i32 to vector<1x64xi32>
    %769 = arith.cmpi sge, %767, %768 : vector<1x64xi32>
    %c0_i32_270 = arith.constant 0 : i32
    %770 = vector.broadcast %c0_i32_270 : i32 to vector<1x64xi32>
    %771 = arith.addi %304, %770 : vector<1x64xi32>
    %c8_i32_271 = arith.constant 8 : i32
    %772 = vector.broadcast %c8_i32_271 : i32 to vector<1x64xi32>
    %773 = arith.cmpi slt, %771, %772 : vector<1x64xi32>
    %774 = arith.andi %769, %773 : vector<1x64xi1>
    %c-1_i32_272 = arith.constant -1 : i32
    %775 = vector.broadcast %c-1_i32_272 : i32 to vector<1x64xi32>
    %776 = arith.addi %302, %775 : vector<1x64xi32>
    %c0_i32_273 = arith.constant 0 : i32
    %777 = vector.broadcast %c0_i32_273 : i32 to vector<1x64xi32>
    %778 = arith.cmpi sge, %776, %777 : vector<1x64xi32>
    %779 = arith.andi %774, %778 : vector<1x64xi1>
    %c-1_i32_274 = arith.constant -1 : i32
    %780 = vector.broadcast %c-1_i32_274 : i32 to vector<1x64xi32>
    %781 = arith.addi %302, %780 : vector<1x64xi32>
    %c8_i32_275 = arith.constant 8 : i32
    %782 = vector.broadcast %c8_i32_275 : i32 to vector<1x64xi32>
    %783 = arith.cmpi slt, %781, %782 : vector<1x64xi32>
    %784 = arith.andi %779, %783 : vector<1x64xi1>
    %cst_276 = arith.constant 0.000000e+00 : bf16
    %785 = vector.broadcast %cst_276 : bf16 to vector<32x64xbf16>
    %786 = vector.shape_cast %784 : vector<1x64xi1> to vector<1x64xi1>
    %787 = vector.broadcast %786 : vector<1x64xi1> to vector<32x64xi1>
    %788 = arith.select %787, %765, %785 : vector<32x64xi1>, vector<32x64xbf16>
    %789 = vector.extract_strided_slice %684 {offsets = [0, 1], sizes = [32, 63], strides = [1, 1]} : vector<32x64xbf16> to vector<32x63xbf16>
    %790 = vector.extract_strided_slice %684 {offsets = [0, 0], sizes = [32, 1], strides = [1, 1]} : vector<32x64xbf16> to vector<32x1xbf16>
    %791 = tpu.concatenate %789, %790 in 1 : vector<32x63xbf16>, vector<32x1xbf16> -> vector<32x64xbf16>
    %c0_i32_277 = arith.constant 0 : i32
    %792 = vector.broadcast %c0_i32_277 : i32 to vector<1x64xi32>
    %793 = arith.addi %304, %792 : vector<1x64xi32>
    %c0_i32_278 = arith.constant 0 : i32
    %794 = vector.broadcast %c0_i32_278 : i32 to vector<1x64xi32>
    %795 = arith.cmpi sge, %793, %794 : vector<1x64xi32>
    %c0_i32_279 = arith.constant 0 : i32
    %796 = vector.broadcast %c0_i32_279 : i32 to vector<1x64xi32>
    %797 = arith.addi %304, %796 : vector<1x64xi32>
    %c8_i32_280 = arith.constant 8 : i32
    %798 = vector.broadcast %c8_i32_280 : i32 to vector<1x64xi32>
    %799 = arith.cmpi slt, %797, %798 : vector<1x64xi32>
    %800 = arith.andi %795, %799 : vector<1x64xi1>
    %c1_i32_281 = arith.constant 1 : i32
    %801 = vector.broadcast %c1_i32_281 : i32 to vector<1x64xi32>
    %802 = arith.addi %302, %801 : vector<1x64xi32>
    %c0_i32_282 = arith.constant 0 : i32
    %803 = vector.broadcast %c0_i32_282 : i32 to vector<1x64xi32>
    %804 = arith.cmpi sge, %802, %803 : vector<1x64xi32>
    %805 = arith.andi %800, %804 : vector<1x64xi1>
    %c1_i32_283 = arith.constant 1 : i32
    %806 = vector.broadcast %c1_i32_283 : i32 to vector<1x64xi32>
    %807 = arith.addi %302, %806 : vector<1x64xi32>
    %c8_i32_284 = arith.constant 8 : i32
    %808 = vector.broadcast %c8_i32_284 : i32 to vector<1x64xi32>
    %809 = arith.cmpi slt, %807, %808 : vector<1x64xi32>
    %810 = arith.andi %805, %809 : vector<1x64xi1>
    %cst_285 = arith.constant 0.000000e+00 : bf16
    %811 = vector.broadcast %cst_285 : bf16 to vector<32x64xbf16>
    %812 = vector.shape_cast %810 : vector<1x64xi1> to vector<1x64xi1>
    %813 = vector.broadcast %812 : vector<1x64xi1> to vector<32x64xi1>
    %814 = arith.select %813, %791, %811 : vector<32x64xi1>, vector<32x64xbf16>
    %815 = vector.extract_strided_slice %684 {offsets = [0, 7], sizes = [32, 57], strides = [1, 1]} : vector<32x64xbf16> to vector<32x57xbf16>
    %816 = vector.extract_strided_slice %684 {offsets = [0, 0], sizes = [32, 7], strides = [1, 1]} : vector<32x64xbf16> to vector<32x7xbf16>
    %817 = tpu.concatenate %815, %816 in 1 : vector<32x57xbf16>, vector<32x7xbf16> -> vector<32x64xbf16>
    %c1_i32_286 = arith.constant 1 : i32
    %818 = vector.broadcast %c1_i32_286 : i32 to vector<1x64xi32>
    %819 = arith.addi %304, %818 : vector<1x64xi32>
    %c0_i32_287 = arith.constant 0 : i32
    %820 = vector.broadcast %c0_i32_287 : i32 to vector<1x64xi32>
    %821 = arith.cmpi sge, %819, %820 : vector<1x64xi32>
    %c1_i32_288 = arith.constant 1 : i32
    %822 = vector.broadcast %c1_i32_288 : i32 to vector<1x64xi32>
    %823 = arith.addi %304, %822 : vector<1x64xi32>
    %c8_i32_289 = arith.constant 8 : i32
    %824 = vector.broadcast %c8_i32_289 : i32 to vector<1x64xi32>
    %825 = arith.cmpi slt, %823, %824 : vector<1x64xi32>
    %826 = arith.andi %821, %825 : vector<1x64xi1>
    %c-1_i32_290 = arith.constant -1 : i32
    %827 = vector.broadcast %c-1_i32_290 : i32 to vector<1x64xi32>
    %828 = arith.addi %302, %827 : vector<1x64xi32>
    %c0_i32_291 = arith.constant 0 : i32
    %829 = vector.broadcast %c0_i32_291 : i32 to vector<1x64xi32>
    %830 = arith.cmpi sge, %828, %829 : vector<1x64xi32>
    %831 = arith.andi %826, %830 : vector<1x64xi1>
    %c-1_i32_292 = arith.constant -1 : i32
    %832 = vector.broadcast %c-1_i32_292 : i32 to vector<1x64xi32>
    %833 = arith.addi %302, %832 : vector<1x64xi32>
    %c8_i32_293 = arith.constant 8 : i32
    %834 = vector.broadcast %c8_i32_293 : i32 to vector<1x64xi32>
    %835 = arith.cmpi slt, %833, %834 : vector<1x64xi32>
    %836 = arith.andi %831, %835 : vector<1x64xi1>
    %cst_294 = arith.constant 0.000000e+00 : bf16
    %837 = vector.broadcast %cst_294 : bf16 to vector<32x64xbf16>
    %838 = vector.shape_cast %836 : vector<1x64xi1> to vector<1x64xi1>
    %839 = vector.broadcast %838 : vector<1x64xi1> to vector<32x64xi1>
    %840 = arith.select %839, %817, %837 : vector<32x64xi1>, vector<32x64xbf16>
    %841 = vector.extract_strided_slice %684 {offsets = [0, 8], sizes = [32, 56], strides = [1, 1]} : vector<32x64xbf16> to vector<32x56xbf16>
    %842 = vector.extract_strided_slice %684 {offsets = [0, 0], sizes = [32, 8], strides = [1, 1]} : vector<32x64xbf16> to vector<32x8xbf16>
    %843 = tpu.concatenate %841, %842 in 1 : vector<32x56xbf16>, vector<32x8xbf16> -> vector<32x64xbf16>
    %c1_i32_295 = arith.constant 1 : i32
    %844 = vector.broadcast %c1_i32_295 : i32 to vector<1x64xi32>
    %845 = arith.addi %304, %844 : vector<1x64xi32>
    %c0_i32_296 = arith.constant 0 : i32
    %846 = vector.broadcast %c0_i32_296 : i32 to vector<1x64xi32>
    %847 = arith.cmpi sge, %845, %846 : vector<1x64xi32>
    %c1_i32_297 = arith.constant 1 : i32
    %848 = vector.broadcast %c1_i32_297 : i32 to vector<1x64xi32>
    %849 = arith.addi %304, %848 : vector<1x64xi32>
    %c8_i32_298 = arith.constant 8 : i32
    %850 = vector.broadcast %c8_i32_298 : i32 to vector<1x64xi32>
    %851 = arith.cmpi slt, %849, %850 : vector<1x64xi32>
    %852 = arith.andi %847, %851 : vector<1x64xi1>
    %c0_i32_299 = arith.constant 0 : i32
    %853 = vector.broadcast %c0_i32_299 : i32 to vector<1x64xi32>
    %854 = arith.addi %302, %853 : vector<1x64xi32>
    %c0_i32_300 = arith.constant 0 : i32
    %855 = vector.broadcast %c0_i32_300 : i32 to vector<1x64xi32>
    %856 = arith.cmpi sge, %854, %855 : vector<1x64xi32>
    %857 = arith.andi %852, %856 : vector<1x64xi1>
    %c0_i32_301 = arith.constant 0 : i32
    %858 = vector.broadcast %c0_i32_301 : i32 to vector<1x64xi32>
    %859 = arith.addi %302, %858 : vector<1x64xi32>
    %c8_i32_302 = arith.constant 8 : i32
    %860 = vector.broadcast %c8_i32_302 : i32 to vector<1x64xi32>
    %861 = arith.cmpi slt, %859, %860 : vector<1x64xi32>
    %862 = arith.andi %857, %861 : vector<1x64xi1>
    %cst_303 = arith.constant 0.000000e+00 : bf16
    %863 = vector.broadcast %cst_303 : bf16 to vector<32x64xbf16>
    %864 = vector.shape_cast %862 : vector<1x64xi1> to vector<1x64xi1>
    %865 = vector.broadcast %864 : vector<1x64xi1> to vector<32x64xi1>
    %866 = arith.select %865, %843, %863 : vector<32x64xi1>, vector<32x64xbf16>
    %867 = vector.extract_strided_slice %684 {offsets = [0, 9], sizes = [32, 55], strides = [1, 1]} : vector<32x64xbf16> to vector<32x55xbf16>
    %868 = vector.extract_strided_slice %684 {offsets = [0, 0], sizes = [32, 9], strides = [1, 1]} : vector<32x64xbf16> to vector<32x9xbf16>
    %869 = tpu.concatenate %867, %868 in 1 : vector<32x55xbf16>, vector<32x9xbf16> -> vector<32x64xbf16>
    %c1_i32_304 = arith.constant 1 : i32
    %870 = vector.broadcast %c1_i32_304 : i32 to vector<1x64xi32>
    %871 = arith.addi %304, %870 : vector<1x64xi32>
    %c0_i32_305 = arith.constant 0 : i32
    %872 = vector.broadcast %c0_i32_305 : i32 to vector<1x64xi32>
    %873 = arith.cmpi sge, %871, %872 : vector<1x64xi32>
    %c1_i32_306 = arith.constant 1 : i32
    %874 = vector.broadcast %c1_i32_306 : i32 to vector<1x64xi32>
    %875 = arith.addi %304, %874 : vector<1x64xi32>
    %c8_i32_307 = arith.constant 8 : i32
    %876 = vector.broadcast %c8_i32_307 : i32 to vector<1x64xi32>
    %877 = arith.cmpi slt, %875, %876 : vector<1x64xi32>
    %878 = arith.andi %873, %877 : vector<1x64xi1>
    %c1_i32_308 = arith.constant 1 : i32
    %879 = vector.broadcast %c1_i32_308 : i32 to vector<1x64xi32>
    %880 = arith.addi %302, %879 : vector<1x64xi32>
    %c0_i32_309 = arith.constant 0 : i32
    %881 = vector.broadcast %c0_i32_309 : i32 to vector<1x64xi32>
    %882 = arith.cmpi sge, %880, %881 : vector<1x64xi32>
    %883 = arith.andi %878, %882 : vector<1x64xi1>
    %c1_i32_310 = arith.constant 1 : i32
    %884 = vector.broadcast %c1_i32_310 : i32 to vector<1x64xi32>
    %885 = arith.addi %302, %884 : vector<1x64xi32>
    %c8_i32_311 = arith.constant 8 : i32
    %886 = vector.broadcast %c8_i32_311 : i32 to vector<1x64xi32>
    %887 = arith.cmpi slt, %885, %886 : vector<1x64xi32>
    %888 = arith.andi %883, %887 : vector<1x64xi1>
    %cst_312 = arith.constant 0.000000e+00 : bf16
    %889 = vector.broadcast %cst_312 : bf16 to vector<32x64xbf16>
    %890 = vector.shape_cast %888 : vector<1x64xi1> to vector<1x64xi1>
    %891 = vector.broadcast %890 : vector<1x64xi1> to vector<32x64xi1>
    %892 = arith.select %891, %869, %889 : vector<32x64xi1>, vector<32x64xbf16>
    %893 = tpu.concatenate %710, %736, %762, %788, %684, %814, %840, %866, %892 in 0 : vector<32x64xbf16>, vector<32x64xbf16>, vector<32x64xbf16>, vector<32x64xbf16>, vector<32x64xbf16>, vector<32x64xbf16>, vector<32x64xbf16>, vector<32x64xbf16>, vector<32x64xbf16> -> vector<288x64xbf16>
    %c0_313 = arith.constant 0 : index
    %c0_314 = arith.constant 0 : index
    %894 = vector.load %arg15[%c0_313, %c0_314] : memref<32x288xbf16, #tpu.memory_space<vmem>>, vector<32x288xbf16>
    %cst_315 = arith.constant dense<0.000000e+00> : vector<32x64xf32>
    %895 = tpu.matmul %894, %893, %cst_315 {dimension_numbers = #tpu.dot_dimension_numbers<[1], [0], [0], [1], [0, 0, 1, 1], [], []>} : vector<32x288xbf16>, vector<288x64xbf16>, vector<32x64xf32> -> vector<32x64xf32>
    %c0_316 = arith.constant 0 : index
    %c0_317 = arith.constant 0 : index
    %896 = vector.load %arg16[%c0_316, %c0_317] : memref<32x1xf32, #tpu.memory_space<vmem>>, vector<32x1xf32>
    %897 = vector.broadcast %896 : vector<32x1xf32> to vector<32x64xf32>
    %898 = arith.addf %895, %897 : vector<32x64xf32>
    %c0_318 = arith.constant 0 : index
    %c0_319 = arith.constant 0 : index
    %899 = vector.load %arg20[%c0_318, %c0_319] : memref<32x1xf32, #tpu.memory_space<vmem>>, vector<32x1xf32>
    %900 = vector.broadcast %899 : vector<32x1xf32> to vector<32x64xf32>
    %901 = vector.broadcast %306 : vector<1x64xf32> to vector<32x64xf32>
    %902 = arith.mulf %900, %901 : vector<32x64xf32>
    %903 = arith.addf %898, %902 : vector<32x64xf32>
    %cst_320 = arith.constant 2.000000e-01 : f32
    %904 = vector.broadcast %cst_320 : f32 to vector<32x64xf32>
    %905 = arith.mulf %904, %903 : vector<32x64xf32>
    %906 = arith.maximumf %903, %905 : vector<32x64xf32>
    %cst_321 = arith.constant dense<0.000000e+00> : vector<32xf32>
    %907 = vector.multi_reduction <add>, %906, %cst_321 [1] : vector<32x64xf32> to vector<32xf32>
    %908 = vector.shape_cast %907 : vector<32xf32> to vector<32x1xf32>
    %cst_322 = arith.constant 6.400000e+01 : f32
    %909 = vector.broadcast %cst_322 : f32 to vector<32x1xf32>
    %910 = arith.divf %908, %909 : vector<32x1xf32>
    %911 = arith.mulf %906, %906 : vector<32x64xf32>
    %cst_323 = arith.constant dense<0.000000e+00> : vector<32xf32>
    %912 = vector.multi_reduction <add>, %911, %cst_323 [1] : vector<32x64xf32> to vector<32xf32>
    %913 = vector.shape_cast %912 : vector<32xf32> to vector<32x1xf32>
    %cst_324 = arith.constant 6.400000e+01 : f32
    %914 = vector.broadcast %cst_324 : f32 to vector<32x1xf32>
    %915 = arith.divf %913, %914 : vector<32x1xf32>
    %916 = arith.mulf %910, %910 : vector<32x1xf32>
    %917 = arith.subf %915, %916 : vector<32x1xf32>
    %cst_325 = arith.constant 0.000000e+00 : f32
    %918 = vector.broadcast %cst_325 : f32 to vector<32x1xf32>
    %919 = arith.maximumf %917, %918 : vector<32x1xf32>
    %920 = vector.broadcast %910 : vector<32x1xf32> to vector<32x64xf32>
    %921 = arith.subf %906, %920 : vector<32x64xf32>
    %cst_326 = arith.constant 9.99999974E-6 : f32
    %922 = vector.broadcast %cst_326 : f32 to vector<32x1xf32>
    %923 = arith.addf %919, %922 : vector<32x1xf32>
    %924 = math.rsqrt %923 : vector<32x1xf32>
    %925 = vector.broadcast %924 : vector<32x1xf32> to vector<32x64xf32>
    %926 = arith.mulf %921, %925 : vector<32x64xf32>
    %927 = vector.broadcast %318 : vector<32x1xf32> to vector<32x64xf32>
    %928 = arith.mulf %927, %926 : vector<32x64xf32>
    %929 = vector.broadcast %319 : vector<32x1xf32> to vector<32x64xf32>
    %930 = arith.addf %928, %929 : vector<32x64xf32>
    %931 = tpu.iota {dimensions = array<i32: 1>} : vector<1x256xi32>
    %c15_i32 = arith.constant 15 : i32
    %932 = vector.broadcast %c15_i32 : i32 to vector<1x256xi32>
    %933 = arith.andi %931, %932 : vector<1x256xi32>
    %c4_i32_327 = arith.constant 4 : i32
    %934 = vector.broadcast %c4_i32_327 : i32 to vector<1x256xi32>
    %935 = arith.shrsi %931, %934 : vector<1x256xi32>
    %c0_328 = arith.constant 0 : index
    %c0_329 = arith.constant 0 : index
    %c0_330 = arith.constant 0 : index
    %936 = vector.load %arg22[%c0_328, %c0_329, %c0_330] : memref<1x1x256xf32, #tpu.memory_space<vmem>>, vector<1x1x256xf32>
    %937 = vector.shape_cast %936 : vector<1x1x256xf32> to vector<1x256xf32>
    %c0_331 = arith.constant 0 : index
    %c0_332 = arith.constant 0 : index
    %c0_333 = arith.constant 0 : index
    %938 = vector.load %arg21[%c0_331, %c0_332, %c0_333] : memref<1x1x32xf32, #tpu.memory_space<vmem>>, vector<1x1x32xf32>
    %939 = vector.shape_cast %938 : vector<1x1x32xf32> to vector<1x32xf32>
    %c0_334 = arith.constant 0 : index
    %c0_335 = arith.constant 0 : index
    %940 = vector.load %arg28[%c0_334, %c0_335] : memref<64x32xf32, #tpu.memory_space<vmem>>, vector<64x32xf32>
    %941 = vector.broadcast %939 : vector<1x32xf32> to vector<64x32xf32>
    %942 = arith.mulf %940, %941 : vector<64x32xf32>
    %cst_336 = arith.constant dense<0.000000e+00> : vector<64xf32>
    %943 = vector.multi_reduction <add>, %942, %cst_336 [1] : vector<64x32xf32> to vector<64xf32>
    %944 = vector.shape_cast %943 : vector<64xf32> to vector<64x1xf32>
    %c0_337 = arith.constant 0 : index
    %c0_338 = arith.constant 0 : index
    %945 = vector.load %arg29[%c0_337, %c0_338] : memref<64x1xf32, #tpu.memory_space<vmem>>, vector<64x1xf32>
    %946 = arith.addf %944, %945 : vector<64x1xf32>
    %947 = vector.extract_strided_slice %946 {offsets = [0, 0], sizes = [16, 1], strides = [1, 1]} : vector<64x1xf32> to vector<16x1xf32>
    %948 = vector.extract_strided_slice %946 {offsets = [16, 0], sizes = [16, 1], strides = [1, 1]} : vector<64x1xf32> to vector<16x1xf32>
    %949 = vector.extract_strided_slice %946 {offsets = [32, 0], sizes = [16, 1], strides = [1, 1]} : vector<64x1xf32> to vector<16x1xf32>
    %950 = vector.extract_strided_slice %946 {offsets = [48, 0], sizes = [16, 1], strides = [1, 1]} : vector<64x1xf32> to vector<16x1xf32>
    %951 = arith.truncf %930 : vector<32x64xf32> to vector<32x64xbf16>
    %c0_339 = arith.constant 0 : index
    %c0_340 = arith.constant 0 : index
    %952 = vector.load %arg25[%c0_339, %c0_340] : memref<64x256xbf16, #tpu.memory_space<vmem>>, vector<64x256xbf16>
    %cst_341 = arith.constant dense<0.000000e+00> : vector<32x256xf32>
    %953 = tpu.matmul %951, %952, %cst_341 {dimension_numbers = #tpu.dot_dimension_numbers<[1], [0], [0], [1], [0, 0, 1, 1], [], []>} : vector<32x64xbf16>, vector<64x256xbf16>, vector<32x256xf32> -> vector<32x256xf32>
    %954 = arith.truncf %953 : vector<32x256xf32> to vector<32x256xbf16>
    %955 = vector.extract_strided_slice %954 {offsets = [0, 239], sizes = [32, 17], strides = [1, 1]} : vector<32x256xbf16> to vector<32x17xbf16>
    %956 = vector.extract_strided_slice %954 {offsets = [0, 0], sizes = [32, 239], strides = [1, 1]} : vector<32x256xbf16> to vector<32x239xbf16>
    %957 = tpu.concatenate %955, %956 in 1 : vector<32x17xbf16>, vector<32x239xbf16> -> vector<32x256xbf16>
    %c-1_i32_342 = arith.constant -1 : i32
    %958 = vector.broadcast %c-1_i32_342 : i32 to vector<1x256xi32>
    %959 = arith.addi %935, %958 : vector<1x256xi32>
    %c0_i32_343 = arith.constant 0 : i32
    %960 = vector.broadcast %c0_i32_343 : i32 to vector<1x256xi32>
    %961 = arith.cmpi sge, %959, %960 : vector<1x256xi32>
    %c-1_i32_344 = arith.constant -1 : i32
    %962 = vector.broadcast %c-1_i32_344 : i32 to vector<1x256xi32>
    %963 = arith.addi %935, %962 : vector<1x256xi32>
    %c16_i32 = arith.constant 16 : i32
    %964 = vector.broadcast %c16_i32 : i32 to vector<1x256xi32>
    %965 = arith.cmpi slt, %963, %964 : vector<1x256xi32>
    %966 = arith.andi %961, %965 : vector<1x256xi1>
    %c-1_i32_345 = arith.constant -1 : i32
    %967 = vector.broadcast %c-1_i32_345 : i32 to vector<1x256xi32>
    %968 = arith.addi %933, %967 : vector<1x256xi32>
    %c0_i32_346 = arith.constant 0 : i32
    %969 = vector.broadcast %c0_i32_346 : i32 to vector<1x256xi32>
    %970 = arith.cmpi sge, %968, %969 : vector<1x256xi32>
    %971 = arith.andi %966, %970 : vector<1x256xi1>
    %c-1_i32_347 = arith.constant -1 : i32
    %972 = vector.broadcast %c-1_i32_347 : i32 to vector<1x256xi32>
    %973 = arith.addi %933, %972 : vector<1x256xi32>
    %c16_i32_348 = arith.constant 16 : i32
    %974 = vector.broadcast %c16_i32_348 : i32 to vector<1x256xi32>
    %975 = arith.cmpi slt, %973, %974 : vector<1x256xi32>
    %976 = arith.andi %971, %975 : vector<1x256xi1>
    %cst_349 = arith.constant 0.000000e+00 : bf16
    %977 = vector.broadcast %cst_349 : bf16 to vector<32x256xbf16>
    %978 = vector.shape_cast %976 : vector<1x256xi1> to vector<1x256xi1>
    %979 = vector.broadcast %978 : vector<1x256xi1> to vector<32x256xi1>
    %980 = arith.select %979, %957, %977 : vector<32x256xi1>, vector<32x256xbf16>
    %981 = vector.extract_strided_slice %954 {offsets = [0, 240], sizes = [32, 16], strides = [1, 1]} : vector<32x256xbf16> to vector<32x16xbf16>
    %982 = vector.extract_strided_slice %954 {offsets = [0, 0], sizes = [32, 240], strides = [1, 1]} : vector<32x256xbf16> to vector<32x240xbf16>
    %983 = tpu.concatenate %981, %982 in 1 : vector<32x16xbf16>, vector<32x240xbf16> -> vector<32x256xbf16>
    %c-1_i32_350 = arith.constant -1 : i32
    %984 = vector.broadcast %c-1_i32_350 : i32 to vector<1x256xi32>
    %985 = arith.addi %935, %984 : vector<1x256xi32>
    %c0_i32_351 = arith.constant 0 : i32
    %986 = vector.broadcast %c0_i32_351 : i32 to vector<1x256xi32>
    %987 = arith.cmpi sge, %985, %986 : vector<1x256xi32>
    %c-1_i32_352 = arith.constant -1 : i32
    %988 = vector.broadcast %c-1_i32_352 : i32 to vector<1x256xi32>
    %989 = arith.addi %935, %988 : vector<1x256xi32>
    %c16_i32_353 = arith.constant 16 : i32
    %990 = vector.broadcast %c16_i32_353 : i32 to vector<1x256xi32>
    %991 = arith.cmpi slt, %989, %990 : vector<1x256xi32>
    %992 = arith.andi %987, %991 : vector<1x256xi1>
    %c0_i32_354 = arith.constant 0 : i32
    %993 = vector.broadcast %c0_i32_354 : i32 to vector<1x256xi32>
    %994 = arith.addi %933, %993 : vector<1x256xi32>
    %c0_i32_355 = arith.constant 0 : i32
    %995 = vector.broadcast %c0_i32_355 : i32 to vector<1x256xi32>
    %996 = arith.cmpi sge, %994, %995 : vector<1x256xi32>
    %997 = arith.andi %992, %996 : vector<1x256xi1>
    %c0_i32_356 = arith.constant 0 : i32
    %998 = vector.broadcast %c0_i32_356 : i32 to vector<1x256xi32>
    %999 = arith.addi %933, %998 : vector<1x256xi32>
    %c16_i32_357 = arith.constant 16 : i32
    %1000 = vector.broadcast %c16_i32_357 : i32 to vector<1x256xi32>
    %1001 = arith.cmpi slt, %999, %1000 : vector<1x256xi32>
    %1002 = arith.andi %997, %1001 : vector<1x256xi1>
    %cst_358 = arith.constant 0.000000e+00 : bf16
    %1003 = vector.broadcast %cst_358 : bf16 to vector<32x256xbf16>
    %1004 = vector.shape_cast %1002 : vector<1x256xi1> to vector<1x256xi1>
    %1005 = vector.broadcast %1004 : vector<1x256xi1> to vector<32x256xi1>
    %1006 = arith.select %1005, %983, %1003 : vector<32x256xi1>, vector<32x256xbf16>
    %1007 = vector.extract_strided_slice %954 {offsets = [0, 241], sizes = [32, 15], strides = [1, 1]} : vector<32x256xbf16> to vector<32x15xbf16>
    %1008 = vector.extract_strided_slice %954 {offsets = [0, 0], sizes = [32, 241], strides = [1, 1]} : vector<32x256xbf16> to vector<32x241xbf16>
    %1009 = tpu.concatenate %1007, %1008 in 1 : vector<32x15xbf16>, vector<32x241xbf16> -> vector<32x256xbf16>
    %c-1_i32_359 = arith.constant -1 : i32
    %1010 = vector.broadcast %c-1_i32_359 : i32 to vector<1x256xi32>
    %1011 = arith.addi %935, %1010 : vector<1x256xi32>
    %c0_i32_360 = arith.constant 0 : i32
    %1012 = vector.broadcast %c0_i32_360 : i32 to vector<1x256xi32>
    %1013 = arith.cmpi sge, %1011, %1012 : vector<1x256xi32>
    %c-1_i32_361 = arith.constant -1 : i32
    %1014 = vector.broadcast %c-1_i32_361 : i32 to vector<1x256xi32>
    %1015 = arith.addi %935, %1014 : vector<1x256xi32>
    %c16_i32_362 = arith.constant 16 : i32
    %1016 = vector.broadcast %c16_i32_362 : i32 to vector<1x256xi32>
    %1017 = arith.cmpi slt, %1015, %1016 : vector<1x256xi32>
    %1018 = arith.andi %1013, %1017 : vector<1x256xi1>
    %c1_i32_363 = arith.constant 1 : i32
    %1019 = vector.broadcast %c1_i32_363 : i32 to vector<1x256xi32>
    %1020 = arith.addi %933, %1019 : vector<1x256xi32>
    %c0_i32_364 = arith.constant 0 : i32
    %1021 = vector.broadcast %c0_i32_364 : i32 to vector<1x256xi32>
    %1022 = arith.cmpi sge, %1020, %1021 : vector<1x256xi32>
    %1023 = arith.andi %1018, %1022 : vector<1x256xi1>
    %c1_i32_365 = arith.constant 1 : i32
    %1024 = vector.broadcast %c1_i32_365 : i32 to vector<1x256xi32>
    %1025 = arith.addi %933, %1024 : vector<1x256xi32>
    %c16_i32_366 = arith.constant 16 : i32
    %1026 = vector.broadcast %c16_i32_366 : i32 to vector<1x256xi32>
    %1027 = arith.cmpi slt, %1025, %1026 : vector<1x256xi32>
    %1028 = arith.andi %1023, %1027 : vector<1x256xi1>
    %cst_367 = arith.constant 0.000000e+00 : bf16
    %1029 = vector.broadcast %cst_367 : bf16 to vector<32x256xbf16>
    %1030 = vector.shape_cast %1028 : vector<1x256xi1> to vector<1x256xi1>
    %1031 = vector.broadcast %1030 : vector<1x256xi1> to vector<32x256xi1>
    %1032 = arith.select %1031, %1009, %1029 : vector<32x256xi1>, vector<32x256xbf16>
    %1033 = vector.extract_strided_slice %954 {offsets = [0, 255], sizes = [32, 1], strides = [1, 1]} : vector<32x256xbf16> to vector<32x1xbf16>
    %1034 = vector.extract_strided_slice %954 {offsets = [0, 0], sizes = [32, 255], strides = [1, 1]} : vector<32x256xbf16> to vector<32x255xbf16>
    %1035 = tpu.concatenate %1033, %1034 in 1 : vector<32x1xbf16>, vector<32x255xbf16> -> vector<32x256xbf16>
    %c0_i32_368 = arith.constant 0 : i32
    %1036 = vector.broadcast %c0_i32_368 : i32 to vector<1x256xi32>
    %1037 = arith.addi %935, %1036 : vector<1x256xi32>
    %c0_i32_369 = arith.constant 0 : i32
    %1038 = vector.broadcast %c0_i32_369 : i32 to vector<1x256xi32>
    %1039 = arith.cmpi sge, %1037, %1038 : vector<1x256xi32>
    %c0_i32_370 = arith.constant 0 : i32
    %1040 = vector.broadcast %c0_i32_370 : i32 to vector<1x256xi32>
    %1041 = arith.addi %935, %1040 : vector<1x256xi32>
    %c16_i32_371 = arith.constant 16 : i32
    %1042 = vector.broadcast %c16_i32_371 : i32 to vector<1x256xi32>
    %1043 = arith.cmpi slt, %1041, %1042 : vector<1x256xi32>
    %1044 = arith.andi %1039, %1043 : vector<1x256xi1>
    %c-1_i32_372 = arith.constant -1 : i32
    %1045 = vector.broadcast %c-1_i32_372 : i32 to vector<1x256xi32>
    %1046 = arith.addi %933, %1045 : vector<1x256xi32>
    %c0_i32_373 = arith.constant 0 : i32
    %1047 = vector.broadcast %c0_i32_373 : i32 to vector<1x256xi32>
    %1048 = arith.cmpi sge, %1046, %1047 : vector<1x256xi32>
    %1049 = arith.andi %1044, %1048 : vector<1x256xi1>
    %c-1_i32_374 = arith.constant -1 : i32
    %1050 = vector.broadcast %c-1_i32_374 : i32 to vector<1x256xi32>
    %1051 = arith.addi %933, %1050 : vector<1x256xi32>
    %c16_i32_375 = arith.constant 16 : i32
    %1052 = vector.broadcast %c16_i32_375 : i32 to vector<1x256xi32>
    %1053 = arith.cmpi slt, %1051, %1052 : vector<1x256xi32>
    %1054 = arith.andi %1049, %1053 : vector<1x256xi1>
    %cst_376 = arith.constant 0.000000e+00 : bf16
    %1055 = vector.broadcast %cst_376 : bf16 to vector<32x256xbf16>
    %1056 = vector.shape_cast %1054 : vector<1x256xi1> to vector<1x256xi1>
    %1057 = vector.broadcast %1056 : vector<1x256xi1> to vector<32x256xi1>
    %1058 = arith.select %1057, %1035, %1055 : vector<32x256xi1>, vector<32x256xbf16>
    %1059 = vector.extract_strided_slice %954 {offsets = [0, 1], sizes = [32, 255], strides = [1, 1]} : vector<32x256xbf16> to vector<32x255xbf16>
    %1060 = vector.extract_strided_slice %954 {offsets = [0, 0], sizes = [32, 1], strides = [1, 1]} : vector<32x256xbf16> to vector<32x1xbf16>
    %1061 = tpu.concatenate %1059, %1060 in 1 : vector<32x255xbf16>, vector<32x1xbf16> -> vector<32x256xbf16>
    %c0_i32_377 = arith.constant 0 : i32
    %1062 = vector.broadcast %c0_i32_377 : i32 to vector<1x256xi32>
    %1063 = arith.addi %935, %1062 : vector<1x256xi32>
    %c0_i32_378 = arith.constant 0 : i32
    %1064 = vector.broadcast %c0_i32_378 : i32 to vector<1x256xi32>
    %1065 = arith.cmpi sge, %1063, %1064 : vector<1x256xi32>
    %c0_i32_379 = arith.constant 0 : i32
    %1066 = vector.broadcast %c0_i32_379 : i32 to vector<1x256xi32>
    %1067 = arith.addi %935, %1066 : vector<1x256xi32>
    %c16_i32_380 = arith.constant 16 : i32
    %1068 = vector.broadcast %c16_i32_380 : i32 to vector<1x256xi32>
    %1069 = arith.cmpi slt, %1067, %1068 : vector<1x256xi32>
    %1070 = arith.andi %1065, %1069 : vector<1x256xi1>
    %c1_i32_381 = arith.constant 1 : i32
    %1071 = vector.broadcast %c1_i32_381 : i32 to vector<1x256xi32>
    %1072 = arith.addi %933, %1071 : vector<1x256xi32>
    %c0_i32_382 = arith.constant 0 : i32
    %1073 = vector.broadcast %c0_i32_382 : i32 to vector<1x256xi32>
    %1074 = arith.cmpi sge, %1072, %1073 : vector<1x256xi32>
    %1075 = arith.andi %1070, %1074 : vector<1x256xi1>
    %c1_i32_383 = arith.constant 1 : i32
    %1076 = vector.broadcast %c1_i32_383 : i32 to vector<1x256xi32>
    %1077 = arith.addi %933, %1076 : vector<1x256xi32>
    %c16_i32_384 = arith.constant 16 : i32
    %1078 = vector.broadcast %c16_i32_384 : i32 to vector<1x256xi32>
    %1079 = arith.cmpi slt, %1077, %1078 : vector<1x256xi32>
    %1080 = arith.andi %1075, %1079 : vector<1x256xi1>
    %cst_385 = arith.constant 0.000000e+00 : bf16
    %1081 = vector.broadcast %cst_385 : bf16 to vector<32x256xbf16>
    %1082 = vector.shape_cast %1080 : vector<1x256xi1> to vector<1x256xi1>
    %1083 = vector.broadcast %1082 : vector<1x256xi1> to vector<32x256xi1>
    %1084 = arith.select %1083, %1061, %1081 : vector<32x256xi1>, vector<32x256xbf16>
    %1085 = vector.extract_strided_slice %954 {offsets = [0, 15], sizes = [32, 241], strides = [1, 1]} : vector<32x256xbf16> to vector<32x241xbf16>
    %1086 = vector.extract_strided_slice %954 {offsets = [0, 0], sizes = [32, 15], strides = [1, 1]} : vector<32x256xbf16> to vector<32x15xbf16>
    %1087 = tpu.concatenate %1085, %1086 in 1 : vector<32x241xbf16>, vector<32x15xbf16> -> vector<32x256xbf16>
    %c1_i32_386 = arith.constant 1 : i32
    %1088 = vector.broadcast %c1_i32_386 : i32 to vector<1x256xi32>
    %1089 = arith.addi %935, %1088 : vector<1x256xi32>
    %c0_i32_387 = arith.constant 0 : i32
    %1090 = vector.broadcast %c0_i32_387 : i32 to vector<1x256xi32>
    %1091 = arith.cmpi sge, %1089, %1090 : vector<1x256xi32>
    %c1_i32_388 = arith.constant 1 : i32
    %1092 = vector.broadcast %c1_i32_388 : i32 to vector<1x256xi32>
    %1093 = arith.addi %935, %1092 : vector<1x256xi32>
    %c16_i32_389 = arith.constant 16 : i32
    %1094 = vector.broadcast %c16_i32_389 : i32 to vector<1x256xi32>
    %1095 = arith.cmpi slt, %1093, %1094 : vector<1x256xi32>
    %1096 = arith.andi %1091, %1095 : vector<1x256xi1>
    %c-1_i32_390 = arith.constant -1 : i32
    %1097 = vector.broadcast %c-1_i32_390 : i32 to vector<1x256xi32>
    %1098 = arith.addi %933, %1097 : vector<1x256xi32>
    %c0_i32_391 = arith.constant 0 : i32
    %1099 = vector.broadcast %c0_i32_391 : i32 to vector<1x256xi32>
    %1100 = arith.cmpi sge, %1098, %1099 : vector<1x256xi32>
    %1101 = arith.andi %1096, %1100 : vector<1x256xi1>
    %c-1_i32_392 = arith.constant -1 : i32
    %1102 = vector.broadcast %c-1_i32_392 : i32 to vector<1x256xi32>
    %1103 = arith.addi %933, %1102 : vector<1x256xi32>
    %c16_i32_393 = arith.constant 16 : i32
    %1104 = vector.broadcast %c16_i32_393 : i32 to vector<1x256xi32>
    %1105 = arith.cmpi slt, %1103, %1104 : vector<1x256xi32>
    %1106 = arith.andi %1101, %1105 : vector<1x256xi1>
    %cst_394 = arith.constant 0.000000e+00 : bf16
    %1107 = vector.broadcast %cst_394 : bf16 to vector<32x256xbf16>
    %1108 = vector.shape_cast %1106 : vector<1x256xi1> to vector<1x256xi1>
    %1109 = vector.broadcast %1108 : vector<1x256xi1> to vector<32x256xi1>
    %1110 = arith.select %1109, %1087, %1107 : vector<32x256xi1>, vector<32x256xbf16>
    %1111 = vector.extract_strided_slice %954 {offsets = [0, 16], sizes = [32, 240], strides = [1, 1]} : vector<32x256xbf16> to vector<32x240xbf16>
    %1112 = vector.extract_strided_slice %954 {offsets = [0, 0], sizes = [32, 16], strides = [1, 1]} : vector<32x256xbf16> to vector<32x16xbf16>
    %1113 = tpu.concatenate %1111, %1112 in 1 : vector<32x240xbf16>, vector<32x16xbf16> -> vector<32x256xbf16>
    %c1_i32_395 = arith.constant 1 : i32
    %1114 = vector.broadcast %c1_i32_395 : i32 to vector<1x256xi32>
    %1115 = arith.addi %935, %1114 : vector<1x256xi32>
    %c0_i32_396 = arith.constant 0 : i32
    %1116 = vector.broadcast %c0_i32_396 : i32 to vector<1x256xi32>
    %1117 = arith.cmpi sge, %1115, %1116 : vector<1x256xi32>
    %c1_i32_397 = arith.constant 1 : i32
    %1118 = vector.broadcast %c1_i32_397 : i32 to vector<1x256xi32>
    %1119 = arith.addi %935, %1118 : vector<1x256xi32>
    %c16_i32_398 = arith.constant 16 : i32
    %1120 = vector.broadcast %c16_i32_398 : i32 to vector<1x256xi32>
    %1121 = arith.cmpi slt, %1119, %1120 : vector<1x256xi32>
    %1122 = arith.andi %1117, %1121 : vector<1x256xi1>
    %c0_i32_399 = arith.constant 0 : i32
    %1123 = vector.broadcast %c0_i32_399 : i32 to vector<1x256xi32>
    %1124 = arith.addi %933, %1123 : vector<1x256xi32>
    %c0_i32_400 = arith.constant 0 : i32
    %1125 = vector.broadcast %c0_i32_400 : i32 to vector<1x256xi32>
    %1126 = arith.cmpi sge, %1124, %1125 : vector<1x256xi32>
    %1127 = arith.andi %1122, %1126 : vector<1x256xi1>
    %c0_i32_401 = arith.constant 0 : i32
    %1128 = vector.broadcast %c0_i32_401 : i32 to vector<1x256xi32>
    %1129 = arith.addi %933, %1128 : vector<1x256xi32>
    %c16_i32_402 = arith.constant 16 : i32
    %1130 = vector.broadcast %c16_i32_402 : i32 to vector<1x256xi32>
    %1131 = arith.cmpi slt, %1129, %1130 : vector<1x256xi32>
    %1132 = arith.andi %1127, %1131 : vector<1x256xi1>
    %cst_403 = arith.constant 0.000000e+00 : bf16
    %1133 = vector.broadcast %cst_403 : bf16 to vector<32x256xbf16>
    %1134 = vector.shape_cast %1132 : vector<1x256xi1> to vector<1x256xi1>
    %1135 = vector.broadcast %1134 : vector<1x256xi1> to vector<32x256xi1>
    %1136 = arith.select %1135, %1113, %1133 : vector<32x256xi1>, vector<32x256xbf16>
    %1137 = vector.extract_strided_slice %954 {offsets = [0, 17], sizes = [32, 239], strides = [1, 1]} : vector<32x256xbf16> to vector<32x239xbf16>
    %1138 = vector.extract_strided_slice %954 {offsets = [0, 0], sizes = [32, 17], strides = [1, 1]} : vector<32x256xbf16> to vector<32x17xbf16>
    %1139 = tpu.concatenate %1137, %1138 in 1 : vector<32x239xbf16>, vector<32x17xbf16> -> vector<32x256xbf16>
    %c1_i32_404 = arith.constant 1 : i32
    %1140 = vector.broadcast %c1_i32_404 : i32 to vector<1x256xi32>
    %1141 = arith.addi %935, %1140 : vector<1x256xi32>
    %c0_i32_405 = arith.constant 0 : i32
    %1142 = vector.broadcast %c0_i32_405 : i32 to vector<1x256xi32>
    %1143 = arith.cmpi sge, %1141, %1142 : vector<1x256xi32>
    %c1_i32_406 = arith.constant 1 : i32
    %1144 = vector.broadcast %c1_i32_406 : i32 to vector<1x256xi32>
    %1145 = arith.addi %935, %1144 : vector<1x256xi32>
    %c16_i32_407 = arith.constant 16 : i32
    %1146 = vector.broadcast %c16_i32_407 : i32 to vector<1x256xi32>
    %1147 = arith.cmpi slt, %1145, %1146 : vector<1x256xi32>
    %1148 = arith.andi %1143, %1147 : vector<1x256xi1>
    %c1_i32_408 = arith.constant 1 : i32
    %1149 = vector.broadcast %c1_i32_408 : i32 to vector<1x256xi32>
    %1150 = arith.addi %933, %1149 : vector<1x256xi32>
    %c0_i32_409 = arith.constant 0 : i32
    %1151 = vector.broadcast %c0_i32_409 : i32 to vector<1x256xi32>
    %1152 = arith.cmpi sge, %1150, %1151 : vector<1x256xi32>
    %1153 = arith.andi %1148, %1152 : vector<1x256xi1>
    %c1_i32_410 = arith.constant 1 : i32
    %1154 = vector.broadcast %c1_i32_410 : i32 to vector<1x256xi32>
    %1155 = arith.addi %933, %1154 : vector<1x256xi32>
    %c16_i32_411 = arith.constant 16 : i32
    %1156 = vector.broadcast %c16_i32_411 : i32 to vector<1x256xi32>
    %1157 = arith.cmpi slt, %1155, %1156 : vector<1x256xi32>
    %1158 = arith.andi %1153, %1157 : vector<1x256xi1>
    %cst_412 = arith.constant 0.000000e+00 : bf16
    %1159 = vector.broadcast %cst_412 : bf16 to vector<32x256xbf16>
    %1160 = vector.shape_cast %1158 : vector<1x256xi1> to vector<1x256xi1>
    %1161 = vector.broadcast %1160 : vector<1x256xi1> to vector<32x256xi1>
    %1162 = arith.select %1161, %1139, %1159 : vector<32x256xi1>, vector<32x256xbf16>
    %1163 = tpu.concatenate %980, %1006, %1032, %1058, %954, %1084, %1110, %1136, %1162 in 0 : vector<32x256xbf16>, vector<32x256xbf16>, vector<32x256xbf16>, vector<32x256xbf16>, vector<32x256xbf16>, vector<32x256xbf16>, vector<32x256xbf16>, vector<32x256xbf16>, vector<32x256xbf16> -> vector<288x256xbf16>
    %c0_413 = arith.constant 0 : index
    %c0_414 = arith.constant 0 : index
    %1164 = vector.load %arg23[%c0_413, %c0_414] : memref<16x288xbf16, #tpu.memory_space<vmem>>, vector<16x288xbf16>
    %cst_415 = arith.constant dense<0.000000e+00> : vector<16x256xf32>
    %1165 = tpu.matmul %1164, %1163, %cst_415 {dimension_numbers = #tpu.dot_dimension_numbers<[1], [0], [0], [1], [0, 0, 1, 1], [], []>} : vector<16x288xbf16>, vector<288x256xbf16>, vector<16x256xf32> -> vector<16x256xf32>
    %c0_416 = arith.constant 0 : index
    %c0_417 = arith.constant 0 : index
    %1166 = vector.load %arg24[%c0_416, %c0_417] : memref<16x1xf32, #tpu.memory_space<vmem>>, vector<16x1xf32>
    %1167 = vector.broadcast %1166 : vector<16x1xf32> to vector<16x256xf32>
    %1168 = arith.addf %1165, %1167 : vector<16x256xf32>
    %1169 = vector.extract_strided_slice %1168 {offsets = [0, 240], sizes = [16, 16], strides = [1, 1]} : vector<16x256xf32> to vector<16x16xf32>
    %1170 = vector.extract_strided_slice %1168 {offsets = [0, 0], sizes = [16, 240], strides = [1, 1]} : vector<16x256xf32> to vector<16x240xf32>
    %1171 = tpu.concatenate %1169, %1170 in 1 : vector<16x16xf32>, vector<16x240xf32> -> vector<16x256xf32>
    %c-1_i32_418 = arith.constant -1 : i32
    %1172 = vector.broadcast %c-1_i32_418 : i32 to vector<1x256xi32>
    %1173 = arith.addi %935, %1172 : vector<1x256xi32>
    %c0_i32_419 = arith.constant 0 : i32
    %1174 = vector.broadcast %c0_i32_419 : i32 to vector<1x256xi32>
    %1175 = arith.cmpi sge, %1173, %1174 : vector<1x256xi32>
    %c-1_i32_420 = arith.constant -1 : i32
    %1176 = vector.broadcast %c-1_i32_420 : i32 to vector<1x256xi32>
    %1177 = arith.addi %935, %1176 : vector<1x256xi32>
    %c16_i32_421 = arith.constant 16 : i32
    %1178 = vector.broadcast %c16_i32_421 : i32 to vector<1x256xi32>
    %1179 = arith.cmpi slt, %1177, %1178 : vector<1x256xi32>
    %1180 = arith.andi %1175, %1179 : vector<1x256xi1>
    %c0_i32_422 = arith.constant 0 : i32
    %1181 = vector.broadcast %c0_i32_422 : i32 to vector<1x256xi32>
    %1182 = arith.addi %933, %1181 : vector<1x256xi32>
    %c0_i32_423 = arith.constant 0 : i32
    %1183 = vector.broadcast %c0_i32_423 : i32 to vector<1x256xi32>
    %1184 = arith.cmpi sge, %1182, %1183 : vector<1x256xi32>
    %1185 = arith.andi %1180, %1184 : vector<1x256xi1>
    %c0_i32_424 = arith.constant 0 : i32
    %1186 = vector.broadcast %c0_i32_424 : i32 to vector<1x256xi32>
    %1187 = arith.addi %933, %1186 : vector<1x256xi32>
    %c16_i32_425 = arith.constant 16 : i32
    %1188 = vector.broadcast %c16_i32_425 : i32 to vector<1x256xi32>
    %1189 = arith.cmpi slt, %1187, %1188 : vector<1x256xi32>
    %1190 = arith.andi %1185, %1189 : vector<1x256xi1>
    %cst_426 = arith.constant 0.000000e+00 : f32
    %1191 = vector.broadcast %cst_426 : f32 to vector<16x256xf32>
    %1192 = vector.shape_cast %1190 : vector<1x256xi1> to vector<1x256xi1>
    %1193 = vector.broadcast %1192 : vector<1x256xi1> to vector<16x256xi1>
    %1194 = arith.select %1193, %1171, %1191 : vector<16x256xi1>, vector<16x256xf32>
    %cst_427 = arith.constant 2.000000e+00 : f32
    %1195 = vector.broadcast %cst_427 : f32 to vector<16x256xf32>
    %1196 = arith.mulf %1195, %1168 : vector<16x256xf32>
    %1197 = arith.addf %1194, %1196 : vector<16x256xf32>
    %1198 = vector.extract_strided_slice %1168 {offsets = [0, 16], sizes = [16, 240], strides = [1, 1]} : vector<16x256xf32> to vector<16x240xf32>
    %1199 = vector.extract_strided_slice %1168 {offsets = [0, 0], sizes = [16, 16], strides = [1, 1]} : vector<16x256xf32> to vector<16x16xf32>
    %1200 = tpu.concatenate %1198, %1199 in 1 : vector<16x240xf32>, vector<16x16xf32> -> vector<16x256xf32>
    %c1_i32_428 = arith.constant 1 : i32
    %1201 = vector.broadcast %c1_i32_428 : i32 to vector<1x256xi32>
    %1202 = arith.addi %935, %1201 : vector<1x256xi32>
    %c0_i32_429 = arith.constant 0 : i32
    %1203 = vector.broadcast %c0_i32_429 : i32 to vector<1x256xi32>
    %1204 = arith.cmpi sge, %1202, %1203 : vector<1x256xi32>
    %c1_i32_430 = arith.constant 1 : i32
    %1205 = vector.broadcast %c1_i32_430 : i32 to vector<1x256xi32>
    %1206 = arith.addi %935, %1205 : vector<1x256xi32>
    %c16_i32_431 = arith.constant 16 : i32
    %1207 = vector.broadcast %c16_i32_431 : i32 to vector<1x256xi32>
    %1208 = arith.cmpi slt, %1206, %1207 : vector<1x256xi32>
    %1209 = arith.andi %1204, %1208 : vector<1x256xi1>
    %c0_i32_432 = arith.constant 0 : i32
    %1210 = vector.broadcast %c0_i32_432 : i32 to vector<1x256xi32>
    %1211 = arith.addi %933, %1210 : vector<1x256xi32>
    %c0_i32_433 = arith.constant 0 : i32
    %1212 = vector.broadcast %c0_i32_433 : i32 to vector<1x256xi32>
    %1213 = arith.cmpi sge, %1211, %1212 : vector<1x256xi32>
    %1214 = arith.andi %1209, %1213 : vector<1x256xi1>
    %c0_i32_434 = arith.constant 0 : i32
    %1215 = vector.broadcast %c0_i32_434 : i32 to vector<1x256xi32>
    %1216 = arith.addi %933, %1215 : vector<1x256xi32>
    %c16_i32_435 = arith.constant 16 : i32
    %1217 = vector.broadcast %c16_i32_435 : i32 to vector<1x256xi32>
    %1218 = arith.cmpi slt, %1216, %1217 : vector<1x256xi32>
    %1219 = arith.andi %1214, %1218 : vector<1x256xi1>
    %cst_436 = arith.constant 0.000000e+00 : f32
    %1220 = vector.broadcast %cst_436 : f32 to vector<16x256xf32>
    %1221 = vector.shape_cast %1219 : vector<1x256xi1> to vector<1x256xi1>
    %1222 = vector.broadcast %1221 : vector<1x256xi1> to vector<16x256xi1>
    %1223 = arith.select %1222, %1200, %1220 : vector<16x256xi1>, vector<16x256xf32>
    %1224 = arith.addf %1197, %1223 : vector<16x256xf32>
    %1225 = vector.extract_strided_slice %1224 {offsets = [0, 255], sizes = [16, 1], strides = [1, 1]} : vector<16x256xf32> to vector<16x1xf32>
    %1226 = vector.extract_strided_slice %1224 {offsets = [0, 0], sizes = [16, 255], strides = [1, 1]} : vector<16x256xf32> to vector<16x255xf32>
    %1227 = tpu.concatenate %1225, %1226 in 1 : vector<16x1xf32>, vector<16x255xf32> -> vector<16x256xf32>
    %c0_i32_437 = arith.constant 0 : i32
    %1228 = vector.broadcast %c0_i32_437 : i32 to vector<1x256xi32>
    %1229 = arith.addi %935, %1228 : vector<1x256xi32>
    %c0_i32_438 = arith.constant 0 : i32
    %1230 = vector.broadcast %c0_i32_438 : i32 to vector<1x256xi32>
    %1231 = arith.cmpi sge, %1229, %1230 : vector<1x256xi32>
    %c0_i32_439 = arith.constant 0 : i32
    %1232 = vector.broadcast %c0_i32_439 : i32 to vector<1x256xi32>
    %1233 = arith.addi %935, %1232 : vector<1x256xi32>
    %c16_i32_440 = arith.constant 16 : i32
    %1234 = vector.broadcast %c16_i32_440 : i32 to vector<1x256xi32>
    %1235 = arith.cmpi slt, %1233, %1234 : vector<1x256xi32>
    %1236 = arith.andi %1231, %1235 : vector<1x256xi1>
    %c-1_i32_441 = arith.constant -1 : i32
    %1237 = vector.broadcast %c-1_i32_441 : i32 to vector<1x256xi32>
    %1238 = arith.addi %933, %1237 : vector<1x256xi32>
    %c0_i32_442 = arith.constant 0 : i32
    %1239 = vector.broadcast %c0_i32_442 : i32 to vector<1x256xi32>
    %1240 = arith.cmpi sge, %1238, %1239 : vector<1x256xi32>
    %1241 = arith.andi %1236, %1240 : vector<1x256xi1>
    %c-1_i32_443 = arith.constant -1 : i32
    %1242 = vector.broadcast %c-1_i32_443 : i32 to vector<1x256xi32>
    %1243 = arith.addi %933, %1242 : vector<1x256xi32>
    %c16_i32_444 = arith.constant 16 : i32
    %1244 = vector.broadcast %c16_i32_444 : i32 to vector<1x256xi32>
    %1245 = arith.cmpi slt, %1243, %1244 : vector<1x256xi32>
    %1246 = arith.andi %1241, %1245 : vector<1x256xi1>
    %cst_445 = arith.constant 0.000000e+00 : f32
    %1247 = vector.broadcast %cst_445 : f32 to vector<16x256xf32>
    %1248 = vector.shape_cast %1246 : vector<1x256xi1> to vector<1x256xi1>
    %1249 = vector.broadcast %1248 : vector<1x256xi1> to vector<16x256xi1>
    %1250 = arith.select %1249, %1227, %1247 : vector<16x256xi1>, vector<16x256xf32>
    %cst_446 = arith.constant 2.000000e+00 : f32
    %1251 = vector.broadcast %cst_446 : f32 to vector<16x256xf32>
    %1252 = arith.mulf %1251, %1224 : vector<16x256xf32>
    %1253 = arith.addf %1250, %1252 : vector<16x256xf32>
    %1254 = vector.extract_strided_slice %1224 {offsets = [0, 1], sizes = [16, 255], strides = [1, 1]} : vector<16x256xf32> to vector<16x255xf32>
    %1255 = vector.extract_strided_slice %1224 {offsets = [0, 0], sizes = [16, 1], strides = [1, 1]} : vector<16x256xf32> to vector<16x1xf32>
    %1256 = tpu.concatenate %1254, %1255 in 1 : vector<16x255xf32>, vector<16x1xf32> -> vector<16x256xf32>
    %c0_i32_447 = arith.constant 0 : i32
    %1257 = vector.broadcast %c0_i32_447 : i32 to vector<1x256xi32>
    %1258 = arith.addi %935, %1257 : vector<1x256xi32>
    %c0_i32_448 = arith.constant 0 : i32
    %1259 = vector.broadcast %c0_i32_448 : i32 to vector<1x256xi32>
    %1260 = arith.cmpi sge, %1258, %1259 : vector<1x256xi32>
    %c0_i32_449 = arith.constant 0 : i32
    %1261 = vector.broadcast %c0_i32_449 : i32 to vector<1x256xi32>
    %1262 = arith.addi %935, %1261 : vector<1x256xi32>
    %c16_i32_450 = arith.constant 16 : i32
    %1263 = vector.broadcast %c16_i32_450 : i32 to vector<1x256xi32>
    %1264 = arith.cmpi slt, %1262, %1263 : vector<1x256xi32>
    %1265 = arith.andi %1260, %1264 : vector<1x256xi1>
    %c1_i32_451 = arith.constant 1 : i32
    %1266 = vector.broadcast %c1_i32_451 : i32 to vector<1x256xi32>
    %1267 = arith.addi %933, %1266 : vector<1x256xi32>
    %c0_i32_452 = arith.constant 0 : i32
    %1268 = vector.broadcast %c0_i32_452 : i32 to vector<1x256xi32>
    %1269 = arith.cmpi sge, %1267, %1268 : vector<1x256xi32>
    %1270 = arith.andi %1265, %1269 : vector<1x256xi1>
    %c1_i32_453 = arith.constant 1 : i32
    %1271 = vector.broadcast %c1_i32_453 : i32 to vector<1x256xi32>
    %1272 = arith.addi %933, %1271 : vector<1x256xi32>
    %c16_i32_454 = arith.constant 16 : i32
    %1273 = vector.broadcast %c16_i32_454 : i32 to vector<1x256xi32>
    %1274 = arith.cmpi slt, %1272, %1273 : vector<1x256xi32>
    %1275 = arith.andi %1270, %1274 : vector<1x256xi1>
    %cst_455 = arith.constant 0.000000e+00 : f32
    %1276 = vector.broadcast %cst_455 : f32 to vector<16x256xf32>
    %1277 = vector.shape_cast %1275 : vector<1x256xi1> to vector<1x256xi1>
    %1278 = vector.broadcast %1277 : vector<1x256xi1> to vector<16x256xi1>
    %1279 = arith.select %1278, %1256, %1276 : vector<16x256xi1>, vector<16x256xf32>
    %1280 = arith.addf %1253, %1279 : vector<16x256xf32>
    %cst_456 = arith.constant 6.250000e-02 : f32
    %1281 = vector.broadcast %cst_456 : f32 to vector<16x256xf32>
    %1282 = arith.mulf %1280, %1281 : vector<16x256xf32>
    %c0_457 = arith.constant 0 : index
    %c0_458 = arith.constant 0 : index
    %1283 = vector.load %arg30[%c0_457, %c0_458] : memref<16x1xf32, #tpu.memory_space<vmem>>, vector<16x1xf32>
    %1284 = vector.broadcast %1283 : vector<16x1xf32> to vector<16x256xf32>
    %1285 = vector.broadcast %937 : vector<1x256xf32> to vector<16x256xf32>
    %1286 = arith.mulf %1284, %1285 : vector<16x256xf32>
    %1287 = arith.addf %1282, %1286 : vector<16x256xf32>
    %cst_459 = arith.constant 2.000000e-01 : f32
    %1288 = vector.broadcast %cst_459 : f32 to vector<16x256xf32>
    %1289 = arith.mulf %1288, %1287 : vector<16x256xf32>
    %1290 = arith.maximumf %1287, %1289 : vector<16x256xf32>
    %cst_460 = arith.constant dense<0.000000e+00> : vector<16xf32>
    %1291 = vector.multi_reduction <add>, %1290, %cst_460 [1] : vector<16x256xf32> to vector<16xf32>
    %1292 = vector.shape_cast %1291 : vector<16xf32> to vector<16x1xf32>
    %cst_461 = arith.constant 2.560000e+02 : f32
    %1293 = vector.broadcast %cst_461 : f32 to vector<16x1xf32>
    %1294 = arith.divf %1292, %1293 : vector<16x1xf32>
    %1295 = arith.mulf %1290, %1290 : vector<16x256xf32>
    %cst_462 = arith.constant dense<0.000000e+00> : vector<16xf32>
    %1296 = vector.multi_reduction <add>, %1295, %cst_462 [1] : vector<16x256xf32> to vector<16xf32>
    %1297 = vector.shape_cast %1296 : vector<16xf32> to vector<16x1xf32>
    %cst_463 = arith.constant 2.560000e+02 : f32
    %1298 = vector.broadcast %cst_463 : f32 to vector<16x1xf32>
    %1299 = arith.divf %1297, %1298 : vector<16x1xf32>
    %1300 = arith.mulf %1294, %1294 : vector<16x1xf32>
    %1301 = arith.subf %1299, %1300 : vector<16x1xf32>
    %cst_464 = arith.constant 0.000000e+00 : f32
    %1302 = vector.broadcast %cst_464 : f32 to vector<16x1xf32>
    %1303 = arith.maximumf %1301, %1302 : vector<16x1xf32>
    %1304 = vector.broadcast %1294 : vector<16x1xf32> to vector<16x256xf32>
    %1305 = arith.subf %1290, %1304 : vector<16x256xf32>
    %cst_465 = arith.constant 9.99999974E-6 : f32
    %1306 = vector.broadcast %cst_465 : f32 to vector<16x1xf32>
    %1307 = arith.addf %1303, %1306 : vector<16x1xf32>
    %1308 = math.rsqrt %1307 : vector<16x1xf32>
    %1309 = vector.broadcast %1308 : vector<16x1xf32> to vector<16x256xf32>
    %1310 = arith.mulf %1305, %1309 : vector<16x256xf32>
    %1311 = vector.broadcast %947 : vector<16x1xf32> to vector<16x256xf32>
    %1312 = arith.mulf %1311, %1310 : vector<16x256xf32>
    %1313 = vector.broadcast %948 : vector<16x1xf32> to vector<16x256xf32>
    %1314 = arith.addf %1312, %1313 : vector<16x256xf32>
    %1315 = arith.truncf %1314 : vector<16x256xf32> to vector<16x256xbf16>
    %1316 = vector.extract_strided_slice %1315 {offsets = [0, 239], sizes = [16, 17], strides = [1, 1]} : vector<16x256xbf16> to vector<16x17xbf16>
    %1317 = vector.extract_strided_slice %1315 {offsets = [0, 0], sizes = [16, 239], strides = [1, 1]} : vector<16x256xbf16> to vector<16x239xbf16>
    %1318 = tpu.concatenate %1316, %1317 in 1 : vector<16x17xbf16>, vector<16x239xbf16> -> vector<16x256xbf16>
    %c-1_i32_466 = arith.constant -1 : i32
    %1319 = vector.broadcast %c-1_i32_466 : i32 to vector<1x256xi32>
    %1320 = arith.addi %935, %1319 : vector<1x256xi32>
    %c0_i32_467 = arith.constant 0 : i32
    %1321 = vector.broadcast %c0_i32_467 : i32 to vector<1x256xi32>
    %1322 = arith.cmpi sge, %1320, %1321 : vector<1x256xi32>
    %c-1_i32_468 = arith.constant -1 : i32
    %1323 = vector.broadcast %c-1_i32_468 : i32 to vector<1x256xi32>
    %1324 = arith.addi %935, %1323 : vector<1x256xi32>
    %c16_i32_469 = arith.constant 16 : i32
    %1325 = vector.broadcast %c16_i32_469 : i32 to vector<1x256xi32>
    %1326 = arith.cmpi slt, %1324, %1325 : vector<1x256xi32>
    %1327 = arith.andi %1322, %1326 : vector<1x256xi1>
    %c-1_i32_470 = arith.constant -1 : i32
    %1328 = vector.broadcast %c-1_i32_470 : i32 to vector<1x256xi32>
    %1329 = arith.addi %933, %1328 : vector<1x256xi32>
    %c0_i32_471 = arith.constant 0 : i32
    %1330 = vector.broadcast %c0_i32_471 : i32 to vector<1x256xi32>
    %1331 = arith.cmpi sge, %1329, %1330 : vector<1x256xi32>
    %1332 = arith.andi %1327, %1331 : vector<1x256xi1>
    %c-1_i32_472 = arith.constant -1 : i32
    %1333 = vector.broadcast %c-1_i32_472 : i32 to vector<1x256xi32>
    %1334 = arith.addi %933, %1333 : vector<1x256xi32>
    %c16_i32_473 = arith.constant 16 : i32
    %1335 = vector.broadcast %c16_i32_473 : i32 to vector<1x256xi32>
    %1336 = arith.cmpi slt, %1334, %1335 : vector<1x256xi32>
    %1337 = arith.andi %1332, %1336 : vector<1x256xi1>
    %cst_474 = arith.constant 0.000000e+00 : bf16
    %1338 = vector.broadcast %cst_474 : bf16 to vector<16x256xbf16>
    %1339 = vector.shape_cast %1337 : vector<1x256xi1> to vector<1x256xi1>
    %1340 = vector.broadcast %1339 : vector<1x256xi1> to vector<16x256xi1>
    %1341 = arith.select %1340, %1318, %1338 : vector<16x256xi1>, vector<16x256xbf16>
    %1342 = vector.extract_strided_slice %1315 {offsets = [0, 240], sizes = [16, 16], strides = [1, 1]} : vector<16x256xbf16> to vector<16x16xbf16>
    %1343 = vector.extract_strided_slice %1315 {offsets = [0, 0], sizes = [16, 240], strides = [1, 1]} : vector<16x256xbf16> to vector<16x240xbf16>
    %1344 = tpu.concatenate %1342, %1343 in 1 : vector<16x16xbf16>, vector<16x240xbf16> -> vector<16x256xbf16>
    %c-1_i32_475 = arith.constant -1 : i32
    %1345 = vector.broadcast %c-1_i32_475 : i32 to vector<1x256xi32>
    %1346 = arith.addi %935, %1345 : vector<1x256xi32>
    %c0_i32_476 = arith.constant 0 : i32
    %1347 = vector.broadcast %c0_i32_476 : i32 to vector<1x256xi32>
    %1348 = arith.cmpi sge, %1346, %1347 : vector<1x256xi32>
    %c-1_i32_477 = arith.constant -1 : i32
    %1349 = vector.broadcast %c-1_i32_477 : i32 to vector<1x256xi32>
    %1350 = arith.addi %935, %1349 : vector<1x256xi32>
    %c16_i32_478 = arith.constant 16 : i32
    %1351 = vector.broadcast %c16_i32_478 : i32 to vector<1x256xi32>
    %1352 = arith.cmpi slt, %1350, %1351 : vector<1x256xi32>
    %1353 = arith.andi %1348, %1352 : vector<1x256xi1>
    %c0_i32_479 = arith.constant 0 : i32
    %1354 = vector.broadcast %c0_i32_479 : i32 to vector<1x256xi32>
    %1355 = arith.addi %933, %1354 : vector<1x256xi32>
    %c0_i32_480 = arith.constant 0 : i32
    %1356 = vector.broadcast %c0_i32_480 : i32 to vector<1x256xi32>
    %1357 = arith.cmpi sge, %1355, %1356 : vector<1x256xi32>
    %1358 = arith.andi %1353, %1357 : vector<1x256xi1>
    %c0_i32_481 = arith.constant 0 : i32
    %1359 = vector.broadcast %c0_i32_481 : i32 to vector<1x256xi32>
    %1360 = arith.addi %933, %1359 : vector<1x256xi32>
    %c16_i32_482 = arith.constant 16 : i32
    %1361 = vector.broadcast %c16_i32_482 : i32 to vector<1x256xi32>
    %1362 = arith.cmpi slt, %1360, %1361 : vector<1x256xi32>
    %1363 = arith.andi %1358, %1362 : vector<1x256xi1>
    %cst_483 = arith.constant 0.000000e+00 : bf16
    %1364 = vector.broadcast %cst_483 : bf16 to vector<16x256xbf16>
    %1365 = vector.shape_cast %1363 : vector<1x256xi1> to vector<1x256xi1>
    %1366 = vector.broadcast %1365 : vector<1x256xi1> to vector<16x256xi1>
    %1367 = arith.select %1366, %1344, %1364 : vector<16x256xi1>, vector<16x256xbf16>
    %1368 = vector.extract_strided_slice %1315 {offsets = [0, 241], sizes = [16, 15], strides = [1, 1]} : vector<16x256xbf16> to vector<16x15xbf16>
    %1369 = vector.extract_strided_slice %1315 {offsets = [0, 0], sizes = [16, 241], strides = [1, 1]} : vector<16x256xbf16> to vector<16x241xbf16>
    %1370 = tpu.concatenate %1368, %1369 in 1 : vector<16x15xbf16>, vector<16x241xbf16> -> vector<16x256xbf16>
    %c-1_i32_484 = arith.constant -1 : i32
    %1371 = vector.broadcast %c-1_i32_484 : i32 to vector<1x256xi32>
    %1372 = arith.addi %935, %1371 : vector<1x256xi32>
    %c0_i32_485 = arith.constant 0 : i32
    %1373 = vector.broadcast %c0_i32_485 : i32 to vector<1x256xi32>
    %1374 = arith.cmpi sge, %1372, %1373 : vector<1x256xi32>
    %c-1_i32_486 = arith.constant -1 : i32
    %1375 = vector.broadcast %c-1_i32_486 : i32 to vector<1x256xi32>
    %1376 = arith.addi %935, %1375 : vector<1x256xi32>
    %c16_i32_487 = arith.constant 16 : i32
    %1377 = vector.broadcast %c16_i32_487 : i32 to vector<1x256xi32>
    %1378 = arith.cmpi slt, %1376, %1377 : vector<1x256xi32>
    %1379 = arith.andi %1374, %1378 : vector<1x256xi1>
    %c1_i32_488 = arith.constant 1 : i32
    %1380 = vector.broadcast %c1_i32_488 : i32 to vector<1x256xi32>
    %1381 = arith.addi %933, %1380 : vector<1x256xi32>
    %c0_i32_489 = arith.constant 0 : i32
    %1382 = vector.broadcast %c0_i32_489 : i32 to vector<1x256xi32>
    %1383 = arith.cmpi sge, %1381, %1382 : vector<1x256xi32>
    %1384 = arith.andi %1379, %1383 : vector<1x256xi1>
    %c1_i32_490 = arith.constant 1 : i32
    %1385 = vector.broadcast %c1_i32_490 : i32 to vector<1x256xi32>
    %1386 = arith.addi %933, %1385 : vector<1x256xi32>
    %c16_i32_491 = arith.constant 16 : i32
    %1387 = vector.broadcast %c16_i32_491 : i32 to vector<1x256xi32>
    %1388 = arith.cmpi slt, %1386, %1387 : vector<1x256xi32>
    %1389 = arith.andi %1384, %1388 : vector<1x256xi1>
    %cst_492 = arith.constant 0.000000e+00 : bf16
    %1390 = vector.broadcast %cst_492 : bf16 to vector<16x256xbf16>
    %1391 = vector.shape_cast %1389 : vector<1x256xi1> to vector<1x256xi1>
    %1392 = vector.broadcast %1391 : vector<1x256xi1> to vector<16x256xi1>
    %1393 = arith.select %1392, %1370, %1390 : vector<16x256xi1>, vector<16x256xbf16>
    %1394 = vector.extract_strided_slice %1315 {offsets = [0, 255], sizes = [16, 1], strides = [1, 1]} : vector<16x256xbf16> to vector<16x1xbf16>
    %1395 = vector.extract_strided_slice %1315 {offsets = [0, 0], sizes = [16, 255], strides = [1, 1]} : vector<16x256xbf16> to vector<16x255xbf16>
    %1396 = tpu.concatenate %1394, %1395 in 1 : vector<16x1xbf16>, vector<16x255xbf16> -> vector<16x256xbf16>
    %c0_i32_493 = arith.constant 0 : i32
    %1397 = vector.broadcast %c0_i32_493 : i32 to vector<1x256xi32>
    %1398 = arith.addi %935, %1397 : vector<1x256xi32>
    %c0_i32_494 = arith.constant 0 : i32
    %1399 = vector.broadcast %c0_i32_494 : i32 to vector<1x256xi32>
    %1400 = arith.cmpi sge, %1398, %1399 : vector<1x256xi32>
    %c0_i32_495 = arith.constant 0 : i32
    %1401 = vector.broadcast %c0_i32_495 : i32 to vector<1x256xi32>
    %1402 = arith.addi %935, %1401 : vector<1x256xi32>
    %c16_i32_496 = arith.constant 16 : i32
    %1403 = vector.broadcast %c16_i32_496 : i32 to vector<1x256xi32>
    %1404 = arith.cmpi slt, %1402, %1403 : vector<1x256xi32>
    %1405 = arith.andi %1400, %1404 : vector<1x256xi1>
    %c-1_i32_497 = arith.constant -1 : i32
    %1406 = vector.broadcast %c-1_i32_497 : i32 to vector<1x256xi32>
    %1407 = arith.addi %933, %1406 : vector<1x256xi32>
    %c0_i32_498 = arith.constant 0 : i32
    %1408 = vector.broadcast %c0_i32_498 : i32 to vector<1x256xi32>
    %1409 = arith.cmpi sge, %1407, %1408 : vector<1x256xi32>
    %1410 = arith.andi %1405, %1409 : vector<1x256xi1>
    %c-1_i32_499 = arith.constant -1 : i32
    %1411 = vector.broadcast %c-1_i32_499 : i32 to vector<1x256xi32>
    %1412 = arith.addi %933, %1411 : vector<1x256xi32>
    %c16_i32_500 = arith.constant 16 : i32
    %1413 = vector.broadcast %c16_i32_500 : i32 to vector<1x256xi32>
    %1414 = arith.cmpi slt, %1412, %1413 : vector<1x256xi32>
    %1415 = arith.andi %1410, %1414 : vector<1x256xi1>
    %cst_501 = arith.constant 0.000000e+00 : bf16
    %1416 = vector.broadcast %cst_501 : bf16 to vector<16x256xbf16>
    %1417 = vector.shape_cast %1415 : vector<1x256xi1> to vector<1x256xi1>
    %1418 = vector.broadcast %1417 : vector<1x256xi1> to vector<16x256xi1>
    %1419 = arith.select %1418, %1396, %1416 : vector<16x256xi1>, vector<16x256xbf16>
    %1420 = vector.extract_strided_slice %1315 {offsets = [0, 1], sizes = [16, 255], strides = [1, 1]} : vector<16x256xbf16> to vector<16x255xbf16>
    %1421 = vector.extract_strided_slice %1315 {offsets = [0, 0], sizes = [16, 1], strides = [1, 1]} : vector<16x256xbf16> to vector<16x1xbf16>
    %1422 = tpu.concatenate %1420, %1421 in 1 : vector<16x255xbf16>, vector<16x1xbf16> -> vector<16x256xbf16>
    %c0_i32_502 = arith.constant 0 : i32
    %1423 = vector.broadcast %c0_i32_502 : i32 to vector<1x256xi32>
    %1424 = arith.addi %935, %1423 : vector<1x256xi32>
    %c0_i32_503 = arith.constant 0 : i32
    %1425 = vector.broadcast %c0_i32_503 : i32 to vector<1x256xi32>
    %1426 = arith.cmpi sge, %1424, %1425 : vector<1x256xi32>
    %c0_i32_504 = arith.constant 0 : i32
    %1427 = vector.broadcast %c0_i32_504 : i32 to vector<1x256xi32>
    %1428 = arith.addi %935, %1427 : vector<1x256xi32>
    %c16_i32_505 = arith.constant 16 : i32
    %1429 = vector.broadcast %c16_i32_505 : i32 to vector<1x256xi32>
    %1430 = arith.cmpi slt, %1428, %1429 : vector<1x256xi32>
    %1431 = arith.andi %1426, %1430 : vector<1x256xi1>
    %c1_i32_506 = arith.constant 1 : i32
    %1432 = vector.broadcast %c1_i32_506 : i32 to vector<1x256xi32>
    %1433 = arith.addi %933, %1432 : vector<1x256xi32>
    %c0_i32_507 = arith.constant 0 : i32
    %1434 = vector.broadcast %c0_i32_507 : i32 to vector<1x256xi32>
    %1435 = arith.cmpi sge, %1433, %1434 : vector<1x256xi32>
    %1436 = arith.andi %1431, %1435 : vector<1x256xi1>
    %c1_i32_508 = arith.constant 1 : i32
    %1437 = vector.broadcast %c1_i32_508 : i32 to vector<1x256xi32>
    %1438 = arith.addi %933, %1437 : vector<1x256xi32>
    %c16_i32_509 = arith.constant 16 : i32
    %1439 = vector.broadcast %c16_i32_509 : i32 to vector<1x256xi32>
    %1440 = arith.cmpi slt, %1438, %1439 : vector<1x256xi32>
    %1441 = arith.andi %1436, %1440 : vector<1x256xi1>
    %cst_510 = arith.constant 0.000000e+00 : bf16
    %1442 = vector.broadcast %cst_510 : bf16 to vector<16x256xbf16>
    %1443 = vector.shape_cast %1441 : vector<1x256xi1> to vector<1x256xi1>
    %1444 = vector.broadcast %1443 : vector<1x256xi1> to vector<16x256xi1>
    %1445 = arith.select %1444, %1422, %1442 : vector<16x256xi1>, vector<16x256xbf16>
    %1446 = vector.extract_strided_slice %1315 {offsets = [0, 15], sizes = [16, 241], strides = [1, 1]} : vector<16x256xbf16> to vector<16x241xbf16>
    %1447 = vector.extract_strided_slice %1315 {offsets = [0, 0], sizes = [16, 15], strides = [1, 1]} : vector<16x256xbf16> to vector<16x15xbf16>
    %1448 = tpu.concatenate %1446, %1447 in 1 : vector<16x241xbf16>, vector<16x15xbf16> -> vector<16x256xbf16>
    %c1_i32_511 = arith.constant 1 : i32
    %1449 = vector.broadcast %c1_i32_511 : i32 to vector<1x256xi32>
    %1450 = arith.addi %935, %1449 : vector<1x256xi32>
    %c0_i32_512 = arith.constant 0 : i32
    %1451 = vector.broadcast %c0_i32_512 : i32 to vector<1x256xi32>
    %1452 = arith.cmpi sge, %1450, %1451 : vector<1x256xi32>
    %c1_i32_513 = arith.constant 1 : i32
    %1453 = vector.broadcast %c1_i32_513 : i32 to vector<1x256xi32>
    %1454 = arith.addi %935, %1453 : vector<1x256xi32>
    %c16_i32_514 = arith.constant 16 : i32
    %1455 = vector.broadcast %c16_i32_514 : i32 to vector<1x256xi32>
    %1456 = arith.cmpi slt, %1454, %1455 : vector<1x256xi32>
    %1457 = arith.andi %1452, %1456 : vector<1x256xi1>
    %c-1_i32_515 = arith.constant -1 : i32
    %1458 = vector.broadcast %c-1_i32_515 : i32 to vector<1x256xi32>
    %1459 = arith.addi %933, %1458 : vector<1x256xi32>
    %c0_i32_516 = arith.constant 0 : i32
    %1460 = vector.broadcast %c0_i32_516 : i32 to vector<1x256xi32>
    %1461 = arith.cmpi sge, %1459, %1460 : vector<1x256xi32>
    %1462 = arith.andi %1457, %1461 : vector<1x256xi1>
    %c-1_i32_517 = arith.constant -1 : i32
    %1463 = vector.broadcast %c-1_i32_517 : i32 to vector<1x256xi32>
    %1464 = arith.addi %933, %1463 : vector<1x256xi32>
    %c16_i32_518 = arith.constant 16 : i32
    %1465 = vector.broadcast %c16_i32_518 : i32 to vector<1x256xi32>
    %1466 = arith.cmpi slt, %1464, %1465 : vector<1x256xi32>
    %1467 = arith.andi %1462, %1466 : vector<1x256xi1>
    %cst_519 = arith.constant 0.000000e+00 : bf16
    %1468 = vector.broadcast %cst_519 : bf16 to vector<16x256xbf16>
    %1469 = vector.shape_cast %1467 : vector<1x256xi1> to vector<1x256xi1>
    %1470 = vector.broadcast %1469 : vector<1x256xi1> to vector<16x256xi1>
    %1471 = arith.select %1470, %1448, %1468 : vector<16x256xi1>, vector<16x256xbf16>
    %1472 = vector.extract_strided_slice %1315 {offsets = [0, 16], sizes = [16, 240], strides = [1, 1]} : vector<16x256xbf16> to vector<16x240xbf16>
    %1473 = vector.extract_strided_slice %1315 {offsets = [0, 0], sizes = [16, 16], strides = [1, 1]} : vector<16x256xbf16> to vector<16x16xbf16>
    %1474 = tpu.concatenate %1472, %1473 in 1 : vector<16x240xbf16>, vector<16x16xbf16> -> vector<16x256xbf16>
    %c1_i32_520 = arith.constant 1 : i32
    %1475 = vector.broadcast %c1_i32_520 : i32 to vector<1x256xi32>
    %1476 = arith.addi %935, %1475 : vector<1x256xi32>
    %c0_i32_521 = arith.constant 0 : i32
    %1477 = vector.broadcast %c0_i32_521 : i32 to vector<1x256xi32>
    %1478 = arith.cmpi sge, %1476, %1477 : vector<1x256xi32>
    %c1_i32_522 = arith.constant 1 : i32
    %1479 = vector.broadcast %c1_i32_522 : i32 to vector<1x256xi32>
    %1480 = arith.addi %935, %1479 : vector<1x256xi32>
    %c16_i32_523 = arith.constant 16 : i32
    %1481 = vector.broadcast %c16_i32_523 : i32 to vector<1x256xi32>
    %1482 = arith.cmpi slt, %1480, %1481 : vector<1x256xi32>
    %1483 = arith.andi %1478, %1482 : vector<1x256xi1>
    %c0_i32_524 = arith.constant 0 : i32
    %1484 = vector.broadcast %c0_i32_524 : i32 to vector<1x256xi32>
    %1485 = arith.addi %933, %1484 : vector<1x256xi32>
    %c0_i32_525 = arith.constant 0 : i32
    %1486 = vector.broadcast %c0_i32_525 : i32 to vector<1x256xi32>
    %1487 = arith.cmpi sge, %1485, %1486 : vector<1x256xi32>
    %1488 = arith.andi %1483, %1487 : vector<1x256xi1>
    %c0_i32_526 = arith.constant 0 : i32
    %1489 = vector.broadcast %c0_i32_526 : i32 to vector<1x256xi32>
    %1490 = arith.addi %933, %1489 : vector<1x256xi32>
    %c16_i32_527 = arith.constant 16 : i32
    %1491 = vector.broadcast %c16_i32_527 : i32 to vector<1x256xi32>
    %1492 = arith.cmpi slt, %1490, %1491 : vector<1x256xi32>
    %1493 = arith.andi %1488, %1492 : vector<1x256xi1>
    %cst_528 = arith.constant 0.000000e+00 : bf16
    %1494 = vector.broadcast %cst_528 : bf16 to vector<16x256xbf16>
    %1495 = vector.shape_cast %1493 : vector<1x256xi1> to vector<1x256xi1>
    %1496 = vector.broadcast %1495 : vector<1x256xi1> to vector<16x256xi1>
    %1497 = arith.select %1496, %1474, %1494 : vector<16x256xi1>, vector<16x256xbf16>
    %1498 = vector.extract_strided_slice %1315 {offsets = [0, 17], sizes = [16, 239], strides = [1, 1]} : vector<16x256xbf16> to vector<16x239xbf16>
    %1499 = vector.extract_strided_slice %1315 {offsets = [0, 0], sizes = [16, 17], strides = [1, 1]} : vector<16x256xbf16> to vector<16x17xbf16>
    %1500 = tpu.concatenate %1498, %1499 in 1 : vector<16x239xbf16>, vector<16x17xbf16> -> vector<16x256xbf16>
    %c1_i32_529 = arith.constant 1 : i32
    %1501 = vector.broadcast %c1_i32_529 : i32 to vector<1x256xi32>
    %1502 = arith.addi %935, %1501 : vector<1x256xi32>
    %c0_i32_530 = arith.constant 0 : i32
    %1503 = vector.broadcast %c0_i32_530 : i32 to vector<1x256xi32>
    %1504 = arith.cmpi sge, %1502, %1503 : vector<1x256xi32>
    %c1_i32_531 = arith.constant 1 : i32
    %1505 = vector.broadcast %c1_i32_531 : i32 to vector<1x256xi32>
    %1506 = arith.addi %935, %1505 : vector<1x256xi32>
    %c16_i32_532 = arith.constant 16 : i32
    %1507 = vector.broadcast %c16_i32_532 : i32 to vector<1x256xi32>
    %1508 = arith.cmpi slt, %1506, %1507 : vector<1x256xi32>
    %1509 = arith.andi %1504, %1508 : vector<1x256xi1>
    %c1_i32_533 = arith.constant 1 : i32
    %1510 = vector.broadcast %c1_i32_533 : i32 to vector<1x256xi32>
    %1511 = arith.addi %933, %1510 : vector<1x256xi32>
    %c0_i32_534 = arith.constant 0 : i32
    %1512 = vector.broadcast %c0_i32_534 : i32 to vector<1x256xi32>
    %1513 = arith.cmpi sge, %1511, %1512 : vector<1x256xi32>
    %1514 = arith.andi %1509, %1513 : vector<1x256xi1>
    %c1_i32_535 = arith.constant 1 : i32
    %1515 = vector.broadcast %c1_i32_535 : i32 to vector<1x256xi32>
    %1516 = arith.addi %933, %1515 : vector<1x256xi32>
    %c16_i32_536 = arith.constant 16 : i32
    %1517 = vector.broadcast %c16_i32_536 : i32 to vector<1x256xi32>
    %1518 = arith.cmpi slt, %1516, %1517 : vector<1x256xi32>
    %1519 = arith.andi %1514, %1518 : vector<1x256xi1>
    %cst_537 = arith.constant 0.000000e+00 : bf16
    %1520 = vector.broadcast %cst_537 : bf16 to vector<16x256xbf16>
    %1521 = vector.shape_cast %1519 : vector<1x256xi1> to vector<1x256xi1>
    %1522 = vector.broadcast %1521 : vector<1x256xi1> to vector<16x256xi1>
    %1523 = arith.select %1522, %1500, %1520 : vector<16x256xi1>, vector<16x256xbf16>
    %1524 = tpu.concatenate %1341, %1367, %1393, %1419, %1315, %1445, %1471, %1497, %1523 in 0 : vector<16x256xbf16>, vector<16x256xbf16>, vector<16x256xbf16>, vector<16x256xbf16>, vector<16x256xbf16>, vector<16x256xbf16>, vector<16x256xbf16>, vector<16x256xbf16>, vector<16x256xbf16> -> vector<144x256xbf16>
    %c0_538 = arith.constant 0 : index
    %c0_539 = arith.constant 0 : index
    %1525 = vector.load %arg26[%c0_538, %c0_539] : memref<16x144xbf16, #tpu.memory_space<vmem>>, vector<16x144xbf16>
    %cst_540 = arith.constant dense<0.000000e+00> : vector<16x256xf32>
    %1526 = tpu.matmul %1525, %1524, %cst_540 {dimension_numbers = #tpu.dot_dimension_numbers<[1], [0], [0], [1], [0, 0, 1, 1], [], []>} : vector<16x144xbf16>, vector<144x256xbf16>, vector<16x256xf32> -> vector<16x256xf32>
    %c0_541 = arith.constant 0 : index
    %c0_542 = arith.constant 0 : index
    %1527 = vector.load %arg27[%c0_541, %c0_542] : memref<16x1xf32, #tpu.memory_space<vmem>>, vector<16x1xf32>
    %1528 = vector.broadcast %1527 : vector<16x1xf32> to vector<16x256xf32>
    %1529 = arith.addf %1526, %1528 : vector<16x256xf32>
    %c0_543 = arith.constant 0 : index
    %c0_544 = arith.constant 0 : index
    %1530 = vector.load %arg31[%c0_543, %c0_544] : memref<16x1xf32, #tpu.memory_space<vmem>>, vector<16x1xf32>
    %1531 = vector.broadcast %1530 : vector<16x1xf32> to vector<16x256xf32>
    %1532 = vector.broadcast %937 : vector<1x256xf32> to vector<16x256xf32>
    %1533 = arith.mulf %1531, %1532 : vector<16x256xf32>
    %1534 = arith.addf %1529, %1533 : vector<16x256xf32>
    %cst_545 = arith.constant 2.000000e-01 : f32
    %1535 = vector.broadcast %cst_545 : f32 to vector<16x256xf32>
    %1536 = arith.mulf %1535, %1534 : vector<16x256xf32>
    %1537 = arith.maximumf %1534, %1536 : vector<16x256xf32>
    %cst_546 = arith.constant dense<0.000000e+00> : vector<16xf32>
    %1538 = vector.multi_reduction <add>, %1537, %cst_546 [1] : vector<16x256xf32> to vector<16xf32>
    %1539 = vector.shape_cast %1538 : vector<16xf32> to vector<16x1xf32>
    %cst_547 = arith.constant 2.560000e+02 : f32
    %1540 = vector.broadcast %cst_547 : f32 to vector<16x1xf32>
    %1541 = arith.divf %1539, %1540 : vector<16x1xf32>
    %1542 = arith.mulf %1537, %1537 : vector<16x256xf32>
    %cst_548 = arith.constant dense<0.000000e+00> : vector<16xf32>
    %1543 = vector.multi_reduction <add>, %1542, %cst_548 [1] : vector<16x256xf32> to vector<16xf32>
    %1544 = vector.shape_cast %1543 : vector<16xf32> to vector<16x1xf32>
    %cst_549 = arith.constant 2.560000e+02 : f32
    %1545 = vector.broadcast %cst_549 : f32 to vector<16x1xf32>
    %1546 = arith.divf %1544, %1545 : vector<16x1xf32>
    %1547 = arith.mulf %1541, %1541 : vector<16x1xf32>
    %1548 = arith.subf %1546, %1547 : vector<16x1xf32>
    %cst_550 = arith.constant 0.000000e+00 : f32
    %1549 = vector.broadcast %cst_550 : f32 to vector<16x1xf32>
    %1550 = arith.maximumf %1548, %1549 : vector<16x1xf32>
    %1551 = vector.broadcast %1541 : vector<16x1xf32> to vector<16x256xf32>
    %1552 = arith.subf %1537, %1551 : vector<16x256xf32>
    %cst_551 = arith.constant 9.99999974E-6 : f32
    %1553 = vector.broadcast %cst_551 : f32 to vector<16x1xf32>
    %1554 = arith.addf %1550, %1553 : vector<16x1xf32>
    %1555 = math.rsqrt %1554 : vector<16x1xf32>
    %1556 = vector.broadcast %1555 : vector<16x1xf32> to vector<16x256xf32>
    %1557 = arith.mulf %1552, %1556 : vector<16x256xf32>
    %1558 = vector.broadcast %949 : vector<16x1xf32> to vector<16x256xf32>
    %1559 = arith.mulf %1558, %1557 : vector<16x256xf32>
    %1560 = vector.broadcast %950 : vector<16x1xf32> to vector<16x256xf32>
    %1561 = arith.addf %1559, %1560 : vector<16x256xf32>
    %c0_552 = arith.constant 0 : index
    %c0_553 = arith.constant 0 : index
    %1562 = vector.load %arg32[%c0_552, %c0_553] : memref<3x16xf32, #tpu.memory_space<vmem>>, vector<3x16xf32>
    %cst_554 = arith.constant dense<0.000000e+00> : vector<3x256xf32>
    %1563 = tpu.matmul %1562, %1561, %cst_554 {dimension_numbers = #tpu.dot_dimension_numbers<[1], [0], [0], [1], [0, 0, 1, 1], [], []>} : vector<3x16xf32>, vector<16x256xf32>, vector<3x256xf32> -> vector<3x256xf32>
    %c0_555 = arith.constant 0 : index
    %c0_556 = arith.constant 0 : index
    %1564 = vector.load %arg33[%c0_555, %c0_556] : memref<3x1xf32, #tpu.memory_space<vmem>>, vector<3x1xf32>
    %1565 = vector.broadcast %1564 : vector<3x1xf32> to vector<3x256xf32>
    %1566 = arith.addf %1563, %1565 : vector<3x256xf32>
    %c0_557 = arith.constant 0 : index
    %c0_558 = arith.constant 0 : index
    %1567 = vector.load %arg34[%c0_557, %c0_558] : memref<3x32xf32, #tpu.memory_space<vmem>>, vector<3x32xf32>
    %cst_559 = arith.constant dense<0.000000e+00> : vector<3x64xf32>
    %1568 = tpu.matmul %1567, %930, %cst_559 {dimension_numbers = #tpu.dot_dimension_numbers<[1], [0], [0], [1], [0, 0, 1, 1], [], []>} : vector<3x32xf32>, vector<32x64xf32>, vector<3x64xf32> -> vector<3x64xf32>
    %c0_560 = arith.constant 0 : index
    %c0_561 = arith.constant 0 : index
    %1569 = vector.load %arg35[%c0_560, %c0_561] : memref<3x1xf32, #tpu.memory_space<vmem>>, vector<3x1xf32>
    %1570 = vector.broadcast %1569 : vector<3x1xf32> to vector<3x64xf32>
    %1571 = arith.addf %1568, %1570 : vector<3x64xf32>
    %c0_562 = arith.constant 0 : index
    %c0_563 = arith.constant 0 : index
    %1572 = vector.load %arg36[%c0_562, %c0_563] : memref<64x256xbf16, #tpu.memory_space<vmem>>, vector<64x256xbf16>
    %1573 = arith.extf %1572 : vector<64x256xbf16> to vector<64x256xf32>
    %cst_564 = arith.constant dense<0.000000e+00> : vector<3x256xf32>
    %1574 = tpu.matmul %1571, %1573, %cst_564 {dimension_numbers = #tpu.dot_dimension_numbers<[1], [0], [0], [1], [0, 0, 1, 1], [], []>} : vector<3x64xf32>, vector<64x256xf32>, vector<3x256xf32> -> vector<3x256xf32>
    %c0_565 = arith.constant 0 : index
    %c0_566 = arith.constant 0 : index
    %1575 = vector.load %arg37[%c0_565, %c0_566] : memref<1x1xf32, #tpu.memory_space<vmem>>, vector<1x1xf32>
    %cst_567 = arith.constant 0.000000e+00 : f32
    %1576 = vector.broadcast %cst_567 : f32 to vector<1x1xf32>
    %1577 = arith.cmpf oge, %1575, %1576 : vector<1x1xf32>
    %cst_568 = arith.constant 1.000000e+00 : f32
    %1578 = vector.broadcast %cst_568 : f32 to vector<1x1xf32>
    %1579 = arith.cmpf olt, %1575, %1578 : vector<1x1xf32>
    %1580 = arith.andi %1577, %1579 : vector<1x1xi1>
    %cst_569 = arith.constant 1.000000e+00 : f32
    %1581 = vector.broadcast %cst_569 : f32 to vector<1x1xf32>
    %1582 = arith.select %1580, %1575, %1581 : vector<1x1xi1>, vector<1x1xf32>
    %1583 = vector.broadcast %1582 : vector<1x1xf32> to vector<3x256xf32>
    %1584 = arith.mulf %1583, %1566 : vector<3x256xf32>
    %cst_570 = arith.constant 1.000000e+00 : f32
    %1585 = vector.broadcast %cst_570 : f32 to vector<1x1xf32>
    %1586 = arith.subf %1585, %1582 : vector<1x1xf32>
    %1587 = vector.broadcast %1586 : vector<1x1xf32> to vector<3x256xf32>
    %1588 = arith.mulf %1587, %1574 : vector<3x256xf32>
    %1589 = arith.addf %1584, %1588 : vector<3x256xf32>
    %1590 = vector.shape_cast %1589 : vector<3x256xf32> to vector<1x3x256xf32>
    %c0_571 = arith.constant 0 : index
    %c0_572 = arith.constant 0 : index
    %c0_573 = arith.constant 0 : index
    %1591 = vector.load %arg38[%c0_571, %c0_572, %c0_573] : memref<1x3x256xf32, #tpu.memory_space<vmem>>, vector<1x3x256xf32>
    tpu.vector_store %arg38[%c0_571, %c0_572, %c0_573], %1590 {strides = array<i32>} : memref<1x3x256xf32, #tpu.memory_space<vmem>>, vector<1x3x256xf32>,
    return
  }
  func.func @transform_0(%arg0: i32) -> (i32, i32, i32) {
    %c0_i32 = arith.constant 0 : i32
    %c0_i32_0 = arith.constant 0 : i32
    %c0_i32_1 = arith.constant 0 : i32
    return %arg0, %c0_i32, %c0_i32_0 : i32, i32, i32
  }
  func.func @transform_1(%arg0: i32) -> (i32, i32, i32) {
    %c0_i32 = arith.constant 0 : i32
    %c0_i32_0 = arith.constant 0 : i32
    %c0_i32_1 = arith.constant 0 : i32
    return %arg0, %c0_i32, %c0_i32_0 : i32, i32, i32
  }
  func.func @transform_2(%arg0: i32) -> (i32, i32) {
    %c0_i32 = arith.constant 0 : i32
    %c0_i32_0 = arith.constant 0 : i32
    %c0_i32_1 = arith.constant 0 : i32
    return %c0_i32, %c0_i32_0 : i32, i32
  }
  func.func @transform_3(%arg0: i32) -> (i32, i32) {
    %c0_i32 = arith.constant 0 : i32
    %c0_i32_0 = arith.constant 0 : i32
    %c0_i32_1 = arith.constant 0 : i32
    return %c0_i32, %c0_i32_0 : i32, i32
  }
  func.func @transform_4(%arg0: i32) -> (i32, i32) {
    %c0_i32 = arith.constant 0 : i32
    %c0_i32_0 = arith.constant 0 : i32
    %c0_i32_1 = arith.constant 0 : i32
    return %c0_i32, %c0_i32_0 : i32, i32
  }
  func.func @transform_5(%arg0: i32) -> (i32, i32) {
    %c0_i32 = arith.constant 0 : i32
    %c0_i32_0 = arith.constant 0 : i32
    %c0_i32_1 = arith.constant 0 : i32
    return %c0_i32, %c0_i32_0 : i32, i32
  }
  func.func @transform_6(%arg0: i32) -> (i32, i32) {
    %c0_i32 = arith.constant 0 : i32
    %c0_i32_0 = arith.constant 0 : i32
    %c0_i32_1 = arith.constant 0 : i32
    return %c0_i32, %c0_i32_0 : i32, i32
  }
  func.func @transform_7(%arg0: i32) -> (i32, i32) {
    %c0_i32 = arith.constant 0 : i32
    %c0_i32_0 = arith.constant 0 : i32
    %c0_i32_1 = arith.constant 0 : i32
    return %c0_i32, %c0_i32_0 : i32, i32
  }
  func.func @transform_8(%arg0: i32) -> (i32, i32) {
    %c0_i32 = arith.constant 0 : i32
    %c0_i32_0 = arith.constant 0 : i32
    %c0_i32_1 = arith.constant 0 : i32
    return %c0_i32, %c0_i32_0 : i32, i32
  }
  func.func @transform_9(%arg0: i32) -> (i32, i32, i32) {
    %c0_i32 = arith.constant 0 : i32
    %c0_i32_0 = arith.constant 0 : i32
    %c0_i32_1 = arith.constant 0 : i32
    return %arg0, %c0_i32, %c0_i32_0 : i32, i32, i32
  }
  func.func @transform_10(%arg0: i32) -> (i32, i32, i32) {
    %c0_i32 = arith.constant 0 : i32
    %c0_i32_0 = arith.constant 0 : i32
    %c0_i32_1 = arith.constant 0 : i32
    return %arg0, %c0_i32, %c0_i32_0 : i32, i32, i32
  }
  func.func @transform_11(%arg0: i32) -> (i32, i32) {
    %c0_i32 = arith.constant 0 : i32
    %c0_i32_0 = arith.constant 0 : i32
    %c0_i32_1 = arith.constant 0 : i32
    return %c0_i32, %c0_i32_0 : i32, i32
  }
  func.func @transform_12(%arg0: i32) -> (i32, i32) {
    %c0_i32 = arith.constant 0 : i32
    %c0_i32_0 = arith.constant 0 : i32
    %c0_i32_1 = arith.constant 0 : i32
    return %c0_i32, %c0_i32_0 : i32, i32
  }
  func.func @transform_13(%arg0: i32) -> (i32, i32) {
    %c0_i32 = arith.constant 0 : i32
    %c0_i32_0 = arith.constant 0 : i32
    %c0_i32_1 = arith.constant 0 : i32
    return %c0_i32, %c0_i32_0 : i32, i32
  }
  func.func @transform_14(%arg0: i32) -> (i32, i32) {
    %c0_i32 = arith.constant 0 : i32
    %c0_i32_0 = arith.constant 0 : i32
    %c0_i32_1 = arith.constant 0 : i32
    return %c0_i32, %c0_i32_0 : i32, i32
  }
  func.func @transform_15(%arg0: i32) -> (i32, i32) {
    %c0_i32 = arith.constant 0 : i32
    %c0_i32_0 = arith.constant 0 : i32
    %c0_i32_1 = arith.constant 0 : i32
    return %c0_i32, %c0_i32_0 : i32, i32
  }
  func.func @transform_16(%arg0: i32) -> (i32, i32) {
    %c0_i32 = arith.constant 0 : i32
    %c0_i32_0 = arith.constant 0 : i32
    %c0_i32_1 = arith.constant 0 : i32
    return %c0_i32, %c0_i32_0 : i32, i32
  }
  func.func @transform_17(%arg0: i32) -> (i32, i32) {
    %c0_i32 = arith.constant 0 : i32
    %c0_i32_0 = arith.constant 0 : i32
    %c0_i32_1 = arith.constant 0 : i32
    return %c0_i32, %c0_i32_0 : i32, i32
  }
  func.func @transform_18(%arg0: i32) -> (i32, i32) {
    %c0_i32 = arith.constant 0 : i32
    %c0_i32_0 = arith.constant 0 : i32
    %c0_i32_1 = arith.constant 0 : i32
    return %c0_i32, %c0_i32_0 : i32, i32
  }
  func.func @transform_19(%arg0: i32) -> (i32, i32) {
    %c0_i32 = arith.constant 0 : i32
    %c0_i32_0 = arith.constant 0 : i32
    %c0_i32_1 = arith.constant 0 : i32
    return %c0_i32, %c0_i32_0 : i32, i32
  }
  func.func @transform_20(%arg0: i32) -> (i32, i32, i32) {
    %c0_i32 = arith.constant 0 : i32
    %c0_i32_0 = arith.constant 0 : i32
    %c0_i32_1 = arith.constant 0 : i32
    return %arg0, %c0_i32, %c0_i32_0 : i32, i32, i32
  }
  func.func @transform_21(%arg0: i32) -> (i32, i32, i32) {
    %c0_i32 = arith.constant 0 : i32
    %c0_i32_0 = arith.constant 0 : i32
    %c0_i32_1 = arith.constant 0 : i32
    return %arg0, %c0_i32, %c0_i32_0 : i32, i32, i32
  }
  func.func @transform_22(%arg0: i32) -> (i32, i32) {
    %c0_i32 = arith.constant 0 : i32
    %c0_i32_0 = arith.constant 0 : i32
    %c0_i32_1 = arith.constant 0 : i32
    return %c0_i32, %c0_i32_0 : i32, i32
  }
  func.func @transform_23(%arg0: i32) -> (i32, i32) {
    %c0_i32 = arith.constant 0 : i32
    %c0_i32_0 = arith.constant 0 : i32
    %c0_i32_1 = arith.constant 0 : i32
    return %c0_i32, %c0_i32_0 : i32, i32
  }
  func.func @transform_24(%arg0: i32) -> (i32, i32) {
    %c0_i32 = arith.constant 0 : i32
    %c0_i32_0 = arith.constant 0 : i32
    %c0_i32_1 = arith.constant 0 : i32
    return %c0_i32, %c0_i32_0 : i32, i32
  }
  func.func @transform_25(%arg0: i32) -> (i32, i32) {
    %c0_i32 = arith.constant 0 : i32
    %c0_i32_0 = arith.constant 0 : i32
    %c0_i32_1 = arith.constant 0 : i32
    return %c0_i32, %c0_i32_0 : i32, i32
  }
  func.func @transform_26(%arg0: i32) -> (i32, i32) {
    %c0_i32 = arith.constant 0 : i32
    %c0_i32_0 = arith.constant 0 : i32
    %c0_i32_1 = arith.constant 0 : i32
    return %c0_i32, %c0_i32_0 : i32, i32
  }
  func.func @transform_27(%arg0: i32) -> (i32, i32) {
    %c0_i32 = arith.constant 0 : i32
    %c0_i32_0 = arith.constant 0 : i32
    %c0_i32_1 = arith.constant 0 : i32
    return %c0_i32, %c0_i32_0 : i32, i32
  }
  func.func @transform_28(%arg0: i32) -> (i32, i32) {
    %c0_i32 = arith.constant 0 : i32
    %c0_i32_0 = arith.constant 0 : i32
    %c0_i32_1 = arith.constant 0 : i32
    return %c0_i32, %c0_i32_0 : i32, i32
  }
  func.func @transform_29(%arg0: i32) -> (i32, i32) {
    %c0_i32 = arith.constant 0 : i32
    %c0_i32_0 = arith.constant 0 : i32
    %c0_i32_1 = arith.constant 0 : i32
    return %c0_i32, %c0_i32_0 : i32, i32
  }
  func.func @transform_30(%arg0: i32) -> (i32, i32) {
    %c0_i32 = arith.constant 0 : i32
    %c0_i32_0 = arith.constant 0 : i32
    %c0_i32_1 = arith.constant 0 : i32
    return %c0_i32, %c0_i32_0 : i32, i32
  }
  func.func @transform_31(%arg0: i32) -> (i32, i32) {
    %c0_i32 = arith.constant 0 : i32
    %c0_i32_0 = arith.constant 0 : i32
    %c0_i32_1 = arith.constant 0 : i32
    return %c0_i32, %c0_i32_0 : i32, i32
  }
  func.func @transform_32(%arg0: i32) -> (i32, i32) {
    %c0_i32 = arith.constant 0 : i32
    %c0_i32_0 = arith.constant 0 : i32
    %c0_i32_1 = arith.constant 0 : i32
    return %c0_i32, %c0_i32_0 : i32, i32
  }
  func.func @transform_33(%arg0: i32) -> (i32, i32) {
    %c0_i32 = arith.constant 0 : i32
    %c0_i32_0 = arith.constant 0 : i32
    %c0_i32_1 = arith.constant 0 : i32
    return %c0_i32, %c0_i32_0 : i32, i32
  }
  func.func @transform_34(%arg0: i32) -> (i32, i32) {
    %c0_i32 = arith.constant 0 : i32
    %c0_i32_0 = arith.constant 0 : i32
    %c0_i32_1 = arith.constant 0 : i32
    return %c0_i32, %c0_i32_0 : i32, i32
  }
  func.func @transform_35(%arg0: i32) -> (i32, i32) {
    %c0_i32 = arith.constant 0 : i32
    %c0_i32_0 = arith.constant 0 : i32
    %c0_i32_1 = arith.constant 0 : i32
    return %c0_i32, %c0_i32_0 : i32, i32
  }
  func.func @transform_36(%arg0: i32) -> (i32, i32) {
    %c0_i32 = arith.constant 0 : i32
    %c0_i32_0 = arith.constant 0 : i32
    %c0_i32_1 = arith.constant 0 : i32
    return %c0_i32, %c0_i32_0 : i32, i32
  }
  func.func @transform_37(%arg0: i32) -> (i32, i32, i32) {
    %c0_i32 = arith.constant 0 : i32
    %c0_i32_0 = arith.constant 0 : i32
    %c0_i32_1 = arith.constant 0 : i32
    return %arg0, %c0_i32, %c0_i32_0 : i32, i32, i32
  }
}

</mosaic_0001>

<bundles_post_ra>
// kernel: fwd.1
= control target key start
LH: loop header
LB: loop body
LE: loop exit
PB: predicated region body
PF: predicated region fallthrough
CT: control target
= control target key end

     0   :  { %s5797_s6 = smov 1   ;;  %s5798_s10 = smov 2   ;;  %s7934_s0 = inlined_call_operand.smem [shape: u32[38], index: -1, kind: input, shape index: {}] }
   0x1   :  { %s5885_s5 = sld [smem:[%s7934_s0]]   ;;  %s5799_s14 = smov 3  }
   0x2   :  { %s5890_s9 = sld [smem:[%s7934_s0 + %s5797_s6]]   ;;  %s5800_s18 = smov 4  }
   0x3   :  { %s5895_s13 = sld [smem:[%s7934_s0 + %s5798_s10]]   ;;  %s5801_s22 = smov 5  }
   0x4   :  { %s5900_s17 = sld [smem:[%s7934_s0 + %s5799_s14]]   ;;  %s5802_s26 = smov 6  }
   0x5   :  { %s5905_s21 = sld [smem:[%s7934_s0 + %s5800_s18]]   ;;  %s5803_s30 = smov 7  }
   0x6   :  { %s5910_s25 = sld [smem:[%s7934_s0 + %s5801_s22]]   ;;  %s5804_s4 = smov 8  }
   0x7   :  { %8025 = sst [smem:[#allocation10_spill]] %s5885_s5  ;;  %s5805_s10 = smov 9  }
   0x8   :  { %8026 = sst [smem:[#allocation11_spill]] %s5890_s9  ;;  %s5806_s15 = smov 10  }
   0x9   :  { %8027 = sst [smem:[#allocation12_spill]] %s5895_s13  ;;  %s5807_s20 = smov 11  }
   0xa   :  { %8028 = sst [smem:[#allocation13_spill]] %s5900_s17  ;;  %s5809_s1 = smov 13  }
   0xb   :  { %8029 = sst [smem:[#allocation14_spill]] %s5905_s21  ;;  %s5810_s7 = smov 14  }
   0xc   :  { %s5915_s29 = sld [smem:[%s7934_s0 + %s5802_s26]]   ;;  %s5808_s26 = smov 12  }
   0xd   :  { %s5920_s3 = sld [smem:[%s7934_s0 + %s5803_s30]]   ;;  %s5812_s22 = smov 16  }
   0xe   :  { %s5925_s8 = sld [smem:[%s7934_s0 + %s5804_s4]]   ;;  %s5813_s28 = smov 17  }
   0xf   :  { %s5930_s14 = sld [smem:[%s7934_s0 + %s5805_s10]]  }
  0x10   :  { %s5935_s19 = sld [smem:[%s7934_s0 + %s5806_s15]]   ;;  %s5811_s15 = smov 15  }
  0x11   :  { %s5940_s24 = sld [smem:[%s7934_s0 + %s5807_s20]]  }
  0x12   :  { %s5945_s30 = sld [smem:[%s7934_s0 + %s5808_s26]]  }
  0x13   :  { %8030 = sst [smem:[#allocation15_spill]] %s5920_s3 }
  0x14   :  { %8031 = sst [smem:[#allocation16_spill]] %s5925_s8 }
  0x15   :  { %8032 = sst [smem:[#allocation17_spill]] %s5930_s14 }
  0x16   :  { %8033 = sst [smem:[#allocation18_spill]] %s5935_s19 }
  0x17   :  { %s5950_s6 = sld [smem:[%s7934_s0 + %s5809_s1]]   ;;  %s5833_s1 = smov 37  }
  0x18   :  { %s5955_s12 = sld [smem:[%s7934_s0 + %s5810_s7]]   ;;  %s5814_s7 = smov 18  }
  0x19   :  { %s5960_s20 = sld [smem:[%s7934_s0 + %s5811_s15]]   ;;  %s5815_s15 = smov 19  }
  0x1a   :  { %s5965_s27 = sld [smem:[%s7934_s0 + %s5812_s22]]   ;;  %s5816_s22 = smov 20  }
  0x1b   :  { %s5970_s4 = sld [smem:[%s7934_s0 + %s5813_s28]]   ;;  %s5817_s28 = smov 21  }
  0x1c   :  { %s5985_s19 = sld [smem:[%s7934_s0 + %s5816_s22]]   ;;  %s5820_s22 = smov 24  }
  0x1d   :  { %8034 = sst [smem:[#allocation19_spill]] %s5950_s6 }
  0x1e   :  { %8035 = sst [smem:[#allocation20_spill]] %s5955_s12 }
  0x1f   :  { %8036 = sst [smem:[#allocation21_spill]] %s5960_s20 }
  0x20   :  { %8037 = sst [smem:[#allocation22_spill]] %s5965_s27 }
  0x21   :  { %8038 = sst [smem:[#allocation23_spill]] %s5970_s4 }
  0x22   :  { %s5975_s12 = sld [smem:[%s7934_s0 + %s5814_s7]]   ;;  %s5818_s7 = smov 22  }
  0x23   :  { %s5980_s20 = sld [smem:[%s7934_s0 + %s5815_s15]]   ;;  %s5819_s15 = smov 23  }
  0x24   :  { %8041 = sst [smem:[#allocation26_spill]] %s5985_s19 }
  0x25   :  { %s5990_s4 = sld [smem:[%s7934_s0 + %s5817_s28]]   ;;  %s5821_s28 = smov 25  }
  0x26   :  { %s6005_s19 = sld [smem:[%s7934_s0 + %s5820_s22]]   ;;  %s5824_s22 = smov 28  }
  0x27   :  { %s6068_s14 = sld [smem:[%s7934_s0 + %s5833_s1]]  }
  0x28   :  { %8039 = sst [smem:[#allocation24_spill]] %s5975_s12 }
  0x29   :  { %8040 = sst [smem:[#allocation25_spill]] %s5980_s20 }
  0x2a   :  { %s5995_s12 = sld [smem:[%s7934_s0 + %s5818_s7]]   ;;  %s5822_s7 = smov 26  }
  0x2b   :  { %8042 = sst [smem:[#allocation27_spill]] %s5990_s4 }
  0x2c   :  { %s6000_s20 = sld [smem:[%s7934_s0 + %s5819_s15]]   ;;  %s5823_s15 = smov 27  }
  0x2d   :  { %8045 = sst [smem:[#allocation30_spill]] %s6005_s19 }
  0x2e   :  { %s6010_s4 = sld [smem:[%s7934_s0 + %s5821_s28]]   ;;  %s5825_s28 = smov 29  }
  0x2f   :  { %s6025_s19 = sld [smem:[%s7934_s0 + %s5824_s22]]   ;;  %s5828_s22 = smov 32  }
  0x30   :  { %8043 = sst [smem:[#allocation28_spill]] %s5995_s12 }
  0x31   :  { %s6015_s12 = sld [smem:[%s7934_s0 + %s5822_s7]]   ;;  %s5826_s7 = smov 30  }
  0x32   :  { %8044 = sst [smem:[#allocation29_spill]] %s6000_s20 }
  0x33   :  { %s6020_s20 = sld [smem:[%s7934_s0 + %s5823_s15]]   ;;  %s5827_s15 = smov 31  }
  0x34   :  { %8046 = sst [smem:[#allocation31_spill]] %s6010_s4 }
  0x35   :  { %8049 = sst [smem:[#allocation34_spill]] %s6025_s19 }
  0x36   :  { %s6030_s4 = sld [smem:[%s7934_s0 + %s5825_s28]]   ;;  %s5829_s28 = smov 33  }
  0x37   :  { %8047 = sst [smem:[#allocation32_spill]] %s6015_s12 }
  0x38   :  { %s6035_s12 = sld [smem:[%s7934_s0 + %s5826_s7]]   ;;  %s5830_s7 = smov 34  }
  0x39   :  { %8048 = sst [smem:[#allocation33_spill]] %s6020_s20 }
  0x3a   :  { %s6040_s20 = sld [smem:[%s7934_s0 + %s5827_s15]]   ;;  %s5831_s15 = smov 35  }
  0x3b   :  { %s6045_s19 = sld [smem:[%s7934_s0 + %s5828_s22]]   ;;  %s5832_s22 = smov 36  }
  0x3c   :  { %8050 = sst [smem:[#allocation35_spill]] %s6030_s4 }
  0x3d   :  { %s6050_s4 = sld [smem:[%s7934_s0 + %s5829_s28]]  }
  0x3e   :  { %8051 = sst [smem:[#allocation36_spill]] %s6035_s12 }
  0x3f   :  { %s6055_s12 = sld [smem:[%s7934_s0 + %s5830_s7]]  }
  0x40   :  { %8052 = sst [smem:[#allocation37_spill]] %s6040_s20 }
  0x41   :  { %8053 = sst [smem:[#allocation38_spill]] %s6045_s19 }
  0x42   :  { %s6060_s27 = sld [smem:[%s7934_s0 + %s5831_s15]]  }
  0x43   :  { %8054 = sst [smem:[#allocation39_spill]] %s6050_s4 }
  0x44   :  { %s5176_s19 = sld [smem:[%s7934_s0 + %s5832_s22]]  }
  0x4a   :  { %v80_v0 = vstv %s5176_s19 }
  0x4b   :  { %81 = vst [vmem:[#allocation2] sm:$0x1] %v80_v0 }
  0x4c   :  { %82 = vsyncpa [#allocation4], 0 }
  0x4d   :  { %83 = vsyncpa [#allocation6], 0  ;;  %s6070_s7 = smov 0  }
  0x4e LB: > { %s8055_s21 = sld [smem:[#allocation14_spill]]  ;;  %s8056_s20 = sld [smem:[#allocation37_spill]]  ;;  %s5795_s7 = sphi %s6070_s7, %s89_s7  }
  0x4f   : > { %s8057_s17 = sld [smem:[#allocation13_spill]]  ;;  %s8058_s13 = sld [smem:[#allocation12_spill]] }
  0x50   : > { %s8059_s8 = sld [smem:[#allocation16_spill]]  ;;  %s8060_s4 = sld [smem:[#allocation39_spill]] }
  0x51   : > { %s8061_s3 = sld [smem:[#allocation15_spill]]  ;;  %s5834_s10 = smov [#allocation5]  }
  0x52   : > { %s1025_s11 = sshll.u32 %s5834_s10, 4  ;;  %s6076_s0 = sadd.s32 4294967295, %s5795_s7   ;;  %s1026_s11 = int_to_ptr.vmem [resolvable:$true] %s1025_s11 }
  0x53   : > { %p5180_p0 = scmp.ge.s32.totalorder %s5795_s7, 1  ;;  %p927_p1 = scmp.lt.s32.totalorder %s5795_s7, 3 }
  0x54   : > { %p7950_p2 = scmp.eq.s32.totalorder %s6076_s0, 0  ;;  %s5835_s15 = smov [#allocation3]  }
  0x55   : > { %p6081_p3 = pnand %p5180_p0, %p927_p1  ;;  %s939_s16 = sshll.u32 %s5835_s15, 4  ;;  %s6093_s16 = int_to_ptr.vmem [resolvable:$true] %s939_s16 }
  0x56   : > { %s5836_s22 = smov [#allocation7]   ;;  %s5697_s26 = scalar_lea.hbm %s8056_s20, 64 }
  0x57   : > { %s8062_s19 = scalar_select %p6081_p3, 1, 0 }
  0x58   : > { %p5494_p4 = pneg %p6081_p3  ;;  %s1039_s23 = sshll.u32 %s5836_s22, 4  ;;  %s6095_s23 = int_to_ptr.vmem [resolvable:$true] %s1039_s23 }
  0x59   : > { %p5698_p6 = scmp.ne.s32.totalorder %s8056_s20, %s5697_s26  ;;  %p5704_p10 = scmp.lt.u32.totalorder %s5697_s26, %s8056_s20 }
  0x5a   : > { %p6089_p5 = pnand %p7950_p2, %p5494_p4 }
  0x5c   : > { %p6101_p7 = pneg %p6089_p5 }
  0x5e   : > { %p5700_p8 = pnand %p6101_p7, %p5698_p6 }
  0x60   : > { %p5701_p9 = pneg %p5700_p8 }
  0x62   : > { %p5706_p11 = pnand %p5704_p10, %p5701_p9 }
  0x64   : > { %5709 = shalt.err (!%p5706_p11)
}
  0x65   : > { %s5710_s28 = scalar_lea.vmem %s1026_s11, 64  ;;  %p5718_p1 = scmp.lt.s32.totalorder %s1026_s11, %s1026_s11 }
  0x66   : > { %p5711_p12 = scmp.ne.s32.totalorder %s1026_s11, %s5710_s28  ;;  %p5719_p4 = scmp.lt.s32.totalorder %s5710_s28, %s5710_s28 }
  0x68   : > { %p5713_p13 = pnand %p5711_p12, %p6101_p7  ;;  %p5720_p2 = por %p5719_p4, %p5718_p1 }
  0x6a   : > { %p5714_p0 = pneg %p5713_p13 }
  0x6c   : > { %p5721_p3 = pnand %p5720_p2, %p5714_p0 }
  0x6e   : > { %5724 = shalt.err (!%p5721_p3)
}
  0x6f   : > { %5500 = dma.hbm_to_vmem [thread:$0]  (!%p6089_p5), %s8056_s20, 64, %s1026_s11, [#allocation6]  }
  0x70   : > { %s5725_s2 = scalar_lea.hbm %s8058_s13, 512 }
  0x71   : > { %p5726_p6 = scmp.ne.s32.totalorder %s8058_s13, %s5725_s2  ;;  %p5732_p10 = scmp.lt.u32.totalorder %s5725_s2, %s8058_s13 }
  0x73   : > { %p5728_p8 = pnand %p5726_p6, %p6101_p7 }
  0x75   : > { %p5729_p9 = pneg %p5728_p8 }
  0x77   : > { %p5734_p11 = pnand %p5732_p10, %p5729_p9 }
  0x79   : > { %5737 = shalt.err (!%p5734_p11)
}
  0x7a   : > { %s5738_s10 = scalar_lea.vmem %s6093_s16, 512  ;;  %p5746_p13 = scmp.lt.s32.totalorder %s6093_s16, %s6093_s16 }
  0x7b   : > { %p5739_p2 = scmp.ne.s32.totalorder %s6093_s16, %s5738_s10  ;;  %p5747_p0 = scmp.lt.s32.totalorder %s5738_s10, %s5738_s10 }
  0x7d   : > { %p5741_p3 = pnand %p5739_p2, %p6101_p7  ;;  %p5748_p1 = por %p5747_p0, %p5746_p13 }
  0x7f   : > { %p5742_p12 = pneg %p5741_p3 }
  0x81   : > { %p5749_p4 = pnand %p5748_p1, %p5742_p12 }
  0x83   : > { %5752 = shalt.err (!%p5749_p4)
}
  0x84   : > { %s5837_s11 = smov 128   ;;  %s5838_s15 = smov 8  }
  0x85   : > { %5497 = dma.hbm_to_vmem [thread:$0]  (!%p6089_p5), %s8058_s13, 512, %s6093_s16, [#allocation4], %s5837_s11, %s5837_s11, %s5838_s15  }
  0x86   : > { %s5753_s22 = scalar_lea.hbm %s8060_s4, 64 }
  0x87   : > { %p5754_p6 = scmp.ne.s32.totalorder %s8060_s4, %s5753_s22  ;;  %p5760_p10 = scmp.lt.u32.totalorder %s5753_s22, %s8060_s4 }
  0x89   : > { %p5756_p8 = pnand %p5754_p6, %p6101_p7 }
  0x8b   : > { %p5757_p9 = pneg %p5756_p8 }
  0x8d   : > { %p5762_p11 = pnand %p5760_p10, %p5757_p9 }
  0x8f   : > { %5765 = shalt.err (!%p5762_p11)
}
  0x90   : > { %s5766_s26 = scalar_lea.vmem %s6095_s23, 64  ;;  %p5774_p13 = scmp.lt.s32.totalorder %s6095_s23, %s6095_s23 }
  0x91   : > { %p5767_p2 = scmp.ne.s32.totalorder %s6095_s23, %s5766_s26  ;;  %p5775_p0 = scmp.lt.s32.totalorder %s5766_s26, %s5766_s26 }
  0x93   : > { %p5769_p3 = pnand %p5767_p2, %p6101_p7  ;;  %p5776_p1 = por %p5775_p0, %p5774_p13 }
  0x95   : > { %p5770_p12 = pneg %p5769_p3 }
  0x97   : > { %p5777_p4 = pnand %p5776_p1, %p5770_p12 }
  0x99   : > { %5780 = shalt.err (!%p5777_p4)
}
  0x9a   : > { %5503 = dma.hbm_to_vmem [thread:$0]  (!%p6089_p5), %s8060_s4, 64, %s6095_s23, [#allocation6]  }
  0x9b   : > { %p8065_p6 = scmp.ne.s32.totalorder %s8062_s19, 0 }
  0x9c   : > { %p8066_p8 = scmp.eq.s32.totalorder (!%p8065_p6), %s6076_s0, 0 }
  0x9d   : > { %1098 = sbr.rel (%p8065_p6) target bundleno = 4861 (0x12fd), region = 168 }
  0xa4   : > { %5786 = dma.done.wait (%p8066_p8), [#allocation4], 512   ;;  %p8067_p7 = pmov %p8066_p8 }
  0xa6   : > { %5788 = vsyncadd (%p8067_p7), [#allocation4], 4294966784  ;;  %p8068_p9 = pmov %p8067_p7 }
  0xa7   : > { %p8069_p10 = pmov %p8067_p7 }
  0xa8   : > { %5790 = dma.done.wait (%p8068_p9), [#allocation6], 128  }
  0xa9   : > { %5792 = vsyncadd (%p8069_p10), [#allocation6], 4294967168  ;;  %s8070_s5 = sld [smem:[#allocation10_spill]]  ;;  %v5839_v1 = vmov 0   ;;  %v1370_v2 = vld [vmem:[%s8061_s3 + $0x10] sm:$0xff]  ;;  %v1368_v3 = vld [vmem:[%s8061_s3] sm:$0xff] }
  0xaa   : > { %5599 = vset.pattern.permute.xlu1 %v5839_v1  ;;  %5598 = vset.pattern.permute.xlu0 %v5839_v1  ;;  %v1371_v4 = vld [vmem:[%s8061_s3 + $0x18] sm:$0xff]  ;;  %v1369_v5 = vld [vmem:[%s8061_s3 + $0x8] sm:$0xff]  ;;  %p1212_p5 = scmp.lt.s32.totalorder %s6076_s0, 1  ;;  %v1245_v7 = vld [vmem:[%s5910_s25] sm:$0xff]  ;;  %vm7975_vm0 = vcmask 261120   ;;  %s8071_s9 = sld [smem:[#allocation11_spill]] }
  0xab   : > { %1384 = vperm.xlu1 %5599, %v1370_v2   ;;  %1374 = vperm.xlu0 %5598, %v1368_v3   ;;  %v1249_v9 = vld [vmem:[%s5910_s25 + $0x20] sm:$0xff]  ;;  %v1246_v10 = vld [vmem:[%s5910_s25 + $0x8] sm:$0xff]  ;;  %v1247_v15 = vld [vmem:[%s5910_s25 + $0x10] sm:$0xff]  ;;  %vm7971_vm1 = vcmask 130048   ;;  %s5840_s18 = smov 5   ;;  %s5841_s23 = smov 117  }
  0xac   : > { %s8338_s0 = smov (!%p1212_p5, %s6076_s0), 1  ;;  %v1250_v14 = vld [vmem:[%s5910_s25 + $0x28] sm:$0xff]  ;;  %v1248_v20 = vld [vmem:[%s5910_s25 + $0x18] sm:$0xff]  ;;  %v1251_v21 = vld [vmem:[%s5910_s25 + $0x30] sm:$0xff]  ;;  %s5842_s1 = smov 4   ;;  %vm1540_vm10 = vcmask 39936  }
  0xad   : > { %v1252_v26 = vld [vmem:[%s5910_s25 + $0x38] sm:$0xff]  ;;  %v1364_v35 = vld [vmem:[#allocation3] sm:$0xff]  ;;  %v1365_v43 = vld [vmem:[#allocation3 + $0x8] sm:$0xff]  ;;  %s5843_s28 = smov 116   ;;  %s7954_s2 = smov 15  }
  0xae   : > { %v1366_v33 = vld [vmem:[#allocation3 + $0x10] sm:$0xff]  ;;  %v1367_v41 = vld [vmem:[#allocation3 + $0x18] sm:$0xff]  ;;  %s7996_s10 = smov 127   ;;  %s5846_s11 = smov 3  }
  0xaf   : > { %1389 = vperm.xlu1 %5599, %v1371_v4   ;;  %1379 = vperm.xlu0 %5598, %v1369_v5   ;;  %s1214_s19 = scalar_lea.vmem %s8070_s5, %s8338_s0  ;;  %v1332_v5 = vld [vmem:[%s5915_s29] sm:$0xff]  ;;  %s5847_s15 = smov 115  }
  0xb0   : > { %v6165_v6 = vld [vmem:[%s1214_s19] ss:$0 sm:$0xff]  ;;  %s1217_s16 = scalar_lea.vmem %s8071_s9, %s8338_s0  ;;  %s5848_s22 = smov 13  }
  0xb1   : > { %v1267_v8 = vmul.f32 %v6165_v6, %v1245_v7  ;;  %v1271_v12 = vmul.f32 %v6165_v6, %v1249_v9  ;;  %v1268_v13 = vmul.f32 %v6165_v6, %v1246_v10  ;;  %v1272_v17 = vmul.f32 %v6165_v6, %v1250_v14  ;;  %v6193_v31 = vld [vmem:[%s1217_s16] ss:$0 sm:$0xff]  ;;  %v1333_v10 = vld [vmem:[%s5915_s29 + $0x8] sm:$0xff]  ;;  %s5849_s26 = smov 125   ;;  %s7990_s19 = smov 1  }
  0xb2   : > { %v1269_v19 = vmul.f32 %v6165_v6, %v1247_v15  ;;  %v1270_v23 = vmul.f32 %v6165_v6, %v1248_v20  ;;  %v1273_v25 = vmul.f32 %v6165_v6, %v1251_v21  ;;  %v1274_v28 = vmul.f32 %v6165_v6, %v1252_v26  ;;  %v1336_v9 = vld [vmem:[%s5915_s29 + $0x20] sm:$0xff]  ;;  %v1337_v15 = vld [vmem:[%s5915_s29 + $0x28] sm:$0xff]  ;;  %v1335_v21 = vld [vmem:[%s5915_s29 + $0x18] sm:$0xff]  ;;  %s7952_s16 = smov 113   ;;  %s8096_s6 = sld [smem:[#allocation19_spill]] }
  0xb3   : > { %v1284_v11 = vsel %vm7975_vm0, %v1267_v8, 0.0  ;;  %v1296_v16 = vsel %vm7975_vm0, %v1271_v12, 0.0  ;;  %v1287_v18 = vsel %vm7975_vm0, %v1268_v13, 0.0  ;;  %v1299_v22 = vsel %vm7975_vm0, %v1272_v17, 0.0  ;;  %s8153_s3 = smov 57   ;;  %s8154_s4 = smov 121  }
  0xb4   : > { %v1290_v24 = vsel %vm7975_vm0, %v1269_v19, 0.0  ;;  %v1293_v27 = vsel %vm7975_vm0, %v1270_v23, 0.0  ;;  %v1302_v29 = vsel %vm7975_vm0, %v1273_v25, 0.0  ;;  %v1305_v30 = vsel %vm7975_vm0, %v1274_v28, 0.0  ;;  %s8158_s5 = smov 120   ;;  %s8161_s9 = smov 119  }
  0xb5   : > { %s8162_s13 = smov 8   ;;  %s8164_s20 = smov 127  }
  0xce   : > { %1285 = vadd.xlane.f32.xlu0 %v1284_v11 }
  0xd2   : > { %1297 = vadd.xlane.f32.xlu0 %v1296_v16  ;;  %v1334_v16 = vld [vmem:[%s5915_s29 + $0x10] sm:$0xff] }
  0xd3   : > { %1288 = vadd.xlane.f32.xlu1 %v1287_v18 }
  0xd6   : > { %1300 = vadd.xlane.f32.xlu0 %v1299_v22  ;;  %v1338_v22 = vld [vmem:[%s5915_s29 + $0x30] sm:$0xff] }
  0xd7   : > { %1291 = vadd.xlane.f32.xlu1 %v1290_v24 }
  0xda   : > { %1294 = vadd.xlane.f32.xlu0 %v1293_v27  ;;  %v1339_v27 = vld [vmem:[%s5915_s29 + $0x38] sm:$0xff] }
  0xdb   : > { %1303 = vadd.xlane.f32.xlu1 %v1302_v29 }
  0xde   : > { %1306 = vadd.xlane.f32.xlu0 %v1305_v30 }
 0x12a   : > { %v1385_v32 = vpop.permute.xlu1 %1384  ;;  %v1375_v34 = vpop.permute.xlu0 %1374 }
 0x12b   : > { %v1400_v36 = vmul.f32 %v6193_v31, %v1385_v32  ;;  %v1398_v37 = vmul.f32 %v6193_v31, %v1375_v34 }
 0x12d   : > { %v1404_v38 = vadd.f32 %v1400_v36, %v1366_v33  ;;  %v1402_v39 = vadd.f32 %v1398_v37, %v1364_v35 }
 0x12e   : > { %v1390_v40 = vpop.permute.xlu1 %1389  ;;  %v1380_v42 = vpop.permute.xlu0 %1379 }
 0x12f   : > { %v1408_v44 = vmul.f32 0.2, %v1404_v38  ;;  %v1406_v45 = vmul.f32 0.2, %v1402_v39  ;;  %v1401_v46 = vmul.f32 %v6193_v31, %v1390_v40  ;;  %v1399_v47 = vmul.f32 %v6193_v31, %v1380_v42 }
 0x131   : > { %v1405_v48 = vadd.f32 %v1401_v46, %v1367_v41  ;;  %v1403_v49 = vadd.f32 %v1399_v47, %v1365_v43  ;;  %v6199_v50 = vmax.f32 %v1402_v39, %v1406_v45  ;;  %v6203_v54 = vmax.f32 %v1404_v38, %v1408_v44 }
 0x133   : > { %v1409_v51 = vmul.f32 0.2, %v1405_v48  ;;  %v1407_v52 = vmul.f32 0.2, %v1403_v49  ;;  %v1415_v53 = vsel %vm7971_vm1, %v6199_v50, 0.0  ;;  %v1421_v57 = vsel %vm7971_vm1, %v6203_v54, 0.0 }
 0x134   : > { %1416 = vadd.xlane.f32.xlu1 %v1415_v53  ;;  %v1432_v59 = vmul.f32 %v6199_v50, %v6199_v50  ;;  %v1434_v63 = vmul.f32 %v6203_v54, %v6203_v54 }
 0x135   : > { %v6205_v55 = vmax.f32 %v1403_v49, %v1407_v52  ;;  %v6211_v58 = vmax.f32 %v1405_v48, %v1409_v51 }
 0x136   : > { %v1436_v61 = vsel %vm7971_vm1, %v1432_v59, 0.0  ;;  %v1442_v2 = vsel %vm7971_vm1, %v1434_v63, 0.0 }
 0x137   : > { %v1418_v56 = vsel %vm7971_vm1, %v6205_v55, 0.0  ;;  %v1424_v60 = vsel %vm7971_vm1, %v6211_v58, 0.0  ;;  %v1433_v62 = vmul.f32 %v6205_v55, %v6205_v55  ;;  %v1435_v3 = vmul.f32 %v6211_v58, %v6211_v58 }
 0x138   : > { %1419 = vadd.xlane.f32.xlu0 %v1418_v56  ;;  %1422 = vadd.xlane.f32.xlu1 %v1421_v57 }
 0x139   : > { %v1439_v0 = vsel %vm7971_vm1, %v1433_v62, 0.0  ;;  %v1445_v4 = vsel %vm7971_vm1, %v1435_v3, 0.0 }
 0x13c   : > { %1425 = vadd.xlane.f32.xlu0 %v1424_v60  ;;  %1437 = vadd.xlane.f32.xlu1 %v1436_v61 }
 0x140   : > { %1440 = vadd.xlane.f32.xlu0 %v1439_v0  ;;  %1443 = vadd.xlane.f32.xlu1 %v1442_v2 }
 0x144   : > { %1446 = vadd.xlane.f32.xlu0 %v1445_v4 }
 0x15b   : > { %v1286_v7 = vpop.xlane.xlu0 %1285 }
 0x15c   : > { %v1348_v8 = vadd.f32 %v1332_v5, %v1286_v7 }
 0x15e   : > { %1482 = vperm.xlu1 %5599, %v1348_v8  }
 0x15f   : > { %v1298_v11 = vpop.xlane.xlu0 %1297 }
 0x160   : > { %v1352_v12 = vadd.f32 %v1336_v9, %v1298_v11  ;;  %v1289_v13 = vpop.xlane.xlu1 %1288 }
 0x161   : > { %v1349_v14 = vadd.f32 %v1333_v10, %v1289_v13 }
 0x162   : > { %1506 = vperm.xlu1 %5599, %v1352_v12  }
 0x163   : > { %v1301_v17 = vpop.xlane.xlu0 %1300  ;;  %1487 = vperm.xlu0 %5598, %v1349_v14  }
 0x164   : > { %v1353_v18 = vadd.f32 %v1337_v15, %v1301_v17  ;;  %v1292_v19 = vpop.xlane.xlu1 %1291 }
 0x165   : > { %v1350_v20 = vadd.f32 %v1334_v16, %v1292_v19 }
 0x166   : > { %1511 = vperm.xlu1 %5599, %v1353_v18  }
 0x167   : > { %v1295_v23 = vpop.xlane.xlu0 %1294  ;;  %1492 = vperm.xlu0 %5598, %v1350_v20  }
 0x168   : > { %v1351_v24 = vadd.f32 %v1335_v21, %v1295_v23  ;;  %v1304_v25 = vpop.xlane.xlu1 %1303 }
 0x169   : > { %v1354_v26 = vadd.f32 %v1338_v22, %v1304_v25 }
 0x16a   : > { %1497 = vperm.xlu1 %5599, %v1351_v24  }
 0x16b   : > { %v1307_v28 = vpop.xlane.xlu0 %1306  ;;  %1516 = vperm.xlu0 %5598, %v1354_v26  }
 0x16c   : > { %v1355_v29 = vadd.f32 %v1339_v27, %v1307_v28 }
 0x16e   : > { %1521 = vperm.xlu1 %5599, %v1355_v29  }
 0x1c1   : > { %v1417_v30 = vpop.xlane.xlu1 %1416 }
 0x1c2   : > { %v1428_v34 = vmul.f32 0.0625, %v1417_v30 }
 0x1c4   : > { %v1452_v39 = vmul.f32 %v1428_v34, %v1428_v34  ;;  %v1464_v5 = vsub.f32 %v6199_v50, %v1428_v34  ;;  %v1800_v34 = vld [vmem:[%s8055_s21 + $0x8] sm:$0xff] }
 0x1c5   : > { %v1420_v32 = vpop.xlane.xlu0 %1419  ;;  %v1423_v33 = vpop.xlane.xlu1 %1422 }
 0x1c6   : > { %v1429_v35 = vmul.f32 0.0625, %v1420_v32  ;;  %v1430_v36 = vmul.f32 0.0625, %v1423_v33 }
 0x1c8   : > { %v1453_v42 = vmul.f32 %v1429_v35, %v1429_v35  ;;  %v1454_v43 = vmul.f32 %v1430_v36, %v1430_v36  ;;  %v1465_v9 = vsub.f32 %v6205_v55, %v1429_v35  ;;  %v1466_v50 = vsub.f32 %v6203_v54, %v1430_v36  ;;  %v5602_v54 = vld [vmem:[%s8057_s17 + $0x4] ss:$12 sps:$4 sm:$0xff]   ;;  %v1802_v36 = vld [vmem:[%s8055_s21 + $0x18] sm:$0xff] }
 0x1c9   : > { %v1426_v37 = vpop.xlane.xlu0 %1425  ;;  %v1438_v38 = vpop.xlane.xlu1 %1437  ;;  %1891 = vmatprep.mubr.bf16.mxu0 %v5602_v54  ;;  %v1799_v35 = vld [vmem:[%s8055_s21] sm:$0xff] }
 0x1ca   : > { %v1448_v40 = vmul.f32 0.0625, %v1438_v38  ;;  %v1431_v46 = vmul.f32 0.0625, %v1426_v37  ;;  %v1801_v37 = vld [vmem:[%s8055_s21 + $0x10] sm:$0xff]  ;;  %v1958_v38 = vld [vmem:[%s8059_s8 + $0x8] sm:$0xff]  ;;  %s8165_s21 = sld [smem:[#allocation21_spill]] }
 0x1cc   : > { %v1456_v41 = vsub.f32 %v1448_v40, %v1452_v39  ;;  %v1455_v57 = vmul.f32 %v1431_v46, %v1431_v46  ;;  %v1467_v22 = vsub.f32 %v6211_v58, %v1431_v46  ;;  %v5605_v58 = vld [vmem:[%s8057_s17 + $0x8] ss:$12 sps:$4 sm:$0xff]   ;;  %v1957_v39 = vld [vmem:[%s8059_s8] sm:$0xff]  ;;  %v1960_v40 = vld [vmem:[%s8059_s8 + $0x18] sm:$0xff] }
 0x1cd   : > { %v1441_v44 = vpop.xlane.xlu0 %1440  ;;  %v1444_v45 = vpop.xlane.xlu1 %1443  ;;  %5379 = vmatprep.mubr.msk.bf16.mxu1 %vm7975_vm0, %v5605_v58 }
 0x1ce   : > { %v1460_v47 = vmax.f32 %v1456_v41, 0.0  ;;  %v1449_v48 = vmul.f32 0.0625, %v1441_v44  ;;  %v1450_v49 = vmul.f32 0.0625, %v1444_v45  ;;  %v1959_v41 = vld [vmem:[%s8059_s8 + $0x10] sm:$0xff]  ;;  %s8160_s8 = smov 55  }
 0x1d0   : > { %v1468_v51 = vadd.f32 1e-05, %v1460_v47  ;;  %v1457_v52 = vsub.f32 %v1449_v48, %v1453_v42  ;;  %v1458_v53 = vsub.f32 %v1450_v49, %v1454_v43  ;;  %v1239_v42 = vlaneseq  ;;  %v1253_v49 = vld [vmem:[%s5910_s25 + $0x40] sm:$0xff] }
 0x1d1   : > { %v1447_v56 = vpop.xlane.xlu0 %1446 }
 0x1d2   : > { %5656 = vrsqrt.f32 %v1468_v51  ;;  %v1461_v59 = vmax.f32 %v1457_v52, 0.0  ;;  %v1451_v60 = vmul.f32 0.0625, %v1447_v56  ;;  %v1462_v62 = vmax.f32 %v1458_v53, 0.0  ;;  %v1255_v53 = vld [vmem:[%s5910_s25 + $0x50] sm:$0xff] }
 0x1d3   : > { %v6276_v43 = vand.u32 127, %v1239_v42  ;;  %v6292_v51 = vshrl.u32 %v1239_v42, 7  ;;  %v1275_v52 = vmul.f32 %v6165_v6, %v1253_v49 }
 0x1d4   : > { %v1469_v61 = vadd.f32 1e-05, %v1461_v59  ;;  %v1459_v63 = vsub.f32 %v1451_v60, %v1455_v57  ;;  %v1470_v2 = vadd.f32 1e-05, %v1462_v62  ;;  %v1254_v57 = vld [vmem:[%s5910_s25 + $0x48] sm:$0xff] }
 0x1d5   : > { %v1242_v44 = vshra.s32 %v6276_v43, 2  ;;  %v1241_v45 = vand.u32 3, %v6276_v43  ;;  %v6297_v56 = vsub.s32 0, %v6292_v51  ;;  %v1308_v60 = vsel %vm7975_vm0, %v1275_v52, 0.0 }
 0x1d6   : > { %5658 = vrsqrt.f32 %v1469_v61  ;;  %v1463_v0 = vmax.f32 %v1459_v63, 0.0  ;;  %v1277_v61 = vmul.f32 %v6165_v6, %v1255_v53  ;;  %v1276_v62 = vmul.f32 %v6165_v6, %v1254_v57 }
 0x1d7   : > { %5660 = vrsqrt.f32 %v1470_v2  ;;  %v1549_v46 = vadd.s32 4294967295, %v1242_v44  ;;  %v6280_v47 = vadd.s32 4294967295, %v1241_v45  ;;  %v6306_v2 = vadd.s32 1, %v1241_v45 }
 0x1d8   : > { %v1471_v3 = vadd.f32 1e-05, %v1463_v0  ;;  %v1256_v0 = vld [vmem:[%s5910_s25 + $0x58] sm:$0xff]  ;;  %vm1651_vm8 = vcmp.ge.s32.totalorder %v1242_v44, 0  ;;  %vm1652_vm9 = vcmp.lt.s32.totalorder %v1242_v44, 4 }
 0x1d9   : > { %vm1550_vm2 = vcmp.ge.s32.totalorder %v1549_v46, 0  ;;  %vm1551_vm3 = vcmp.lt.s32.totalorder %v1549_v46, 4  ;;  %vm1554_vm5 = vcmp.ge.s32.totalorder %v6280_v47, 0  ;;  %vm1621_vm12 = vcmp.lt.s32.totalorder %v6306_v2, 4  ;;  %vm6319_vm13 = vmand %vm1651_vm8, %vm1652_vm9 }
 0x1da   : > { %5662 = vrsqrt.f32 %v1471_v3  ;;  %vm6282_vm4 = vmand %vm1550_vm2, %vm1551_vm3  ;;  %v1257_v3 = vld [vmem:[%s5910_s25 + $0x60] sm:$0xff]  ;;  %vm1577_vm3 = vcmask 31744   ;;  %vm7970_vm8 = vcmask 121856  }
 0x1db   : > { %vm1555_vm6 = vmand %vm6282_vm4, %vm1554_vm5 }
 0x1dc   : > { %v5657_v4 = vpop.eup %5656  ;;  %vm1560_vm7 = vmpackc.low %vm1555_vm6, %vm1555_vm6 }
 0x1dd   : > { %v1483_v7 = vpop.permute.xlu1 %1482  ;;  %v1476_v8 = vmul.f32 %v5657_v4, %v1464_v5  ;;  %v1561_v59 = vsel %vm1560_vm7, 65537, %v5839_v1  ;;  %v1314_v4 = vsel %vm7975_vm0, %v1277_v61, 0.0  ;;  %v1278_v5 = vmul.f32 %v6165_v6, %v1256_v0  ;;  %vm6333_vm14 = vmand %vm6319_vm13, %vm1621_vm12  ;;  %v1342_v0 = vld [vmem:[%s5915_s29 + $0x50] sm:$0xff] }
 0x1de   : > { %v1565_v63 = vrot.slane %v1561_v59, %v6297_v56  ;;  %vm1592_vm15 = vmpackc.low %vm6282_vm4, %vm6282_vm4 }
 0x1df   : > { %v1500_v13 = vmul.f32 %v1483_v7, %v1476_v8  ;;  %v1311_v7 = vsel %vm7975_vm0, %v1276_v62, 0.0  ;;  %vm1688_vm2 = vmpackc.low %vm6333_vm14, %vm6333_vm14 }
 0x1e0   : > { %v5659_v10 = vpop.eup %5658  ;;  %vm6312_vm11 = vcmp.ne.s16.totalorder %v1565_v63, 0  ;;  %vm1622_vm14 = vmand %vm6282_vm4, %vm1621_vm12  ;;  %vm1609_vm4 = vcmask 23552  }
 0x1e1   : > { %v1507_v11 = vpop.permute.xlu1 %1506  ;;  %v1477_v12 = vmul.f32 %v5659_v10, %v1465_v9  ;;  %v5661_v17 = vpop.eup %5660  ;;  %v1279_v9 = vmul.f32 %v6165_v6, %v1257_v3  ;;  %v1258_v10 = vld [vmem:[%s5910_s25 + $0x68] sm:$0xff] }
 0x1e2   : > { %v1488_v14 = vpop.permute.xlu0 %1487  ;;  %v1524_v18 = vadd.f32 %v1507_v11, %v1500_v13  ;;  %v1478_v25 = vmul.f32 %v5661_v17, %v1466_v50  ;;  %v1317_v17 = vsel %vm7975_vm0, %v1278_v5, 0.0  ;;  %v1260_v50 = vld [vmem:[%s5910_s25 + $0x78] sm:$0xff]  ;;  %v1341_v3 = vld [vmem:[%s5915_s29 + $0x48] sm:$0xff] }
 0x1e3   : > { %v1501_v15 = vmul.f32 %v1488_v14, %v1477_v12  ;;  %v1259_v14 = vld [vmem:[%s5910_s25 + $0x70] sm:$0xff] }
 0x1e4   : > { %v5663_v21 = vpop.eup %5662 }
 0x1e5   : > { %v1512_v16 = vpop.permute.xlu1 %1511  ;;  %v1479_v55 = vmul.f32 %v5663_v21, %v1467_v22  ;;  %v1281_v21 = vmul.f32 %v6165_v6, %v1259_v14 }
 0x1e6   : > { %v1525_v19 = vadd.f32 %v1512_v16, %v1501_v15  ;;  %v1493_v20 = vpop.permute.xlu0 %1492 }
 0x1e7   : > { %v1502_v27 = vmul.f32 %v1493_v20, %v1478_v25  ;;  %v1320_v20 = vsel %vm7975_vm0, %v1279_v9, 0.0 }
 0x1e8   : > { %v1528_v23 = vpack.c.bf16 %v1525_v19, %v1524_v18  ;;  %v1280_v18 = vmul.f32 %v6165_v6, %v1258_v10 }
 0x1e9   : > { %v1498_v24 = vpop.permute.xlu1 %1497 }
 0x1ea   : > { %1536 = vrot.lane.b32.xlu1 %v1528_v23, %s5840_s18  ;;  %1532 = vrot.lane.b32.xlu0 %v1528_v23, %s5841_s23  ;;  %v1517_v26 = vpop.permute.xlu0 %1516  ;;  %v1503_v28 = vmul.f32 %v1498_v24, %v1479_v55  ;;  %v1323_v22 = vsel %vm7975_vm0, %v1280_v18, 0.0  ;;  %v1326_v24 = vsel %vm7975_vm0, %v1281_v21, 0.0 }
 0x1eb   : > { %5271 = vmatprep.subr.bf16.mxu0 %v1528_v23  ;;  %v1526_v30 = vadd.f32 %v1517_v26, %v1502_v27  ;;  %v1689_v26 = vsel %vm1688_vm2, 65537, %v5839_v1  ;;  %v1593_v27 = vsel %vm1592_vm15, 65537, %v5839_v1  ;;  %vm1625_vm2 = vmpackc.low %vm1622_vm14, %vm1622_vm14 }
 0x1ec   : > { %v1626_v52 = vsel %vm1625_vm2, 65537, %v5839_v1 }
 0x1ed   : > { %v1522_v29 = vpop.permute.xlu1 %1521 }
 0x1ee   : > { %v1527_v32 = vadd.f32 %v1522_v29, %v1503_v28  ;;  %v1714_v28 = vadd.s32 1, %v1242_v44 }
 0x1f0   : > { %v6239_v33 = vpack.c.bf16 %v1527_v32, %v1526_v30  ;;  %vm1715_vm6 = vcmp.ge.s32.totalorder %v1714_v28, 0  ;;  %vm1716_vm7 = vcmp.lt.s32.totalorder %v1714_v28, 4 }
 0x1f2   : > { %1538 = vrot.lane.b32.xlu1 %v6239_v33, %s5840_s18  ;;  %1534 = vrot.lane.b32.xlu0 %v6239_v33, %s5841_s23  ;;  %s5852_s18 = smov 12   ;;  %s5853_s23 = smov 124  }
 0x1f6   : > { %1573 = vrot.lane.b32.xlu1 %v1528_v23, %s5842_s1  ;;  %1569 = vrot.lane.b32.xlu0 %v1528_v23, %s5843_s28 }
 0x1fa   : > { %1671 = vrot.lane.b32.xlu1 %v1528_v23, %s7954_s2  ;;  %1667 = vrot.lane.b32.xlu0 %v1528_v23, %s7996_s10 }
 0x1fe   : > { %1575 = vrot.lane.b32.xlu1 %v6239_v33, %s5842_s1  ;;  %1571 = vrot.lane.b32.xlu0 %v6239_v33, %s5843_s28  ;;  %s5854_s1 = smov 11   ;;  %s5855_s28 = smov 123  }
 0x202   : > { %1673 = vrot.lane.b32.xlu1 %v6239_v33, %s7954_s2  ;;  %1669 = vrot.lane.b32.xlu0 %v6239_v33, %s7996_s10  ;;  %s7988_s2 = smov 65  }
 0x206   : > { %1605 = vrot.lane.b32.xlu1 %v1528_v23, %s5846_s11  ;;  %1601 = vrot.lane.b32.xlu0 %v1528_v23, %s5847_s15 }
 0x20a   : > { %1701 = vrot.lane.b32.xlu1 %v1528_v23, %s5848_s22  ;;  %1697 = vrot.lane.b32.xlu0 %v1528_v23, %s5849_s26 }
 0x20e   : > { %1607 = vrot.lane.b32.xlu1 %v6239_v33, %s5846_s11  ;;  %1603 = vrot.lane.b32.xlu0 %v6239_v33, %s5847_s15  ;;  %s7958_s11 = smov 9   ;;  %s7956_s15 = smov 73  }
 0x212   : > { %1703 = vrot.lane.b32.xlu1 %v6239_v33, %s5848_s22  ;;  %1699 = vrot.lane.b32.xlu0 %v6239_v33, %s5849_s26  ;;  %s7995_s22 = smov 8   ;;  %s7994_s26 = smov 72  }
 0x216   : > { %1638 = vrot.lane.b32.xlu1 %v1528_v23, %s7990_s19  ;;  %1634 = vrot.lane.b32.xlu0 %v1528_v23, %s7952_s16 }
 0x21a   : > { %1735 = vrot.lane.b32.xlu1 %v1528_v23, %s5852_s18  ;;  %1731 = vrot.lane.b32.xlu0 %v1528_v23, %s5853_s23 }
 0x21e   : > { %1640 = vrot.lane.b32.xlu1 %v6239_v33, %s7990_s19  ;;  %1636 = vrot.lane.b32.xlu0 %v6239_v33, %s7952_s16  ;;  %s7964_s16 = smov 121  }
 0x222   : > { %1737 = vrot.lane.b32.xlu1 %v6239_v33, %s5852_s18  ;;  %1733 = vrot.lane.b32.xlu0 %v6239_v33, %s5853_s23  ;;  %s7968_s18 = smov 63   ;;  %s7960_s23 = smov 7  }
 0x226   : > { %1765 = vrot.lane.b32.xlu1 %v1528_v23, %s5854_s1  ;;  %1761 = vrot.lane.b32.xlu0 %v1528_v23, %s5855_s28  ;;  %v1282_v23 = vmul.f32 %v6165_v6, %v1260_v50  ;;  %v1693_v6 = vrot.slane %v1689_v26, %v6297_v56 }
 0x228   : > { %v1329_v32 = vsel %vm7975_vm0, %v1282_v23, 0.0  ;;  %vm6359_vm9 = vcmp.ne.s16.totalorder %v1693_v6, 0 }
 0x22a   : > { %1767 = vrot.lane.b32.xlu1 %v6239_v33, %s5854_s1  ;;  %1763 = vrot.lane.b32.xlu0 %v6239_v33, %s5855_s28  ;;  %s7966_s1 = smov 71   ;;  %s7962_s28 = smov 57  }
 0x22e   : > { %1810 = vperm.xlu1 %5599, %v1800_v34   ;;  %1805 = vperm.xlu0 %5598, %v1799_v35  }
 0x232   : > { %1820 = vperm.xlu1 %5599, %v1802_v36   ;;  %1815 = vperm.xlu0 %5598, %v1801_v37  }
 0x236   : > { %1968 = vperm.xlu1 %5599, %v1958_v38   ;;  %1963 = vperm.xlu0 %5598, %v1957_v39  }
 0x23a   : > { %1978 = vperm.xlu1 %5599, %v1960_v40   ;;  %1973 = vperm.xlu0 %5598, %v1959_v41  }
 0x259   : > { %1309 = vadd.xlane.f32.xlu0 %v1308_v60  ;;  %v1630_v60 = vrot.slane %v1626_v52, %v6297_v56 }
 0x25b   : > { %vm6399_vm14 = vcmp.ne.s16.totalorder %v1630_v60, 0  ;;  %v1340_v60 = vld [vmem:[%s5915_s29 + $0x40] sm:$0xff] }
 0x25c   : > { %v1533_v12 = vpop.permute.xlu0 %1532  ;;  %v1537_v13 = vpop.permute.xlu1 %1536 }
 0x25d   : > { %1315 = vadd.xlane.f32.xlu0 %v1314_v4  ;;  %v1543_v15 = vsel %vm1540_vm10, %v1533_v12, %v1537_v13 }
 0x25e   : > { %1312 = vadd.xlane.f32.xlu1 %v1311_v7  ;;  %v1567_v16 = vsel %vm6312_vm11, %v1543_v15, 0 }
 0x25f   : > { %5272 = vmatpush3.bf16.msra.mxu0 %v1567_v16 }
 0x260   : > { %5273 = vmatprep.subr.bf16.mxu0 %v6239_v33  ;;  %v1597_v33 = vrot.slane %v1593_v27, %v6297_v56 }
 0x261   : > { %1318 = vadd.xlane.f32.xlu0 %v1317_v17 }
 0x262   : > { %1321 = vadd.xlane.f32.xlu1 %v1320_v20 }
 0x264   : > { %v1535_v25 = vpop.permute.xlu0 %1534  ;;  %v1539_v55 = vpop.permute.xlu1 %1538 }
 0x265   : > { %v1547_v29 = vsel %vm1540_vm10, %v1535_v25, %v1539_v55  ;;  %1324 = vadd.xlane.f32.xlu0 %v1323_v22  ;;  %vm6363_vm10 = vcmp.ne.s16.totalorder %v1597_v33, 0 }
 0x266   : > { %v1568_v30 = vsel %vm6312_vm11, %v1547_v29, 0  ;;  %1327 = vadd.xlane.f32.xlu1 %v1326_v24  ;;  %vm6367_vm11 = vmand %vm1715_vm6, %vm1716_vm7 }
 0x267   : > { %5274 = vmatpush3.bf16.msra.mxu0 %v1568_v30  ;;  %vm1718_vm15 = vmand %vm6367_vm11, %vm1554_vm5 }
 0x268   : > { %v1570_v54 = vpop.permute.xlu0 %1569  ;;  %v1574_v58 = vpop.permute.xlu1 %1573  ;;  %vm1722_vm6 = vmpackc.low %vm1718_vm15, %vm1718_vm15 }
 0x269   : > { %1330 = vadd.xlane.f32.xlu0 %v1329_v32  ;;  %v1580_v34 = vsel %vm1577_vm3, %v1570_v54, %v1574_v58  ;;  %v1723_v49 = vsel %vm1722_vm6, 65537, %v5839_v1  ;;  %vm1752_vm15 = vmpackc.low %vm6367_vm11, %vm6367_vm11  ;;  %v5600_v54 = vld [vmem:[%s8057_s17] ss:$12 sps:$4 sm:$0xff]  }
 0x26a   : > { %v1599_v41 = vsel %vm6363_vm10, %v1580_v34, 0  ;;  %v1727_v59 = vrot.slane %v1723_v49, %v6297_v56  ;;  %v1753_v11 = vsel %vm1752_vm15, 65537, %v5839_v1  ;;  %vm1779_vm2 = vmand %vm6367_vm11, %vm1621_vm12  ;;  %vm1769_vm12 = vcmask 89088   ;;  %v5603_v34 = vld [vmem:[%s8057_s17 + $0x1c] ss:$12 sps:$4 sm:$0xff]  }
 0x26b   : > { %v1757_v17 = vrot.slane %v1753_v11, %v6297_v56 }
 0x26c   : > { %v1668_v38 = vpop.permute.xlu0 %1667  ;;  %v1672_v39 = vpop.permute.xlu1 %1671  ;;  %vm6395_vm7 = vcmp.ne.s16.totalorder %v1727_v59, 0 }
 0x26d   : > { %v1678_v40 = vsel %vm7970_vm8, %v1668_v38, %v1672_v39  ;;  %vm6430_vm6 = vcmp.ne.s16.totalorder %v1757_v17, 0 }
 0x26e   : > { %5450 = vmatprep.subr.msk.bf16.mxu0 %vm6359_vm9, %v1678_v40 }
 0x26f   : > { %5276 = vmatpush3.bf16.msra.mxu0 %v1599_v41 }
 0x270   : > { %v1572_v42 = vpop.permute.xlu0 %1571  ;;  %v1576_v44 = vpop.permute.xlu1 %1575 }
 0x271   : > { %v1584_v45 = vsel %vm1577_vm3, %v1572_v42, %v1576_v44  ;;  %vm1705_vm3 = vcmask 105472   ;;  %v5606_v44 = vld [vmem:[%s8057_s17 + $0x18] ss:$12 sps:$4 sm:$0xff]  }
 0x272   : > { %v1600_v57 = vsel %vm6363_vm10, %v1584_v45, 0  ;;  %v5607_v45 = vld [vmem:[%s8057_s17 + $0x20] ss:$12 sps:$4 sm:$0xff]   ;;  %s8163_s17 = smov 72  }
 0x274   : > { %v1670_v46 = vpop.permute.xlu0 %1669  ;;  %v1674_v48 = vpop.permute.xlu1 %1673 }
 0x275   : > { %v1682_v53 = vsel %vm7970_vm8, %v1670_v46, %v1674_v48 }
 0x276   : > { %5451 = vmatprep.subr.msk.bf16.mxu0 %vm6359_vm9, %v1682_v53  ;;  %vm1654_vm9 = vmand %vm6319_vm13, %vm1554_vm5  ;;  %vm7979_vm5 = vcmask 7168   ;;  %vm1739_vm13 = vcmask 97280  }
 0x277   : > { %5278 = vmatpush3.bf16.msra.mxu0 %v1600_v57  ;;  %vm1658_vm10 = vmpackc.low %vm1654_vm9, %vm1654_vm9 }
 0x278   : > { %v1602_v61 = vpop.permute.xlu0 %1601  ;;  %v1606_v62 = vpop.permute.xlu1 %1605  ;;  %v1659_v14 = vsel %vm1658_vm10, 65537, %v5839_v1 }
 0x279   : > { %v1612_v63 = vsel %vm1609_vm4, %v1602_v61, %v1606_v62  ;;  %v1663_v18 = vrot.slane %v1659_v14, %v6297_v56  ;;  %v1345_v14 = vld [vmem:[%s5915_s29 + $0x68] sm:$0xff] }
 0x27a   : > { %v1632_v8 = vsel %vm6399_vm14, %v1612_v63, 0 }
 0x27c   : > { %v1698_v4 = vpop.permute.xlu0 %1697  ;;  %v1702_v5 = vpop.permute.xlu1 %1701 }
 0x27d   : > { %v1708_v7 = vsel %vm1705_vm3, %v1698_v4, %v1702_v5 }
 0x27e   : > { %5452 = vmatprep.subr.msk.bf16.mxu0 %vm6395_vm7, %v1708_v7 }
 0x27f   : > { %5280 = vmatpush3.bf16.msra.mxu0 %v1632_v8 }
 0x280   : > { %v1604_v9 = vpop.permute.xlu0 %1603  ;;  %v1608_v10 = vpop.permute.xlu1 %1607 }
 0x281   : > { %v1616_v12 = vsel %vm1609_vm4, %v1604_v9, %v1608_v10  ;;  %vm6434_vm4 = vcmp.ne.s16.totalorder %v1663_v18, 0  ;;  %v1343_v9 = vld [vmem:[%s5915_s29 + $0x58] sm:$0xff]  ;;  %v1344_v10 = vld [vmem:[%s5915_s29 + $0x60] sm:$0xff] }
 0x282   : > { %v1633_v16 = vsel %vm6399_vm14, %v1616_v12, 0 }
 0x284   : > { %v1700_v47 = vpop.permute.xlu0 %1699  ;;  %v1704_v13 = vpop.permute.xlu1 %1703 }
 0x285   : > { %v1712_v15 = vsel %vm1705_vm3, %v1700_v47, %v1704_v13  ;;  %vm1782_vm3 = vmpackc.low %vm1779_vm2, %vm1779_vm2 }
 0x286   : > { %5453 = vmatprep.subr.msk.bf16.mxu0 %vm6395_vm7, %v1712_v15  ;;  %v1783_v27 = vsel %vm1782_vm3, 65537, %v5839_v1 }
 0x287   : > { %5282 = vmatpush3.bf16.msra.mxu0 %v1633_v16  ;;  %v1787_v29 = vrot.slane %v1783_v27, %v6297_v56 }
 0x288   : > { %v1635_v19 = vpop.permute.xlu0 %1634  ;;  %v1639_v20 = vpop.permute.xlu1 %1638 }
 0x289   : > { %v1645_v21 = vsel %vm7979_vm5, %v1635_v19, %v1639_v20  ;;  %vm6452_vm11 = vcmp.ne.s16.totalorder %v1787_v29, 0 }
 0x28a   : > { %v1665_v2 = vsel %vm6434_vm4, %v1645_v21, 0 }
 0x28c   : > { %v1732_v23 = vpop.permute.xlu0 %1731  ;;  %v1736_v24 = vpop.permute.xlu1 %1735 }
 0x28d   : > { %v1742_v25 = vsel %vm1739_vm13, %v1732_v23, %v1736_v24 }
 0x28e   : > { %5454 = vmatprep.subr.msk.bf16.mxu0 %vm6430_vm6, %v1742_v25 }
 0x28f   : > { %5284 = vmatpush3.bf16.msra.mxu0 %v1665_v2 }
 0x290   : > { %v1637_v55 = vpop.permute.xlu0 %1636  ;;  %v1641_v26 = vpop.permute.xlu1 %1640 }
 0x291   : > { %v1649_v28 = vsel %vm7979_vm5, %v1637_v55, %v1641_v26 }
 0x292   : > { %v1666_v33 = vsel %vm6434_vm4, %v1649_v28, 0 }
 0x294   : > { %v1734_v30 = vpop.permute.xlu0 %1733  ;;  %v1738_v32 = vpop.permute.xlu1 %1737 }
 0x295   : > { %v1746_v6 = vsel %vm1739_vm13, %v1734_v30, %v1738_v32 }
 0x296   : > { %5455 = vmatprep.subr.msk.bf16.mxu0 %vm6430_vm6, %v1746_v6 }
 0x297   : > { %5286 = vmatpush3.bf16.msra.mxu0 %v1666_v33 }
 0x298   : > { %v1762_v35 = vpop.permute.xlu0 %1761  ;;  %v1766_v36 = vpop.permute.xlu1 %1765 }
 0x299   : > { %v1772_v37 = vsel %vm1769_vm12, %v1762_v35, %v1766_v36 }
 0x29a   : > { %1892 = vmatmul.mubr.bf16.vlgmr.msra.gmra.mrb[0].mxu0 %v5600_v54  ;;  %5456 = vmatprep.subr.msk.bf16.mxu1 %vm6452_vm11, %v1772_v37  ;;  %v1789_v38 = vsel %vm6452_vm11, %v1772_v37, 0 }
 0x29b   : > { %5376 = vmatpush3.bf16.msra.mxu1 %v1789_v38  ;;  %1899 = vmatprep.mubr.bf16.mxu0 %v5603_v34 }
 0x29c   : > { %v1764_v39 = vpop.permute.xlu0 %1763  ;;  %v1768_v40 = vpop.permute.xlu1 %1767 }
 0x29d   : > { %v1776_v41 = vsel %vm1769_vm12, %v1764_v39, %v1768_v40 }
 0x29e   : > { %5457 = vmatprep.subr.msk.bf16.mxu1 %vm6452_vm11, %v1776_v41  ;;  %v1790_v42 = vsel %vm6452_vm11, %v1776_v41, 0 }
 0x29f   : > { %5378 = vmatpush3.bf16.msra.mxu1 %v1790_v42 }
 0x2a2   : > { %1900 = vmatmul.mubr.bf16.gmra.mrb[4].mxu0 %v5606_v44  ;;  %5380 = vmatmul.mubr.msk.bf16.vlgmr.msra.gmra.mrb[0].mxu1 %vm7975_vm0, %v5607_v45 }
 0x2ad   : > { %v1806_v46 = vpop.permute.xlu0 %1805  ;;  %v1811_v48 = vpop.permute.xlu1 %1810 }
 0x2b1   : > { %v1816_v49 = vpop.permute.xlu0 %1815  ;;  %v1821_v52 = vpop.permute.xlu1 %1820 }
 0x2b5   : > { %v1964_v53 = vpop.permute.xlu0 %1963  ;;  %v1969_v57 = vpop.permute.xlu1 %1968 }
 0x2b6   : > { %v1981_v55 = vmul.f32 %v6193_v31, %v1964_v53  ;;  %v1982_v32 = vmul.f32 %v6193_v31, %v1969_v57 }
 0x2b9   : > { %v1974_v59 = vpop.permute.xlu0 %1973  ;;  %v1979_v62 = vpop.permute.xlu1 %1978 }
 0x2ba   : > { %v1983_v36 = vmul.f32 %v6193_v31, %v1974_v59  ;;  %v1984_v41 = vmul.f32 %v6193_v31, %v1979_v62 }
 0x2e6   : > { %v1310_v61 = vpop.xlane.xlu0 %1309 }
 0x2e7   : > { %v1356_v63 = vadd.f32 %v1340_v60, %v1310_v61 }
 0x2e9   : > { %2063 = vperm.xlu1 %5599, %v1356_v63  }
 0x2ea   : > { %v1316_v4 = vpop.xlane.xlu0 %1315 }
 0x2eb   : > { %v1358_v5 = vadd.f32 %v1342_v0, %v1316_v4  ;;  %v1313_v7 = vpop.xlane.xlu1 %1312 }
 0x2ec   : > { %v1357_v8 = vadd.f32 %v1341_v3, %v1313_v7 }
 0x2ed   : > { %2073 = vperm.xlu1 %5599, %v1358_v5  }
 0x2ee   : > { %v1319_v12 = vpop.xlane.xlu0 %1318  ;;  %2068 = vperm.xlu0 %5598, %v1357_v8  }
 0x2ef   : > { %v1359_v47 = vadd.f32 %v1343_v9, %v1319_v12  ;;  %v1322_v13 = vpop.xlane.xlu1 %1321 }
 0x2f0   : > { %v1360_v11 = vadd.f32 %v1344_v10, %v1322_v13  ;;  %v1347_v10 = vld [vmem:[%s5915_s29 + $0x78] sm:$0xff]  ;;  %v1346_v13 = vld [vmem:[%s5915_s29 + $0x70] sm:$0xff] }
 0x2f1   : > { %2078 = vperm.xlu1 %5599, %v1359_v47  }
 0x2f2   : > { %v1325_v15 = vpop.xlane.xlu0 %1324  ;;  %2087 = vperm.xlu0 %5598, %v1360_v11  }
 0x2f3   : > { %v1361_v16 = vadd.f32 %v1345_v14, %v1325_v15  ;;  %v1328_v11 = vpop.xlane.xlu1 %1327  ;;  %v5608_v15 = vld [vmem:[%s8096_s6] sm:$0xff]   ;;  %s8159_s6 = sld [smem:[#allocation20_spill]] }
 0x2f4   : > { %v1362_v14 = vadd.f32 %v1346_v13, %v1328_v11  ;;  %5383 = vmatprep.subr.bf16.mxu1 %v5608_v15 }
 0x2f5   : > { %2092 = vperm.xlu1 %5599, %v1361_v16   ;;  %5384 = vmatpush3.bf16.msra.mxu1 %v5608_v15 }
 0x2f6   : > { %v1331_v12 = vpop.xlane.xlu0 %1330 }
 0x2f7   : > { %v1363_v47 = vadd.f32 %v1347_v10, %v1331_v12 }
 0x368   : > { %v2064_v16 = vpop.permute.xlu1 %2063 }
 0x36d   : > { %v5287_v17 = vpop.f32.mrb[0].mxu0 }
 0x36e   : > { %v5288_v18 = vpop.f32.mrb[1].mxu0 }
 0x36f   : > { %v5289_v19 = vadd.f32 %v5288_v18, %v5287_v17  ;;  %v5290_v20 = vpop.f32.mrb[2].mxu0  ;;  %v2074_v17 = vpop.permute.xlu1 %2073 }
 0x370   : > { %v5291_v21 = vpop.f32.mrb[3].mxu0 }
 0x371   : > { %v5292_v50 = vadd.f32 %v5291_v21, %v5290_v20  ;;  %v1894_v24 = vadd.f32 %v5289_v19, %v1806_v46  ;;  %v2069_v19 = vpop.permute.xlu0 %2068 }
 0x373   : > { %v1897_v30 = vadd.f32 %v5292_v50, %v1811_v48  ;;  %v2079_v18 = vpop.permute.xlu1 %2078 }
 0x375   : > { %v5293_v22 = vpop.f32.mrb[4].mxu0  ;;  %v5381_v23 = vpop.f32.mrb[0].mxu1 }
 0x376   : > { %v5294_v25 = vpop.f32.mrb[5].mxu0  ;;  %v1942_v2 = vpop.f32.mrb[1].mxu1 }
 0x377   : > { %v5295_v26 = vadd.f32 %v5294_v25, %v5293_v22  ;;  %v1943_v27 = vadd.f32 %v1942_v2, %v1894_v24  ;;  %v5296_v28 = vpop.f32.mrb[6].mxu0  ;;  %v5382_v29 = vpop.f32.mrb[2].mxu1 }
 0x378   : > { %v5297_v6 = vpop.f32.mrb[7].mxu0  ;;  %v1945_v33 = vpop.f32.mrb[3].mxu1 }
 0x379   : > { %v1902_v54 = vadd.f32 %v5295_v26, %v1816_v49  ;;  %v1985_v58 = vadd.f32 %v1981_v55, %v1943_v27  ;;  %v5298_v34 = vadd.f32 %v5297_v6, %v5296_v28  ;;  %v1946_v35 = vadd.f32 %v1945_v33, %v1897_v30  ;;  %v2093_v20 = vpop.permute.xlu1 %2092  ;;  %v2088_v21 = vpop.permute.xlu0 %2087 }
 0x37b   : > { %v1951_v37 = vadd.f32 %v5381_v23, %v1902_v54  ;;  %v1989_v38 = vmul.f32 0.2, %v1985_v58  ;;  %v1905_v39 = vadd.f32 %v5298_v34, %v1821_v52  ;;  %v1986_v40 = vadd.f32 %v1982_v32, %v1946_v35 }
 0x37d   : > { %v1987_v42 = vadd.f32 %v1983_v36, %v1951_v37  ;;  %v6478_v44 = vmax.f32 %v1985_v58, %v1989_v38  ;;  %v1954_v45 = vadd.f32 %v5382_v29, %v1905_v39  ;;  %v1990_v46 = vmul.f32 0.2, %v1986_v40 }
 0x37f   : > { %v1988_v48 = vadd.f32 %v1984_v41, %v1954_v45  ;;  %v6480_v53 = vmax.f32 %v1986_v40, %v1990_v46  ;;  %v1997_v49 = vsel %vm7971_vm1, %v6478_v44, 0.0  ;;  %v2013_v57 = vmul.f32 %v6478_v44, %v6478_v44 }
 0x380   : > { %1998 = vadd.xlane.f32.xlu1 %v1997_v49  ;;  %v1991_v59 = vmul.f32 0.2, %v1987_v42 }
 0x381   : > { %v2000_v52 = vsel %vm7971_vm1, %v6480_v53, 0.0  ;;  %v2014_v31 = vmul.f32 %v6480_v53, %v6480_v53  ;;  %v1992_v60 = vmul.f32 0.2, %v1988_v48  ;;  %v2017_v61 = vsel %vm7971_vm1, %v2013_v57, 0.0 }
 0x382   : > { %2001 = vadd.xlane.f32.xlu0 %v2000_v52  ;;  %v6491_v62 = vmax.f32 %v1987_v42, %v1991_v59 }
 0x383   : > { %v2020_v63 = vsel %vm7971_vm1, %v2014_v31, 0.0  ;;  %v6494_v0 = vmax.f32 %v1988_v48, %v1992_v60 }
 0x384   : > { %2018 = vadd.xlane.f32.xlu1 %v2017_v61  ;;  %v2003_v3 = vsel %vm7971_vm1, %v6491_v62, 0.0  ;;  %v2015_v4 = vmul.f32 %v6491_v62, %v6491_v62 }
 0x385   : > { %v2006_v5 = vsel %vm7971_vm1, %v6494_v0, 0.0  ;;  %v2016_v7 = vmul.f32 %v6494_v0, %v6494_v0 }
 0x386   : > { %2021 = vadd.xlane.f32.xlu0 %v2020_v63  ;;  %v2023_v8 = vsel %vm7971_vm1, %v2015_v4, 0.0 }
 0x387   : > { %v2026_v9 = vsel %vm7971_vm1, %v2016_v7, 0.0 }
 0x388   : > { %2004 = vadd.xlane.f32.xlu1 %v2003_v3 }
 0x38a   : > { %2007 = vadd.xlane.f32.xlu0 %v2006_v5 }
 0x38c   : > { %2024 = vadd.xlane.f32.xlu1 %v2023_v8 }
 0x38e   : > { %2027 = vadd.xlane.f32.xlu0 %v2026_v9 }
 0x39d   : > { %2102 = vperm.xlu1 %5599, %v1363_v47  }
 0x3a4   : > { %2097 = vperm.xlu0 %5598, %v1362_v14  }
 0x40d   : > { %v1999_v50 = vpop.xlane.xlu1 %1998 }
 0x40e   : > { %v2009_v22 = vmul.f32 0.0625, %v1999_v50 }
 0x40f   : > { %v2002_v23 = vpop.xlane.xlu0 %2001 }
 0x410   : > { %v2010_v24 = vmul.f32 0.0625, %v2002_v23  ;;  %v2033_v2 = vmul.f32 %v2009_v22, %v2009_v22  ;;  %v2045_v52 = vsub.f32 %v6478_v44, %v2009_v22 }
 0x411   : > { %v2019_v25 = vpop.xlane.xlu1 %2018 }
 0x412   : > { %v2029_v55 = vmul.f32 0.0625, %v2019_v25  ;;  %v2034_v27 = vmul.f32 %v2010_v24, %v2010_v24  ;;  %v2046_v60 = vsub.f32 %v6480_v53, %v2010_v24  ;;  %v2567_v25 = vld [vmem:[%s5945_s30 + $0x8] sm:$0xff] }
 0x413   : > { %v2022_v26 = vpop.xlane.xlu0 %2021 }
 0x414   : > { %v2037_v28 = vsub.f32 %v2029_v55, %v2033_v2  ;;  %v2030_v29 = vmul.f32 0.0625, %v2022_v26  ;;  %v2569_v2 = vld [vmem:[%s5945_s30 + $0x18] sm:$0xff] }
 0x415   : > { %v2005_v30 = vpop.xlane.xlu1 %2004 }
 0x416   : > { %v2041_v32 = vmax.f32 %v2037_v28, 0.0  ;;  %v2038_v6 = vsub.f32 %v2030_v29, %v2034_v27  ;;  %v2011_v33 = vmul.f32 0.0625, %v2005_v30 }
 0x417   : > { %v2008_v54 = vpop.xlane.xlu0 %2007 }
 0x418   : > { %v2049_v58 = vadd.f32 1e-05, %v2041_v32  ;;  %v2042_v34 = vmax.f32 %v2038_v6, 0.0  ;;  %v2012_v35 = vmul.f32 0.0625, %v2008_v54  ;;  %v2035_v38 = vmul.f32 %v2011_v33, %v2011_v33 }
 0x419   : > { %v2025_v36 = vpop.xlane.xlu1 %2024  ;;  %v2047_v7 = vsub.f32 %v6491_v62, %v2011_v33 }
 0x41a   : > { %5664 = vrsqrt.f32 %v2049_v58  ;;  %v2050_v37 = vadd.f32 1e-05, %v2042_v34  ;;  %v2031_v39 = vmul.f32 0.0625, %v2025_v36  ;;  %v2036_v41 = vmul.f32 %v2012_v35, %v2012_v35 }
 0x41b   : > { %v2028_v40 = vpop.xlane.xlu0 %2027  ;;  %v2048_v12 = vsub.f32 %v6494_v0, %v2012_v35  ;;  %v2110_v58 = vshra.s32 %v6276_v43, 3  ;;  %v2109_v36 = vand.u32 7, %v6276_v43 }
 0x41c   : > { %5666 = vrsqrt.f32 %v2050_v37  ;;  %v2039_v42 = vsub.f32 %v2031_v39, %v2035_v38  ;;  %v2032_v45 = vmul.f32 0.0625, %v2028_v40  ;;  %v2566_v40 = vld [vmem:[%s5945_s30] sm:$0xff] }
 0x41d   : > { %v2103_v15 = vpop.permute.xlu1 %2102  ;;  %v2317_v37 = vadd.s32 4294967295, %v2110_v58  ;;  %vm2418_vm13 = vcmp.ge.s32.totalorder %v2110_v58, 0  ;;  %vm2419_vm2 = vcmp.lt.s32.totalorder %v2110_v58, 8 }
 0x41e   : > { %v2043_v46 = vmax.f32 %v2039_v42, 0.0  ;;  %v2040_v48 = vsub.f32 %v2032_v45, %v2036_v41  ;;  %v6593_v41 = vadd.s32 4294967295, %v2109_v36  ;;  %vm6633_vm3 = vmand %vm2418_vm13, %vm2419_vm2  ;;  %vm7972_vm2 = vcmask 72704  }
 0x41f   : > { %vm2318_vm7 = vcmp.ge.s32.totalorder %v2317_v37, 0  ;;  %vm2319_vm14 = vcmp.lt.s32.totalorder %v2317_v37, 8 }
 0x420   : > { %v2051_v49 = vadd.f32 1e-05, %v2043_v46  ;;  %v2044_v57 = vmax.f32 %v2040_v48, 0.0  ;;  %v2568_v46 = vld [vmem:[%s5945_s30 + $0x10] sm:$0xff]  ;;  %vm6600_vm9 = vmand %vm2318_vm7, %vm2319_vm14  ;;  %vm2322_vm10 = vcmp.ge.s32.totalorder %v6593_v41, 0 }
 0x421   : > { %vm6613_vm15 = vmand %vm6600_vm9, %vm2322_vm10 }
 0x422   : > { %5668 = vrsqrt.f32 %v2051_v49  ;;  %v2052_v59 = vadd.f32 1e-05, %v2044_v57  ;;  %vm2328_vm6 = vmpackc.low %vm6613_vm15, %vm6613_vm15 }
 0x423   : > { %v2098_v50 = vpop.permute.xlu0 %2097  ;;  %vm2360_vm15 = vmpackc.low %vm6600_vm9, %vm6600_vm9 }
 0x424   : > { %v5665_v31 = vpop.eup %5664  ;;  %5670 = vrsqrt.f32 %v2052_v59 }
 0x425   : > { %v2057_v61 = vmul.f32 %v5665_v31, %v2045_v52 }
 0x426   : > { %v5667_v63 = vpop.eup %5666 }
 0x427   : > { %v2058_v3 = vmul.f32 %v5667_v63, %v2046_v60  ;;  %v2081_v4 = vmul.f32 %v2064_v16, %v2057_v61  ;;  %v6621_v63 = vadd.s32 1, %v2109_v36 }
 0x429   : > { %v2082_v5 = vmul.f32 %v2069_v19, %v2058_v3  ;;  %v2105_v8 = vadd.f32 %v2088_v21, %v2081_v4  ;;  %vm2389_vm4 = vcmp.lt.s32.totalorder %v6621_v63, 8 }
 0x42a   : > { %vm6642_vm12 = vmand %vm6633_vm3, %vm2389_vm4 }
 0x42b   : > { %v2106_v9 = vadd.f32 %v2093_v20, %v2082_v5  ;;  %v2481_v5 = vadd.s32 1, %v2110_v58  ;;  %vm2455_vm14 = vmpackc.low %vm6642_vm12, %vm6642_vm12 }
 0x42c   : > { %v5669_v10 = vpop.eup %5668 }
 0x42d   : > { %v2059_v47 = vmul.f32 %v5669_v10, %v2047_v7  ;;  %v2231_v13 = vpack.c.bf16 %v2106_v9, %v2105_v8  ;;  %v2329_v10 = vsel %vm2328_vm6, 65537, %v5839_v1  ;;  %vm2482_vm11 = vcmp.ge.s32.totalorder %v2481_v5, 0 }
 0x42e   : > { %v5671_v11 = vpop.eup %5670  ;;  %vm2483_vm7 = vcmp.lt.s32.totalorder %v2481_v5, 8 }
 0x42f   : > { %v2060_v44 = vmul.f32 %v5671_v11, %v2048_v12  ;;  %v2083_v14 = vmul.f32 %v2074_v17, %v2059_v47  ;;  %5385 = vmatprep.mubr.msk.bf16.mxu1 %vm7971_vm1, %v2231_v13  ;;  %v5611_v17 = vld [vmem:[%s5940_s24 + $0x4] ss:$12 sps:$4 sm:$0xff]   ;;  %v2333_v11 = vrot.slane %v2329_v10, %v6297_v56  ;;  %vm6657_vm13 = vmand %vm2482_vm11, %vm2483_vm7 }
 0x430   : > { %vm6674_vm11 = vmand %vm6657_vm13, %vm2322_vm10 }
 0x431   : > { %v2084_v53 = vmul.f32 %v2079_v18, %v2060_v44  ;;  %v2107_v16 = vadd.f32 %v2098_v50, %v2083_v14  ;;  %v5614_v18 = vld [vmem:[%s5940_s24 + $0x8] ss:$12 sps:$4 sm:$0xff]   ;;  %vm6662_vm6 = vcmp.ne.s16.totalorder %v2333_v11, 0  ;;  %vm6684_vm7 = vmand %vm6600_vm9, %vm2389_vm4 }
 0x432   : > { %5393 = vmatprep.mubr.msk.bf16.mxu0 %vm7975_vm0, %v5614_v18  ;;  %vm2393_vm8 = vmpackc.low %vm6684_vm7, %vm6684_vm7 }
 0x433   : > { %v2108_v22 = vadd.f32 %v2103_v15, %v2084_v53  ;;  %v2456_v15 = vsel %vm2455_vm14, 65537, %v5839_v1  ;;  %vm2489_vm14 = vmpackc.low %vm6674_vm11, %vm6674_vm11 }
 0x434   : > { %vm2519_vm7 = vmpackc.low %vm6657_vm13, %vm6657_vm13 }
 0x435   : > { %v2232_v19 = vpack.c.bf16 %v2108_v22, %v2107_v16  ;;  %v2361_v16 = vsel %vm2360_vm15, 65537, %v5839_v1  ;;  %vm7974_vm15 = vcmask 64512  }
 0x436   : > { %v2365_v18 = vrot.slane %v2361_v16, %v6297_v56 }
 0x437   : > { %5386 = vmatmul.mubr.msk.bf16.vlgmr.msra.gmra.mrb[4].mxu1 %vm7971_vm1, %v2232_v19 }
 0x438   : > { %2658 = vmatprep.mubr.bf16.mxu1 %v5611_v17  ;;  %vm6704_vm11 = vcmp.ne.s16.totalorder %v2365_v18, 0 }
 0x50a   : > { %v5387_v62 = vpop.f32.mrb[4].mxu1 }
 0x50b   : > { %v2281_v20 = vpop.f32.mrb[5].mxu1 }
 0x50c   : > { %v5388_v21 = vpop.f32.mrb[6].mxu1 }
 0x50d   : > { %v6515_v23 = vpack.c.bf16 %v5388_v21, %v5387_v62  ;;  %v2284_v0 = vpop.f32.mrb[7].mxu1  ;;  %v2460_v21 = vrot.slane %v2456_v15, %v6297_v56 }
 0x50e   : > { %v2296_v24 = vpack.c.bf16 %v2284_v0, %v2281_v20  ;;  %v5609_v0 = vld [vmem:[%s5940_s24] ss:$12 sps:$4 sm:$0xff]  }
 0x50f   : > { %2306 = vrot.lane.b32.xlu1 %v6515_v23, %s7958_s11  ;;  %2302 = vrot.lane.b32.xlu0 %v6515_v23, %s7956_s15  ;;  %vm6699_vm1 = vcmp.ne.s16.totalorder %v2460_v21, 0 }
 0x510   : > { %5306 = vmatprep.subr.bf16.mxu1 %v2296_v24 }
 0x513   : > { %2343 = vrot.lane.b32.xlu1 %v6515_v23, %s7995_s22  ;;  %2339 = vrot.lane.b32.xlu0 %v6515_v23, %s7994_s26 }
 0x517   : > { %2440 = vrot.lane.b32.xlu1 %v6515_v23, %s7968_s18  ;;  %2436 = vrot.lane.b32.xlu0 %v6515_v23, %s7996_s10 }
 0x51b   : > { %2375 = vrot.lane.b32.xlu1 %v6515_v23, %s7960_s23  ;;  %2371 = vrot.lane.b32.xlu0 %v6515_v23, %s7966_s1 }
 0x51f   : > { %2470 = vrot.lane.b32.xlu1 %v6515_v23, %s7962_s28  ;;  %2466 = vrot.lane.b32.xlu0 %v6515_v23, %s7964_s16 }
 0x523   : > { %2408 = vrot.lane.b32.xlu1 %v6515_v23, %s7990_s19  ;;  %2404 = vrot.lane.b32.xlu0 %v6515_v23, %s7988_s2 }
 0x527   : > { %2304 = vrot.lane.b32.xlu1 %v2296_v24, %s7958_s11  ;;  %2300 = vrot.lane.b32.xlu0 %v2296_v24, %s7956_s15  ;;  %s7986_s15 = smov 56   ;;  %s7984_s11 = smov 120  }
 0x52b   : > { %2341 = vrot.lane.b32.xlu1 %v2296_v24, %s7995_s22  ;;  %2337 = vrot.lane.b32.xlu0 %v2296_v24, %s7994_s26 }
 0x52f   : > { %2438 = vrot.lane.b32.xlu1 %v2296_v24, %s7968_s18  ;;  %2434 = vrot.lane.b32.xlu0 %v2296_v24, %s7996_s10 }
 0x533   : > { %2373 = vrot.lane.b32.xlu1 %v2296_v24, %s7960_s23  ;;  %2369 = vrot.lane.b32.xlu0 %v2296_v24, %s7966_s1  ;;  %s8097_s23 = sld [smem:[#allocation17_spill]]  ;;  %s7980_s1 = smov 119  }
 0x537   : > { %2468 = vrot.lane.b32.xlu1 %v2296_v24, %s7962_s28  ;;  %2464 = vrot.lane.b32.xlu0 %v2296_v24, %s7964_s16  ;;  %s8098_s28 = sld [smem:[#allocation22_spill]]  ;;  %s7982_s16 = smov 55  }
 0x539   : > { %s6572_s18 = scalar_lea.vmem %s8097_s23, %s8338_s0  ;;  %s8134_s23 = sld [smem:[#allocation24_spill]] }
 0x53a   : > { %v6575_v55 = vld [vmem:[%s6572_s18] ss:$0 sm:$0xff] }
 0x53b   : > { %2406 = vrot.lane.b32.xlu1 %v2296_v24, %s7990_s19  ;;  %2402 = vrot.lane.b32.xlu0 %v2296_v24, %s7988_s2 }
 0x53d   : > { %v2113_v26 = vld [vmem:[%s8098_s28] sm:$0xff]  ;;  %v2118_v32 = vld [vmem:[%s8098_s28 + $0x28] sm:$0xff]  ;;  %v2115_v57 = vld [vmem:[%s8098_s28 + $0x10] sm:$0xff] }
 0x53e   : > { %v2135_v27 = vmul.f32 %v6575_v55, %v2113_v26  ;;  %v2117_v28 = vld [vmem:[%s8098_s28 + $0x20] sm:$0xff]  ;;  %v2140_v33 = vmul.f32 %v6575_v55, %v2118_v32  ;;  %v2114_v49 = vld [vmem:[%s8098_s28 + $0x8] sm:$0xff]  ;;  %v2137_v52 = vmul.f32 %v6575_v55, %v2115_v57  ;;  %v2394_v32 = vsel %vm2393_vm8, 65537, %v5839_v1  ;;  %vm6725_vm8 = vmand %vm6633_vm3, %vm2322_vm10 }
 0x53f   : > { %2502 = vrot.lane.b32.xlu1 %v2296_v24, %s7986_s15  ;;  %2498 = vrot.lane.b32.xlu0 %v2296_v24, %s7984_s11  ;;  %v2139_v30 = vmul.f32 %v6575_v55, %v2117_v28  ;;  %v2136_v59 = vmul.f32 %v6575_v55, %v2114_v49  ;;  %v2490_v28 = vsel %vm2489_vm14, 65537, %v5839_v1  ;;  %v2398_v37 = vrot.slane %v2394_v32, %v6297_v56  ;;  %vm2425_vm10 = vmpackc.low %vm6725_vm8, %vm6725_vm8  ;;  %v5616_v32 = vld [vmem:[%s5940_s24 + $0x20] ss:$12 sps:$4 sm:$0xff]   ;;  %v2120_v44 = vld [vmem:[%s8098_s28 + $0x38] sm:$0xff] }
 0x540   : > { %v2151_v29 = vsel %vm7975_vm0, %v2135_v27, 0.0  ;;  %v2166_v54 = vsel %vm7975_vm0, %v2140_v33, 0.0  ;;  %v2157_v4 = vsel %vm7975_vm0, %v2137_v52, 0.0  ;;  %v2494_v58 = vrot.slane %v2490_v28, %v6297_v56 }
 0x541   : > { %v2163_v6 = vsel %vm7975_vm0, %v2139_v30, 0.0  ;;  %v2154_v3 = vsel %vm7975_vm0, %v2136_v59, 0.0  ;;  %vm7977_vm14 = vcmask 56320   ;;  %vm6755_vm0 = vmand %vm6657_vm13, %vm2389_vm4  ;;  %v2426_v59 = vsel %vm2425_vm10, 65537, %v5839_v1 }
 0x542   : > { %vm6741_vm3 = vcmp.ne.s16.totalorder %v2494_v58, 0  ;;  %vm2549_vm4 = vmpackc.low %vm6755_vm0, %vm6755_vm0  ;;  %v2430_v9 = vrot.slane %v2426_v59, %v6297_v56  ;;  %vm7978_vm0 = vcmask 449536  }
 0x543   : > { %2504 = vrot.lane.b32.xlu1 %v6515_v23, %s7986_s15  ;;  %2500 = vrot.lane.b32.xlu0 %v6515_v23, %s7984_s11 }
 0x547   : > { %2532 = vrot.lane.b32.xlu1 %v2296_v24, %s7982_s16  ;;  %2528 = vrot.lane.b32.xlu0 %v2296_v24, %s7980_s1 }
 0x54b   : > { %2534 = vrot.lane.b32.xlu1 %v6515_v23, %s7982_s16  ;;  %2530 = vrot.lane.b32.xlu0 %v6515_v23, %s7980_s1  ;;  %s8138_s1 = smov 63   ;;  %s8139_s16 = sld [smem:[#allocation23_spill]] }
 0x54f   : > { %2577 = vperm.xlu1 %5599, %v2567_v25  }
 0x553   : > { %2587 = vperm.xlu1 %5599, %v2569_v2  }
 0x56a   : > { %2152 = vadd.xlane.f32.xlu0 %v2151_v29 }
 0x56e   : > { %2164 = vadd.xlane.f32.xlu0 %v2163_v6 }
 0x572   : > { %2167 = vadd.xlane.f32.xlu0 %v2166_v54 }
 0x577   : > { %2155 = vadd.xlane.f32.xlu1 %v2154_v3 }
 0x57b   : > { %2158 = vadd.xlane.f32.xlu1 %v2157_v4 }
 0x581   : > { %v2307_v34 = vpop.permute.xlu1 %2306  ;;  %v2303_v35 = vpop.permute.xlu0 %2302 }
 0x582   : > { %v2315_v20 = vsel %vm7972_vm2, %v2303_v35, %v2307_v34 }
 0x583   : > { %v2336_v25 = vsel %vm6662_vm6, %v2315_v20, 0 }
 0x585   : > { %v6588_v38 = vpop.permute.xlu1 %2343  ;;  %v6590_v39 = vpop.permute.xlu0 %2339 }
 0x586   : > { %v2352_v33 = vsel %vm7974_vm15, %v6590_v39, %v6588_v38 }
 0x587   : > { %v2368_v38 = vsel %vm6704_vm11, %v2352_v33, 0 }
 0x588   : > { %2572 = vperm.xlu0 %5598, %v2566_v40  }
 0x589   : > { %v6595_v42 = vpop.permute.xlu1 %2440  ;;  %v6597_v45 = vpop.permute.xlu0 %2436 }
 0x58c   : > { %2582 = vperm.xlu0 %5598, %v2568_v46  }
 0x58d   : > { %v6617_v60 = vpop.permute.xlu1 %2375  ;;  %v6619_v61 = vpop.permute.xlu0 %2371 }
 0x58e   : > { %v2384_v31 = vsel %vm7977_vm14, %v6619_v61, %v6617_v60 }
 0x591   : > { %v6628_v7 = vpop.permute.xlu1 %2470  ;;  %v6630_v8 = vpop.permute.xlu0 %2466 }
 0x595   : > { %v6646_v47 = vpop.permute.xlu1 %2408  ;;  %v6648_v13 = vpop.permute.xlu0 %2404 }
 0x596   : > { %v2416_v16 = vsel %vm7979_vm5, %v6648_v13, %v6646_v47  ;;  %v5612_v47 = vld [vmem:[%s5940_s24 + $0x1c] ss:$12 sps:$4 sm:$0xff]  }
 0x599   : > { %v2305_v14 = vpop.permute.xlu1 %2304  ;;  %v2301_v53 = vpop.permute.xlu0 %2300 }
 0x59a   : > { %v2311_v22 = vsel %vm7972_vm2, %v2301_v53, %v2305_v14  ;;  %vm7973_vm2 = vcmask 515072   ;;  %v5621_v14 = vld [vmem:[%s8159_s6 + $0x20] ss:$12 sps:$4 sm:$0xff]  }
 0x59b   : > { %v2335_v19 = vsel %vm6662_vm6, %v2311_v22, 0  ;;  %v2449_v54 = vsel %vm7973_vm2, %v6597_v45, %v6595_v42  ;;  %v2520_v45 = vsel %vm2519_vm7, 65537, %v5839_v1  ;;  %vm2506_vm7 = vcmask 457728  }
 0x59c   : > { %5307 = vmatpush3.bf16.msra.mxu1 %v2335_v19  ;;  %v2524_v3 = vrot.slane %v2520_v45, %v6297_v56 }
 0x59d   : > { %v2342_v24 = vpop.permute.xlu1 %2341  ;;  %v2338_v17 = vpop.permute.xlu0 %2337  ;;  %5308 = vmatprep.subr.bf16.mxu1 %v6515_v23 }
 0x59e   : > { %v2348_v2 = vsel %vm7974_vm15, %v2338_v17, %v2342_v24  ;;  %vm6746_vm15 = vcmp.ne.s16.totalorder %v2398_v37, 0  ;;  %vm6780_vm10 = vcmp.ne.s16.totalorder %v2524_v3, 0 }
 0x59f   : > { %v2367_v6 = vsel %vm6704_vm11, %v2348_v2, 0  ;;  %v2401_v60 = vsel %vm6746_vm15, %v2384_v31, 0 }
 0x5a0   : > { %5309 = vmatpush3.bf16.msra.mxu1 %v2336_v25 }
 0x5a1   : > { %v2439_v23 = vpop.permute.xlu1 %2438  ;;  %v2435_v27 = vpop.permute.xlu0 %2434 }
 0x5a2   : > { %v2445_v30 = vsel %vm7973_vm2, %v2435_v27, %v2439_v23  ;;  %vm7976_vm2 = vcmask 465920  }
 0x5a3   : > { %5458 = vmatprep.subr.msk.bf16.mxu1 %vm6699_vm1, %v2445_v30  ;;  %v2479_v63 = vsel %vm7976_vm2, %v6630_v8, %v6628_v7  ;;  %v2550_v8 = vsel %vm2549_vm4, 65537, %v5839_v1  ;;  %v5615_v30 = vld [vmem:[%s5940_s24 + $0x18] ss:$12 sps:$4 sm:$0xff]  }
 0x5a4   : > { %5311 = vmatpush3.bf16.msra.mxu1 %v2367_v6  ;;  %v2554_v22 = vrot.slane %v2550_v8, %v6297_v56  ;;  %v5624_v7 = vld [vmem:[%s8159_s6 + $0x18] ss:$12 sps:$4 sm:$0xff]  }
 0x5a5   : > { %v2374_v35 = vpop.permute.xlu1 %2373  ;;  %v2370_v36 = vpop.permute.xlu0 %2369  ;;  %5459 = vmatprep.subr.msk.bf16.mxu1 %vm6699_vm1, %v2449_v54 }
 0x5a6   : > { %v2380_v39 = vsel %vm7977_vm14, %v2370_v36, %v2374_v35  ;;  %vm6804_vm4 = vcmp.ne.s16.totalorder %v2554_v22, 0  ;;  %vm8133_vm14 = vcmask 261120  }
 0x5a7   : > { %v2400_v52 = vsel %vm6746_vm15, %v2380_v39, 0 }
 0x5a8   : > { %5313 = vmatpush3.bf16.msra.mxu1 %v2368_v38 }
 0x5a9   : > { %v2469_v41 = vpop.permute.xlu1 %2468  ;;  %v2465_v42 = vpop.permute.xlu0 %2464 }
 0x5aa   : > { %v2475_v49 = vsel %vm7976_vm2, %v2465_v42, %v2469_v41  ;;  %vm6785_vm2 = vcmp.ne.s16.totalorder %v2430_v9, 0 }
 0x5ab   : > { %5460 = vmatprep.subr.msk.bf16.mxu1 %vm6741_vm3, %v2475_v49  ;;  %v2433_v21 = vsel %vm6785_vm2, %v2416_v16, 0 }
 0x5ac   : > { %5315 = vmatpush3.bf16.msra.mxu1 %v2400_v52 }
 0x5ad   : > { %v2407_v4 = vpop.permute.xlu1 %2406  ;;  %v2403_v5 = vpop.permute.xlu0 %2402  ;;  %5461 = vmatprep.subr.msk.bf16.mxu1 %vm6741_vm3, %v2479_v63 }
 0x5ae   : > { %v2412_v61 = vsel %vm7979_vm5, %v2403_v5, %v2407_v4 }
 0x5af   : > { %v2432_v15 = vsel %vm6785_vm2, %v2412_v61, 0 }
 0x5b0   : > { %5317 = vmatpush3.bf16.msra.mxu1 %v2401_v60 }
 0x5b1   : > { %v2503_v10 = vpop.permute.xlu1 %2502  ;;  %v2499_v11 = vpop.permute.xlu0 %2498 }
 0x5b2   : > { %v2509_v53 = vsel %vm2506_vm7, %v2499_v11, %v2503_v10 }
 0x5b3   : > { %5462 = vmatprep.subr.msk.bf16.mxu1 %vm6780_vm10, %v2509_v53 }
 0x5b4   : > { %5319 = vmatpush3.bf16.msra.mxu1 %v2432_v15 }
 0x5b5   : > { %v2505_v19 = vpop.permute.xlu1 %2504  ;;  %v2501_v62 = vpop.permute.xlu0 %2500 }
 0x5b6   : > { %v2513_v20 = vsel %vm2506_vm7, %v2501_v62, %v2505_v19  ;;  %v2889_v19 = vld [vmem:[%s8134_s23 + $0x8] sm:$0xff]  ;;  %v2891_v62 = vld [vmem:[%s8134_s23 + $0x18] sm:$0xff] }
 0x5b7   : > { %5463 = vmatprep.subr.msk.bf16.mxu1 %vm6780_vm10, %v2513_v20  ;;  %v2116_v20 = vld [vmem:[%s8098_s28 + $0x18] sm:$0xff] }
 0x5b8   : > { %5321 = vmatpush3.bf16.msra.mxu1 %v2433_v21  ;;  %v2138_v21 = vmul.f32 %v6575_v55, %v2116_v20 }
 0x5b9   : > { %v2533_v13 = vpop.permute.xlu1 %2532  ;;  %v2529_v17 = vpop.permute.xlu0 %2528 }
 0x5ba   : > { %v2539_v18 = vsel %vm7978_vm0, %v2529_v17, %v2533_v13  ;;  %v2890_v13 = vld [vmem:[%s8134_s23 + $0x10] sm:$0xff] }
 0x5bb   : > { %v2556_v25 = vsel %vm6804_vm4, %v2539_v18, 0  ;;  %2659 = vmatmul.mubr.bf16.vlgmr.msra.gmra.mrb[8].mxu1 %v5609_v0  ;;  %5464 = vmatprep.subr.msk.bf16.mxu0 %vm6804_vm4, %v2539_v18  ;;  %v2160_v0 = vsel %vm8133_vm14, %v2138_v21, 0.0 }
 0x5bc   : > { %5390 = vmatpush3.bf16.msra.mxu0 %v2556_v25  ;;  %2666 = vmatprep.mubr.bf16.mxu1 %v5612_v47  ;;  %v2888_v47 = vld [vmem:[%s8134_s23] sm:$0xff] }
 0x5bd   : > { %v2535_v2 = vpop.permute.xlu1 %2534  ;;  %v2531_v23 = vpop.permute.xlu0 %2530 }
 0x5be   : > { %v2543_v27 = vsel %vm7978_vm0, %v2531_v23, %v2535_v2  ;;  %vm8135_vm0 = vcmask 64512  }
 0x5bf   : > { %v2557_v28 = vsel %vm6804_vm4, %v2543_v27, 0  ;;  %5465 = vmatprep.subr.msk.bf16.mxu0 %vm6804_vm4, %v2543_v27  ;;  %vm8136_vm5 = vmmov %vm8135_vm0 }
 0x5c0   : > { %5392 = vmatpush3.bf16.msra.mxu0 %v2557_v28 }
 0x5c3   : > { %2667 = vmatmul.mubr.bf16.gmra.mrb[12].mxu1 %v5615_v30  ;;  %5394 = vmatmul.mubr.msk.bf16.vlgmr.msra.gmra.mrb[8].mxu0 %vm8133_vm14, %v5616_v32 }
 0x5ce   : > { %v2578_v42 = vpop.permute.xlu1 %2577 }
 0x5d2   : > { %v2588_v53 = vpop.permute.xlu1 %2587 }
 0x5f7   : > { %v6822_v6 = vpop.xlane.xlu0 %2152 }
 0x5fb   : > { %v6824_v33 = vpop.xlane.xlu0 %2164 }
 0x5ff   : > { %v6826_v54 = vpop.xlane.xlu0 %2167 }
 0x604   : > { %v6863_v17 = vpop.xlane.xlu1 %2155 }
 0x607   : > { %v2573_v35 = vpop.permute.xlu0 %2572 }
 0x608   : > { %v6865_v18 = vpop.xlane.xlu1 %2158 }
 0x60b   : > { %v2583_v45 = vpop.permute.xlu0 %2582 }
 0x68e   : > { %v5322_v58 = vpop.f32.mrb[8].mxu1 }
 0x68f   : > { %v5323_v36 = vpop.f32.mrb[9].mxu1 }
 0x690   : > { %v5324_v37 = vadd.f32 %v5323_v36, %v5322_v58  ;;  %v5325_v38 = vpop.f32.mrb[10].mxu1 }
 0x691   : > { %v5326_v39 = vpop.f32.mrb[11].mxu1 }
 0x692   : > { %v5327_v41 = vadd.f32 %v5326_v39, %v5325_v38  ;;  %v2661_v59 = vadd.f32 %v5324_v37, %v2573_v35 }
 0x694   : > { %v2664_v9 = vadd.f32 %v5327_v41, %v2578_v42 }
 0x696   : > { %v5328_v49 = vpop.f32.mrb[12].mxu1  ;;  %v5395_v57 = vpop.f32.mrb[8].mxu0 }
 0x697   : > { %v5329_v52 = vpop.f32.mrb[13].mxu1  ;;  %v2709_v31 = vpop.f32.mrb[9].mxu0 }
 0x698   : > { %v5330_v63 = vadd.f32 %v5329_v52, %v5328_v49  ;;  %v2710_v3 = vadd.f32 %v2709_v31, %v2661_v59  ;;  %v5331_v4 = vpop.f32.mrb[14].mxu1  ;;  %v5396_v5 = vpop.f32.mrb[10].mxu0 }
 0x699   : > { %v5332_v60 = vpop.f32.mrb[15].mxu1  ;;  %v2712_v61 = vpop.f32.mrb[11].mxu0 }
 0x69a   : > { %v2669_v8 = vadd.f32 %v5330_v63, %v2583_v45  ;;  %v5333_v10 = vadd.f32 %v5332_v60, %v5331_v4  ;;  %v2713_v11 = vadd.f32 %v2712_v61, %v2664_v9  ;;  %2728 = vrot.lane.b32.xlu0 %v2710_v3, %s7994_s26  ;;  %v2760_v36 = vmul.f32 2.0, %v2710_v3 }
 0x69c   : > { %v6829_v15 = vadd.f32 %v5395_v57, %v2669_v8  ;;  %v2672_v22 = vadd.f32 %v5333_v10, %v2588_v53  ;;  %2730 = vrot.lane.b32.xlu1 %v2713_v11, %s7994_s26  ;;  %v2761_v41 = vmul.f32 2.0, %v2713_v11 }
 0x69e   : > { %v6832_v16 = vadd.f32 %v5396_v5, %v2672_v22  ;;  %2740 = vrot.lane.b32.xlu0 %v2710_v3, %s7995_s22  ;;  %v2762_v53 = vmul.f32 2.0, %v6829_v15 }
 0x6a0   : > { %2742 = vrot.lane.b32.xlu1 %v2713_v11, %s7995_s22  ;;  %v2763_v20 = vmul.f32 2.0, %v6832_v16 }
 0x6a2   : > { %2768 = vrot.lane.b32.xlu0 %v2710_v3, %s7984_s11 }
 0x6a4   : > { %2770 = vrot.lane.b32.xlu1 %v2713_v11, %s7984_s11 }
 0x6a6   : > { %2780 = vrot.lane.b32.xlu0 %v2710_v3, %s7986_s15 }
 0x6a8   : > { %2782 = vrot.lane.b32.xlu1 %v2713_v11, %s7986_s15 }
 0x6aa   : > { %2732 = vrot.lane.b32.xlu0 %v6829_v15, %s7994_s26 }
 0x6ac   : > { %2734 = vrot.lane.b32.xlu1 %v6832_v16, %s7994_s26 }
 0x6ae   : > { %2744 = vrot.lane.b32.xlu0 %v6829_v15, %s7995_s22 }
 0x6b0   : > { %2746 = vrot.lane.b32.xlu1 %v6832_v16, %s7995_s22 }
 0x6b2   : > { %2772 = vrot.lane.b32.xlu0 %v6829_v15, %s7984_s11 }
 0x6b4   : > { %2774 = vrot.lane.b32.xlu1 %v6832_v16, %s7984_s11  ;;  %s8142_s11 = sld [smem:[#allocation18_spill]] }
 0x6b6   : > { %2784 = vrot.lane.b32.xlu0 %v6829_v15, %s7986_s15 }
 0x6b8   : > { %2786 = vrot.lane.b32.xlu1 %v6832_v16, %s7986_s15 }
 0x6ba   : > { %s1223_s15 = scalar_lea.vmem %s8142_s11, %s8338_s0  ;;  %s8149_s11 = smov 9  }
 0x6bc   : > { %2899 = vperm.xlu1 %5599, %v2889_v19  }
 0x6c0   : > { %2909 = vperm.xlu1 %5599, %v2891_v62  }
 0x6d5   : > { %2161 = vadd.xlane.f32.xlu0 %v2160_v0 }
 0x6eb   : > { %2894 = vperm.xlu0 %5598, %v2888_v47  }
 0x6ef   : > { %2904 = vperm.xlu0 %5598, %v2890_v13  }
 0x70c   : > { %v2729_v25 = vpop.permute.xlu0 %2728 }
 0x70e   : > { %v2731_v2 = vpop.permute.xlu1 %2730 }
 0x710   : > { %v2741_v23 = vpop.permute.xlu0 %2740 }
 0x711   : > { %v2752_v28 = vsel %vm8135_vm0, %v2729_v25, %v2741_v23 }
 0x712   : > { %v2743_v27 = vpop.permute.xlu1 %2742  ;;  %v2756_v58 = vsel %vm6600_vm9, %v2752_v28, 0.0 }
 0x713   : > { %v2753_v32 = vsel %vm8136_vm5, %v2731_v2, %v2743_v27  ;;  %v2764_v39 = vadd.f32 %v2760_v36, %v2756_v58  ;;  %vm8137_vm5 = vmmov %vm8135_vm0  ;;  %v2142_v2 = vmul.f32 %v6575_v55, %v2120_v44  ;;  %v2119_v27 = vld [vmem:[%s8098_s28 + $0x30] sm:$0xff]  ;;  %v2199_v58 = vld [vmem:[%s8139_s16] sm:$0xff] }
 0x714   : > { %v2769_v30 = vpop.permute.xlu0 %2768  ;;  %v2757_v37 = vsel %vm6600_vm9, %v2753_v32, 0.0  ;;  %v2141_v28 = vmul.f32 %v6575_v55, %v2119_v27  ;;  %v2200_v32 = vld [vmem:[%s8139_s16 + $0x8] sm:$0xff]  ;;  %v2201_v36 = vld [vmem:[%s8139_s16 + $0x10] sm:$0xff] }
 0x715   : > { %v2765_v57 = vadd.f32 %v2761_v41, %v2757_v37  ;;  %v2215_v37 = vadd.f32 %v2199_v58, %v6822_v6  ;;  %v2204_v55 = vld [vmem:[%s8139_s16 + $0x28] sm:$0xff] }
 0x716   : > { %v2771_v35 = vpop.permute.xlu1 %2770 }
 0x718   : > { %v2781_v38 = vpop.permute.xlu0 %2780 }
 0x719   : > { %v2792_v42 = vsel %vm2506_vm7, %v2769_v30, %v2781_v38  ;;  %v2203_v38 = vld [vmem:[%s8139_s16 + $0x20] sm:$0xff] }
 0x71a   : > { %v2796_v45 = vsel %vm6657_vm13, %v2792_v42, 0.0  ;;  %v2783_v49 = vpop.permute.xlu1 %2782  ;;  %v2219_v41 = vadd.f32 %v2203_v38, %v6824_v33  ;;  %v2202_v42 = vld [vmem:[%s8139_s16 + $0x18] sm:$0xff] }
 0x71b   : > { %v6876_v59 = vadd.f32 %v2796_v45, %v2764_v39  ;;  %v2793_v52 = vsel %vm2506_vm7, %v2771_v35, %v2783_v49  ;;  %v2216_v35 = vadd.f32 %v2200_v32, %v6863_v17  ;;  %v2217_v39 = vadd.f32 %v2201_v36, %v6865_v18 }
 0x71c   : > { %v2797_v31 = vsel %vm6657_vm13, %v2793_v52, 0.0  ;;  %v2733_v63 = vpop.permute.xlu0 %2732  ;;  %v2220_v45 = vadd.f32 %v2204_v55, %v6826_v54 }
 0x71d   : > { %v6881_v3 = vadd.f32 %v2797_v31, %v2765_v57  ;;  %2808 = vrot.lane.b32.xlu0 %v6876_v59, %s7988_s2 }
 0x71e   : > { %v2735_v4 = vpop.permute.xlu1 %2734 }
 0x71f   : > { %2810 = vrot.lane.b32.xlu1 %v6881_v3, %s7988_s2 }
 0x720   : > { %v2745_v5 = vpop.permute.xlu0 %2744 }
 0x721   : > { %2820 = vrot.lane.b32.xlu0 %v6876_v59, %s7990_s19  ;;  %v2754_v60 = vsel %vm8137_vm5, %v2733_v63, %v2745_v5 }
 0x722   : > { %v2747_v9 = vpop.permute.xlu1 %2746  ;;  %v2758_v10 = vsel %vm6600_vm9, %v2754_v60, 0.0 }
 0x723   : > { %2822 = vrot.lane.b32.xlu1 %v6881_v3, %s7990_s19  ;;  %v2755_v8 = vsel %vm8135_vm0, %v2735_v4, %v2747_v9  ;;  %v2766_v62 = vadd.f32 %v2762_v53, %v2758_v10  ;;  %vm8145_vm0 = vcmask 515072  }
 0x724   : > { %v2773_v61 = vpop.permute.xlu0 %2772  ;;  %v2759_v22 = vsel %vm6600_vm9, %v2755_v8, 0.0  ;;  %vm8140_vm9 = vmmov %vm8133_vm14  ;;  %vm8143_vm14 = vcmask 7168   ;;  %v2840_v8 = vmul.f32 2.0, %v6876_v59 }
 0x725   : > { %2848 = vrot.lane.b32.xlu0 %v6876_v59, %s7996_s10  ;;  %v2767_v47 = vadd.f32 %v2763_v20, %v2759_v22  ;;  %v2172_v23 = vsel %vm8140_vm9, %v2142_v2, 0.0  ;;  %vm8144_vm5 = vmmov %vm8143_vm14  ;;  %v2841_v22 = vmul.f32 2.0, %v6881_v3 }
 0x726   : > { %v2775_v11 = vpop.permute.xlu1 %2774 }
 0x727   : > { %2850 = vrot.lane.b32.xlu1 %v6881_v3, %s7996_s10 }
 0x728   : > { %v2785_v19 = vpop.permute.xlu0 %2784 }
 0x729   : > { %v2794_v21 = vsel %vm2506_vm7, %v2773_v61, %v2785_v19  ;;  %2860 = vrot.lane.b32.xlu0 %v6876_v59, %s8138_s1 }
 0x72a   : > { %v2798_v0 = vsel %vm6657_vm13, %v2794_v21, 0.0  ;;  %v2787_v15 = vpop.permute.xlu1 %2786 }
 0x72b   : > { %v6908_v13 = vadd.f32 %v2798_v0, %v2766_v62  ;;  %v2795_v48 = vsel %vm2506_vm7, %v2775_v11, %v2787_v15  ;;  %2862 = vrot.lane.b32.xlu1 %v6881_v3, %s8138_s1 }
 0x72c   : > { %v2799_v16 = vsel %vm6657_vm13, %v2795_v48, 0.0  ;;  %vm8141_vm13 = vmmov %vm8140_vm9 }
 0x72d   : > { %v6915_v25 = vadd.f32 %v2799_v16, %v2767_v47  ;;  %2812 = vrot.lane.b32.xlu0 %v6908_v13, %s7988_s2  ;;  %v2169_v30 = vsel %vm8141_vm13, %v2141_v28, 0.0  ;;  %vm8146_vm9 = vmmov %vm8145_vm0  ;;  %v6968_v47 = vld [vmem:[%s1223_s15] ss:$0 sm:$0xff]  ;;  %vm8003_vm13 = vcmask 523264   ;;  %s8150_s15 = smov 73  }
 0x72f   : > { %2814 = vrot.lane.b32.xlu1 %v6915_v25, %s7988_s2  ;;  %s8151_s2 = smov 7  }
 0x731   : > { %2824 = vrot.lane.b32.xlu0 %v6908_v13, %s7990_s19 }
 0x733   : > { %2826 = vrot.lane.b32.xlu1 %v6915_v25, %s7990_s19  ;;  %s8152_s19 = smov 71  }
 0x735   : > { %2852 = vrot.lane.b32.xlu0 %v6908_v13, %s7996_s10 }
 0x737   : > { %2854 = vrot.lane.b32.xlu1 %v6915_v25, %s7996_s10 }
 0x739   : > { %2864 = vrot.lane.b32.xlu0 %v6908_v13, %s8138_s1 }
 0x73b   : > { %2866 = vrot.lane.b32.xlu1 %v6915_v25, %s8138_s1  ;;  %v2900_v6 = vpop.permute.xlu1 %2899 }
 0x73f   : > { %v6952_v18 = vpop.permute.xlu1 %2909 }
 0x758   : > { %2173 = vadd.xlane.f32.xlu0 %v2172_v23  ;;  %v2919_v23 = vmul.f32 %v6968_v47, %v2900_v6 }
 0x75f   : > { %2170 = vadd.xlane.f32.xlu1 %v2169_v30 }
 0x762   : > { %v2162_v49 = vpop.xlane.xlu0 %2161 }
 0x763   : > { %v2218_v57 = vadd.f32 %v2202_v42, %v2162_v49 }
 0x76a   : > { %v2895_v17 = vpop.permute.xlu0 %2894 }
 0x76b   : > { %v2918_v16 = vmul.f32 %v6968_v47, %v2895_v17  ;;  %v2842_v17 = vmul.f32 2.0, %v6908_v13 }
 0x76e   : > { %3007 = vperm.xlu0 %5598, %v2216_v35   ;;  %v6950_v52 = vpop.permute.xlu0 %2904 }
 0x770   : > { %3002 = vperm.xlu1 %5599, %v2215_v37  }
 0x772   : > { %3012 = vperm.xlu0 %5598, %v2217_v39  }
 0x774   : > { %3026 = vperm.xlu1 %5599, %v2219_v41  }
 0x778   : > { %3031 = vperm.xlu1 %5599, %v2220_v45  }
 0x77c   : > { %3017 = vperm.xlu1 %5599, %v2218_v57  }
 0x78f   : > { %v2809_v31 = vpop.permute.xlu0 %2808 }
 0x791   : > { %v2811_v33 = vpop.permute.xlu1 %2810 }
 0x793   : > { %v2821_v63 = vpop.permute.xlu0 %2820 }
 0x794   : > { %v2832_v5 = vsel %vm8143_vm14, %v2809_v31, %v2821_v63  ;;  %vm8147_vm14 = vmmov %vm8144_vm5 }
 0x795   : > { %v2823_v4 = vpop.permute.xlu1 %2822  ;;  %v2836_v60 = vsel %vm6725_vm8, %v2832_v5, 0.0  ;;  %v2843_v5 = vmul.f32 2.0, %v6915_v25  ;;  %v2920_v25 = vmul.f32 %v6968_v47, %v6950_v52 }
 0x796   : > { %v2833_v54 = vsel %vm8144_vm5, %v2811_v33, %v2823_v4  ;;  %v2844_v53 = vadd.f32 %v2840_v8, %v2836_v60 }
 0x797   : > { %v2849_v9 = vpop.permute.xlu0 %2848  ;;  %v2837_v10 = vsel %vm6725_vm8, %v2833_v54, 0.0 }
 0x798   : > { %v2845_v21 = vadd.f32 %v2841_v22, %v2837_v10 }
 0x799   : > { %v2851_v61 = vpop.permute.xlu1 %2850 }
 0x79b   : > { %v2861_v11 = vpop.permute.xlu0 %2860 }
 0x79c   : > { %v2872_v19 = vsel %vm8145_vm0, %v2849_v9, %v2861_v11 }
 0x79d   : > { %v2876_v62 = vsel %vm6642_vm12, %v2872_v19, 0.0  ;;  %v2863_v20 = vpop.permute.xlu1 %2862  ;;  %v2921_v19 = vmul.f32 %v6968_v47, %v6952_v18 }
 0x79e   : > { %v2880_v0 = vadd.f32 %v2876_v62, %v2844_v53  ;;  %v2873_v15 = vsel %vm8146_vm9, %v2851_v61, %v2863_v20  ;;  %vm8148_vm9 = vmmov %vm8145_vm0 }
 0x79f   : > { %v2877_v59 = vsel %vm6642_vm12, %v2873_v15, 0.0  ;;  %v2813_v48 = vpop.permute.xlu0 %2812 }
 0x7a0   : > { %v2884_v44 = vmul.f32 0.0625, %v2880_v0  ;;  %v2881_v3 = vadd.f32 %v2877_v59, %v2845_v21 }
 0x7a1   : > { %v2815_v2 = vpop.permute.xlu1 %2814 }
 0x7a2   : > { %v2922_v27 = vadd.f32 %v2918_v16, %v2884_v44  ;;  %v2885_v28 = vmul.f32 0.0625, %v2881_v3 }
 0x7a3   : > { %v2825_v30 = vpop.permute.xlu0 %2824 }
 0x7a4   : > { %v2923_v32 = vadd.f32 %v2919_v23, %v2885_v28  ;;  %v2926_v58 = vmul.f32 0.2, %v2922_v27  ;;  %v2834_v36 = vsel %vm8147_vm14, %v2813_v48, %v2825_v30  ;;  %v2205_v28 = vld [vmem:[%s8139_s16 + $0x30] sm:$0xff] }
 0x7a5   : > { %v2827_v35 = vpop.permute.xlu1 %2826  ;;  %v2838_v49 = vsel %vm6725_vm8, %v2834_v36, 0.0 }
 0x7a6   : > { %v6975_v37 = vmax.f32 %v2922_v27, %v2926_v58  ;;  %v2927_v38 = vmul.f32 0.2, %v2923_v32  ;;  %v2835_v41 = vsel %vm8144_vm5, %v2815_v2, %v2827_v35  ;;  %v2846_v4 = vadd.f32 %v2842_v17, %v2838_v49  ;;  %v2206_v2 = vld [vmem:[%s8139_s16 + $0x38] sm:$0xff] }
 0x7a7   : > { %v2853_v39 = vpop.permute.xlu0 %2852  ;;  %v2839_v33 = vsel %vm6725_vm8, %v2835_v41, 0.0 }
 0x7a8   : > { %v2935_v55 = vsel %vm8003_vm13, %v6975_v37, 0.0  ;;  %v6980_v42 = vmax.f32 %v2923_v32, %v2927_v38  ;;  %v2952_v45 = vmul.f32 %v6975_v37, %v6975_v37  ;;  %v2847_v61 = vadd.f32 %v2843_v5, %v2839_v33 }
 0x7a9   : > { %v2855_v57 = vpop.permute.xlu1 %2854  ;;  %2936 = vadd.xlane.f32.xlu1 %v2935_v55 }
 0x7aa   : > { %v2938_v6 = vsel %vm8003_vm13, %v6980_v42, 0.0  ;;  %v2953_v31 = vmul.f32 %v6980_v42, %v6980_v42  ;;  %v2956_v54 = vsel %vm8003_vm13, %v2952_v45, 0.0 }
 0x7ab   : > { %2939 = vadd.xlane.f32.xlu0 %v2938_v6  ;;  %v2865_v63 = vpop.permute.xlu0 %2864 }
 0x7ac   : > { %v2874_v9 = vsel %vm8145_vm0, %v2853_v39, %v2865_v63  ;;  %v2959_v34 = vsel %vm8003_vm13, %v2953_v31, 0.0 }
 0x7ad   : > { %v2878_v13 = vsel %vm6642_vm12, %v2874_v9, 0.0  ;;  %v2867_v60 = vpop.permute.xlu1 %2866  ;;  %2957 = vadd.xlane.f32.xlu1 %v2956_v54 }
 0x7ae   : > { %v2882_v8 = vadd.f32 %v2878_v13, %v2846_v4  ;;  %v2875_v10 = vsel %vm8148_vm9, %v2855_v57, %v2867_v60 }
 0x7af   : > { %v2879_v11 = vsel %vm6642_vm12, %v2875_v10, 0.0  ;;  %2960 = vadd.xlane.f32.xlu0 %v2959_v34  ;;  %vm8167_vm12 = vcmask 261120  }
 0x7b0   : > { %v2886_v53 = vmul.f32 0.0625, %v2882_v8  ;;  %v2883_v22 = vadd.f32 %v2879_v11, %v2847_v61  ;;  %vm8168_vm8 = vmmov %vm8167_vm12 }
 0x7b1   : > { %vm8169_vm14 = vmmov %vm8168_vm8 }
 0x7b2   : > { %v2924_v62 = vadd.f32 %v2920_v25, %v2886_v53  ;;  %v2887_v20 = vmul.f32 0.0625, %v2883_v22  ;;  %vm8170_vm5 = vmmov %vm8168_vm8 }
 0x7b3   : > { %vm8171_vm0 = vmmov %vm8170_vm5 }
 0x7b4   : > { %v2925_v21 = vadd.f32 %v2921_v19, %v2887_v20  ;;  %v2928_v0 = vmul.f32 0.2, %v2924_v62  ;;  %vm8172_vm9 = vmmov %vm8171_vm0 }
 0x7b6   : > { %v7006_v15 = vmax.f32 %v2924_v62, %v2928_v0  ;;  %v2929_v59 = vmul.f32 0.2, %v2925_v21 }
 0x7b8   : > { %v2941_v12 = vsel %vm8003_vm13, %v7006_v15, 0.0  ;;  %v7010_v48 = vmax.f32 %v2925_v21, %v2929_v59  ;;  %v2954_v52 = vmul.f32 %v7006_v15, %v7006_v15 }
 0x7b9   : > { %2942 = vadd.xlane.f32.xlu1 %v2941_v12 }
 0x7ba   : > { %v2944_v18 = vsel %vm8003_vm13, %v7010_v48, 0.0  ;;  %v2955_v16 = vmul.f32 %v7010_v48, %v7010_v48  ;;  %v2962_v44 = vsel %vm8003_vm13, %v2954_v52, 0.0 }
 0x7bb   : > { %2945 = vadd.xlane.f32.xlu0 %v2944_v18 }
 0x7bc   : > { %v2965_v3 = vsel %vm8003_vm13, %v2955_v16, 0.0 }
 0x7bd   : > { %2963 = vadd.xlane.f32.xlu1 %v2962_v44 }
 0x7bf   : > { %2966 = vadd.xlane.f32.xlu0 %v2965_v3 }
 0x7e5   : > { %v2174_v23 = vpop.xlane.xlu0 %2173 }
 0x7e6   : > { %v2222_v27 = vadd.f32 %v2206_v2, %v2174_v23 }
 0x7e8   : > { %3041 = vperm.xlu1 %5599, %v2222_v27  }
 0x7ec   : > { %v2171_v30 = vpop.xlane.xlu1 %2170 }
 0x7ed   : > { %v2221_v32 = vadd.f32 %v2205_v28, %v2171_v30  ;;  %v3008_v38 = vpop.permute.xlu0 %3007 }
 0x7ef   : > { %3036 = vperm.xlu0 %5598, %v2221_v32  }
 0x7f0   : > { %v3003_v58 = vpop.permute.xlu1 %3002 }
 0x7f1   : > { %v7024_v41 = vpop.permute.xlu0 %3012 }
 0x7f4   : > { %v3027_v35 = vpop.permute.xlu1 %3026 }
 0x7f8   : > { %v3032_v36 = vpop.permute.xlu1 %3031 }
 0x7fc   : > { %v7022_v39 = vpop.permute.xlu1 %3017 }
 0x836   : > { %v2937_v55 = vpop.xlane.xlu1 %2936 }
 0x837   : > { %v2948_v45 = vmul.f32 0.015625, %v2937_v55 }
 0x838   : > { %v2940_v49 = vpop.xlane.xlu0 %2939 }
 0x839   : > { %v2949_v57 = vmul.f32 0.015625, %v2940_v49  ;;  %v2972_v6 = vmul.f32 %v2948_v45, %v2948_v45  ;;  %v2984_v34 = vsub.f32 %v6975_v37, %v2948_v45 }
 0x83a   : > { %v2958_v17 = vpop.xlane.xlu1 %2957 }
 0x83b   : > { %v2968_v31 = vmul.f32 0.015625, %v2958_v17  ;;  %v2973_v63 = vmul.f32 %v2949_v57, %v2949_v57  ;;  %v2985_v22 = vsub.f32 %v6980_v42, %v2949_v57 }
 0x83c   : > { %v2961_v33 = vpop.xlane.xlu0 %2960 }
 0x83d   : > { %v2976_v4 = vsub.f32 %v2968_v31, %v2972_v6  ;;  %v2969_v5 = vmul.f32 0.015625, %v2961_v33  ;;  %v3205_v33 = vld [vmem:[%s8165_s21 + $0x8] sm:$0xff] }
 0x83f   : > { %v2980_v9 = vmax.f32 %v2976_v4, 0.0  ;;  %v2977_v54 = vsub.f32 %v2969_v5, %v2973_v63  ;;  %v3204_v63 = vld [vmem:[%s8165_s21] sm:$0xff] }
 0x841   : > { %v2988_v13 = vadd.f32 1e-05, %v2980_v9  ;;  %v2981_v60 = vmax.f32 %v2977_v54, 0.0  ;;  %v3207_v9 = vld [vmem:[%s8165_s21 + $0x18] sm:$0xff]  ;;  %v3206_v54 = vld [vmem:[%s8165_s21 + $0x10] sm:$0xff] }
 0x843   : > { %5672 = vrsqrt.f32 %v2988_v13  ;;  %v2989_v61 = vadd.f32 1e-05, %v2981_v60 }
 0x845   : > { %5674 = vrsqrt.f32 %v2989_v61  ;;  %v2121_v61 = vld [vmem:[%s8098_s28 + $0x40] sm:$0xff] }
 0x846   : > { %v2943_v8 = vpop.xlane.xlu1 %2942 }
 0x847   : > { %v2950_v53 = vmul.f32 0.015625, %v2943_v8  ;;  %v5696_v8 = vld [vmem:[%s6572_s18] ss:$0 sm:$0xff]  ;;  %s8284_s18 = sld [smem:[#allocation26_spill]] }
 0x848   : > { %v2946_v10 = vpop.xlane.xlu0 %2945 }
 0x849   : > { %v2951_v21 = vmul.f32 0.015625, %v2946_v10  ;;  %v2974_v52 = vmul.f32 %v2950_v53, %v2950_v53  ;;  %v2143_v10 = vmul.f32 %v5696_v8, %v2121_v61 }
 0x84a   : > { %v2964_v11 = vpop.xlane.xlu1 %2963 }
 0x84b   : > { %v2970_v0 = vmul.f32 0.015625, %v2964_v11  ;;  %v2975_v44 = vmul.f32 %v2951_v21, %v2951_v21  ;;  %v2122_v11 = vld [vmem:[%s8098_s28 + $0x48] sm:$0xff] }
 0x84c   : > { %v2967_v62 = vpop.xlane.xlu0 %2966 }
 0x84d   : > { %v5673_v25 = vpop.eup %5672  ;;  %v2971_v18 = vmul.f32 0.015625, %v2967_v62  ;;  %v2978_v3 = vsub.f32 %v2970_v0, %v2974_v52  ;;  %v2123_v62 = vld [vmem:[%s8098_s28 + $0x50] sm:$0xff] }
 0x84e   : > { %v2996_v19 = vmul.f32 %v5673_v25, %v2984_v34  ;;  %v2125_v34 = vld [vmem:[%s8098_s28 + $0x60] sm:$0xff]  ;;  %v2175_v25 = vsel %vm8168_vm8, %v2143_v10, 0.0  ;;  %v2127_v52 = vld [vmem:[%s8098_s28 + $0x70] sm:$0xff]  ;;  %vm8174_vm8 = vmmov %vm8171_vm0 }
 0x84f   : > { %v5675_v20 = vpop.eup %5674  ;;  %v2979_v37 = vsub.f32 %v2971_v18, %v2975_v44  ;;  %v2982_v28 = vmax.f32 %v2978_v3, 0.0  ;;  %v2149_v3 = vmul.f32 %v5696_v8, %v2127_v52 }
 0x850   : > { %v3020_v59 = vmul.f32 %v3003_v58, %v2996_v19  ;;  %v2997_v12 = vmul.f32 %v5675_v20, %v2985_v22  ;;  %v2144_v22 = vmul.f32 %v5696_v8, %v2122_v11  ;;  %v2126_v19 = vld [vmem:[%s8098_s28 + $0x68] sm:$0xff] }
 0x851   : > { %v2983_v42 = vmax.f32 %v2979_v37, 0.0  ;;  %v2990_v30 = vadd.f32 1e-05, %v2982_v28 }
 0x852   : > { %v3021_v16 = vmul.f32 %v3008_v38, %v2997_v12  ;;  %v3044_v2 = vadd.f32 %v3027_v35, %v3020_v59  ;;  %v2986_v35 = vsub.f32 %v7006_v15, %v2950_v53  ;;  %v2987_v38 = vsub.f32 %v7010_v48, %v2951_v21  ;;  %v2124_v12 = vld [vmem:[%s8098_s28 + $0x58] sm:$0xff] }
 0x853   : > { %v2991_v32 = vadd.f32 1e-05, %v2983_v42  ;;  %5676 = vrsqrt.f32 %v2990_v30  ;;  %v2147_v53 = vmul.f32 %v5696_v8, %v2125_v34  ;;  %v2148_v21 = vmul.f32 %v5696_v8, %v2126_v19 }
 0x854   : > { %v3045_v23 = vadd.f32 %v3032_v36, %v3021_v16  ;;  %v2178_v0 = vsel %vm8170_vm5, %v2144_v22, 0.0  ;;  %v2145_v59 = vmul.f32 %v5696_v8, %v2123_v62  ;;  %v2146_v16 = vmul.f32 %v5696_v8, %v2124_v12  ;;  %vm8176_vm5 = vmmov %vm8171_vm0 }
 0x855   : > { %5678 = vrsqrt.f32 %v2991_v32  ;;  %v2187_v20 = vsel %vm8169_vm14, %v2147_v53, 0.0  ;;  %v2190_v18 = vsel %vm8171_vm0, %v2148_v21, 0.0  ;;  %vm8175_vm14 = vmmov %vm8171_vm0  ;;  %vm8177_vm0 = vcmask 449536  }
 0x856   : > { %v3048_v27 = vpack.c.bf16 %v3045_v23, %v3044_v2  ;;  %v2181_v44 = vsel %vm8172_vm9, %v2145_v59, 0.0  ;;  %v2128_v2 = vld [vmem:[%s8098_s28 + $0x78] sm:$0xff]  ;;  %v2184_v42 = vsel %vm8174_vm8, %v2146_v16, 0.0  ;;  %v2193_v32 = vsel %vm8175_vm14, %v2149_v3, 0.0 }
 0x857   : > { %v2150_v30 = vmul.f32 %v5696_v8, %v2128_v2  ;;  %vm8180_vm8 = vcmask 515072  }
 0x858   : > { %3056 = vrot.lane.b32.xlu1 %v3048_v27, %s8149_s11  ;;  %3052 = vrot.lane.b32.xlu0 %v3048_v27, %s8150_s15 }
 0x859   : > { %5338 = vmatprep.subr.bf16.mxu0 %v3048_v27 }
 0x85c   : > { %3074 = vrot.lane.b32.xlu1 %v3048_v27, %s7995_s22  ;;  %3070 = vrot.lane.b32.xlu0 %v3048_v27, %s7994_s26  ;;  %s8155_s26 = smov 1   ;;  %s8156_s22 = smov 65  }
 0x85d   : > { %v5677_v58 = vpop.eup %5676 }
 0x85e   : > { %v2998_v55 = vmul.f32 %v5677_v58, %v2986_v35 }
 0x85f   : > { %v5679_v36 = vpop.eup %5678 }
 0x860   : > { %3128 = vrot.lane.b32.xlu1 %v3048_v27, %s8138_s1  ;;  %3124 = vrot.lane.b32.xlu0 %v3048_v27, %s7996_s10  ;;  %v2999_v45 = vmul.f32 %v5679_v36, %v2987_v38  ;;  %v3022_v57 = vmul.f32 %v7024_v41, %v2998_v55  ;;  %s8157_s10 = smov 56   ;;  %v5620_v41 = vld [vmem:[%s8159_s6 + $0x8] ss:$12 sps:$4 sm:$0xff]   ;;  %v2196_v36 = vsel %vm8176_vm5, %v2150_v30, 0.0  ;;  %vm8182_vm5 = vmmov %vm8180_vm8 }
 0x861   : > { %5401 = vmatprep.mubr.msk.bf16.mxu1 %vm8167_vm12, %v5620_v41  ;;  %vm8173_vm12 = vcmask 72704  }
 0x862   : > { %v3023_v15 = vmul.f32 %v7022_v39, %v2999_v45  ;;  %v5619_v39 = vld [vmem:[%s8159_s6 + $0x4] ss:$12 sps:$4 sm:$0xff]   ;;  %vm8178_vm9 = vmmov %vm8173_vm12 }
 0x863   : > { %3296 = vmatprep.mubr.bf16.mxu0 %v5619_v39 }
 0x864   : > { %3092 = vrot.lane.b32.xlu1 %v3048_v27, %s8151_s2  ;;  %3088 = vrot.lane.b32.xlu0 %v3048_v27, %s8152_s19 }
 0x867   : > { %v3042_v17 = vpop.permute.xlu1 %3041 }
 0x868   : > { %3146 = vrot.lane.b32.xlu1 %v3048_v27, %s8153_s3  ;;  %3142 = vrot.lane.b32.xlu0 %v3048_v27, %s8154_s4  ;;  %v3047_v31 = vadd.f32 %v3042_v17, %v3023_v15 }
 0x86c   : > { %3110 = vrot.lane.b32.xlu1 %v3048_v27, %s8155_s26  ;;  %3106 = vrot.lane.b32.xlu0 %v3048_v27, %s8156_s22 }
 0x86e   : > { %v3037_v49 = vpop.permute.xlu0 %3036 }
 0x86f   : > { %v3046_v6 = vadd.f32 %v3037_v49, %v3022_v57 }
 0x870   : > { %3164 = vrot.lane.b32.xlu1 %v3048_v27, %s8157_s10  ;;  %3160 = vrot.lane.b32.xlu0 %v3048_v27, %s8158_s5 }
 0x871   : > { %v7048_v48 = vpack.c.bf16 %v3047_v31, %v3046_v6 }
 0x874   : > { %3182 = vrot.lane.b32.xlu1 %v3048_v27, %s8160_s8  ;;  %3178 = vrot.lane.b32.xlu0 %v3048_v27, %s8161_s9 }
 0x878   : > { %3058 = vrot.lane.b32.xlu1 %v7048_v48, %s8149_s11  ;;  %3054 = vrot.lane.b32.xlu0 %v7048_v48, %s8150_s15  ;;  %s1226_s11 = scalar_lea.vmem %s8284_s18, %s8338_s0  ;;  %s8289_s15 = sld [smem:[#allocation27_spill]] }
 0x879   : > { %s5189_s18 = sshll.u32 %s8338_s0, 1 }
 0x87c   : > { %3076 = vrot.lane.b32.xlu1 %v7048_v48, %s8162_s13  ;;  %3072 = vrot.lane.b32.xlu0 %v7048_v48, %s8163_s17  ;;  %s8166_s13 = sld [smem:[#allocation25_spill]]  ;;  %s5871_s17 = smov 16  }
 0x880   : > { %3130 = vrot.lane.b32.xlu1 %v7048_v48, %s8138_s1  ;;  %3126 = vrot.lane.b32.xlu0 %v7048_v48, %s8164_s20  ;;  %s8285_s1 = sld [smem:[#allocation33_spill]] }
 0x882   : > { %v3363_v4 = vld [vmem:[%s8166_s13 + $0x8] sm:$0xff]  ;;  %v3362_v5 = vld [vmem:[%s8166_s13] sm:$0xff]  ;;  %v3365_v13 = vld [vmem:[%s8166_s13 + $0x18] sm:$0xff] }
 0x883   : > { %v3364_v60 = vld [vmem:[%s8166_s13 + $0x10] sm:$0xff] }
 0x884   : > { %3094 = vrot.lane.b32.xlu1 %v7048_v48, %s8151_s2  ;;  %3090 = vrot.lane.b32.xlu0 %v7048_v48, %s8152_s19  ;;  %s8195_s2 = sld [smem:[#allocation29_spill]]  ;;  %s5873_s19 = smov 111  }
 0x888   : > { %3148 = vrot.lane.b32.xlu1 %v7048_v48, %s8153_s3  ;;  %3144 = vrot.lane.b32.xlu0 %v7048_v48, %s8154_s4  ;;  %s8192_s3 = smov 15   ;;  %s8194_s4 = smov 113  }
 0x88c   : > { %3112 = vrot.lane.b32.xlu1 %v7048_v48, %s8155_s26  ;;  %3108 = vrot.lane.b32.xlu0 %v7048_v48, %s8156_s22  ;;  %s8279_s22 = sld [smem:[#allocation35_spill]] }
 0x890   : > { %3166 = vrot.lane.b32.xlu1 %v7048_v48, %s8157_s10  ;;  %3162 = vrot.lane.b32.xlu0 %v7048_v48, %s8158_s5  ;;  %s8191_s5 = sld [smem:[#allocation30_spill]]  ;;  %s5872_s10 = smov 112  }
 0x894   : > { %3184 = vrot.lane.b32.xlu1 %v7048_v48, %s8160_s8  ;;  %3180 = vrot.lane.b32.xlu0 %v7048_v48, %s8161_s9  ;;  %s5870_s9 = smov 17   ;;  %s8193_s8 = sld [smem:[#allocation28_spill]] }
 0x898   : > { %3215 = vperm.xlu1 %5599, %v3205_v33   ;;  %3210 = vperm.xlu0 %5598, %v3204_v63  }
 0x89c   : > { %3373 = vperm.xlu1 %5599, %v3363_v4   ;;  %3368 = vperm.xlu0 %5598, %v3362_v5  }
 0x8a0   : > { %3225 = vperm.xlu1 %5599, %v3207_v9   ;;  %3220 = vperm.xlu0 %5598, %v3206_v54  }
 0x8a4   : > { %3383 = vperm.xlu1 %5599, %v3365_v13   ;;  %3378 = vperm.xlu0 %5598, %v3364_v60  }
 0x8c3   : > { %2176 = vadd.xlane.f32.xlu0 %v2175_v25 }
 0x8c7   : > { %2188 = vadd.xlane.f32.xlu0 %v2187_v20 }
 0x8c8   : > { %2179 = vadd.xlane.f32.xlu1 %v2178_v0 }
 0x8ca   : > { %v3053_v23 = vpop.permute.xlu0 %3052  ;;  %v3057_v37 = vpop.permute.xlu1 %3056 }
 0x8cb   : > { %v3062_v27 = vsel %vm8173_vm12, %v3053_v23, %v3057_v37  ;;  %2191 = vadd.xlane.f32.xlu0 %v2190_v18  ;;  %vm8179_vm12 = vcmask 64512  }
 0x8cc   : > { %v3068_v28 = vsel %vm6662_vm6, %v3062_v27, 0  ;;  %2182 = vadd.xlane.f32.xlu1 %v2181_v44  ;;  %vm8181_vm14 = vmmov %vm8179_vm12  ;;  %v5617_v27 = vld [vmem:[%s8159_s6] ss:$12 sps:$4 sm:$0xff]  }
 0x8cd   : > { %5339 = vmatpush3.bf16.msra.mxu0 %v3068_v28  ;;  %v5622_v28 = vld [vmem:[%s8159_s6 + $0x1c] ss:$12 sps:$4 sm:$0xff]  }
 0x8ce   : > { %v3071_v58 = vpop.permute.xlu0 %3070  ;;  %5340 = vmatprep.subr.bf16.mxu0 %v7048_v48  ;;  %v3075_v35 = vpop.permute.xlu1 %3074 }
 0x8cf   : > { %2185 = vadd.xlane.f32.xlu0 %v2184_v42  ;;  %v3080_v13 = vsel %vm8179_vm12, %v3071_v58, %v3075_v35 }
 0x8d0   : > { %2194 = vadd.xlane.f32.xlu1 %v2193_v32  ;;  %v3086_v10 = vsel %vm6704_vm11, %v3080_v13, 0 }
 0x8d2   : > { %v3125_v38 = vpop.permute.xlu0 %3124  ;;  %v3129_v55 = vpop.permute.xlu1 %3128 }
 0x8d3   : > { %2197 = vadd.xlane.f32.xlu0 %v2196_v36  ;;  %v3134_v60 = vsel %vm8180_vm8, %v3125_v38, %v3129_v55 }
 0x8d6   : > { %v3089_v45 = vpop.permute.xlu0 %3088  ;;  %v3093_v49 = vpop.permute.xlu1 %3092 }
 0x8da   : > { %v3143_v57 = vpop.permute.xlu0 %3142  ;;  %v3147_v17 = vpop.permute.xlu1 %3146 }
 0x8de   : > { %v3107_v15 = vpop.permute.xlu0 %3106  ;;  %v3111_v6 = vpop.permute.xlu1 %3110 }
 0x8e2   : > { %v3161_v31 = vpop.permute.xlu0 %3160  ;;  %v3165_v39 = vpop.permute.xlu1 %3164 }
 0x8e3   : > { %v3170_v18 = vsel %vm2506_vm7, %v3161_v31, %v3165_v39  ;;  %v2211_v31 = vld [vmem:[%s8139_s16 + $0x60] sm:$0xff]  ;;  %v2208_v39 = vld [vmem:[%s8139_s16 + $0x48] sm:$0xff] }
 0x8e6   : > { %v3179_v41 = vpop.permute.xlu0 %3178  ;;  %v3183_v33 = vpop.permute.xlu1 %3182 }
 0x8e7   : > { %v3188_v48 = vsel %vm8177_vm0, %v3179_v41, %v3183_v33  ;;  %vm8184_vm0 = vcmask 465920  }
 0x8e8   : > { %v3194_v63 = vsel %vm6804_vm4, %v3188_v48, 0  ;;  %5472 = vmatprep.subr.msk.bf16.mxu1 %vm6804_vm4, %v3188_v48  ;;  %v3152_v19 = vsel %vm8184_vm0, %v3143_v57, %v3147_v17  ;;  %v2207_v57 = vld [vmem:[%s8139_s16 + $0x40] sm:$0xff] }
 0x8e9   : > { %5398 = vmatpush3.bf16.msra.mxu1 %v3194_v63 }
 0x8ea   : > { %v3055_v4 = vpop.permute.xlu0 %3054  ;;  %v3059_v5 = vpop.permute.xlu1 %3058 }
 0x8eb   : > { %v3066_v9 = vsel %vm8178_vm9, %v3055_v4, %v3059_v5  ;;  %v2212_v4 = vld [vmem:[%s8139_s16 + $0x68] sm:$0xff]  ;;  %v2209_v5 = vld [vmem:[%s8139_s16 + $0x50] sm:$0xff] }
 0x8ec   : > { %v3069_v54 = vsel %vm6662_vm6, %v3066_v9, 0  ;;  %vm8183_vm6 = vcmask 56320  }
 0x8ed   : > { %5341 = vmatpush3.bf16.msra.mxu0 %v3069_v54  ;;  %v3098_v22 = vsel %vm8183_vm6, %v3089_v45, %v3093_v49  ;;  %vm8185_vm9 = vmmov %vm8183_vm6 }
 0x8ee   : > { %v3073_v61 = vpop.permute.xlu0 %3072  ;;  %5466 = vmatprep.subr.msk.bf16.mxu0 %vm6699_vm1, %v3134_v60  ;;  %v3077_v8 = vpop.permute.xlu1 %3076  ;;  %v3104_v21 = vsel %vm6746_vm15, %v3098_v22, 0 }
 0x8ef   : > { %v3084_v34 = vsel %vm8181_vm14, %v3073_v61, %v3077_v8  ;;  %v2210_v61 = vld [vmem:[%s8139_s16 + $0x58] sm:$0xff] }
 0x8f0   : > { %v3087_v53 = vsel %vm6704_vm11, %v3084_v34, 0  ;;  %vm8186_vm11 = vmmov %vm8184_vm0 }
 0x8f1   : > { %5343 = vmatpush3.bf16.msra.mxu0 %v3086_v10 }
 0x8f2   : > { %v3127_v11 = vpop.permute.xlu0 %3126  ;;  %v3131_v25 = vpop.permute.xlu1 %3130 }
 0x8f3   : > { %v3138_v50 = vsel %vm8182_vm5, %v3127_v11, %v3131_v25 }
 0x8f4   : > { %5467 = vmatprep.subr.msk.bf16.mxu0 %vm6699_vm1, %v3138_v50  ;;  %vm8187_vm1 = vcmask 7168  }
 0x8f5   : > { %5345 = vmatpush3.bf16.msra.mxu0 %v3087_v53  ;;  %v3116_v52 = vsel %vm8187_vm1, %v3107_v15, %v3111_v6  ;;  %vm8188_vm12 = vmmov %vm8187_vm1  ;;  %vm8006_vm1 = vcmask 138240  }
 0x8f6   : > { %v3091_v62 = vpop.permute.xlu0 %3090  ;;  %5468 = vmatprep.subr.msk.bf16.mxu0 %vm6741_vm3, %v3152_v19  ;;  %v3095_v20 = vpop.permute.xlu1 %3094  ;;  %v3122_v3 = vsel %vm6785_vm2, %v3116_v52, 0 }
 0x8f7   : > { %v3102_v0 = vsel %vm8185_vm9, %v3091_v62, %v3095_v20 }
 0x8f8   : > { %v3105_v12 = vsel %vm6746_vm15, %v3102_v0, 0  ;;  %vm8189_vm15 = vcmask 449536  }
 0x8f9   : > { %5347 = vmatpush3.bf16.msra.mxu0 %v3104_v21 }
 0x8fa   : > { %v3145_v29 = vpop.permute.xlu0 %3144  ;;  %v3149_v59 = vpop.permute.xlu1 %3148 }
 0x8fb   : > { %v3156_v26 = vsel %vm8186_vm11, %v3145_v29, %v3149_v59 }
 0x8fc   : > { %5469 = vmatprep.subr.msk.bf16.mxu0 %vm6741_vm3, %v3156_v26 }
 0x8fd   : > { %5349 = vmatpush3.bf16.msra.mxu0 %v3105_v12 }
 0x8fe   : > { %v3109_v16 = vpop.permute.xlu0 %3108  ;;  %5470 = vmatprep.subr.msk.bf16.mxu0 %vm6780_vm10, %v3170_v18  ;;  %v3113_v44 = vpop.permute.xlu1 %3112 }
 0x8ff   : > { %v3120_v46 = vsel %vm8188_vm12, %v3109_v16, %v3113_v44 }
 0x900   : > { %v3123_v37 = vsel %vm6785_vm2, %v3120_v46, 0  ;;  %vm8190_vm2 = vcmask 261120  }
 0x901   : > { %5351 = vmatpush3.bf16.msra.mxu0 %v3122_v3 }
 0x902   : > { %v3163_v40 = vpop.permute.xlu0 %3162  ;;  %v3167_v2 = vpop.permute.xlu1 %3166 }
 0x903   : > { %v3174_v23 = vsel %vm2506_vm7, %v3163_v40, %v3167_v2 }
 0x904   : > { %5471 = vmatprep.subr.msk.bf16.mxu0 %vm6780_vm10, %v3174_v23 }
 0x905   : > { %5353 = vmatpush3.bf16.msra.mxu0 %v3123_v37 }
 0x906   : > { %v3181_v42 = vpop.permute.xlu0 %3180  ;;  %v3185_v30 = vpop.permute.xlu1 %3184 }
 0x907   : > { %v3192_v32 = vsel %vm8189_vm15, %v3181_v42, %v3185_v30 }
 0x908   : > { %v3195_v58 = vsel %vm6804_vm4, %v3192_v32, 0  ;;  %3297 = vmatmul.mubr.bf16.vlgmr.msra.gmra.mrb[12].mxu0 %v5617_v27  ;;  %5473 = vmatprep.subr.msk.bf16.mxu1 %vm6804_vm4, %v3192_v32 }
 0x909   : > { %5400 = vmatpush3.bf16.msra.mxu1 %v3195_v58  ;;  %3304 = vmatprep.mubr.bf16.mxu0 %v5622_v28 }
 0x90c   : > { %5402 = vmatmul.mubr.msk.bf16.vlgmr.msra.gmra.mrb[16].mxu1 %vm8190_vm2, %v5621_v14 }
 0x90d   : > { %3671 = vmatprep.mubr.bf16.mxu1 %v5839_v1 }
 0x910   : > { %3305 = vmatmul.mubr.bf16.gmra.mrb[16].mxu0 %v5624_v7 }
 0x917   : > { %v3211_v35 = vpop.permute.xlu0 %3210  ;;  %v3216_v36 = vpop.permute.xlu1 %3215 }
 0x91b   : > { %v3369_v38 = vpop.permute.xlu0 %3368  ;;  %v3374_v55 = vpop.permute.xlu1 %3373 }
 0x91c   : > { %v3386_v21 = vmul.f32 %v6968_v47, %v3369_v38  ;;  %v3387_v12 = vmul.f32 %v6968_v47, %v3374_v55 }
 0x91f   : > { %v3221_v45 = vpop.permute.xlu0 %3220  ;;  %v3226_v24 = vpop.permute.xlu1 %3225 }
 0x923   : > { %v3379_v49 = vpop.permute.xlu0 %3378  ;;  %v3384_v15 = vpop.permute.xlu1 %3383 }
 0x924   : > { %v3388_v30 = vmul.f32 %v6968_v47, %v3379_v49 }
 0x950   : > { %v2177_v17 = vpop.xlane.xlu0 %2176 }
 0x951   : > { %v2223_v6 = vadd.f32 %v2207_v57, %v2177_v17 }
 0x953   : > { %3468 = vperm.xlu1 %5599, %v2223_v6  }
 0x954   : > { %v2189_v41 = vpop.xlane.xlu0 %2188 }
 0x955   : > { %v2227_v33 = vadd.f32 %v2211_v31, %v2189_v41  ;;  %v2180_v48 = vpop.xlane.xlu1 %2179 }
 0x956   : > { %v2224_v63 = vadd.f32 %v2208_v39, %v2180_v48 }
 0x957   : > { %3492 = vperm.xlu1 %5599, %v2227_v33  }
 0x958   : > { %v2192_v9 = vpop.xlane.xlu0 %2191  ;;  %3473 = vperm.xlu0 %5598, %v2224_v63  }
 0x959   : > { %v2228_v54 = vadd.f32 %v2212_v4, %v2192_v9  ;;  %v2183_v13 = vpop.xlane.xlu1 %2182 }
 0x95a   : > { %v2225_v60 = vadd.f32 %v2209_v5, %v2183_v13  ;;  %v2214_v5 = vld [vmem:[%s8139_s16 + $0x78] sm:$0xff]  ;;  %v2213_v13 = vld [vmem:[%s8139_s16 + $0x70] sm:$0xff] }
 0x95b   : > { %3497 = vperm.xlu1 %5599, %v2228_v54  }
 0x95c   : > { %v2186_v8 = vpop.xlane.xlu0 %2185  ;;  %3478 = vperm.xlu0 %5598, %v2225_v60   ;;  %v5627_v60 = vld [vmem:[%s8191_s5 + $0x4] ss:$8 sps:$4 sm:$0xff]  }
 0x95d   : > { %v2226_v10 = vadd.f32 %v2210_v61, %v2186_v8  ;;  %v2195_v61 = vpop.xlane.xlu1 %2194  ;;  %v5625_v8 = vld [vmem:[%s8191_s5] ss:$8 sps:$4 sm:$0xff]   ;;  %3639 = vmatprep.subr.bf16.mxu1 %v5627_v60 }
 0x95e   : > { %3640 = vmatpush1.bf16.msra.mxu1 %v5625_v8 }
 0x95f   : > { %3483 = vperm.xlu1 %5599, %v2226_v10   ;;  %v2229_v10 = vadd.f32 %v2213_v13, %v2195_v61 }
 0x960   : > { %v2198_v9 = vpop.xlane.xlu0 %2197 }
 0x961   : > { %v2230_v54 = vadd.f32 %v2214_v5, %v2198_v9 }
 0x9db   : > { %v5354_v34 = vpop.f32.mrb[12].mxu0 }
 0x9dc   : > { %v5355_v11 = vpop.f32.mrb[13].mxu0 }
 0x9dd   : > { %v5356_v25 = vadd.f32 %v5355_v11, %v5354_v34  ;;  %v5357_v50 = vpop.f32.mrb[14].mxu0  ;;  %v5630_v34 = vld [vmem:[%s8191_s5 + $0x14] ss:$8 sps:$4 sm:$0xff]   ;;  %v5628_v11 = vld [vmem:[%s8191_s5 + $0x10] ss:$8 sps:$4 sm:$0xff]  }
 0x9de   : > { %v5358_v53 = vpop.f32.mrb[15].mxu0  ;;  %3641 = vmatprep.subr.bf16.mxu1 %v5630_v34 }
 0x9df   : > { %v5359_v22 = vadd.f32 %v5358_v53, %v5357_v50  ;;  %v5403_v19 = vpop.f32.mrb[16].mxu1  ;;  %v3299_v62 = vadd.f32 %v5356_v25, %v3211_v35  ;;  %v3389_v35 = vmul.f32 %v6968_v47, %v3384_v15  ;;  %3642 = vmatpush1.bf16.msra.mxu1 %v5628_v11  ;;  %v5633_v25 = vld [vmem:[%s8191_s5 + $0x24] ss:$8 sps:$4 sm:$0xff]   ;;  %v5631_v50 = vld [vmem:[%s8191_s5 + $0x20] ss:$8 sps:$4 sm:$0xff]  }
 0x9e0   : > { %v3347_v20 = vpop.f32.mrb[17].mxu1  ;;  %3643 = vmatprep.subr.bf16.mxu1 %v5633_v25  ;;  %v5636_v53 = vld [vmem:[%s8191_s5 + $0x34] ss:$8 sps:$4 sm:$0xff]  }
 0x9e1   : > { %v3348_v0 = vadd.f32 %v3347_v20, %v3299_v62  ;;  %v5404_v29 = vpop.f32.mrb[18].mxu1  ;;  %v3302_v59 = vadd.f32 %v5359_v22, %v3216_v36  ;;  %v5634_v22 = vld [vmem:[%s8191_s5 + $0x30] ss:$8 sps:$4 sm:$0xff]  }
 0x9e2   : > { %v3350_v26 = vpop.f32.mrb[19].mxu1 }
 0x9e3   : > { %v3390_v52 = vadd.f32 %v3386_v21, %v3348_v0  ;;  %v3351_v18 = vadd.f32 %v3350_v26, %v3302_v59  ;;  %v5360_v16 = vpop.f32.mrb[16].mxu0  ;;  %3644 = vmatpush1.bf16.msra.mxu1 %v5631_v50  ;;  %v3474_v21 = vpop.permute.xlu0 %3473 }
 0x9e4   : > { %v5361_v44 = vpop.f32.mrb[17].mxu0  ;;  %3645 = vmatprep.subr.bf16.mxu1 %v5636_v53 }
 0x9e5   : > { %v3394_v3 = vmul.f32 0.2, %v3390_v52  ;;  %v3391_v46 = vadd.f32 %v3387_v12, %v3351_v18  ;;  %v5362_v40 = vadd.f32 %v5361_v44, %v5360_v16  ;;  %v5363_v2 = vpop.f32.mrb[18].mxu0 }
 0x9e6   : > { %v5364_v23 = vpop.f32.mrb[19].mxu0 }
 0x9e7   : > { %v7177_v37 = vmax.f32 %v3390_v52, %v3394_v3  ;;  %v3395_v27 = vmul.f32 0.2, %v3391_v46  ;;  %v3307_v28 = vadd.f32 %v5362_v40, %v3221_v45  ;;  %v5365_v42 = vadd.f32 %v5364_v23, %v5363_v2  ;;  %3646 = vmatpush1.bf16.msra.mxu1 %v5634_v22 }
 0x9e9   : > { %v7180_v32 = vmax.f32 %v3391_v46, %v3395_v27  ;;  %v3356_v58 = vadd.f32 %v5403_v19, %v3307_v28  ;;  %v3310_v14 = vadd.f32 %v5365_v42, %v3226_v24  ;;  %v3402_v7 = vsel %vm8003_vm13, %v7177_v37, 0.0  ;;  %v3469_v19 = vpop.permute.xlu1 %3468 }
 0x9ea   : > { %3403 = vadd.xlane.f32.xlu1 %v3402_v7  ;;  %v3418_v36 = vmul.f32 %v7177_v37, %v7177_v37 }
 0x9eb   : > { %v3392_v38 = vadd.f32 %v3388_v30, %v3356_v58  ;;  %v3359_v55 = vadd.f32 %v5404_v29, %v3310_v14  ;;  %v3405_v45 = vsel %vm8003_vm13, %v7180_v32, 0.0  ;;  %v3419_v49 = vmul.f32 %v7180_v32, %v7180_v32  ;;  %v3479_v29 = vpop.permute.xlu0 %3478 }
 0x9ec   : > { %3406 = vadd.xlane.f32.xlu0 %v3405_v45  ;;  %v3422_v24 = vsel %vm8003_vm13, %v3418_v36, 0.0 }
 0x9ed   : > { %v3393_v57 = vadd.f32 %v3389_v35, %v3359_v55  ;;  %v3396_v17 = vmul.f32 0.2, %v3392_v38  ;;  %v3425_v47 = vsel %vm8003_vm13, %v3419_v49, 0.0  ;;  %v3493_v62 = vpop.permute.xlu1 %3492 }
 0x9ee   : > { %3423 = vadd.xlane.f32.xlu1 %v3422_v24 }
 0x9ef   : > { %v7193_v15 = vmax.f32 %v3392_v38, %v3396_v17  ;;  %v3397_v6 = vmul.f32 0.2, %v3393_v57 }
 0x9f0   : > { %3426 = vadd.xlane.f32.xlu0 %v3425_v47 }
 0x9f1   : > { %v3408_v31 = vsel %vm8003_vm13, %v7193_v15, 0.0  ;;  %v7197_v39 = vmax.f32 %v3393_v57, %v3397_v6  ;;  %v3420_v41 = vmul.f32 %v7193_v15, %v7193_v15  ;;  %v3498_v20 = vpop.permute.xlu1 %3497 }
 0x9f2   : > { %3409 = vadd.xlane.f32.xlu1 %v3408_v31 }
 0x9f3   : > { %v3411_v33 = vsel %vm8003_vm13, %v7197_v39, 0.0  ;;  %v3421_v48 = vmul.f32 %v7197_v39, %v7197_v39  ;;  %v3428_v63 = vsel %vm8003_vm13, %v3420_v41, 0.0 }
 0x9f4   : > { %3412 = vadd.xlane.f32.xlu0 %v3411_v33 }
 0x9f5   : > { %v3431_v4 = vsel %vm8003_vm13, %v3421_v48, 0.0  ;;  %v3484_v0 = vpop.permute.xlu1 %3483 }
 0x9f6   : > { %3429 = vadd.xlane.f32.xlu1 %v3428_v63 }
 0x9f8   : > { %3432 = vadd.xlane.f32.xlu0 %v3431_v4 }
 0xa07   : > { %3507 = vperm.xlu1 %5599, %v2230_v54  }
 0xa0e   : > { %3502 = vperm.xlu0 %5598, %v2229_v10  }
 0xa77   : > { %v3404_v59 = vpop.xlane.xlu1 %3403 }
 0xa78   : > { %v3414_v26 = vmul.f32 0.015625, %v3404_v59 }
 0xa79   : > { %v3407_v12 = vpop.xlane.xlu0 %3406 }
 0xa7a   : > { %v3415_v52 = vmul.f32 0.015625, %v3407_v12  ;;  %v3438_v16 = vmul.f32 %v3414_v26, %v3414_v26  ;;  %v3450_v33 = vsub.f32 %v7177_v37, %v3414_v26 }
 0xa7b   : > { %v3424_v18 = vpop.xlane.xlu1 %3423 }
 0xa7c   : > { %v3434_v44 = vmul.f32 0.015625, %v3424_v18  ;;  %v3439_v46 = vmul.f32 %v3415_v52, %v3415_v52  ;;  %v3451_v63 = vsub.f32 %v7180_v32, %v3415_v52 }
 0xa7d   : > { %v3427_v3 = vpop.xlane.xlu0 %3426 }
 0xa7e   : > { %v3442_v40 = vsub.f32 %v3434_v44, %v3438_v16  ;;  %v3435_v2 = vmul.f32 0.015625, %v3427_v3 }
 0xa7f   : > { %v3410_v23 = vpop.xlane.xlu1 %3409 }
 0xa80   : > { %v3446_v27 = vmax.f32 %v3442_v40, 0.0  ;;  %v3443_v28 = vsub.f32 %v3435_v2, %v3439_v46  ;;  %v3416_v42 = vmul.f32 0.015625, %v3410_v23  ;;  %v5639_v46 = vld [vmem:[%s8193_s8 + $0x4] ss:$12 sps:$4 sm:$0xff]   ;;  %v4108_v40 = vld [vmem:[%s8195_s2 + $0x8] sm:$0xff]  ;;  %v3514_v23 = vadd.s32 128, %v6276_v43 }
 0xa81   : > { %v3413_v30 = vpop.xlane.xlu0 %3412  ;;  %4169 = vmatprep.mubr.bf16.mxu0 %v5639_v46  ;;  %v4107_v2 = vld [vmem:[%s8195_s2] sm:$0xff] }
 0xa82   : > { %v3454_v58 = vadd.f32 1e-05, %v3446_v27  ;;  %v3447_v14 = vmax.f32 %v3443_v28, 0.0  ;;  %v3417_v7 = vmul.f32 0.015625, %v3413_v30  ;;  %v3440_v38 = vmul.f32 %v3416_v42, %v3416_v42 }
 0xa83   : > { %v3430_v35 = vpop.xlane.xlu1 %3429  ;;  %v3452_v60 = vsub.f32 %v7193_v15, %v3416_v42  ;;  %v7307_v27 = vshra.s32 %v6276_v43, 4  ;;  %v7309_v28 = vshra.s32 %v3514_v23, 4  ;;  %v3515_v42 = vand.u32 15, %v6276_v43 }
 0xa84   : > { %5680 = vrsqrt.f32 %v3454_v58  ;;  %v3455_v36 = vadd.f32 1e-05, %v3447_v14  ;;  %v3436_v55 = vmul.f32 0.015625, %v3430_v35  ;;  %v3441_v49 = vmul.f32 %v3417_v7, %v3417_v7 }
 0xa85   : > { %v3433_v45 = vpop.xlane.xlu0 %3432  ;;  %v3453_v34 = vsub.f32 %v7197_v39, %v3417_v7  ;;  %v3516_v30 = vand.u32 15, %v3514_v23  ;;  %v3722_v58 = vadd.s32 4294967295, %v7307_v27  ;;  %v3723_v14 = vadd.s32 4294967295, %v7309_v28 }
 0xa86   : > { %5682 = vrsqrt.f32 %v3455_v36  ;;  %v3444_v57 = vsub.f32 %v3436_v55, %v3440_v38  ;;  %v3437_v24 = vmul.f32 0.015625, %v3433_v45  ;;  %v7314_v7 = vadd.s32 4294967295, %v3515_v42  ;;  %v7705_v36 = vld [vmem:[%s1226_s11] ss:$0 sm:$0xff]  ;;  %s1230_s11 = scalar_lea.vmem %s8289_s15, %s5189_s18  ;;  %s8300_s15 = sld [smem:[#allocation34_spill]] }
 0xa87   : > { %v3508_v22 = vpop.permute.xlu1 %3507  ;;  %vm3724_vm3 = vcmp.ge.s32.totalorder %v3722_v58, 0  ;;  %vm3726_vm7 = vcmp.lt.s32.totalorder %v3722_v58, 16  ;;  %v7316_v35 = vadd.s32 4294967295, %v3516_v30  ;;  %vm3725_vm10 = vcmp.ge.s32.totalorder %v3723_v14, 0  ;;  %s8301_s18 = sld [smem:[#allocation31_spill]] }
 0xa88   : > { %v3448_v17 = vmax.f32 %v3444_v57, 0.0  ;;  %v3445_v47 = vsub.f32 %v3437_v24, %v3441_v49  ;;  %vm3727_vm4 = vcmp.lt.s32.totalorder %v3723_v14, 16  ;;  %vm7318_vm8 = vmand %vm3724_vm3, %vm3726_vm7  ;;  %vm8008_vm14 = vcmp.ge.s32.totalorder %v7314_v7, 0 }
 0xa89   : > { %vm7323_vm5 = vmand %vm3725_vm10, %vm3727_vm4  ;;  %vm8007_vm6 = vcmp.ge.s32.totalorder %v7316_v35, 0  ;;  %v7337_v38 = vsub.s32 4, %v6292_v51  ;;  %v7342_v57 = vadd.s32 1, %v3515_v42  ;;  %v8226_v23 = vmov 0 }
 0xa8a   : > { %v3456_v6 = vadd.f32 1e-05, %v3448_v17  ;;  %v3449_v31 = vmax.f32 %v3445_v47, 0.0  ;;  %vm3734_vm0 = vmand %vm7318_vm8, %vm8008_vm14  ;;  %v8200_v17 = vmov 0  ;;  %v8202_v47 = vmov 0 }
 0xa8b   : > { %vm3735_vm9 = vmand %vm7323_vm5, %vm8007_vm6  ;;  %vm8005_vm3 = vcmp.lt.s32.totalorder %v7342_v57, 16 }
 0xa8c   : > { %5684 = vrsqrt.f32 %v3456_v6  ;;  %v3457_v41 = vadd.f32 1e-05, %v3449_v31  ;;  %vm3744_vm11 = vmpackc.low %vm3735_vm9, %vm3734_vm0  ;;  %v7352_v6 = vadd.s32 1, %v3516_v30  ;;  %vm3881_vm0 = vcmp.ge.s32.totalorder %v7307_v27, 0 }
 0xa8d   : > { %v3745_v55 = vsel %vm3744_vm11, 65537, %v5839_v1  ;;  %vm3793_vm2 = vmpackc.low %vm7323_vm5, %vm7318_vm8  ;;  %vm3883_vm9 = vcmp.lt.s32.totalorder %v7307_v27, 16  ;;  %vm3882_vm11 = vcmp.ge.s32.totalorder %v7309_v28, 0 }
 0xa8e   : > { %v5681_v48 = vpop.eup %5680  ;;  %5686 = vrsqrt.f32 %v3457_v41  ;;  %v3749_v45 = vrot.slane %v3745_v55, %v6297_v56  ;;  %v3753_v49 = vrot.slane %v3745_v55, %v7337_v38  ;;  %vm8004_vm7 = vcmp.lt.s32.totalorder %v7352_v6, 16  ;;  %vm7371_vm10 = vmand %vm7318_vm8, %vm8005_vm3 }
 0xa8f   : > { %v3462_v4 = vmul.f32 %v5681_v48, %v3450_v33  ;;  %vm7379_vm4 = vmand %vm7323_vm5, %vm8004_vm7 }
 0xa90   : > { %v5683_v5 = vpop.eup %5682  ;;  %vm7344_vm12 = vcmp.ne.s16.totalorder %v3753_v49, 0  ;;  %vm7348_vm15 = vcmp.ne.s16.totalorder %v3749_v45, 0  ;;  %vm7399_vm7 = vmand %vm3881_vm0, %vm3883_vm9 }
 0xa91   : > { %v3463_v9 = vmul.f32 %v5683_v5, %v3451_v63  ;;  %v3486_v54 = vmul.f32 %v3469_v19, %v3462_v4  ;;  %v3503_v19 = vpop.permute.xlu0 %3502  ;;  %v8201_v17 = vsel %vm7344_vm12, 4294967295, %v8200_v17  ;;  %v8203_v47 = vsel %vm7348_vm15, 4294967295, %v8202_v47  ;;  %vm7422_vm9 = vmand %vm7399_vm7, %vm8008_vm14 }
 0xa92   : > { %v3794_v63 = vsel %vm3793_vm2, 65537, %v5839_v1  ;;  %vm3884_vm2 = vcmp.lt.s32.totalorder %v7309_v28, 16  ;;  %v8232_v4 = vmov 0  ;;  %v8234_v5 = vmov 0 }
 0xa93   : > { %v3487_v13 = vmul.f32 %v3474_v21, %v3463_v9  ;;  %v3510_v61 = vadd.f32 %v3493_v62, %v3486_v54  ;;  %v3798_v54 = vrot.slane %v3794_v63, %v6297_v56 }
 0xa95   : > { %v3511_v8 = vadd.f32 %v3498_v20, %v3487_v13  ;;  %v3802_v13 = vrot.slane %v3794_v63, %v7337_v38  ;;  %vm7403_vm3 = vcmp.ne.s16.totalorder %v3798_v54, 0 }
 0xa96   : > { %v5685_v10 = vpop.eup %5684 }
 0xa97   : > { %v3464_v11 = vmul.f32 %v5685_v10, %v3452_v60  ;;  %v7221_v25 = vpack.c.bf16 %v3511_v8, %v3510_v61 }
 0xa98   : > { %v5687_v37 = vpop.eup %5686 }
 0xa99   : > { %v3465_v50 = vmul.f32 %v5687_v37, %v3453_v34  ;;  %v3488_v53 = vmul.f32 %v3479_v29, %v3464_v11  ;;  %5232 = vmatmul.mubr.msk.bf16.vlgmr.msra.gmra.mrb[20].mxu1 %vm8003_vm13, %v7221_v25  ;;  %v8210_v37 = vmov 0 }
 0xa9a   : > { %3681 = vmatprep.mubr.bf16.mxu1 %v5839_v1  ;;  %v8211_v37 = vsel %vm7403_vm3, 4294967295, %v8210_v37 }
 0xa9b   : > { %v3489_v32 = vmul.f32 %v3484_v0, %v3465_v50  ;;  %v3512_v62 = vadd.f32 %v3503_v19, %v3488_v53  ;;  %v8212_v50 = vmov 0 }
 0xa9d   : > { %v3513_v15 = vadd.f32 %v3508_v22, %v3489_v32 }
 0xa9f   : > { %v7226_v20 = vpack.c.bf16 %v3513_v15, %v3512_v62 }
 0xaa1   : > { %5233 = vmatmul.mubr.msk.bf16.gmra.mrb[24].mxu1 %vm8003_vm13, %v7226_v20  ;;  %vm3844_vm13 = vmpackc.low %vm7379_vm4, %vm7371_vm10  ;;  %vm8216_vm4 = vcmask 130048  }
 0xaa2   : > { %vm7411_vm10 = vmand %vm3882_vm11, %vm3884_vm2  ;;  %v3845_v22 = vsel %vm3844_vm13, 65537, %v5839_v1 }
 0xaa3   : > { %vm8217_vm0 = vmmov %vm8216_vm4 }
 0xaa4   : > { %vm7434_vm13 = vmand %vm7411_vm10, %vm8007_vm6 }
 0xaa5   : > { %vm8222_vm11 = vmmov %vm8217_vm0 }
 0xaa6   : > { %vm8223_vm2 = vmmov %vm8217_vm0 }
 0xb6c   : > { %v3673_v39 = vpop.f32.mrb[20].mxu1 }
 0xb6d   : > { %v3675_v21 = vpop.f32.mrb[21].mxu1 }
 0xb6e   : > { %v3677_v59 = vpop.f32.mrb[22].mxu1 }
 0xb6f   : > { %v7230_v26 = vpack.c.bf16 %v3677_v59, %v3673_v39  ;;  %v3679_v29 = vpop.f32.mrb[23].mxu1 }
 0xb70   : > { %v7232_v12 = vpack.c.bf16 %v3679_v29, %v3675_v21  ;;  %v8220_v21 = vmov 0  ;;  %v3849_v29 = vrot.slane %v3845_v22, %v6297_v56 }
 0xb71   : > { %3704 = vrot.lane.b32.xlu1 %v7230_v26, %s5870_s9  ;;  %v8221_v21 = vsel %vm7434_vm13, 4294967295, %v8220_v21 }
 0xb72   : > { %3698 = vrot.lane.b32.xlu0 %v7232_v12, %s5870_s9 }
 0xb74   : > { %v3683_v0 = vpop.f32.mrb[24].mxu1 }
 0xb75   : > { %v3685_v52 = vpop.f32.mrb[25].mxu1 }
 0xb76   : > { %v3687_v18 = vpop.f32.mrb[26].mxu1 }
 0xb77   : > { %v7238_v16 = vpack.c.bf16 %v3687_v18, %v3683_v0  ;;  %v3689_v44 = vpop.f32.mrb[27].mxu1  ;;  %v3853_v0 = vrot.slane %v3845_v22, %v7337_v38  ;;  %v3521_v22 = vld [vmem:[%s8285_s1] sm:$0xff] }
 0xb78   : > { %v7240_v3 = vpack.c.bf16 %v3689_v44, %v3685_v52 }
 0xb79   : > { %3706 = vrot.lane.b32.xlu1 %v7238_v16, %s5870_s9 }
 0xb7a   : > { %3700 = vrot.lane.b32.xlu0 %v7240_v3, %s5870_s9 }
 0xb7d   : > { %3764 = vrot.lane.b32.xlu1 %v7230_v26, %s5871_s17 }
 0xb7e   : > { %3760 = vrot.lane.b32.xlu0 %v7232_v12, %s5871_s17 }
 0xb81   : > { %3766 = vrot.lane.b32.xlu1 %v7238_v16, %s5871_s17 }
 0xb82   : > { %3762 = vrot.lane.b32.xlu0 %v7240_v3, %s5871_s17 }
 0xb85   : > { %3813 = vrot.lane.b32.xlu1 %v7230_v26, %s8192_s3 }
 0xb86   : > { %3809 = vrot.lane.b32.xlu0 %v7232_v12, %s8192_s3 }
 0xb89   : > { %3815 = vrot.lane.b32.xlu1 %v7238_v16, %s8192_s3 }
 0xb8a   : > { %3811 = vrot.lane.b32.xlu0 %v7240_v3, %s8192_s3 }
 0xb8d   : > { %3864 = vrot.lane.b32.xlu1 %v7230_v26, %s8155_s26 }
 0xb8e   : > { %3860 = vrot.lane.b32.xlu0 %v7232_v12, %s8155_s26 }
 0xb91   : > { %3866 = vrot.lane.b32.xlu1 %v7238_v16, %s8155_s26 }
 0xb92   : > { %3862 = vrot.lane.b32.xlu0 %v7240_v3, %s8155_s26 }
 0xb95   : > { %3913 = vrot.lane.b32.xlu1 %v7232_v12, %s8164_s20 }
 0xb96   : > { %3911 = vrot.lane.b32.xlu0 %v7230_v26, %s8164_s20 }
 0xb99   : > { %3917 = vrot.lane.b32.xlu1 %v7240_v3, %s8164_s20 }
 0xb9a   : > { %3915 = vrot.lane.b32.xlu0 %v7238_v16, %s8164_s20 }
 0xb9d   : > { %3959 = vrot.lane.b32.xlu1 %v7232_v12, %s8194_s4 }
 0xb9e   : > { %3957 = vrot.lane.b32.xlu0 %v7230_v26, %s8194_s4 }
 0xba1   : > { %3963 = vrot.lane.b32.xlu1 %v7240_v3, %s8194_s4 }
 0xba2   : > { %3961 = vrot.lane.b32.xlu0 %v7238_v16, %s8194_s4 }
 0xba5   : > { %4013 = vrot.lane.b32.xlu1 %v7232_v12, %s5872_s10 }
 0xba6   : > { %4011 = vrot.lane.b32.xlu0 %v7230_v26, %s5872_s10 }
 0xba9   : > { %4017 = vrot.lane.b32.xlu1 %v7240_v3, %s5872_s10 }
 0xbaa   : > { %4015 = vrot.lane.b32.xlu0 %v7238_v16, %s5872_s10 }
 0xbad   : > { %4059 = vrot.lane.b32.xlu1 %v7232_v12, %s5873_s19 }
 0xbae   : > { %4057 = vrot.lane.b32.xlu0 %v7230_v26, %s5873_s19 }
 0xbb1   : > { %4063 = vrot.lane.b32.xlu1 %v7240_v3, %s5873_s19 }
 0xbb2   : > { %4061 = vrot.lane.b32.xlu0 %v7238_v16, %s5873_s19 }
 0xbb5   : > { %4116 = vperm.xlu1 %5599, %v4108_v40  }
 0xbb6   : > { %4111 = vperm.xlu0 %5598, %v4107_v2   ;;  %v8224_v2 = vmov 0 }
 0xbe3   : > { %v3705_v24 = vpop.permute.xlu1 %3704 }
 0xbe4   : > { %v3699_v31 = vpop.permute.xlu0 %3698 }
 0xbe5   : > { %v3716_v41 = vsel %vm8006_vm1, %v3699_v31, %v3705_v24  ;;  %v3709_v33 = vsel %vm8006_vm1, %v3705_v24, %v3699_v31 }
 0xbe6   : > { %5237 = vmatprep.subr.msk.bf16.mxu0 %vm7344_vm12, %v3709_v33  ;;  %v3756_v48 = vsel %vm7348_vm15, %v3716_v41, 0 }
 0xbe7   : > { %4138 = vmatpush1.bf16.msra.mxu0 %v3756_v48 }
 0xbeb   : > { %v3707_v9 = vpop.permute.xlu1 %3706 }
 0xbec   : > { %v3701_v60 = vpop.permute.xlu0 %3700 }
 0xbed   : > { %v3710_v61 = vsel %vm8006_vm1, %v3707_v9, %v3701_v60  ;;  %v3720_v8 = vsel %vm8006_vm1, %v3701_v60, %v3707_v9  ;;  %vm7407_vm1 = vcmp.ne.s16.totalorder %v3802_v13, 0  ;;  %v3979_v9 = vadd.s32 1, %v7307_v27 }
 0xbee   : > { %v3758_v10 = vsel %vm7348_vm15, %v3720_v8, 0  ;;  %5238 = vmatprep.subr.msk.bf16.mxu0 %vm7344_vm12, %v3710_v61  ;;  %v8213_v50 = vsel %vm7407_vm1, 4294967295, %v8212_v50  ;;  %v3980_v13 = vadd.s32 1, %v7309_v28  ;;  %vm8244_vm12 = vcmask 7168  }
 0xbef   : > { %4140 = vmatpush1.bf16.msra.mxu0 %v3758_v10  ;;  %v3765_v11 = vpop.permute.xlu1 %3764  ;;  %vm8245_vm15 = vmmov %vm8244_vm12 }
 0xbf0   : > { %v3761_v32 = vpop.permute.xlu0 %3760 }
 0xbf1   : > { %v3769_v19 = vsel %vm8216_vm4, %v3765_v11, %v3761_v32  ;;  %v3775_v15 = vsel %vm8217_vm0, %v3761_v32, %v3765_v11  ;;  %vm3895_vm4 = vmpackc.low %vm7434_vm13, %vm7422_vm9  ;;  %vm7450_vm0 = vcmp.ne.s16.totalorder %v3849_v29, 0 }
 0xbf2   : > { %v3805_v39 = vsel %vm7403_vm3, %v3775_v15, 0  ;;  %5239 = vmatprep.subr.msk.bf16.mxu0 %vm7407_vm1, %v3769_v19  ;;  %v8225_v2 = vsel %vm7450_vm0, 4294967295, %v8224_v2  ;;  %v3896_v30 = vsel %vm3895_vm4, 65537, %v5839_v1 }
 0xbf3   : > { %4142 = vmatpush1.bf16.msra.mxu0 %v3805_v39  ;;  %v3767_v59 = vpop.permute.xlu1 %3766  ;;  %v3900_v49 = vrot.slane %v3896_v30, %v6297_v56  ;;  %v3904_v24 = vrot.slane %v3896_v30, %v7337_v38 }
 0xbf4   : > { %v3763_v52 = vpop.permute.xlu0 %3762 }
 0xbf5   : > { %v3770_v18 = vsel %vm8222_vm11, %v3767_v59, %v3763_v52  ;;  %v3779_v44 = vsel %vm8223_vm2, %v3763_v52, %v3767_v59  ;;  %vm7454_vm11 = vcmp.ne.s16.totalorder %v3853_v0, 0  ;;  %vm8228_vm2 = vcmask 121856  }
 0xbf6   : > { %v3807_v46 = vsel %vm7403_vm3, %v3779_v44, 0  ;;  %5240 = vmatprep.subr.msk.bf16.mxu0 %vm7407_vm1, %v3770_v18  ;;  %v8227_v23 = vsel %vm7454_vm11, 4294967295, %v8226_v23  ;;  %vm8229_vm6 = vmmov %vm8228_vm2  ;;  %vm8241_vm1 = vcmp.lt.s32.totalorder %v7352_v6, 16  ;;  %vm3984_vm3 = vcmp.lt.s32.totalorder %v3980_v13, 16 }
 0xbf7   : > { %4144 = vmatpush1.bf16.msra.mxu0 %v3807_v46  ;;  %v3814_v40 = vpop.permute.xlu1 %3813  ;;  %vm8230_vm14 = vmmov %vm8228_vm2  ;;  %v8254_v18 = vmov 0 }
 0xbf8   : > { %v3810_v42 = vpop.permute.xlu0 %3809  ;;  %vm8231_vm4 = vmmov %vm8228_vm2 }
 0xbf9   : > { %v3818_v58 = vsel %vm8228_vm2, %v3814_v40, %v3810_v42  ;;  %v3824_v14 = vsel %vm8229_vm6, %v3810_v42, %v3814_v40  ;;  %vm7473_vm6 = vcmp.ne.s16.totalorder %v3900_v49, 0  ;;  %vm7477_vm2 = vcmp.ne.s16.totalorder %v3904_v24, 0 }
 0xbfa   : > { %v3856_v55 = vsel %vm7450_vm0, %v3824_v14, 0  ;;  %5241 = vmatprep.subr.msk.bf16.mxu0 %vm7454_vm11, %v3818_v58  ;;  %v8233_v4 = vsel %vm7473_vm6, 4294967295, %v8232_v4  ;;  %v8235_v5 = vsel %vm7477_vm2, 4294967295, %v8234_v5 }
 0xbfb   : > { %4146 = vmatpush1.bf16.msra.mxu0 %v3856_v55  ;;  %v3816_v45 = vpop.permute.xlu1 %3815 }
 0xbfc   : > { %v3812_v31 = vpop.permute.xlu0 %3811 }
 0xbfd   : > { %v3819_v41 = vsel %vm8230_vm14, %v3816_v45, %v3812_v31  ;;  %v3828_v33 = vsel %vm8231_vm4, %v3812_v31, %v3816_v45  ;;  %vm8236_vm14 = vcmask 7168  }
 0xbfe   : > { %v3858_v48 = vsel %vm7450_vm0, %v3828_v33, 0  ;;  %5242 = vmatprep.subr.msk.bf16.mxu0 %vm7454_vm11, %v3819_v41  ;;  %vm8237_vm4 = vmmov %vm8236_vm14  ;;  %vm8238_vm11 = vcmp.lt.s32.totalorder %v7342_v57, 16 }
 0xbff   : > { %4148 = vmatpush1.bf16.msra.mxu0 %v3858_v48  ;;  %v3865_v63 = vpop.permute.xlu1 %3864  ;;  %vm7489_vm0 = vmand %vm7399_vm7, %vm8238_vm11  ;;  %vm3981_vm7 = vcmp.ge.s32.totalorder %v3979_v9, 0  ;;  %vm3983_vm11 = vcmp.lt.s32.totalorder %v3979_v9, 16 }
 0xc00   : > { %v3861_v54 = vpop.permute.xlu0 %3860 }
 0xc01   : > { %v3869_v60 = vsel %vm8236_vm14, %v3865_v63, %v3861_v54  ;;  %v3875_v61 = vsel %vm8237_vm4, %v3861_v54, %v3865_v63  ;;  %vm7501_vm14 = vmand %vm7411_vm10, %vm8241_vm1  ;;  %vm3982_vm4 = vcmp.ge.s32.totalorder %v3980_v13, 0 }
 0xc02   : > { %v3907_v10 = vsel %vm7473_vm6, %v3875_v61, 0  ;;  %5243 = vmatprep.subr.msk.bf16.mxu0 %vm7477_vm2, %v3869_v60  ;;  %vm3941_vm13 = vmpackc.low %vm7501_vm14, %vm7489_vm0 }
 0xc03   : > { %4150 = vmatpush1.bf16.msra.mxu0 %v3907_v10  ;;  %v3867_v28 = vpop.permute.xlu1 %3866  ;;  %vm7515_vm1 = vmand %vm3981_vm7, %vm3983_vm11  ;;  %v3942_v39 = vsel %vm3941_vm13, 65537, %v5839_v1  ;;  %vm8017_vm13 = vcmask 1039360  }
 0xc04   : > { %v3863_v34 = vpop.permute.xlu0 %3862  ;;  %v3950_v0 = vrot.slane %v3942_v39, %v7337_v38  ;;  %v3946_v52 = vrot.slane %v3942_v39, %v6297_v56 }
 0xc05   : > { %v3870_v11 = vsel %vm8244_vm12, %v3867_v28, %v3863_v34  ;;  %v3879_v32 = vsel %vm8245_vm15, %v3863_v34, %v3867_v28  ;;  %vm7519_vm12 = vmand %vm3982_vm4, %vm3984_vm3  ;;  %vm8250_vm15 = vcmp.ge.s32.totalorder %v7314_v7, 0  ;;  %vm8253_vm3 = vcmp.ge.s32.totalorder %v7316_v35, 0 }
 0xc06   : > { %v3909_v53 = vsel %vm7473_vm6, %v3879_v32, 0  ;;  %5244 = vmatprep.subr.msk.bf16.mxu0 %vm7477_vm2, %v3870_v11  ;;  %vm7529_vm10 = vmand %vm7515_vm1, %vm8250_vm15  ;;  %vm7543_vm4 = vcmp.ne.s16.totalorder %v3950_v0, 0  ;;  %vm7547_vm15 = vcmp.ne.s16.totalorder %v3946_v52, 0  ;;  %v8256_v35 = vmov 0 }
 0xc07   : > { %4152 = vmatpush1.bf16.msra.mxu0 %v3909_v53  ;;  %v3914_v19 = vpop.permute.xlu1 %3913  ;;  %vm3988_vm7 = vmand %vm7519_vm12, %vm8253_vm3  ;;  %v8255_v18 = vsel %vm7543_vm4, 4294967295, %v8254_v18  ;;  %v8257_v35 = vsel %vm7547_vm15, 4294967295, %v8256_v35 }
 0xc08   : > { %v3912_v59 = vpop.permute.xlu0 %3911  ;;  %4153 = vmatprep.subr.bf16.mxu0 %v7232_v12  ;;  %vm3995_vm11 = vmpackc.low %vm3988_vm7, %vm7529_vm10  ;;  %vm8019_vm10 = vcmask 924672  }
 0xc09   : > { %v3920_v44 = vsel %vm8017_vm13, %v3912_v59, %v3914_v19  ;;  %vm4041_vm3 = vmpackc.low %vm7519_vm12, %vm7515_vm1 }
 0xc0a   : > { %v3953_v30 = vsel %vm7547_vm15, %v3920_v44, 0  ;;  %v4042_v63 = vsel %vm4041_vm3, 65537, %v5839_v1 }
 0xc0b   : > { %4154 = vmatpush1.bf16.msra.mxu0 %v7230_v26  ;;  %v3918_v12 = vpop.permute.xlu1 %3917  ;;  %v3927_v26 = vsel %vm8017_vm13, %v3914_v19, %v3912_v59  ;;  %v4050_v13 = vrot.slane %v4042_v63, %v7337_v38  ;;  %v4046_v28 = vrot.slane %v4042_v63, %v6297_v56 }
 0xc0c   : > { %v3916_v7 = vpop.permute.xlu0 %3915  ;;  %4155 = vmatprep.subr.bf16.mxu0 %v7240_v3  ;;  %v3996_v3 = vsel %vm3995_vm11, 65537, %v5839_v1 }
 0xc0d   : > { %v4004_v42 = vrot.slane %v3996_v3, %v7337_v38  ;;  %v3921_v58 = vsel %vm8017_vm13, %v3916_v7, %v3918_v12  ;;  %v3931_v14 = vsel %vm8017_vm13, %v3918_v12, %v3916_v7  ;;  %v4000_v55 = vrot.slane %v3996_v3, %v6297_v56  ;;  %v5637_v3 = vld [vmem:[%s8193_s8] ss:$12 sps:$4 sm:$0xff]  }
 0xc0e   : > { %v3955_v24 = vsel %vm7547_vm15, %v3921_v58, 0  ;;  %vm8262_vm13 = vcmp.lt.s32.totalorder %v7342_v57, 16  ;;  %vm7612_vm6 = vcmp.ne.s16.totalorder %v4050_v13, 0 }
 0xc0f   : > { %4156 = vmatpush1.bf16.msra.mxu0 %v7238_v16  ;;  %v3960_v46 = vpop.permute.xlu1 %3959  ;;  %vm7569_vm7 = vcmp.ne.s16.totalorder %v4004_v42, 0  ;;  %vm7575_vm11 = vcmp.ne.s16.totalorder %v4000_v55, 0  ;;  %vm7588_vm15 = vmand %vm7515_vm1, %vm8262_vm13  ;;  %vm4019_vm13 = vcmask 916480  }
 0xc10   : > { %v3958_v40 = vpop.permute.xlu0 %3957  ;;  %5245 = vmatprep.subr.msk.bf16.mxu0 %vm7543_vm4, %v3927_v26 }
 0xc11   : > { %v3966_v41 = vsel %vm8019_vm10, %v3958_v40, %v3960_v46  ;;  %v3973_v33 = vsel %vm8019_vm10, %v3960_v46, %v3958_v40  ;;  %vm8265_vm10 = vcmp.lt.s32.totalorder %v7352_v6, 16  ;;  %v8276_v40 = vmov 0 }
 0xc12   : > { %v4007_v60 = vsel %vm7575_vm11, %v3966_v41, 0  ;;  %vm7599_vm3 = vmand %vm7519_vm12, %vm8265_vm10  ;;  %v5640_v41 = vld [vmem:[%s8193_s8 + $0x8] ss:$12 sps:$4 sm:$0xff]  }
 0xc13   : > { %4158 = vmatpush1.bf16.msra.mxu0 %v3953_v30  ;;  %v3964_v16 = vpop.permute.xlu1 %3963  ;;  %vm4087_vm10 = vmpackc.low %vm7599_vm3, %vm7588_vm15 }
 0xc14   : > { %v3962_v45 = vpop.permute.xlu0 %3961  ;;  %5246 = vmatprep.subr.msk.bf16.mxu0 %vm7543_vm4, %v3931_v14  ;;  %vm8268_vm4 = vcmask 924672   ;;  %v4088_v59 = vsel %vm4087_vm10, 65537, %v5839_v1  ;;  %vm8278_vm10 = vcmask 261120  }
 0xc15   : > { %v3967_v57 = vsel %vm8268_vm4, %v3962_v45, %v3964_v16  ;;  %vm8269_vm2 = vmmov %vm8268_vm4  ;;  %v4096_v29 = vrot.slane %v4088_v59, %v7337_v38  ;;  %v4092_v26 = vrot.slane %v4088_v59, %v6297_v56  ;;  %vm8023_vm4 = vcmask 908288  }
 0xc16   : > { %v3977_v10 = vsel %vm8269_vm2, %v3964_v16, %v3962_v45  ;;  %v4009_v32 = vsel %vm7575_vm11, %v3967_v57, 0  ;;  %vm7618_vm2 = vcmp.ne.s16.totalorder %v4046_v28, 0  ;;  %v4348_v28 = vld [vmem:[%s8279_s22 + $0x8] sm:$0xff] }
 0xc17   : > { %4160 = vmatpush1.bf16.msra.mxu0 %v3955_v24  ;;  %v4014_v48 = vpop.permute.xlu1 %4013  ;;  %vm7635_vm15 = vcmp.ne.s16.totalorder %v4096_v29, 0  ;;  %vm7642_vm3 = vcmp.ne.s16.totalorder %v4092_v26, 0 }
 0xc18   : > { %v4012_v9 = vpop.permute.xlu0 %4011  ;;  %5247 = vmatprep.subr.msk.bf16.mxu0 %vm7569_vm7, %v3973_v33  ;;  %v8277_v40 = vsel %vm7642_vm3, 4294967295, %v8276_v40 }
 0xc19   : > { %v4020_v19 = vsel %vm4019_vm13, %v4012_v9, %v4014_v48  ;;  %v4027_v39 = vsel %vm4019_vm13, %v4014_v48, %v4012_v9 }
 0xc1a   : > { %v4053_v0 = vsel %vm7618_vm2, %v4020_v19, 0 }
 0xc1b   : > { %4162 = vmatpush1.bf16.msra.mxu0 %v4007_v60  ;;  %v4018_v34 = vpop.permute.xlu1 %4017 }
 0xc1c   : > { %v4016_v11 = vpop.permute.xlu0 %4015  ;;  %5248 = vmatprep.subr.msk.bf16.mxu0 %vm7569_vm7, %v3977_v10  ;;  %v4347_v10 = vld [vmem:[%s8279_s22] sm:$0xff] }
 0xc1d   : > { %v4021_v7 = vsel %vm4019_vm13, %v4016_v11, %v4018_v34  ;;  %v4031_v44 = vsel %vm4019_vm13, %v4018_v34, %v4016_v11 }
 0xc1e   : > { %v4055_v38 = vsel %vm7618_vm2, %v4021_v7, 0 }
 0xc1f   : > { %4164 = vmatpush1.bf16.msra.mxu0 %v4009_v32  ;;  %v4060_v52 = vpop.permute.xlu1 %4059 }
 0xc20   : > { %5249 = vmatprep.subr.msk.bf16.mxu0 %vm7612_vm6, %v4027_v39  ;;  %v4058_v12 = vpop.permute.xlu0 %4057 }
 0xc21   : > { %v4066_v42 = vsel %vm8023_vm4, %v4058_v12, %v4060_v52  ;;  %v4073_v30 = vsel %vm8023_vm4, %v4060_v52, %v4058_v12 }
 0xc22   : > { %v4099_v55 = vsel %vm7642_vm3, %v4066_v42, 0 }
 0xc23   : > { %4166 = vmatpush1.bf16.msra.mxu0 %v4053_v0  ;;  %v4064_v58 = vpop.permute.xlu1 %4063 }
 0xc24   : > { %5250 = vmatprep.subr.msk.bf16.mxu0 %vm7612_vm6, %v4031_v44  ;;  %v4062_v14 = vpop.permute.xlu0 %4061 }
 0xc25   : > { %v4067_v16 = vsel %vm8023_vm4, %v4062_v14, %v4064_v58  ;;  %v4077_v45 = vsel %vm8023_vm4, %v4064_v58, %v4062_v14 }
 0xc26   : > { %v4101_v24 = vsel %vm7642_vm3, %v4067_v16, 0 }
 0xc27   : > { %4168 = vmatpush1.bf16.msra.mxu0 %v4055_v38 }
 0xc28   : > { %5251 = vmatprep.subr.msk.bf16.mxu0 %vm7635_vm15, %v4073_v30 }
 0xc2a   : > { %4170 = vmatmul.mubr.bf16.vlgmr.msra.gmra.mrb[20].mxu0 %v5637_v3 }
 0xc2b   : > { %4181 = vmatpush1.bf16.msra.mxu0 %v4099_v55  ;;  %4212 = vmatprep.mubr.bf16.mxu0 %v5839_v1 }
 0xc2c   : > { %5252 = vmatprep.subr.msk.bf16.mxu0 %vm7635_vm15, %v4077_v45 }
 0xc2f   : > { %4183 = vmatpush1.bf16.msra.mxu0 %v4101_v24 }
 0xc34   : > { %v4117_v1 = vpop.permute.xlu1 %4116 }
 0xc35   : > { %v4112_v33 = vpop.permute.xlu0 %4111 }
 0xc36   : > { %5253 = vmatmul.mubr.msk.bf16.vlgmr.msra.gmra.mrb[20].mxu0 %vm8278_vm10, %v5640_v41  ;;  %vm8280_vm10 = vcmask 130048  }
 0xc37   : > { %vm8281_vm4 = vmmov %vm8280_vm10 }
 0xc38   : > { %vm8282_vm3 = vmmov %vm8281_vm4 }
 0xd09   : > { %v4214_v48 = vpop.f32.mrb[20].mxu0 }
 0xd0a   : > { %v5442_v63 = vadd.f32 %v4214_v48, %v4112_v33  ;;  %v4216_v9 = vpop.f32.mrb[21].mxu0 }
 0xd0b   : > { %v5443_v54 = vadd.f32 %v4216_v9, %v4112_v33  ;;  %v4218_v13 = vpop.f32.mrb[22].mxu0 }
 0xd0c   : > { %v4220_v60 = vpop.f32.mrb[23].mxu0  ;;  %4233 = vrot.lane.b32.xlu0 %v5442_v63, %s5871_s17  ;;  %v5444_v61 = vadd.f32 %v4218_v13, %v4117_v1  ;;  %v4249_v38 = vmul.f32 2.0, %v5442_v63 }
 0xd0d   : > { %4259 = vrot.lane.b32.xlu1 %v5443_v54, %s5872_s10  ;;  %v5445_v57 = vadd.f32 %v4220_v60, %v4117_v1  ;;  %v4250_v59 = vmul.f32 2.0, %v5443_v54 }
 0xd0e   : > { %v4251_v60 = vmul.f32 2.0, %v5444_v61 }
 0xd0f   : > { %v4252_v30 = vmul.f32 2.0, %v5445_v57 }
 0xd10   : > { %4257 = vrot.lane.b32.xlu0 %v5442_v63, %s5872_s10 }
 0xd11   : > { %4235 = vrot.lane.b32.xlu1 %v5444_v61, %s5871_s17 }
 0xd14   : > { %4225 = vrot.lane.b32.xlu0 %v5443_v54, %s5871_s17 }
 0xd15   : > { %4227 = vrot.lane.b32.xlu1 %v5445_v57, %s5871_s17 }
 0xd18   : > { %4261 = vrot.lane.b32.xlu0 %v5444_v61, %s5872_s10  ;;  %v3535_v61 = vmul.f32 %v7705_v36, %v3521_v22 }
 0xd19   : > { %4263 = vrot.lane.b32.xlu1 %v5445_v57, %s5872_s10 }
 0xd1c   : > { %4351 = vperm.xlu0 %5598, %v4347_v10  }
 0xd1d   : > { %4356 = vperm.xlu1 %5599, %v4348_v28   ;;  %v3523_v28 = vld [vmem:[%s8285_s1 + $0x10] sm:$0xff] }
 0xd7e   : > { %v4234_v34 = vpop.permute.xlu0 %4233 }
 0xd7f   : > { %v4260_v11 = vpop.permute.xlu1 %4259 }
 0xd82   : > { %v4258_v32 = vpop.permute.xlu0 %4257 }
 0xd83   : > { %v4236_v19 = vpop.permute.xlu1 %4235  ;;  %v4273_v29 = vsel %vm4019_vm13, %v4260_v11, %v4258_v32  ;;  %v4265_v55 = vsel %vm4019_vm13, %v4258_v32, %v4260_v11  ;;  %v3537_v32 = vmul.f32 %v7705_v36, %v3523_v28 }
 0xd84   : > { %v4276_v58 = vsel %vm7519_vm12, %v4273_v29, 0.0  ;;  %v4275_v9 = vsel %vm7515_vm1, %v4265_v55, 0.0 }
 0xd86   : > { %v4226_v39 = vpop.permute.xlu0 %4225 }
 0xd87   : > { %v4237_v0 = vsel %vm8280_vm10, %v4234_v34, %v4226_v39  ;;  %v4243_v52 = vsel %vm8281_vm4, %v4226_v39, %v4234_v34  ;;  %v4228_v12 = vpop.permute.xlu1 %4227  ;;  %vm8283_vm4 = vmmov %vm8282_vm3  ;;  %v3522_v34 = vld [vmem:[%s8285_s1 + $0x8] sm:$0xff]  ;;  %v3524_v39 = vld [vmem:[%s8285_s1 + $0x18] sm:$0xff] }
 0xd88   : > { %v4245_v7 = vsel %vm7318_vm8, %v4243_v52, 0.0  ;;  %v4246_v44 = vsel %vm7323_vm5, %v4237_v0, 0.0  ;;  %v4238_v26 = vsel %vm8282_vm3, %v4236_v19, %v4228_v12  ;;  %v4244_v24 = vsel %vm8283_vm4, %v4228_v12, %v4236_v19 }
 0xd89   : > { %v4254_v3 = vadd.f32 %v4250_v59, %v4246_v44  ;;  %v4248_v42 = vsel %vm7323_vm5, %v4238_v26, 0.0  ;;  %v4253_v16 = vadd.f32 %v4249_v38, %v4245_v7  ;;  %v4247_v54 = vsel %vm7318_vm8, %v4244_v24, 0.0 }
 0xd8a   : > { %v4262_v14 = vpop.permute.xlu0 %4261  ;;  %v4256_v33 = vadd.f32 %v4252_v30, %v4248_v42  ;;  %v4255_v57 = vadd.f32 %v4251_v60, %v4247_v54  ;;  %vm8286_vm8 = vcmask 261120   ;;  %v3536_v19 = vmul.f32 %v7705_v36, %v3522_v34 }
 0xd8b   : > { %v4280_v45 = vadd.f32 %v4276_v58, %v4254_v3  ;;  %v4264_v41 = vpop.permute.xlu1 %4263  ;;  %v4279_v1 = vadd.f32 %v4275_v9, %v4253_v16  ;;  %v3543_v11 = vsel %vm8286_vm8, %v3535_v61, 0.0  ;;  %vm8287_vm5 = vmmov %vm8286_vm8  ;;  %v3538_v29 = vmul.f32 %v7705_v36, %v3524_v39 }
 0xd8c   : > { %v4274_v48 = vsel %vm4019_vm13, %v4264_v41, %v4262_v14  ;;  %v4266_v63 = vsel %vm4019_vm13, %v4262_v14, %v4264_v41  ;;  %v3549_v59 = vsel %vm8287_vm5, %v3537_v32, 0.0  ;;  %vm8291_vm3 = vcmask 7168  }
 0xd8d   : > { %v4278_v43 = vsel %vm7519_vm12, %v4274_v48, 0.0  ;;  %4319 = vrot.lane.b32.xlu1 %v4280_v45, %s8164_s20  ;;  %4285 = vrot.lane.b32.xlu0 %v4280_v45, %s8155_s26  ;;  %v4277_v15 = vsel %vm7515_vm1, %v4266_v63, 0.0  ;;  %vm8288_vm1 = vmmov %vm8287_vm5  ;;  %v4310_v42 = vmul.f32 2.0, %v4280_v45  ;;  %v4309_v14 = vmul.f32 2.0, %v4279_v1 }
 0xd8e   : > { %v4282_v13 = vadd.f32 %v4278_v43, %v4256_v33  ;;  %v4281_v10 = vadd.f32 %v4277_v15, %v4255_v57  ;;  %v3546_v0 = vsel %vm8288_vm1, %v3536_v19, 0.0  ;;  %vm8290_vm12 = vmmov %vm8288_vm1  ;;  %vm8293_vm4 = vnez %v8221_v21  ;;  %v3519_v43 = vld [vmem:[%s1230_s11] sm:$0x3]  ;;  %s8302_s11 = sld [smem:[#allocation32_spill]] }
 0xd8f   : > { %v3552_v52 = vsel %vm8290_vm12, %v3538_v29, 0.0  ;;  %vm8292_vm10 = vmmov %vm8291_vm3  ;;  %v4366_v33 = vsub.s32 1, %v6292_v51  ;;  %vm8294_vm8 = vcmask 1039360  }
 0xd90   : > { %vm8295_vm5 = vmmov %vm8294_vm8  ;;  %v4311_v28 = vmul.f32 2.0, %v4281_v10  ;;  %v4312_v34 = vmul.f32 2.0, %v4282_v13 }
 0xd91   : > { %4293 = vrot.lane.b32.xlu0 %v4279_v1, %s8155_s26  ;;  %4287 = vrot.lane.b32.xlu1 %v4282_v13, %s8155_s26  ;;  %vm8296_vm1 = vmmov %vm8291_vm3  ;;  %v7745_v32 = vrot.slane %v3519_v43, %v4366_v33 }
 0xd92   : > { %vm8297_vm12 = vmmov %vm8296_vm1 }
 0xd95   : > { %4317 = vrot.lane.b32.xlu0 %v4279_v1, %s8164_s20  ;;  %4295 = vrot.lane.b32.xlu1 %v4281_v10, %s8155_s26 }
 0xd99   : > { %4321 = vrot.lane.b32.xlu0 %v4281_v10, %s8164_s20  ;;  %4323 = vrot.lane.b32.xlu1 %v4282_v13, %s8164_s20 }
 0xd9b   : > { %v7719_v12 = vpop.permute.xlu0 %4351 }
 0xd9c   : > { %v4357_v7 = vpop.permute.xlu1 %4356 }
 0xdb8   : > { %3544 = vadd.xlane.f32.xlu0 %v3543_v11  ;;  %v7743_v11 = vrot.slane %v3519_v43, %v6297_v56 }
 0xdbc   : > { %3550 = vadd.xlane.f32.xlu0 %v3549_v59 }
 0xdbd   : > { %3547 = vadd.xlane.f32.xlu1 %v3546_v0 }
 0xdc0   : > { %3553 = vadd.xlane.f32.xlu0 %v3552_v52 }
 0xdff   : > { %v4286_v44 = vpop.permute.xlu0 %4285  ;;  %v4320_v26 = vpop.permute.xlu1 %4319 }
 0xe03   : > { %v4294_v38 = vpop.permute.xlu0 %4293  ;;  %v4288_v3 = vpop.permute.xlu1 %4287 }
 0xe04   : > { %v4297_v30 = vsel %vm8291_vm3, %v4294_v38, %v4286_v44  ;;  %v4303_v58 = vsel %vm8292_vm10, %v4286_v44, %v4294_v38  ;;  %vm8298_vm3 = vmmov %vm8295_vm5  ;;  %v4372_v44 = vmul.f32 %v7743_v11, %v4357_v7 }
 0xe05   : > { %v4305_v55 = vsel %vm7422_vm9, %v4303_v58, 0.0  ;;  %v4306_v16 = vsel %vm8293_vm4, %v4297_v30, 0.0  ;;  %vm8299_vm10 = vmmov %vm8298_vm3 }
 0xe06   : > { %v4313_v24 = vadd.f32 %v4309_v14, %v4305_v55  ;;  %v4314_v41 = vadd.f32 %v4310_v42, %v4306_v16 }
 0xe07   : > { %v4318_v48 = vpop.permute.xlu0 %4317  ;;  %v4296_v63 = vpop.permute.xlu1 %4295 }
 0xe08   : > { %v4325_v45 = vsel %vm8294_vm8, %v4318_v48, %v4320_v26  ;;  %v4333_v9 = vsel %vm8295_vm5, %v4320_v26, %v4318_v48  ;;  %v4298_v54 = vsel %vm8296_vm1, %v4296_v63, %v4288_v3  ;;  %v4304_v60 = vsel %vm8297_vm12, %v4288_v3, %v4296_v63  ;;  %v3568_v63 = vld [vmem:[%s8300_s15 + $0x8] sm:$0xff] }
 0xe09   : > { %v4335_v1 = vsel %vm7489_vm0, %v4325_v45, 0.0  ;;  %v4336_v15 = vsel %vm7501_vm14, %v4333_v9, 0.0  ;;  %v4307_v51 = vsel %vm7422_vm9, %v4304_v60, 0.0  ;;  %v4308_v57 = vsel %vm8293_vm4, %v4298_v54, 0.0 }
 0xe0a   : > { %v4339_v22 = vadd.f32 %v4335_v1, %v4313_v24  ;;  %v4340_v61 = vadd.f32 %v4336_v15, %v4314_v41  ;;  %v4315_v59 = vadd.f32 %v4311_v28, %v4307_v51  ;;  %v4316_v29 = vadd.f32 %v4312_v34, %v4308_v57  ;;  %v3567_v41 = vld [vmem:[%s8300_s15] sm:$0xff] }
 0xe0b   : > { %v4322_v19 = vpop.permute.xlu0 %4321  ;;  %v4324_v39 = vpop.permute.xlu1 %4323  ;;  %v4373_v26 = vmul.f32 %v7745_v32, %v4357_v7  ;;  %v4370_v60 = vmul.f32 %v7743_v11, %v7719_v12  ;;  %v4371_v1 = vmul.f32 %v7745_v32, %v7719_v12  ;;  %vm8304_vm9 = vcmask 130048  }
 0xe0c   : > { %v4326_v0 = vsel %vm8298_vm3, %v4322_v19, %v4324_v39  ;;  %v4334_v62 = vsel %vm8299_vm10, %v4324_v39, %v4322_v19  ;;  %v4343_v9 = vmul.f32 0.0625, %v4339_v22  ;;  %v4344_v54 = vmul.f32 0.0625, %v4340_v61  ;;  %vm8313_vm10 = vmmov %vm8304_vm9 }
 0xe0d   : > { %v4337_v21 = vsel %vm7489_vm0, %v4326_v0, 0.0  ;;  %v4338_v10 = vsel %vm7501_vm14, %v4334_v62, 0.0  ;;  %v3569_v0 = vld [vmem:[%s8300_s15 + $0x10] sm:$0xff]  ;;  %vm8305_vm0 = vcmask 261120   ;;  %vm8309_vm5 = vcmask 138240  }
 0xe0e   : > { %v4341_v13 = vadd.f32 %v4337_v21, %v4315_v59  ;;  %v4342_v52 = vadd.f32 %v4338_v10, %v4316_v29  ;;  %v4374_v15 = vadd.f32 %v4370_v60, %v4343_v9  ;;  %v4375_v51 = vadd.f32 %v4371_v1, %v4344_v54  ;;  %v3570_v21 = vld [vmem:[%s8300_s15 + $0x18] sm:$0xff]  ;;  %vm8306_vm14 = vmmov %vm8305_vm0 }
 0xe0f   : > { %vm8307_vm4 = vmmov %vm8305_vm0  ;;  %vm8311_vm12 = vnez %v8203_v47  ;;  %vm8312_vm3 = vnez %v8201_v17 }
 0xe10   : > { %v4345_v38 = vmul.f32 0.0625, %v4341_v13  ;;  %v4346_v3 = vmul.f32 0.0625, %v4342_v52  ;;  %v4378_v57 = vmul.f32 0.2, %v4374_v15  ;;  %v4379_v28 = vmul.f32 0.2, %v4375_v51  ;;  %vm8308_vm8 = vmmov %vm8305_vm0 }
 0xe11   : > { %vm8310_vm1 = vmmov %vm8309_vm5 }
 0xe12   : > { %v4376_v42 = vadd.f32 %v4372_v44, %v4345_v38  ;;  %v4377_v30 = vadd.f32 %v4373_v26, %v4346_v3  ;;  %v4382_v34 = vmax.f32 %v4374_v15, %v4378_v57  ;;  %v4383_v19 = vmax.f32 %v4375_v51, %v4379_v28 }
 0xe14   : > { %v4380_v58 = vmul.f32 0.2, %v4376_v42  ;;  %v4381_v14 = vmul.f32 0.2, %v4377_v30  ;;  %v4386_v39 = vadd.f32 %v4383_v19, %v4382_v34  ;;  %v4395_v59 = vmul.f32 %v4382_v34, %v4382_v34 }
 0xe15   : > { %v4396_v29 = vmul.f32 %v4383_v19, %v4383_v19 }
 0xe16   : > { %v7755_v55 = vmax.f32 %v4376_v42, %v4380_v58  ;;  %v7757_v8 = vmax.f32 %v4377_v30, %v4381_v14 }
 0xe17   : > { %v4399_v22 = vadd.f32 %v4396_v29, %v4395_v59 }
 0xe18   : > { %v4389_v27 = vadd.f32 %v7757_v8, %v7755_v55  ;;  %v4397_v16 = vmul.f32 %v7755_v55, %v7755_v55  ;;  %v4398_v7 = vmul.f32 %v7757_v8, %v7757_v8 }
 0xe1a   : > { %4390 = vadd.xlane.f32.xlu0 %v4389_v27  ;;  %v4402_v24 = vadd.f32 %v4398_v7, %v4397_v16 }
 0xe1e   : > { %4403 = vadd.xlane.f32.xlu0 %v4402_v24 }
 0xe45   : > { %v3545_v33 = vpop.xlane.xlu0 %3544 }
 0xe46   : > { %v3575_v48 = vadd.f32 %v3567_v41, %v3545_v33 }
 0xe48   : > { %4427 = vperm.xlu1 %5599, %v3575_v48  }
 0xe49   : > { %v3551_v61 = vpop.xlane.xlu0 %3550 }
 0xe4a   : > { %v3548_v43 = vpop.xlane.xlu1 %3547  ;;  %v3577_v62 = vadd.f32 %v3569_v0, %v3551_v61 }
 0xe4b   : > { %v3576_v45 = vadd.f32 %v3568_v63, %v3548_v43 }
 0xe4d   : > { %4432 = vperm.xlu0 %5598, %v3576_v45   ;;  %v3554_v10 = vpop.xlane.xlu0 %3553 }
 0xe4e   : > { %v3578_v12 = vadd.f32 %v3570_v21, %v3554_v10 }
 0xe6c   : > { %4387 = vadd.xlane.f32.xlu1 %v4386_v39 }
 0xe70   : > { %4400 = vadd.xlane.f32.xlu1 %v4399_v22 }
 0xe81   : > { %4441 = vperm.xlu1 %5599, %v3577_v62  }
 0xe85   : > { %4446 = vperm.xlu1 %5599, %v3578_v12  }
 0xea7   : > { %v4391_v13 = vpop.xlane.xlu0 %4390 }
 0xea8   : > { %v4394_v44 = vmul.f32 0.00390625, %v4391_v13  ;;  %v4556_v13 = vld [vmem:[%s8302_s11 + $0x8] sm:$0xff] }
 0xeaa   : > { %v4408_v3 = vmul.f32 %v4394_v44, %v4394_v44  ;;  %v4415_v45 = vsub.f32 %v7755_v55, %v4394_v44  ;;  %v4416_v9 = vsub.f32 %v7757_v8, %v4394_v44 }
 0xeab   : > { %v4404_v52 = vpop.xlane.xlu0 %4403 }
 0xeac   : > { %v4406_v26 = vmul.f32 0.00390625, %v4404_v52 }
 0xeae   : > { %v4410_v42 = vsub.f32 %v4406_v26, %v4408_v3  ;;  %v3525_v26 = vld [vmem:[%s8285_s1 + $0x20] sm:$0xff]  ;;  %v3526_v3 = vld [vmem:[%s8285_s1 + $0x28] sm:$0xff] }
 0xeb0   : > { %v4412_v14 = vmax.f32 %v4410_v42, 0.0 }
 0xeb2   : > { %v4418_v24 = vadd.f32 1e-05, %v4412_v14  ;;  %v3527_v14 = vld [vmem:[%s8285_s1 + $0x30] sm:$0xff] }
 0xeb4   : > { %5688 = vrsqrt.f32 %v4418_v24 }
 0xebe   : > { %v5689_v43 = vpop.eup %5688 }
 0xebf   : > { %v4423_v51 = vmul.f32 %v5689_v43, %v4415_v45  ;;  %v4424_v57 = vmul.f32 %v5689_v43, %v4416_v9 }
 0xec7   : > { %v4428_v38 = vpop.permute.xlu1 %4427 }
 0xecc   : > { %v4433_v15 = vpop.permute.xlu0 %4432 }
 0xecd   : > { %v4437_v29 = vmul.f32 %v4433_v15, %v4423_v51  ;;  %v4438_v22 = vmul.f32 %v4433_v15, %v4424_v57 }
 0xef9   : > { %v4388_v30 = vpop.xlane.xlu1 %4387 }
 0xefa   : > { %v4393_v58 = vmul.f32 0.00390625, %v4388_v30  ;;  %v3540_v30 = vmul.f32 %v7705_v36, %v3526_v3 }
 0xefc   : > { %v4407_v16 = vmul.f32 %v4393_v58, %v4393_v58  ;;  %v4413_v54 = vsub.f32 %v4382_v34, %v4393_v58  ;;  %v4414_v60 = vsub.f32 %v4383_v19, %v4393_v58  ;;  %v5643_v34 = vld [vmem:[%s8301_s18 + $0x4] ss:$8 sps:$4 sm:$0xff]   ;;  %v3558_v58 = vsel %vm8306_vm14, %v3540_v30, 0.0 }
 0xefd   : > { %v4401_v27 = vpop.xlane.xlu1 %4400  ;;  %5264 = vmatprep.mubr.msk.bf16.mxu1 %vm8304_vm9, %v5643_v34  ;;  %v4555_v19 = vld [vmem:[%s8302_s11] sm:$0xff]  ;;  %vm8315_vm14 = vnez %v8213_v50 }
 0xefe   : > { %v4405_v7 = vmul.f32 0.00390625, %v4401_v27  ;;  %v3528_v27 = vld [vmem:[%s8285_s1 + $0x38] sm:$0xff] }
 0xf00   : > { %v4409_v41 = vsub.f32 %v4405_v7, %v4407_v16  ;;  %v3541_v16 = vmul.f32 %v7705_v36, %v3527_v14  ;;  %v3542_v7 = vmul.f32 %v7705_v36, %v3528_v27 }
 0xf01   : > { %v4442_v63 = vpop.permute.xlu1 %4441 }
 0xf02   : > { %v4411_v33 = vmax.f32 %v4409_v41, 0.0  ;;  %v3561_v24 = vsel %vm8307_vm4, %v3541_v16, 0.0  ;;  %v3564_v41 = vsel %vm8308_vm8, %v3542_v7, 0.0  ;;  %vm8316_vm4 = vcmask 121856  }
 0xf03   : > { %vm8317_vm8 = vmmov %vm8316_vm4 }
 0xf04   : > { %v4417_v48 = vadd.f32 1e-05, %v4411_v33 }
 0xf05   : > { %v4447_v59 = vpop.permute.xlu1 %4446 }
 0xf06   : > { %5690 = vrsqrt.f32 %v4417_v48  ;;  %v4451_v10 = vadd.f32 %v4447_v59, %v4437_v29  ;;  %v4452_v55 = vadd.f32 %v4447_v59, %v4438_v22 }
 0xf10   : > { %v5691_v1 = vpop.eup %5690 }
 0xf11   : > { %v4421_v28 = vmul.f32 %v5691_v1, %v4413_v54  ;;  %v4422_v39 = vmul.f32 %v5691_v1, %v4414_v60 }
 0xf13   : > { %v4435_v61 = vmul.f32 %v4428_v38, %v4421_v28  ;;  %v4436_v0 = vmul.f32 %v4428_v38, %v4422_v39  ;;  %v3539_v38 = vmul.f32 %v7705_v36, %v3525_v26 }
 0xf15   : > { %v4449_v62 = vadd.f32 %v4442_v63, %v4435_v61  ;;  %v4450_v21 = vadd.f32 %v4442_v63, %v4436_v0  ;;  %v3555_v42 = vsel %vm8305_vm0, %v3539_v38, 0.0  ;;  %vm8314_vm0 = vnez %v8211_v37 }
 0xf17   : > { %v7775_v12 = vpack.c.bf16 %v4451_v10, %v4449_v62  ;;  %v7777_v8 = vpack.c.bf16 %v4452_v55, %v4450_v21 }
 0xf19   : > { %4456 = vrot.lane.b32.xlu0 %v7777_v8, %s5870_s9  ;;  %4459 = vrot.lane.b32.xlu1 %v7775_v12, %s5870_s9  ;;  %s8303_s9 = sld [smem:[#allocation36_spill]] }
 0xf1d   : > { %4469 = vrot.lane.b32.xlu0 %v7777_v8, %s5871_s17  ;;  %4471 = vrot.lane.b32.xlu1 %v7775_v12, %s5871_s17 }
 0xf1f   : > { %v4622_v52 = vld [vmem:[%s8303_s9] sm:$0xff]  ;;  %v4623_v44 = vld [vmem:[%s8303_s9 + $0x8] sm:$0xff] }
 0xf21   : > { %4481 = vrot.lane.b32.xlu0 %v7777_v8, %s8192_s3  ;;  %4483 = vrot.lane.b32.xlu1 %v7775_v12, %s8192_s3 }
 0xf25   : > { %4493 = vrot.lane.b32.xlu0 %v7777_v8, %s8155_s26  ;;  %4495 = vrot.lane.b32.xlu1 %v7775_v12, %s8155_s26  ;;  %s5270_s26 = sshll.u32 %s8338_s0, 3 }
 0xf26   : > { %s1235_s17 = scalar_lea.vmem %s6068_s14, %s5270_s26 }
 0xf29   : > { %4505 = vrot.lane.b32.xlu0 %v7775_v12, %s8164_s20  ;;  %4507 = vrot.lane.b32.xlu1 %v7777_v8, %s8164_s20  ;;  %s8333_s20 = sld [smem:[#allocation38_spill]] }
 0xf2d   : > { %4517 = vrot.lane.b32.xlu0 %v7775_v12, %s8194_s4  ;;  %4519 = vrot.lane.b32.xlu1 %v7777_v8, %s8194_s4 }
 0xf31   : > { %4529 = vrot.lane.b32.xlu0 %v7775_v12, %s5872_s10  ;;  %4531 = vrot.lane.b32.xlu1 %v7777_v8, %s5872_s10 }
 0xf35   : > { %4541 = vrot.lane.b32.xlu0 %v7775_v12, %s5873_s19  ;;  %4543 = vrot.lane.b32.xlu1 %v7777_v8, %s5873_s19 }
 0xf39   : > { %4559 = vperm.xlu0 %5598, %v4555_v19   ;;  %4564 = vperm.xlu1 %5599, %v4556_v13   ;;  %v5641_v13 = vld [vmem:[%s8301_s18] ss:$8 sps:$4 sm:$0xff]  }
 0xf3d   : > { %4626 = vperm.xlu0 %5598, %v4622_v52   ;;  %4631 = vperm.xlu1 %5599, %v4623_v44   ;;  %v3571_v44 = vld [vmem:[%s8300_s15 + $0x20] sm:$0xff] }
 0xf5c   : > { %3556 = vadd.xlane.f32.xlu0 %v3555_v42 }
 0xf60   : > { %3562 = vadd.xlane.f32.xlu0 %v3561_v24 }
 0xf61   : > { %3559 = vadd.xlane.f32.xlu1 %v3558_v58 }
 0xf64   : > { %3565 = vadd.xlane.f32.xlu0 %v3564_v41 }
 0xf8b   : > { %v4457_v33 = vpop.permute.xlu0 %4456  ;;  %v4460_v48 = vpop.permute.xlu1 %4459 }
 0xf8c   : > { %v4461_v63 = vsel %vm8309_vm5, %v4460_v48, %v4457_v33  ;;  %v4465_v43 = vsel %vm8310_vm1, %v4457_v33, %v4460_v48  ;;  %vm8318_vm5 = vnez %v8225_v2  ;;  %vm8319_vm1 = vnez %v8227_v23 }
 0xf8d   : > { %v4467_v45 = vsel %vm8311_vm12, %v4465_v43, 0  ;;  %5256 = vmatprep.subr.msk.bf16.mxu1 %vm8312_vm3, %v4461_v63  ;;  %vm8320_vm12 = vcmask 7168  }
 0xf8e   : > { %4580 = vmatpush1.bf16.msra.mxu1 %v4467_v45  ;;  %vm8321_vm3 = vmmov %vm8320_vm12 }
 0xf8f   : > { %v4470_v36 = vpop.permute.xlu0 %4469  ;;  %v4472_v9 = vpop.permute.xlu1 %4471 }
 0xf90   : > { %v4473_v54 = vsel %vm8313_vm10, %v4472_v9, %v4470_v36  ;;  %v4477_v60 = vsel %vm8304_vm9, %v4470_v36, %v4472_v9  ;;  %vm8322_vm10 = vnez %v8233_v4  ;;  %vm8323_vm9 = vnez %v8235_v5 }
 0xf91   : > { %v4479_v1 = vsel %vm8314_vm0, %v4477_v60, 0  ;;  %5257 = vmatprep.subr.msk.bf16.mxu1 %vm8315_vm14, %v4473_v54  ;;  %vm8324_vm0 = vcmask 1039360  }
 0xf92   : > { %4582 = vmatpush1.bf16.msra.mxu1 %v4479_v1  ;;  %vm8325_vm14 = vmmov %vm8324_vm0 }
 0xf93   : > { %v4482_v15 = vpop.permute.xlu0 %4481  ;;  %v4484_v47 = vpop.permute.xlu1 %4483 }
 0xf94   : > { %v4485_v51 = vsel %vm8316_vm4, %v4484_v47, %v4482_v15  ;;  %v4489_v17 = vsel %vm8317_vm8, %v4482_v15, %v4484_v47  ;;  %vm8326_vm4 = vnez %v8255_v18  ;;  %vm8327_vm8 = vnez %v8257_v35 }
 0xf95   : > { %v4491_v57 = vsel %vm8318_vm5, %v4489_v17, 0  ;;  %5258 = vmatprep.subr.msk.bf16.mxu1 %vm8319_vm1, %v4485_v51  ;;  %vm8328_vm5 = vcmask 924672  }
 0xf96   : > { %4584 = vmatpush1.bf16.msra.mxu1 %v4491_v57  ;;  %vm8329_vm1 = vmmov %vm8328_vm5 }
 0xf97   : > { %v4494_v28 = vpop.permute.xlu0 %4493  ;;  %v4496_v37 = vpop.permute.xlu1 %4495 }
 0xf98   : > { %v4497_v39 = vsel %vm8320_vm12, %v4496_v37, %v4494_v28  ;;  %v4501_v50 = vsel %vm8321_vm3, %v4494_v28, %v4496_v37  ;;  %vm8330_vm12 = vcmask 908288   ;;  %vm5876_vm3 = vmmov 0  }
 0xf99   : > { %v4503_v59 = vsel %vm8322_vm10, %v4501_v50, 0  ;;  %5259 = vmatprep.subr.msk.bf16.mxu1 %vm8323_vm9, %v4497_v39  ;;  %vm8335_vm10 = vcmask 261120   ;;  %vm8336_vm9 = vcmask 523264  }
 0xf9a   : > { %4586 = vmatpush1.bf16.msra.mxu1 %v4503_v59 }
 0xf9b   : > { %v4506_v29 = vpop.permute.xlu0 %4505  ;;  %4587 = vmatprep.subr.bf16.mxu1 %v7777_v8  ;;  %v4508_v2 = vpop.permute.xlu1 %4507 }
 0xf9c   : > { %v4509_v23 = vsel %vm8324_vm0, %v4506_v29, %v4508_v2  ;;  %v4513_v22 = vsel %vm8325_vm14, %v4508_v2, %v4506_v29  ;;  %v4975_v29 = vld [vmem:[#allocation2] sm:$0x1]  ;;  %v3573_v2 = vld [vmem:[%s8300_s15 + $0x30] sm:$0xff] }
 0xf9d   : > { %v4515_v5 = vsel %vm8327_vm8, %v4509_v23, 0 }
 0xf9e   : > { %4588 = vmatpush1.bf16.msra.mxu1 %v7775_v12 }
 0xf9f   : > { %v4518_v61 = vpop.permute.xlu0 %4517  ;;  %5260 = vmatprep.subr.msk.bf16.mxu1 %vm8326_vm4, %v4513_v22  ;;  %v4520_v4 = vpop.permute.xlu1 %4519  ;;  %v3574_v22 = vld [vmem:[%s8300_s15 + $0x38] sm:$0xff] }
 0xfa0   : > { %v4521_v0 = vsel %vm8328_vm5, %v4518_v61, %v4520_v4  ;;  %v4525_v62 = vsel %vm8329_vm1, %v4520_v4, %v4518_v61  ;;  %v3572_v4 = vld [vmem:[%s8300_s15 + $0x28] sm:$0xff] }
 0xfa1   : > { %v4527_v55 = vsel %vm7575_vm11, %v4521_v0, 0  ;;  %vm8332_vm11 = vnez %v8277_v40 }
 0xfa2   : > { %4590 = vmatpush1.bf16.msra.mxu1 %v4515_v5 }
 0xfa3   : > { %v4530_v21 = vpop.permute.xlu0 %4529  ;;  %5261 = vmatprep.subr.msk.bf16.mxu1 %vm7569_vm7, %v4525_v62  ;;  %v4532_v10 = vpop.permute.xlu1 %4531  ;;  %vm8331_vm7 = vmmov %vm8330_vm12 }
 0xfa4   : > { %v4533_v18 = vsel %vm4019_vm13, %v4530_v21, %v4532_v10  ;;  %v4537_v12 = vsel %vm4019_vm13, %v4532_v10, %v4530_v21  ;;  %vm4977_vm13 = vcmp.lt.f32.partialorder %v4975_v29, 1.0 }
 0xfa5   : > { %v4539_v49 = vsel %vm7618_vm2, %v4533_v18, 0  ;;  %v4798_v18 = vld [vmem:[%s6055_s12] sm:$0x7] }
 0xfa6   : > { %4592 = vmatpush1.bf16.msra.mxu1 %v4527_v55  ;;  %v4717_v55 = vld [vmem:[%s8333_s20] sm:$0x7] }
 0xfa7   : > { %v4542_v35 = vpop.permute.xlu0 %4541  ;;  %5262 = vmatprep.subr.msk.bf16.mxu1 %vm7612_vm6, %v4537_v12  ;;  %v4544_v8 = vpop.permute.xlu1 %4543  ;;  %vm4976_vm6 = vcmp.ge.f32.partialorder %v4975_v29, 0.0 }
 0xfa8   : > { %v4545_v34 = vsel %vm8330_vm12, %v4542_v35, %v4544_v8  ;;  %v4549_v19 = vsel %vm8331_vm7, %v4544_v8, %v4542_v35  ;;  %vm4978_vm2 = vmand %vm4976_vm6, %vm4977_vm13  ;;  %v5874_v8 = vmov 0.0  }
 0xfa9   : > { %v4551_v31 = vsel %vm8332_vm11, %v4545_v34, 0  ;;  %v4979_v0 = vsel %vm4978_vm2, %v4975_v29, 1.0  ;;  %v5649_v29 = vld [vmem:[%s6060_s27 + $0x10] ss:$8 sps:$4 sm:$0xff]  }
 0xfaa   : > { %4594 = vmatpush1.bf16.msra.mxu1 %v4539_v49  ;;  %v4991_v10 = vsub.f32 1.0, %v4979_v0  ;;  %v4984_v35 = vrot.slane %v4979_v0, %v6297_v56 }
 0xfab   : > { %5263 = vmatprep.subr.msk.bf16.mxu1 %vm7635_vm15, %v4549_v19  ;;  %vm8334_vm15 = vcmask 130048  }
 0xfac   : > { %v4996_v12 = vrot.slane %v4991_v10, %v6297_v56 }
 0xfae   : > { %4596 = vmatpush1.bf16.msra.mxu1 %v4551_v31 }
 0xfb1   : > { %4612 = vmatmul.mubr.bf16.vlgmr.msra.gmra.mrb[28].mxu1 %v5641_v13 }
 0xfb2   : > { %4790 = vmatprep.mubr.f32.mxu1 %v5874_v8 }
 0xfb8   : > { %v4560_v6 = vpop.permute.xlu0 %4559  ;;  %v4565_v38 = vpop.permute.xlu1 %4564 }
 0xfbc   : > { %v4627_v52 = vpop.permute.xlu0 %4626  ;;  %v4632_v3 = vpop.permute.xlu1 %4631 }
 0xfbd   : > { %v4634_v30 = vmul.f32 %v4627_v52, %v7743_v11  ;;  %v4635_v14 = vmul.f32 %v4627_v52, %v7745_v32  ;;  %v4636_v16 = vmul.f32 %v4632_v3, %v7743_v11  ;;  %v4637_v33 = vmul.f32 %v4632_v3, %v7745_v32 }
 0xfe9   : > { %v3557_v26 = vpop.xlane.xlu0 %3556 }
 0xfea   : > { %v3579_v53 = vadd.f32 %v3571_v44, %v3557_v26 }
 0xfec   : > { %4690 = vperm.xlu1 %5599, %v3579_v53  }
 0xfed   : > { %v3563_v59 = vpop.xlane.xlu0 %3562 }
 0xfee   : > { %v3581_v23 = vadd.f32 %v3573_v2, %v3563_v59  ;;  %v3560_v62 = vpop.xlane.xlu1 %3559  ;;  %v5647_v59 = vld [vmem:[%s6060_s27 + $0x14] ss:$8 sps:$4 sm:$0xff]   ;;  %v5652_v2 = vld [vmem:[%s6060_s27 + $0x20] ss:$8 sps:$4 sm:$0xff]  }
 0xfef   : > { %v3580_v21 = vadd.f32 %v3572_v4, %v3560_v62 }
 0xff1   : > { %v3566_v61 = vpop.xlane.xlu0 %3565 }
 0xff2   : > { %v3582_v5 = vadd.f32 %v3574_v22, %v3566_v61  ;;  %v5655_v22 = vld [vmem:[%s6060_s27 + $0x30] ss:$8 sps:$4 sm:$0xff]  }
0x106b   : > { %v4691_v49 = vpop.permute.xlu1 %4690 }
0x1084   : > { %v4613_v42 = vpop.f32.mrb[28].mxu1 }
0x1085   : > { %v4614_v58 = vadd.f32 %v4613_v42, %v4560_v6  ;;  %v4615_v46 = vpop.f32.mrb[29].mxu1 }
0x1086   : > { %v4616_v40 = vadd.f32 %v4615_v46, %v4560_v6  ;;  %v4617_v27 = vpop.f32.mrb[30].mxu1 }
0x1087   : > { %v4638_v7 = vadd.f32 %v4634_v30, %v4614_v58  ;;  %v4618_v24 = vadd.f32 %v4617_v27, %v4565_v38  ;;  %v4619_v41 = vpop.f32.mrb[31].mxu1 }
0x1088   : > { %v4639_v48 = vadd.f32 %v4635_v14, %v4616_v40  ;;  %v4620_v63 = vadd.f32 %v4619_v41, %v4565_v38 }
0x1089   : > { %v4642_v43 = vmul.f32 0.2, %v4638_v7  ;;  %v4640_v45 = vadd.f32 %v4636_v16, %v4618_v24 }
0x108a   : > { %v4643_v36 = vmul.f32 0.2, %v4639_v48  ;;  %v4641_v9 = vadd.f32 %v4637_v33, %v4620_v63 }
0x108b   : > { %v7885_v54 = vmax.f32 %v4638_v7, %v4642_v43  ;;  %v4644_v60 = vmul.f32 0.2, %v4640_v45 }
0x108c   : > { %v7887_v1 = vmax.f32 %v4639_v48, %v4643_v36  ;;  %v4645_v15 = vmul.f32 0.2, %v4641_v9 }
0x108d   : > { %v7889_v47 = vmax.f32 %v4640_v45, %v4644_v60  ;;  %v4658_v51 = vmul.f32 %v7885_v54, %v7885_v54 }
0x108e   : > { %v7891_v11 = vmax.f32 %v4641_v9, %v4645_v15  ;;  %v4650_v32 = vadd.f32 %v7887_v1, %v7885_v54  ;;  %v4659_v17 = vmul.f32 %v7887_v1, %v7887_v1 }
0x108f   : > { %v4660_v28 = vmul.f32 %v7889_v47, %v7889_v47 }
0x1090   : > { %4651 = vadd.xlane.f32.xlu1 %v4650_v32  ;;  %v4653_v57 = vadd.f32 %v7891_v11, %v7889_v47  ;;  %v4661_v37 = vmul.f32 %v7891_v11, %v7891_v11  ;;  %v4662_v39 = vadd.f32 %v4659_v17, %v4658_v51 }
0x1092   : > { %4654 = vadd.xlane.f32.xlu0 %v4653_v57  ;;  %v4665_v50 = vadd.f32 %v4661_v37, %v4660_v28  ;;  %v5875_v28 = vmov 0.0|0.0   ;;  %v5644_v37 = vld [vmem:[%s6060_s27 + $0x4] ss:$8 sps:$4 sm:$0xff]  }
0x1094   : > { %4663 = vadd.xlane.f32.xlu1 %v4662_v39  ;;  %v4797_v39 = vld [vmem:[#allocation7] sm:$0x7] }
0x1096   : > { %4666 = vadd.xlane.f32.xlu0 %v4665_v50  ;;  %v5646_v50 = vld [vmem:[%s6060_s27] ss:$8 sps:$4 sm:$0xff]  }
0x10a5   : > { %4704 = vperm.xlu1 %5599, %v3581_v23   ;;  %v5653_v23 = vld [vmem:[%s6060_s27 + $0x34] ss:$8 sps:$4 sm:$0xff]  }
0x10a9   : > { %4709 = vperm.xlu1 %5599, %v3582_v5  }
0x10ac   : > { %4695 = vperm.xlu0 %5598, %v3580_v21  }
0x10ad   : > { %4720 = vperm.xlu1 %5599, %v4717_v55  }
0x10b0   : > { %4801 = vperm.xlu0 %5598, %v4798_v18  }
0x10b1   : > { %4998 = vperm.xlu1 %5599, %v4996_v12  }
0x10b4   : > { %4986 = vperm.xlu0 %5598, %v4984_v35  }
0x111d   : > { %v4652_v34 = vpop.xlane.xlu1 %4651 }
0x111e   : > { %v4656_v19 = vmul.f32 0.00390625, %v4652_v34 }
0x111f   : > { %v4655_v31 = vpop.xlane.xlu0 %4654 }
0x1120   : > { %v4657_v13 = vmul.f32 0.00390625, %v4655_v31  ;;  %v4670_v52 = vmul.f32 %v4656_v19, %v4656_v19  ;;  %v4676_v14 = vsub.f32 %v7885_v54, %v4656_v19  ;;  %v4677_v40 = vsub.f32 %v7887_v1, %v4656_v19 }
0x1121   : > { %v4664_v6 = vpop.xlane.xlu1 %4663 }
0x1122   : > { %v4668_v44 = vmul.f32 0.00390625, %v4664_v6  ;;  %v4671_v38 = vmul.f32 %v4657_v13, %v4657_v13  ;;  %v4678_v7 = vsub.f32 %v7889_v47, %v4657_v13  ;;  %v4679_v24 = vsub.f32 %v7891_v11, %v4657_v13  ;;  %v4716_v11 = vld [vmem:[#allocation5] sm:$0x7] }
0x1123   : > { %v4667_v26 = vpop.xlane.xlu0 %4666 }
0x1124   : > { %v4672_v53 = vsub.f32 %v4668_v44, %v4670_v52  ;;  %v4669_v3 = vmul.f32 0.00390625, %v4667_v26 }
0x1125   : > { %v4705_v16 = vpop.permute.xlu1 %4704 }
0x1126   : > { %v4674_v42 = vmax.f32 %v4672_v53, 0.0  ;;  %v4673_v30 = vsub.f32 %v4669_v3, %v4671_v38 }
0x1128   : > { %v4680_v58 = vadd.f32 1e-05, %v4674_v42  ;;  %v4675_v56 = vmax.f32 %v4673_v30, 0.0 }
0x1129   : > { %v4710_v32 = vpop.permute.xlu1 %4709 }
0x112a   : > { %5692 = vrsqrt.f32 %v4680_v58  ;;  %v4681_v46 = vadd.f32 1e-05, %v4675_v56 }
0x112b   : > { %v4696_v9 = vpop.permute.xlu0 %4695 }
0x112c   : > { %5694 = vrsqrt.f32 %v4681_v46 }
0x112d   : > { %v4721_v21 = vpop.permute.xlu1 %4720 }
0x112f   : > { %v4802_v4 = vpop.permute.xlu0 %4801 }
0x1131   : > { %v4999_v18 = vpop.permute.xlu1 %4998 }
0x1133   : > { %v4987_v12 = vpop.permute.xlu0 %4986 }
0x1134   : > { %v5693_v27 = vpop.eup %5692 }
0x1135   : > { %v4684_v41 = vmul.f32 %v5693_v27, %v4676_v14  ;;  %v4685_v33 = vmul.f32 %v5693_v27, %v4677_v40 }
0x1136   : > { %v5695_v48 = vpop.eup %5694 }
0x1137   : > { %v4698_v63 = vmul.f32 %v4691_v49, %v4684_v41  ;;  %v4699_v43 = vmul.f32 %v4691_v49, %v4685_v33  ;;  %v4686_v45 = vmul.f32 %v5695_v48, %v4678_v7  ;;  %v4687_v36 = vmul.f32 %v5695_v48, %v4679_v24 }
0x1139   : > { %v4700_v60 = vmul.f32 %v4696_v9, %v4686_v45  ;;  %v4701_v15 = vmul.f32 %v4696_v9, %v4687_v36  ;;  %v4712_v54 = vadd.f32 %v4705_v16, %v4698_v63  ;;  %v4713_v1 = vadd.f32 %v4705_v16, %v4699_v43 }
0x113b   : > { %v4714_v51 = vadd.f32 %v4710_v32, %v4700_v60  ;;  %v4715_v17 = vadd.f32 %v4710_v32, %v4701_v15 }
0x113d   : > { %v5418_v47 = vpack.c.bf16 %v4714_v51, %v4712_v54  ;;  %v5416_v57 = vpack.c.bf16 %v4715_v17, %v4713_v1 }
0x113f   : > { %5417 = vmatprep.subr.bf16.mxu1 %v5416_v57 }
0x1140   : > { %5419 = vmatpush1.bf16.msra.mxu1 %v5418_v47 }
0x1141   : > { %5420 = vmatprep.subr.bf16.mxu1 %v5875_v28 }
0x1143   : > { %5265 = vmatmul.mubr.msk.f32.vlgmr.msra.gmra.mrb[32].mxu1 %vm8334_vm15, %v4716_v11 }
0x1144   : > { %5422 = vmatpush3.bf16.msra.mxu1 %v7221_v25  ;;  %5413 = vmatprep.mubr.msk.f32.mxu1 %vm5876_vm3, %v5874_v8  ;;  %v5650_v25 = vld [vmem:[%s6060_s27 + $0x24] ss:$8 sps:$4 sm:$0xff]  }
0x1145   : > { %5423 = vmatprep.subr.bf16.mxu1 %v5875_v28 }
0x1148   : > { %5425 = vmatpush3.bf16.msra.mxu1 %v7226_v20 }
0x1149   : > { %5427 = vmatprep.subr.bf16.mxu1 %v5644_v37 }
0x114b   : > { %5414 = vmatmul.mubr.msk.f32.vlgmr.msra.gmra.mrb[34].mxu1 %vm8335_vm10, %v4797_v39 }
0x114c   : > { %5429 = vmatpush1.bf16.msra.mxu1 %v5646_v50  ;;  %4968 = vmatprep.mubr.f32.mxu1 %v5874_v8 }
0x114d   : > { %5431 = vmatprep.subr.bf16.mxu1 %v5647_v59 }
0x1150   : > { %5433 = vmatpush1.bf16.msra.mxu1 %v5649_v29 }
0x1151   : > { %5435 = vmatprep.subr.bf16.mxu1 %v5650_v25 }
0x1154   : > { %5437 = vmatpush1.bf16.msra.mxu1 %v5652_v2 }
0x1155   : > { %5439 = vmatprep.subr.bf16.mxu1 %v5653_v23 }
0x1158   : > { %5441 = vmatpush1.bf16.msra.mxu1 %v5655_v22 }
0x1216   : > { %v4792_v20 = vpop.f32.mrb[32].mxu1 }
0x1217   : > { %v4794_v61 = vpop.f32.mrb[33].mxu1  ;;  %v4793_v10 = vadd.f32 %v4792_v20, %v4721_v21 }
0x1218   : > { %v4795_v55 = vadd.f32 %v4794_v61, %v4721_v21 }
0x1219   : > { %v4989_v8 = vmul.f32 %v4987_v12, %v4793_v10 }
0x121a   : > { %v4990_v19 = vmul.f32 %v4987_v12, %v4795_v55 }
0x121e   : > { %v4873_v5 = vpop.f32.mrb[34].mxu1 }
0x121f   : > { %v4874_v0 = vadd.f32 %v4873_v5, %v4802_v4  ;;  %v5415_v62 = vpop.f32.mrb[35].mxu1 }
0x1221   : > { %5267 = vmatmul.mubr.msk.f32.vlgmr.msra.gmra.mrb[36].mxu1 %vm8336_vm9, %v4874_v0 }
0x12f4   : > { %v4970_v35 = vpop.f32.mrb[36].mxu1 }
0x12f5   : > { %v5001_v49 = vmul.f32 %v4999_v18, %v4970_v35  ;;  %v4972_v34 = vpop.f32.mrb[37].mxu1 }
0x12f6   : > { %v5002_v31 = vmul.f32 %v4999_v18, %v4972_v34 }
0x12f7   : > { %v5003_v13 = vadd.f32 %v5001_v49, %v4989_v8 }
0x12f8   : > { %v5004_v6 = vadd.f32 %v5002_v31, %v4990_v19 }
0x12fa   : > { %v5007_v52 = vcombine.low %v5003_v13, %v5004_v6 }
0x12fc   : > { %5009 = vst [vmem:[%s1235_s17] sm:$0x77] %v5007_v52 }
0x12fd PF: > { %s89_s7 = sadd.s32 1, %s5795_s7  }
0x12fe   : > { %p86_p11 = scmp.ge.s32.totalorder %s89_s7, 4  }
0x1300   :  { %88 = sbr.rel (!%p86_p11) target bundleno = 78 (0x4e), region = 263 }
0x1307   :  { %5031 = vsyncpa [#allocation4], 1 }
0x1308   :  { %5033 = vsyncpa [#allocation4 + $0x1], 1 }
0x1309   :  { %5034 = vsyncpa [#allocation6], 1 }

</bundles_post_ra>
